<compile_context>
chip_gen: v7x
topology: tpu7x:2x2x1
jax: 0.10.0
libtpu: 0.0.40
codegen_flags: <defaults>
</compile_context>

<pallas_src>
import numpy as np
import jax
import jax.numpy as jnp
from jax import lax
from jax.experimental import pallas as pl
from jax.experimental.pallas import tpu as pltpu


# ------------------------------ math helpers (in-kernel) ----------------------

_ERF_P = 0.3275911
_ERF_A = (0.254829592, -0.284496736, 1.421413741, -1.453152027, 1.061405429)


def _erf(x):
    # Abramowitz & Stegun 7.1.26 (|err| < 1.5e-7): exact-erf GELU semantics with
    # ops guaranteed to lower.  Exact (approx=False) reciprocal per review.
    sgn = jnp.where(x >= 0.0, 1.0, -1.0)
    a = jnp.abs(x)
    t = pl.reciprocal(1.0 + _ERF_P * a, approx=False)
    poly = t * (_ERF_A[0] + t * (_ERF_A[1] + t * (_ERF_A[2] + t * (_ERF_A[3] + t * _ERF_A[4]))))
    return sgn * (1.0 - poly * jnp.exp(-a * a))


def _gelu(x):
    # torch.nn.GELU() default = exact erf-based GELU, computed in f32.
    return 0.5 * x * (1.0 + _erf(x * np.float32(0.7071067811865476)))


def _im2col(x, K):
    """'same' conv patches: zero-pad time ONCE, take K static windows, lane-concat."""
    if K == 1:
        return x
    T, C = x.shape
    pad = (K - 1) // 2
    z = jnp.zeros((pad, C), jnp.float32)
    xp = jnp.concatenate([z, x, z], axis=0)              # [T + K - 1, C]
    cols = [xp[k:k + T, :] for k in range(K)]            # window k == shift by k-pad
    return jnp.concatenate(cols, axis=1)                 # [T, K*C]


def _conv_block(x, w_ref, gamma, beta, *, pool=1, pool_sel_ref=None, up_ref=None):
    """ConvBlock: 'same' Conv1d (no bias) -> LayerNorm(C) -> GELU ->
    [Dropout == identity at inference] -> MaxPool1d(pool,pool) [-> linear Upsample]."""
    T, Cin = x.shape
    KC, Cout = w_ref.shape
    K = KC // Cin
    xc = _im2col(x, K)
    # single bf16 MXU matmul over the full K*Cin contraction, f32 accumulation
    acc = jnp.dot(xc.astype(jnp.bfloat16), w_ref[...],
                  preferred_element_type=jnp.float32)    # [T, Cout]
    # LayerNorm over channels (lane axis): eps=1e-5, biased variance, affine.
    mean = jnp.mean(acc, axis=-1, keepdims=True)
    var = jnp.mean(jnp.square(acc - mean), axis=-1, keepdims=True)
    y = (acc - mean) * lax.rsqrt(var + 1e-5)
    y = y * gamma + beta
    y = _gelu(y)
    # nn.Dropout(p=0.1): identity at inference.
    if pool > 1:
        # MaxPool1d(pool,pool): running max of `pool` shifted windows, then pick
        # every pool-th row with a host-precomputed one-hot bf16 matrix (rows
        # touching the zero tail are never selected, so the zero-pad is safe).
        z = jnp.concatenate([y, jnp.zeros((pool - 1, Cout), jnp.float32)], axis=0)
        m = y
        for d in range(1, pool):
            m = jnp.maximum(m, z[d:d + T, :])
        y = jnp.dot(pool_sel_ref[...], m.astype(jnp.bfloat16),
                    preferred_element_type=jnp.float32)  # [T//pool, Cout]
    if up_ref is not None:
        # nn.Upsample(linear, align_corners=False) as a bf16 interpolation matmul.
        y = jnp.dot(up_ref[...], y.astype(jnp.bfloat16),
                    preferred_element_type=jnp.float32)  # [T*scale, Cout]
    return y


# ------------------------------ host-precomputed constants --------------------

def _linear_upsample_matrix(t_in, scale):
    """nn.Upsample(scale, mode='linear', align_corners=False) as [t_out, t_in] bf16."""
    t_out = int(round(t_in * scale))
    i = np.arange(t_out)
    src = np.maximum((i + 0.5) / float(scale) - 0.5, 0.0)
    i0 = np.minimum(np.floor(src).astype(np.int64), t_in - 1)
    i1 = np.minimum(i0 + 1, t_in - 1)
    w1 = (src - i0).astype(np.float32)
    w0 = 1.0 - w1
    m = np.zeros((t_out, t_in), np.float32)
    m[i, i0] += w0
    m[i, i1] += w1
    return jnp.asarray(m, dtype=jnp.bfloat16)


def _maxpool_select_matrix(t_in, pool):
    """One-hot [t_in//pool, t_in] bf16 matrix picking rows j*pool."""
    t_out = t_in // pool
    m = np.zeros((t_out, t_in), np.float32)
    m[np.arange(t_out), np.arange(t_out) * pool] = 1.0
    return jnp.asarray(m, dtype=jnp.bfloat16)


def _pack_rows(vecs):
    """Pack small [1, C] params into one [n_rows, max_C] f32 array (one DMA)."""
    width = max(int(np.prod(v.shape)) for v in vecs)
    rows = []
    for v in vecs:
        v = jnp.reshape(v, (1, -1)).astype(jnp.float32)
        rows.append(jnp.pad(v, ((0, 0), (0, width - v.shape[1]))))
    return jnp.concatenate(rows, axis=0)


# ------------------------------ fused forward ---------------------------------

def autoencoder1d_forward(params, x_nct, *, strides):
    """Fused AutoEncoder1D forward.  x_nct: [batch, n_electrodes, time] (NCT)."""
    B, E, T = x_nct.shape
    depth = len(strides)
    n_out = params["head_w"].shape[0]

    # --- packed tiny params (biases + LayerNorm gamma/beta): one input.
    names = (["siren_b1", "siren_b2", "siren_b3", "sr_g", "sr_b"]
             + [f"down{i}_{s}" for i in range(depth) for s in ("g", "b")]
             + [f"up{j}_{s}" for j in range(depth) for s in ("g", "b")])
    row_of = {n: r for r, n in enumerate(names)}
    width_of = {n: int(np.prod(params[n].shape)) for n in names}
    vec = _pack_rows([params[n] for n in names])

    # --- host-precomputed bf16 pooling-selection & upsample matrices.
    has_pool = [s > 1 for s in strides]
    pool_sel, t = [], T
    for i in range(depth):
        assert t % strides[i] == 0
        pool_sel.append(_maxpool_select_matrix(t, strides[i]) if has_pool[i] else None)
        t //= strides[i]
    up_mats = []
    for j, i in enumerate(range(depth - 1, -1, -1)):
        up_mats.append(_linear_upsample_matrix(t, strides[i]))
        t *= strides[i]
    assert t == T

    flat = [vec, params["siren_w1"], params["siren_w2"], params["siren_w3"],
            params["sr_w"]]
    for i in range(depth):
        flat.append(params[f"down{i}_w"])
        if has_pool[i]:
            flat.append(pool_sel[i])
    for j in range(depth):
        flat += [params[f"up{j}_w"], up_mats[j]]
    flat += [params["head_w"], params["head_b"]]

    def kernel(*refs):
        x_ref, o_ref = refs[0], refs[-1]
        it = iter(refs[1:-1])
        vec_ref = next(it)
        V = vec_ref[...]                                 # [rows, W] f32 (tiny)

        def row(name):
            r = row_of[name]
            return V[r:r + 1, :width_of[name]]           # [1, width]

        w1 = next(it); w2 = next(it); w3 = next(it); sr_w = next(it)
        down = []
        for i in range(depth):
            wd = next(it)
            sel = next(it) if has_pool[i] else None
            down.append((wd, sel))
        up = [(next(it), next(it)) for _ in range(depth)]
        head_w = next(it); head_b = next(it)

        # --- artur_block (Siren_Block): KSize=1 convs + sine, omega_0 = 10 / 3.
        # First layer stays f32 (tiny, keeps sin(10*x) close to torch f32).
        h = jnp.transpose(x_ref[0])                      # [E, T] -> [T, E]
        h = jnp.dot(h, w1[...], preferred_element_type=jnp.float32) + row("siren_b1")
        h = jnp.sin(10.0 * h)
        h = jnp.dot(h.astype(jnp.bfloat16), w2[...],
                    preferred_element_type=jnp.float32) + row("siren_b2")
        h = jnp.sin(3.0 * h)
        h = jnp.dot(h.astype(jnp.bfloat16), w3[...],
                    preferred_element_type=jnp.float32) + row("siren_b3")
        # --- spatial_reduce (stride=1 -> MaxPool1d(1,1) identity)
        h = _conv_block(h, sr_w, row("sr_g"), row("sr_b"))
        # --- encoder
        for i in range(depth):
            wd, sel = down[i]
            h = _conv_block(h, wd, row(f"down{i}_g"), row(f"down{i}_b"),
                            pool=strides[i], pool_sel_ref=sel)
        # --- decoder (decoder_reduce = 1)
        for j in range(depth):
            wu, um = up[j]
            h = _conv_block(h, wu, row(f"up{j}_g"), row(f"up{j}_b"), up_ref=um)
        # --- final Conv1d(kernel_size=1) with bias, computed as an NT dot so the
        # result is already [n_out, T]: lane-dense output store, no transpose.
        y = lax.dot_general(head_w[...], h.astype(jnp.bfloat16),
                            (((1,), (1,)), ((), ())),
                            preferred_element_type=jnp.float32)   # [n_out, T]
        o_ref[0] = y + head_b[...]

    out = pl.pallas_call(
        kernel,
        out_shape=jax.ShapeDtypeStruct((B, n_out, T), jnp.float32),
        grid=(B,),
        in_specs=[pl.BlockSpec((1, E, T), lambda b: (b, 0, 0))]
                 + [pl.BlockSpec(p.shape, (lambda b, _n=p.ndim: (0,) * _n))
                    for p in flat],
        out_specs=pl.BlockSpec((1, n_out, T), lambda b: (b, 0, 0)),
        compiler_params=pltpu.CompilerParams(dimension_semantics=("parallel",)),
    )(x_nct.astype(jnp.float32), *flat)
    return out                                            # [B, n_out, T] (NCT)


# ------------------------------ parameters ------------------------------------

def init_params(key, *, n_electrodes, n_channels_out, channels, kernel_sizes,
                hidden_channels, siren_hidden=256):
    keys = iter(jax.random.split(key, 64))

    def u(shape, bound):
        return jax.random.uniform(next(keys), shape, jnp.float32, -bound, bound)

    p = {}
    e, hdim, hc = n_electrodes, siren_hidden, hidden_channels
    depth = len(channels) - 1

    # Siren (KSize=1): first layer U(-1/in, 1/in); hidden/final U(+-sqrt(6/in)/omega).
    p["siren_w1"] = u((e, hdim), 1.0 / e)                                    # f32
    p["siren_b1"] = u((1, hdim), 1.0 / np.sqrt(e))
    p["siren_w2"] = u((hdim, hdim), np.sqrt(6.0 / hdim) / 3.0).astype(jnp.bfloat16)
    p["siren_b2"] = u((1, hdim), 1.0 / np.sqrt(hdim))
    p["siren_w3"] = u((hdim, hc), np.sqrt(6.0 / hdim) / 3.0).astype(jnp.bfloat16)
    p["siren_b3"] = u((1, hc), 1.0 / np.sqrt(hdim))

    def conv_ln(name, cin, cout, k):
        # 'same' Conv1d taps [K, Cin, Cout] -> im2col weight [K*Cin, Cout] in bf16.
        w = u((k, cin, cout), 1.0 / np.sqrt(cin * k))
        p[name + "_w"] = w.reshape(k * cin, cout).astype(jnp.bfloat16)
        p[name + "_g"] = jnp.ones((1, cout), jnp.float32)    # LayerNorm weight
        p[name + "_b"] = jnp.zeros((1, cout), jnp.float32)   # LayerNorm bias

    conv_ln("sr", hc, channels[0], 3)                                # spatial_reduce
    for i in range(depth):                                           # encoder
        conv_ln(f"down{i}", channels[i], channels[i + 1], kernel_sizes[i])
    for j, i in enumerate(range(depth - 1, -1, -1)):                 # decoder
        conv_ln(f"up{j}", channels[i + 1], channels[i], kernel_sizes[i])
    # 1x1 head stored transposed ([n_out, C0], bf16) for the NT dot; bias as column.
    p["head_w"] = u((n_channels_out, channels[0]),
                    1.0 / np.sqrt(channels[0])).astype(jnp.bfloat16)
    p["head_b"] = u((n_channels_out, 1), 1.0 / np.sqrt(channels[0]))
    return p


# ------------------------------ main -------------------------------------------

if __name__ == "__main__":
    # Small config consistent with AutoEncoder1D.forward (defaults shrunk:
    # 30 electrodes -> 4, 21 output channels -> 3, strides 4 -> 2, time = 64).
    n_electrodes, n_channels_out = 4, 3
    channels = [8, 16, 32, 32]
    kernel_sizes = [3, 3, 3]
    strides = [2, 2, 2]
    hidden_channels = 5
    batch, time = 2, 64

    key = jax.random.PRNGKey(0)
    pkey, xkey = jax.random.split(key)
    params = init_params(pkey, n_electrodes=n_electrodes,
                         n_channels_out=n_channels_out, channels=channels,
                         kernel_sizes=kernel_sizes, hidden_channels=hidden_channels)
    x = jax.random.normal(xkey, (batch, n_electrodes, time), jnp.float32)

    fwd = jax.jit(lambda p, xx: autoencoder1d_forward(p, xx, strides=tuple(strides)))
    y = jax.block_until_ready(fwd(params, x))
    assert y.shape == (batch, n_channels_out, time), y.shape
    assert bool(jnp.all(jnp.isfinite(y)))
    print("KERNEL_OK")
</pallas_src>

<mosaic_0001>
module attributes {stable_mosaic.version = 11 : i64} {
  func.func @kernel(%arg0: i32, %arg1: memref<1x4x64xf32, #tpu.memory_space<vmem>>, %arg2: memref<17x256xf32, #tpu.memory_space<vmem>>, %arg3: memref<4x256xf32, #tpu.memory_space<vmem>>, %arg4: memref<256x256xbf16, #tpu.memory_space<vmem>>, %arg5: memref<256x5xbf16, #tpu.memory_space<vmem>>, %arg6: memref<15x8xbf16, #tpu.memory_space<vmem>>, %arg7: memref<24x16xbf16, #tpu.memory_space<vmem>>, %arg8: memref<32x64xbf16, #tpu.memory_space<vmem>>, %arg9: memref<48x32xbf16, #tpu.memory_space<vmem>>, %arg10: memref<16x32xbf16, #tpu.memory_space<vmem>>, %arg11: memref<96x32xbf16, #tpu.memory_space<vmem>>, %arg12: memref<8x16xbf16, #tpu.memory_space<vmem>>, %arg13: memref<96x32xbf16, #tpu.memory_space<vmem>>, %arg14: memref<16x8xbf16, #tpu.memory_space<vmem>>, %arg15: memref<96x16xbf16, #tpu.memory_space<vmem>>, %arg16: memref<32x16xbf16, #tpu.memory_space<vmem>>, %arg17: memref<48x8xbf16, #tpu.memory_space<vmem>>, %arg18: memref<64x32xbf16, #tpu.memory_space<vmem>>, %arg19: memref<3x8xbf16, #tpu.memory_space<vmem>>, %arg20: memref<3x1xf32, #tpu.memory_space<vmem>>, %arg21: memref<1x3x64xf32, #tpu.memory_space<vmem>>) attributes {dimension_semantics = [#tpu.dimension_semantics<parallel>], iteration_bounds = array<i64: 2>, scalar_prefetch = 0 : i64, scratch_operands = 0 : i64, tpu.core_type = #tpu.core_type<tc>, window_params = [{transform_indices = @transform_0, window_bounds = array<i64: 1, 4, 64>}, {pipeline_mode = #tpu.pipeline_mode<synchronous>, transform_indices = @transform_1, window_bounds = array<i64: 17, 256>}, {pipeline_mode = #tpu.pipeline_mode<synchronous>, transform_indices = @transform_2, window_bounds = array<i64: 4, 256>}, {pipeline_mode = #tpu.pipeline_mode<synchronous>, transform_indices = @transform_3, window_bounds = array<i64: 256, 256>}, {pipeline_mode = #tpu.pipeline_mode<synchronous>, transform_indices = @transform_4, window_bounds = array<i64: 256, 5>}, {pipeline_mode = #tpu.pipeline_mode<synchronous>, transform_indices = @transform_5, window_bounds = array<i64: 15, 8>}, {pipeline_mode = #tpu.pipeline_mode<synchronous>, transform_indices = @transform_6, window_bounds = array<i64: 24, 16>}, {pipeline_mode = #tpu.pipeline_mode<synchronous>, transform_indices = @transform_7, window_bounds = array<i64: 32, 64>}, {pipeline_mode = #tpu.pipeline_mode<synchronous>, transform_indices = @transform_8, window_bounds = array<i64: 48, 32>}, {pipeline_mode = #tpu.pipeline_mode<synchronous>, transform_indices = @transform_9, window_bounds = array<i64: 16, 32>}, {pipeline_mode = #tpu.pipeline_mode<synchronous>, transform_indices = @transform_10, window_bounds = array<i64: 96, 32>}, {pipeline_mode = #tpu.pipeline_mode<synchronous>, transform_indices = @transform_11, window_bounds = array<i64: 8, 16>}, {pipeline_mode = #tpu.pipeline_mode<synchronous>, transform_indices = @transform_12, window_bounds = array<i64: 96, 32>}, {pipeline_mode = #tpu.pipeline_mode<synchronous>, transform_indices = @transform_13, window_bounds = array<i64: 16, 8>}, {pipeline_mode = #tpu.pipeline_mode<synchronous>, transform_indices = @transform_14, window_bounds = array<i64: 96, 16>}, {pipeline_mode = #tpu.pipeline_mode<synchronous>, transform_indices = @transform_15, window_bounds = array<i64: 32, 16>}, {pipeline_mode = #tpu.pipeline_mode<synchronous>, transform_indices = @transform_16, window_bounds = array<i64: 48, 8>}, {pipeline_mode = #tpu.pipeline_mode<synchronous>, transform_indices = @transform_17, window_bounds = array<i64: 64, 32>}, {pipeline_mode = #tpu.pipeline_mode<synchronous>, transform_indices = @transform_18, window_bounds = array<i64: 3, 8>}, {pipeline_mode = #tpu.pipeline_mode<synchronous>, transform_indices = @transform_19, window_bounds = array<i64: 3, 1>}, {transform_indices = @transform_20, window_bounds = array<i64: 1, 3, 64>}]} {
    %c0 = arith.constant 0 : index
    %c0_0 = arith.constant 0 : index
    %0 = vector.load %arg2[%c0, %c0_0] : memref<17x256xf32, #tpu.memory_space<vmem>>, vector<17x256xf32>
    %c0_1 = arith.constant 0 : index
    %c0_2 = arith.constant 0 : index
    %c0_3 = arith.constant 0 : index
    %1 = vector.load %arg1[%c0_1, %c0_2, %c0_3] : memref<1x4x64xf32, #tpu.memory_space<vmem>>, vector<1x4x64xf32>
    %2 = vector.shape_cast %1 : vector<1x4x64xf32> to vector<4x64xf32>
    %3 = tpu.transpose %2, [1, 0] : vector<4x64xf32> -> vector<64x4xf32>
    %c0_4 = arith.constant 0 : index
    %c0_5 = arith.constant 0 : index
    %4 = vector.load %arg3[%c0_4, %c0_5] : memref<4x256xf32, #tpu.memory_space<vmem>>, vector<4x256xf32>
    %cst = arith.constant dense<0.000000e+00> : vector<64x256xf32>
    %5 = tpu.matmul %3, %4, %cst {dimension_numbers = #tpu.dot_dimension_numbers<[1], [0], [0], [1], [0, 0, 1, 1], [], []>} : vector<64x4xf32>, vector<4x256xf32>, vector<64x256xf32> -> vector<64x256xf32>
    %6 = vector.extract_strided_slice %0 {offsets = [0, 0], sizes = [1, 256], strides = [1, 1]} : vector<17x256xf32> to vector<1x256xf32>
    %7 = vector.broadcast %6 : vector<1x256xf32> to vector<64x256xf32>
    %8 = arith.addf %5, %7 : vector<64x256xf32>
    %cst_6 = arith.constant 1.000000e+01 : f32
    %9 = vector.broadcast %cst_6 : f32 to vector<64x256xf32>
    %10 = arith.mulf %9, %8 : vector<64x256xf32>
    %11 = math.sin %10 : vector<64x256xf32>
    %12 = arith.truncf %11 : vector<64x256xf32> to vector<64x256xbf16>
    %c0_7 = arith.constant 0 : index
    %c0_8 = arith.constant 0 : index
    %13 = vector.load %arg4[%c0_7, %c0_8] : memref<256x256xbf16, #tpu.memory_space<vmem>>, vector<256x256xbf16>
    %cst_9 = arith.constant dense<0.000000e+00> : vector<64x256xf32>
    %14 = tpu.matmul %12, %13, %cst_9 {dimension_numbers = #tpu.dot_dimension_numbers<[1], [0], [0], [1], [0, 0, 1, 1], [], []>} : vector<64x256xbf16>, vector<256x256xbf16>, vector<64x256xf32> -> vector<64x256xf32>
    %15 = vector.extract_strided_slice %0 {offsets = [1, 0], sizes = [1, 256], strides = [1, 1]} : vector<17x256xf32> to vector<1x256xf32>
    %16 = vector.broadcast %15 : vector<1x256xf32> to vector<64x256xf32>
    %17 = arith.addf %14, %16 : vector<64x256xf32>
    %cst_10 = arith.constant 3.000000e+00 : f32
    %18 = vector.broadcast %cst_10 : f32 to vector<64x256xf32>
    %19 = arith.mulf %18, %17 : vector<64x256xf32>
    %20 = math.sin %19 : vector<64x256xf32>
    %21 = arith.truncf %20 : vector<64x256xf32> to vector<64x256xbf16>
    %c0_11 = arith.constant 0 : index
    %c0_12 = arith.constant 0 : index
    %22 = vector.load %arg5[%c0_11, %c0_12] : memref<256x5xbf16, #tpu.memory_space<vmem>>, vector<256x5xbf16>
    %cst_13 = arith.constant dense<0.000000e+00> : vector<64x5xf32>
    %23 = tpu.matmul %21, %22, %cst_13 {dimension_numbers = #tpu.dot_dimension_numbers<[1], [0], [0], [1], [0, 0, 1, 1], [], []>} : vector<64x256xbf16>, vector<256x5xbf16>, vector<64x5xf32> -> vector<64x5xf32>
    %24 = vector.extract_strided_slice %0 {offsets = [2, 0], sizes = [1, 5], strides = [1, 1]} : vector<17x256xf32> to vector<1x5xf32>
    %25 = vector.broadcast %24 : vector<1x5xf32> to vector<64x5xf32>
    %26 = arith.addf %23, %25 : vector<64x5xf32>
    %27 = vector.extract_strided_slice %0 {offsets = [3, 0], sizes = [1, 8], strides = [1, 1]} : vector<17x256xf32> to vector<1x8xf32>
    %28 = vector.extract_strided_slice %0 {offsets = [4, 0], sizes = [1, 8], strides = [1, 1]} : vector<17x256xf32> to vector<1x8xf32>
    %cst_14 = arith.constant 0.000000e+00 : f32
    %29 = vector.broadcast %cst_14 : f32 to vector<1x5xf32>
    %30 = tpu.concatenate %29, %26, %29 in 0 : vector<1x5xf32>, vector<64x5xf32>, vector<1x5xf32> -> vector<66x5xf32>
    %31 = vector.extract_strided_slice %30 {offsets = [0, 0], sizes = [64, 5], strides = [1, 1]} : vector<66x5xf32> to vector<64x5xf32>
    %32 = vector.extract_strided_slice %30 {offsets = [1, 0], sizes = [64, 5], strides = [1, 1]} : vector<66x5xf32> to vector<64x5xf32>
    %33 = vector.extract_strided_slice %30 {offsets = [2, 0], sizes = [64, 5], strides = [1, 1]} : vector<66x5xf32> to vector<64x5xf32>
    %34 = tpu.concatenate %31, %32, %33 in 1 : vector<64x5xf32>, vector<64x5xf32>, vector<64x5xf32> -> vector<64x15xf32>
    %35 = arith.truncf %34 : vector<64x15xf32> to vector<64x15xbf16>
    %c0_15 = arith.constant 0 : index
    %c0_16 = arith.constant 0 : index
    %36 = vector.load %arg6[%c0_15, %c0_16] : memref<15x8xbf16, #tpu.memory_space<vmem>>, vector<15x8xbf16>
    %cst_17 = arith.constant dense<0.000000e+00> : vector<64x8xf32>
    %37 = tpu.matmul %35, %36, %cst_17 {dimension_numbers = #tpu.dot_dimension_numbers<[1], [0], [0], [1], [0, 0, 1, 1], [], []>} : vector<64x15xbf16>, vector<15x8xbf16>, vector<64x8xf32> -> vector<64x8xf32>
    %cst_18 = arith.constant dense<0.000000e+00> : vector<64xf32>
    %38 = vector.multi_reduction <add>, %37, %cst_18 [1] : vector<64x8xf32> to vector<64xf32>
    %39 = vector.shape_cast %38 : vector<64xf32> to vector<64x1xf32>
    %cst_19 = arith.constant 8.000000e+00 : f32
    %40 = vector.broadcast %cst_19 : f32 to vector<64x1xf32>
    %41 = arith.divf %39, %40 : vector<64x1xf32>
    %42 = vector.broadcast %41 : vector<64x1xf32> to vector<64x8xf32>
    %43 = arith.subf %37, %42 : vector<64x8xf32>
    %44 = arith.mulf %43, %43 : vector<64x8xf32>
    %cst_20 = arith.constant dense<0.000000e+00> : vector<64xf32>
    %45 = vector.multi_reduction <add>, %44, %cst_20 [1] : vector<64x8xf32> to vector<64xf32>
    %46 = vector.shape_cast %45 : vector<64xf32> to vector<64x1xf32>
    %cst_21 = arith.constant 8.000000e+00 : f32
    %47 = vector.broadcast %cst_21 : f32 to vector<64x1xf32>
    %48 = arith.divf %46, %47 : vector<64x1xf32>
    %49 = vector.broadcast %41 : vector<64x1xf32> to vector<64x8xf32>
    %50 = arith.subf %37, %49 : vector<64x8xf32>
    %cst_22 = arith.constant 9.99999974E-6 : f32
    %51 = vector.broadcast %cst_22 : f32 to vector<64x1xf32>
    %52 = arith.addf %48, %51 : vector<64x1xf32>
    %53 = math.rsqrt %52 : vector<64x1xf32>
    %54 = vector.broadcast %53 : vector<64x1xf32> to vector<64x8xf32>
    %55 = arith.mulf %50, %54 : vector<64x8xf32>
    %56 = vector.broadcast %27 : vector<1x8xf32> to vector<64x8xf32>
    %57 = arith.mulf %55, %56 : vector<64x8xf32>
    %58 = vector.broadcast %28 : vector<1x8xf32> to vector<64x8xf32>
    %59 = arith.addf %57, %58 : vector<64x8xf32>
    %cst_23 = arith.constant 5.000000e-01 : f32
    %60 = vector.broadcast %cst_23 : f32 to vector<64x8xf32>
    %61 = arith.mulf %60, %59 : vector<64x8xf32>
    %cst_24 = arith.constant 0.707106769 : f32
    %62 = vector.broadcast %cst_24 : f32 to vector<64x8xf32>
    %63 = arith.mulf %59, %62 : vector<64x8xf32>
    %cst_25 = arith.constant 0.000000e+00 : f32
    %64 = vector.broadcast %cst_25 : f32 to vector<64x8xf32>
    %65 = arith.cmpf oge, %63, %64 : vector<64x8xf32>
    %cst_26 = arith.constant 1.000000e+00 : f32
    %cst_27 = arith.constant -1.000000e+00 : f32
    %66 = vector.broadcast %cst_26 : f32 to vector<64x8xf32>
    %67 = vector.broadcast %cst_27 : f32 to vector<64x8xf32>
    %68 = arith.select %65, %66, %67 : vector<64x8xi1>, vector<64x8xf32>
    %69 = math.absf %63 : vector<64x8xf32>
    %cst_28 = arith.constant 0.327591091 : f32
    %70 = vector.broadcast %cst_28 : f32 to vector<64x8xf32>
    %71 = arith.mulf %70, %69 : vector<64x8xf32>
    %cst_29 = arith.constant 1.000000e+00 : f32
    %72 = vector.broadcast %cst_29 : f32 to vector<64x8xf32>
    %73 = arith.addf %72, %71 : vector<64x8xf32>
    %74 = tpu.reciprocal %73 : vector<64x8xf32> -> vector<64x8xf32>
    %cst_30 = arith.constant 1.06140542 : f32
    %75 = vector.broadcast %cst_30 : f32 to vector<64x8xf32>
    %76 = arith.mulf %74, %75 : vector<64x8xf32>
    %cst_31 = arith.constant -1.45315206 : f32
    %77 = vector.broadcast %cst_31 : f32 to vector<64x8xf32>
    %78 = arith.addf %77, %76 : vector<64x8xf32>
    %79 = arith.mulf %74, %78 : vector<64x8xf32>
    %cst_32 = arith.constant 1.42141378 : f32
    %80 = vector.broadcast %cst_32 : f32 to vector<64x8xf32>
    %81 = arith.addf %80, %79 : vector<64x8xf32>
    %82 = arith.mulf %74, %81 : vector<64x8xf32>
    %cst_33 = arith.constant -0.284496725 : f32
    %83 = vector.broadcast %cst_33 : f32 to vector<64x8xf32>
    %84 = arith.addf %83, %82 : vector<64x8xf32>
    %85 = arith.mulf %74, %84 : vector<64x8xf32>
    %cst_34 = arith.constant 0.254829586 : f32
    %86 = vector.broadcast %cst_34 : f32 to vector<64x8xf32>
    %87 = arith.addf %86, %85 : vector<64x8xf32>
    %88 = arith.mulf %74, %87 : vector<64x8xf32>
    %cst_35 = arith.constant 0.000000e+00 : f32
    %89 = vector.broadcast %cst_35 : f32 to vector<64x8xf32>
    %90 = arith.subf %89, %69 : vector<64x8xf32>
    %91 = arith.mulf %90, %69 : vector<64x8xf32>
    %92 = math.exp %91 : vector<64x8xf32>
    %93 = arith.mulf %88, %92 : vector<64x8xf32>
    %cst_36 = arith.constant 1.000000e+00 : f32
    %94 = vector.broadcast %cst_36 : f32 to vector<64x8xf32>
    %95 = arith.subf %94, %93 : vector<64x8xf32>
    %96 = arith.mulf %68, %95 : vector<64x8xf32>
    %cst_37 = arith.constant 1.000000e+00 : f32
    %97 = vector.broadcast %cst_37 : f32 to vector<64x8xf32>
    %98 = arith.addf %97, %96 : vector<64x8xf32>
    %99 = arith.mulf %61, %98 : vector<64x8xf32>
    %100 = vector.extract_strided_slice %0 {offsets = [5, 0], sizes = [1, 16], strides = [1, 1]} : vector<17x256xf32> to vector<1x16xf32>
    %101 = vector.extract_strided_slice %0 {offsets = [6, 0], sizes = [1, 16], strides = [1, 1]} : vector<17x256xf32> to vector<1x16xf32>
    %cst_38 = arith.constant 0.000000e+00 : f32
    %102 = vector.broadcast %cst_38 : f32 to vector<1x8xf32>
    %103 = tpu.concatenate %102, %99, %102 in 0 : vector<1x8xf32>, vector<64x8xf32>, vector<1x8xf32> -> vector<66x8xf32>
    %104 = vector.extract_strided_slice %103 {offsets = [0, 0], sizes = [64, 8], strides = [1, 1]} : vector<66x8xf32> to vector<64x8xf32>
    %105 = vector.extract_strided_slice %103 {offsets = [1, 0], sizes = [64, 8], strides = [1, 1]} : vector<66x8xf32> to vector<64x8xf32>
    %106 = vector.extract_strided_slice %103 {offsets = [2, 0], sizes = [64, 8], strides = [1, 1]} : vector<66x8xf32> to vector<64x8xf32>
    %107 = tpu.concatenate %104, %105, %106 in 1 : vector<64x8xf32>, vector<64x8xf32>, vector<64x8xf32> -> vector<64x24xf32>
    %108 = arith.truncf %107 : vector<64x24xf32> to vector<64x24xbf16>
    %c0_39 = arith.constant 0 : index
    %c0_40 = arith.constant 0 : index
    %109 = vector.load %arg7[%c0_39, %c0_40] : memref<24x16xbf16, #tpu.memory_space<vmem>>, vector<24x16xbf16>
    %cst_41 = arith.constant dense<0.000000e+00> : vector<64x16xf32>
    %110 = tpu.matmul %108, %109, %cst_41 {dimension_numbers = #tpu.dot_dimension_numbers<[1], [0], [0], [1], [0, 0, 1, 1], [], []>} : vector<64x24xbf16>, vector<24x16xbf16>, vector<64x16xf32> -> vector<64x16xf32>
    %cst_42 = arith.constant dense<0.000000e+00> : vector<64xf32>
    %111 = vector.multi_reduction <add>, %110, %cst_42 [1] : vector<64x16xf32> to vector<64xf32>
    %112 = vector.shape_cast %111 : vector<64xf32> to vector<64x1xf32>
    %cst_43 = arith.constant 1.600000e+01 : f32
    %113 = vector.broadcast %cst_43 : f32 to vector<64x1xf32>
    %114 = arith.divf %112, %113 : vector<64x1xf32>
    %115 = vector.broadcast %114 : vector<64x1xf32> to vector<64x16xf32>
    %116 = arith.subf %110, %115 : vector<64x16xf32>
    %117 = arith.mulf %116, %116 : vector<64x16xf32>
    %cst_44 = arith.constant dense<0.000000e+00> : vector<64xf32>
    %118 = vector.multi_reduction <add>, %117, %cst_44 [1] : vector<64x16xf32> to vector<64xf32>
    %119 = vector.shape_cast %118 : vector<64xf32> to vector<64x1xf32>
    %cst_45 = arith.constant 1.600000e+01 : f32
    %120 = vector.broadcast %cst_45 : f32 to vector<64x1xf32>
    %121 = arith.divf %119, %120 : vector<64x1xf32>
    %122 = vector.broadcast %114 : vector<64x1xf32> to vector<64x16xf32>
    %123 = arith.subf %110, %122 : vector<64x16xf32>
    %cst_46 = arith.constant 9.99999974E-6 : f32
    %124 = vector.broadcast %cst_46 : f32 to vector<64x1xf32>
    %125 = arith.addf %121, %124 : vector<64x1xf32>
    %126 = math.rsqrt %125 : vector<64x1xf32>
    %127 = vector.broadcast %126 : vector<64x1xf32> to vector<64x16xf32>
    %128 = arith.mulf %123, %127 : vector<64x16xf32>
    %129 = vector.broadcast %100 : vector<1x16xf32> to vector<64x16xf32>
    %130 = arith.mulf %128, %129 : vector<64x16xf32>
    %131 = vector.broadcast %101 : vector<1x16xf32> to vector<64x16xf32>
    %132 = arith.addf %130, %131 : vector<64x16xf32>
    %cst_47 = arith.constant 5.000000e-01 : f32
    %133 = vector.broadcast %cst_47 : f32 to vector<64x16xf32>
    %134 = arith.mulf %133, %132 : vector<64x16xf32>
    %cst_48 = arith.constant 0.707106769 : f32
    %135 = vector.broadcast %cst_48 : f32 to vector<64x16xf32>
    %136 = arith.mulf %132, %135 : vector<64x16xf32>
    %cst_49 = arith.constant 0.000000e+00 : f32
    %137 = vector.broadcast %cst_49 : f32 to vector<64x16xf32>
    %138 = arith.cmpf oge, %136, %137 : vector<64x16xf32>
    %cst_50 = arith.constant 1.000000e+00 : f32
    %cst_51 = arith.constant -1.000000e+00 : f32
    %139 = vector.broadcast %cst_50 : f32 to vector<64x16xf32>
    %140 = vector.broadcast %cst_51 : f32 to vector<64x16xf32>
    %141 = arith.select %138, %139, %140 : vector<64x16xi1>, vector<64x16xf32>
    %142 = math.absf %136 : vector<64x16xf32>
    %cst_52 = arith.constant 0.327591091 : f32
    %143 = vector.broadcast %cst_52 : f32 to vector<64x16xf32>
    %144 = arith.mulf %143, %142 : vector<64x16xf32>
    %cst_53 = arith.constant 1.000000e+00 : f32
    %145 = vector.broadcast %cst_53 : f32 to vector<64x16xf32>
    %146 = arith.addf %145, %144 : vector<64x16xf32>
    %147 = tpu.reciprocal %146 : vector<64x16xf32> -> vector<64x16xf32>
    %cst_54 = arith.constant 1.06140542 : f32
    %148 = vector.broadcast %cst_54 : f32 to vector<64x16xf32>
    %149 = arith.mulf %147, %148 : vector<64x16xf32>
    %cst_55 = arith.constant -1.45315206 : f32
    %150 = vector.broadcast %cst_55 : f32 to vector<64x16xf32>
    %151 = arith.addf %150, %149 : vector<64x16xf32>
    %152 = arith.mulf %147, %151 : vector<64x16xf32>
    %cst_56 = arith.constant 1.42141378 : f32
    %153 = vector.broadcast %cst_56 : f32 to vector<64x16xf32>
    %154 = arith.addf %153, %152 : vector<64x16xf32>
    %155 = arith.mulf %147, %154 : vector<64x16xf32>
    %cst_57 = arith.constant -0.284496725 : f32
    %156 = vector.broadcast %cst_57 : f32 to vector<64x16xf32>
    %157 = arith.addf %156, %155 : vector<64x16xf32>
    %158 = arith.mulf %147, %157 : vector<64x16xf32>
    %cst_58 = arith.constant 0.254829586 : f32
    %159 = vector.broadcast %cst_58 : f32 to vector<64x16xf32>
    %160 = arith.addf %159, %158 : vector<64x16xf32>
    %161 = arith.mulf %147, %160 : vector<64x16xf32>
    %cst_59 = arith.constant 0.000000e+00 : f32
    %162 = vector.broadcast %cst_59 : f32 to vector<64x16xf32>
    %163 = arith.subf %162, %142 : vector<64x16xf32>
    %164 = arith.mulf %163, %142 : vector<64x16xf32>
    %165 = math.exp %164 : vector<64x16xf32>
    %166 = arith.mulf %161, %165 : vector<64x16xf32>
    %cst_60 = arith.constant 1.000000e+00 : f32
    %167 = vector.broadcast %cst_60 : f32 to vector<64x16xf32>
    %168 = arith.subf %167, %166 : vector<64x16xf32>
    %169 = arith.mulf %141, %168 : vector<64x16xf32>
    %cst_61 = arith.constant 1.000000e+00 : f32
    %170 = vector.broadcast %cst_61 : f32 to vector<64x16xf32>
    %171 = arith.addf %170, %169 : vector<64x16xf32>
    %172 = arith.mulf %134, %171 : vector<64x16xf32>
    %cst_62 = arith.constant 0.000000e+00 : f32
    %173 = vector.broadcast %cst_62 : f32 to vector<1x16xf32>
    %174 = tpu.concatenate %172, %173 in 0 : vector<64x16xf32>, vector<1x16xf32> -> vector<65x16xf32>
    %175 = vector.extract_strided_slice %174 {offsets = [1, 0], sizes = [64, 16], strides = [1, 1]} : vector<65x16xf32> to vector<64x16xf32>
    %176 = arith.maximumf %172, %175 : vector<64x16xf32>
    %c0_63 = arith.constant 0 : index
    %c0_64 = arith.constant 0 : index
    %177 = vector.load %arg8[%c0_63, %c0_64] : memref<32x64xbf16, #tpu.memory_space<vmem>>, vector<32x64xbf16>
    %178 = arith.truncf %176 : vector<64x16xf32> to vector<64x16xbf16>
    %cst_65 = arith.constant dense<0.000000e+00> : vector<32x16xf32>
    %179 = tpu.matmul %177, %178, %cst_65 {dimension_numbers = #tpu.dot_dimension_numbers<[1], [0], [0], [1], [0, 0, 1, 1], [], []>} : vector<32x64xbf16>, vector<64x16xbf16>, vector<32x16xf32> -> vector<32x16xf32>
    %180 = vector.extract_strided_slice %0 {offsets = [7, 0], sizes = [1, 32], strides = [1, 1]} : vector<17x256xf32> to vector<1x32xf32>
    %181 = vector.extract_strided_slice %0 {offsets = [8, 0], sizes = [1, 32], strides = [1, 1]} : vector<17x256xf32> to vector<1x32xf32>
    %cst_66 = arith.constant 0.000000e+00 : f32
    %182 = vector.broadcast %cst_66 : f32 to vector<1x16xf32>
    %183 = tpu.concatenate %182, %179, %182 in 0 : vector<1x16xf32>, vector<32x16xf32>, vector<1x16xf32> -> vector<34x16xf32>
    %184 = vector.extract_strided_slice %183 {offsets = [0, 0], sizes = [32, 16], strides = [1, 1]} : vector<34x16xf32> to vector<32x16xf32>
    %185 = vector.extract_strided_slice %183 {offsets = [1, 0], sizes = [32, 16], strides = [1, 1]} : vector<34x16xf32> to vector<32x16xf32>
    %186 = vector.extract_strided_slice %183 {offsets = [2, 0], sizes = [32, 16], strides = [1, 1]} : vector<34x16xf32> to vector<32x16xf32>
    %187 = tpu.concatenate %184, %185, %186 in 1 : vector<32x16xf32>, vector<32x16xf32>, vector<32x16xf32> -> vector<32x48xf32>
    %188 = arith.truncf %187 : vector<32x48xf32> to vector<32x48xbf16>
    %c0_67 = arith.constant 0 : index
    %c0_68 = arith.constant 0 : index
    %189 = vector.load %arg9[%c0_67, %c0_68] : memref<48x32xbf16, #tpu.memory_space<vmem>>, vector<48x32xbf16>
    %cst_69 = arith.constant dense<0.000000e+00> : vector<32x32xf32>
    %190 = tpu.matmul %188, %189, %cst_69 {dimension_numbers = #tpu.dot_dimension_numbers<[1], [0], [0], [1], [0, 0, 1, 1], [], []>} : vector<32x48xbf16>, vector<48x32xbf16>, vector<32x32xf32> -> vector<32x32xf32>
    %cst_70 = arith.constant dense<0.000000e+00> : vector<32xf32>
    %191 = vector.multi_reduction <add>, %190, %cst_70 [1] : vector<32x32xf32> to vector<32xf32>
    %192 = vector.shape_cast %191 : vector<32xf32> to vector<32x1xf32>
    %cst_71 = arith.constant 3.200000e+01 : f32
    %193 = vector.broadcast %cst_71 : f32 to vector<32x1xf32>
    %194 = arith.divf %192, %193 : vector<32x1xf32>
    %195 = vector.broadcast %194 : vector<32x1xf32> to vector<32x32xf32>
    %196 = arith.subf %190, %195 : vector<32x32xf32>
    %197 = arith.mulf %196, %196 : vector<32x32xf32>
    %cst_72 = arith.constant dense<0.000000e+00> : vector<32xf32>
    %198 = vector.multi_reduction <add>, %197, %cst_72 [1] : vector<32x32xf32> to vector<32xf32>
    %199 = vector.shape_cast %198 : vector<32xf32> to vector<32x1xf32>
    %cst_73 = arith.constant 3.200000e+01 : f32
    %200 = vector.broadcast %cst_73 : f32 to vector<32x1xf32>
    %201 = arith.divf %199, %200 : vector<32x1xf32>
    %202 = vector.broadcast %194 : vector<32x1xf32> to vector<32x32xf32>
    %203 = arith.subf %190, %202 : vector<32x32xf32>
    %cst_74 = arith.constant 9.99999974E-6 : f32
    %204 = vector.broadcast %cst_74 : f32 to vector<32x1xf32>
    %205 = arith.addf %201, %204 : vector<32x1xf32>
    %206 = math.rsqrt %205 : vector<32x1xf32>
    %207 = vector.broadcast %206 : vector<32x1xf32> to vector<32x32xf32>
    %208 = arith.mulf %203, %207 : vector<32x32xf32>
    %209 = vector.broadcast %180 : vector<1x32xf32> to vector<32x32xf32>
    %210 = arith.mulf %208, %209 : vector<32x32xf32>
    %211 = vector.broadcast %181 : vector<1x32xf32> to vector<32x32xf32>
    %212 = arith.addf %210, %211 : vector<32x32xf32>
    %cst_75 = arith.constant 5.000000e-01 : f32
    %213 = vector.broadcast %cst_75 : f32 to vector<32x32xf32>
    %214 = arith.mulf %213, %212 : vector<32x32xf32>
    %cst_76 = arith.constant 0.707106769 : f32
    %215 = vector.broadcast %cst_76 : f32 to vector<32x32xf32>
    %216 = arith.mulf %212, %215 : vector<32x32xf32>
    %cst_77 = arith.constant 0.000000e+00 : f32
    %217 = vector.broadcast %cst_77 : f32 to vector<32x32xf32>
    %218 = arith.cmpf oge, %216, %217 : vector<32x32xf32>
    %cst_78 = arith.constant 1.000000e+00 : f32
    %cst_79 = arith.constant -1.000000e+00 : f32
    %219 = vector.broadcast %cst_78 : f32 to vector<32x32xf32>
    %220 = vector.broadcast %cst_79 : f32 to vector<32x32xf32>
    %221 = arith.select %218, %219, %220 : vector<32x32xi1>, vector<32x32xf32>
    %222 = math.absf %216 : vector<32x32xf32>
    %cst_80 = arith.constant 0.327591091 : f32
    %223 = vector.broadcast %cst_80 : f32 to vector<32x32xf32>
    %224 = arith.mulf %223, %222 : vector<32x32xf32>
    %cst_81 = arith.constant 1.000000e+00 : f32
    %225 = vector.broadcast %cst_81 : f32 to vector<32x32xf32>
    %226 = arith.addf %225, %224 : vector<32x32xf32>
    %227 = tpu.reciprocal %226 : vector<32x32xf32> -> vector<32x32xf32>
    %cst_82 = arith.constant 1.06140542 : f32
    %228 = vector.broadcast %cst_82 : f32 to vector<32x32xf32>
    %229 = arith.mulf %227, %228 : vector<32x32xf32>
    %cst_83 = arith.constant -1.45315206 : f32
    %230 = vector.broadcast %cst_83 : f32 to vector<32x32xf32>
    %231 = arith.addf %230, %229 : vector<32x32xf32>
    %232 = arith.mulf %227, %231 : vector<32x32xf32>
    %cst_84 = arith.constant 1.42141378 : f32
    %233 = vector.broadcast %cst_84 : f32 to vector<32x32xf32>
    %234 = arith.addf %233, %232 : vector<32x32xf32>
    %235 = arith.mulf %227, %234 : vector<32x32xf32>
    %cst_85 = arith.constant -0.284496725 : f32
    %236 = vector.broadcast %cst_85 : f32 to vector<32x32xf32>
    %237 = arith.addf %236, %235 : vector<32x32xf32>
    %238 = arith.mulf %227, %237 : vector<32x32xf32>
    %cst_86 = arith.constant 0.254829586 : f32
    %239 = vector.broadcast %cst_86 : f32 to vector<32x32xf32>
    %240 = arith.addf %239, %238 : vector<32x32xf32>
    %241 = arith.mulf %227, %240 : vector<32x32xf32>
    %cst_87 = arith.constant 0.000000e+00 : f32
    %242 = vector.broadcast %cst_87 : f32 to vector<32x32xf32>
    %243 = arith.subf %242, %222 : vector<32x32xf32>
    %244 = arith.mulf %243, %222 : vector<32x32xf32>
    %245 = math.exp %244 : vector<32x32xf32>
    %246 = arith.mulf %241, %245 : vector<32x32xf32>
    %cst_88 = arith.constant 1.000000e+00 : f32
    %247 = vector.broadcast %cst_88 : f32 to vector<32x32xf32>
    %248 = arith.subf %247, %246 : vector<32x32xf32>
    %249 = arith.mulf %221, %248 : vector<32x32xf32>
    %cst_89 = arith.constant 1.000000e+00 : f32
    %250 = vector.broadcast %cst_89 : f32 to vector<32x32xf32>
    %251 = arith.addf %250, %249 : vector<32x32xf32>
    %252 = arith.mulf %214, %251 : vector<32x32xf32>
    %cst_90 = arith.constant 0.000000e+00 : f32
    %253 = vector.broadcast %cst_90 : f32 to vector<1x32xf32>
    %254 = tpu.concatenate %252, %253 in 0 : vector<32x32xf32>, vector<1x32xf32> -> vector<33x32xf32>
    %255 = vector.extract_strided_slice %254 {offsets = [1, 0], sizes = [32, 32], strides = [1, 1]} : vector<33x32xf32> to vector<32x32xf32>
    %256 = arith.maximumf %252, %255 : vector<32x32xf32>
    %c0_91 = arith.constant 0 : index
    %c0_92 = arith.constant 0 : index
    %257 = vector.load %arg10[%c0_91, %c0_92] : memref<16x32xbf16, #tpu.memory_space<vmem>>, vector<16x32xbf16>
    %258 = arith.truncf %256 : vector<32x32xf32> to vector<32x32xbf16>
    %cst_93 = arith.constant dense<0.000000e+00> : vector<16x32xf32>
    %259 = tpu.matmul %257, %258, %cst_93 {dimension_numbers = #tpu.dot_dimension_numbers<[1], [0], [0], [1], [0, 0, 1, 1], [], []>} : vector<16x32xbf16>, vector<32x32xbf16>, vector<16x32xf32> -> vector<16x32xf32>
    %260 = vector.extract_strided_slice %0 {offsets = [9, 0], sizes = [1, 32], strides = [1, 1]} : vector<17x256xf32> to vector<1x32xf32>
    %261 = vector.extract_strided_slice %0 {offsets = [10, 0], sizes = [1, 32], strides = [1, 1]} : vector<17x256xf32> to vector<1x32xf32>
    %cst_94 = arith.constant 0.000000e+00 : f32
    %262 = vector.broadcast %cst_94 : f32 to vector<1x32xf32>
    %263 = tpu.concatenate %262, %259, %262 in 0 : vector<1x32xf32>, vector<16x32xf32>, vector<1x32xf32> -> vector<18x32xf32>
    %264 = vector.extract_strided_slice %263 {offsets = [0, 0], sizes = [16, 32], strides = [1, 1]} : vector<18x32xf32> to vector<16x32xf32>
    %265 = vector.extract_strided_slice %263 {offsets = [1, 0], sizes = [16, 32], strides = [1, 1]} : vector<18x32xf32> to vector<16x32xf32>
    %266 = vector.extract_strided_slice %263 {offsets = [2, 0], sizes = [16, 32], strides = [1, 1]} : vector<18x32xf32> to vector<16x32xf32>
    %267 = tpu.concatenate %264, %265, %266 in 1 : vector<16x32xf32>, vector<16x32xf32>, vector<16x32xf32> -> vector<16x96xf32>
    %268 = arith.truncf %267 : vector<16x96xf32> to vector<16x96xbf16>
    %c0_95 = arith.constant 0 : index
    %c0_96 = arith.constant 0 : index
    %269 = vector.load %arg11[%c0_95, %c0_96] : memref<96x32xbf16, #tpu.memory_space<vmem>>, vector<96x32xbf16>
    %cst_97 = arith.constant dense<0.000000e+00> : vector<16x32xf32>
    %270 = tpu.matmul %268, %269, %cst_97 {dimension_numbers = #tpu.dot_dimension_numbers<[1], [0], [0], [1], [0, 0, 1, 1], [], []>} : vector<16x96xbf16>, vector<96x32xbf16>, vector<16x32xf32> -> vector<16x32xf32>
    %cst_98 = arith.constant dense<0.000000e+00> : vector<16xf32>
    %271 = vector.multi_reduction <add>, %270, %cst_98 [1] : vector<16x32xf32> to vector<16xf32>
    %272 = vector.shape_cast %271 : vector<16xf32> to vector<16x1xf32>
    %cst_99 = arith.constant 3.200000e+01 : f32
    %273 = vector.broadcast %cst_99 : f32 to vector<16x1xf32>
    %274 = arith.divf %272, %273 : vector<16x1xf32>
    %275 = vector.broadcast %274 : vector<16x1xf32> to vector<16x32xf32>
    %276 = arith.subf %270, %275 : vector<16x32xf32>
    %277 = arith.mulf %276, %276 : vector<16x32xf32>
    %cst_100 = arith.constant dense<0.000000e+00> : vector<16xf32>
    %278 = vector.multi_reduction <add>, %277, %cst_100 [1] : vector<16x32xf32> to vector<16xf32>
    %279 = vector.shape_cast %278 : vector<16xf32> to vector<16x1xf32>
    %cst_101 = arith.constant 3.200000e+01 : f32
    %280 = vector.broadcast %cst_101 : f32 to vector<16x1xf32>
    %281 = arith.divf %279, %280 : vector<16x1xf32>
    %282 = vector.broadcast %274 : vector<16x1xf32> to vector<16x32xf32>
    %283 = arith.subf %270, %282 : vector<16x32xf32>
    %cst_102 = arith.constant 9.99999974E-6 : f32
    %284 = vector.broadcast %cst_102 : f32 to vector<16x1xf32>
    %285 = arith.addf %281, %284 : vector<16x1xf32>
    %286 = math.rsqrt %285 : vector<16x1xf32>
    %287 = vector.broadcast %286 : vector<16x1xf32> to vector<16x32xf32>
    %288 = arith.mulf %283, %287 : vector<16x32xf32>
    %289 = vector.broadcast %260 : vector<1x32xf32> to vector<16x32xf32>
    %290 = arith.mulf %288, %289 : vector<16x32xf32>
    %291 = vector.broadcast %261 : vector<1x32xf32> to vector<16x32xf32>
    %292 = arith.addf %290, %291 : vector<16x32xf32>
    %cst_103 = arith.constant 5.000000e-01 : f32
    %293 = vector.broadcast %cst_103 : f32 to vector<16x32xf32>
    %294 = arith.mulf %293, %292 : vector<16x32xf32>
    %cst_104 = arith.constant 0.707106769 : f32
    %295 = vector.broadcast %cst_104 : f32 to vector<16x32xf32>
    %296 = arith.mulf %292, %295 : vector<16x32xf32>
    %cst_105 = arith.constant 0.000000e+00 : f32
    %297 = vector.broadcast %cst_105 : f32 to vector<16x32xf32>
    %298 = arith.cmpf oge, %296, %297 : vector<16x32xf32>
    %cst_106 = arith.constant 1.000000e+00 : f32
    %cst_107 = arith.constant -1.000000e+00 : f32
    %299 = vector.broadcast %cst_106 : f32 to vector<16x32xf32>
    %300 = vector.broadcast %cst_107 : f32 to vector<16x32xf32>
    %301 = arith.select %298, %299, %300 : vector<16x32xi1>, vector<16x32xf32>
    %302 = math.absf %296 : vector<16x32xf32>
    %cst_108 = arith.constant 0.327591091 : f32
    %303 = vector.broadcast %cst_108 : f32 to vector<16x32xf32>
    %304 = arith.mulf %303, %302 : vector<16x32xf32>
    %cst_109 = arith.constant 1.000000e+00 : f32
    %305 = vector.broadcast %cst_109 : f32 to vector<16x32xf32>
    %306 = arith.addf %305, %304 : vector<16x32xf32>
    %307 = tpu.reciprocal %306 : vector<16x32xf32> -> vector<16x32xf32>
    %cst_110 = arith.constant 1.06140542 : f32
    %308 = vector.broadcast %cst_110 : f32 to vector<16x32xf32>
    %309 = arith.mulf %307, %308 : vector<16x32xf32>
    %cst_111 = arith.constant -1.45315206 : f32
    %310 = vector.broadcast %cst_111 : f32 to vector<16x32xf32>
    %311 = arith.addf %310, %309 : vector<16x32xf32>
    %312 = arith.mulf %307, %311 : vector<16x32xf32>
    %cst_112 = arith.constant 1.42141378 : f32
    %313 = vector.broadcast %cst_112 : f32 to vector<16x32xf32>
    %314 = arith.addf %313, %312 : vector<16x32xf32>
    %315 = arith.mulf %307, %314 : vector<16x32xf32>
    %cst_113 = arith.constant -0.284496725 : f32
    %316 = vector.broadcast %cst_113 : f32 to vector<16x32xf32>
    %317 = arith.addf %316, %315 : vector<16x32xf32>
    %318 = arith.mulf %307, %317 : vector<16x32xf32>
    %cst_114 = arith.constant 0.254829586 : f32
    %319 = vector.broadcast %cst_114 : f32 to vector<16x32xf32>
    %320 = arith.addf %319, %318 : vector<16x32xf32>
    %321 = arith.mulf %307, %320 : vector<16x32xf32>
    %cst_115 = arith.constant 0.000000e+00 : f32
    %322 = vector.broadcast %cst_115 : f32 to vector<16x32xf32>
    %323 = arith.subf %322, %302 : vector<16x32xf32>
    %324 = arith.mulf %323, %302 : vector<16x32xf32>
    %325 = math.exp %324 : vector<16x32xf32>
    %326 = arith.mulf %321, %325 : vector<16x32xf32>
    %cst_116 = arith.constant 1.000000e+00 : f32
    %327 = vector.broadcast %cst_116 : f32 to vector<16x32xf32>
    %328 = arith.subf %327, %326 : vector<16x32xf32>
    %329 = arith.mulf %301, %328 : vector<16x32xf32>
    %cst_117 = arith.constant 1.000000e+00 : f32
    %330 = vector.broadcast %cst_117 : f32 to vector<16x32xf32>
    %331 = arith.addf %330, %329 : vector<16x32xf32>
    %332 = arith.mulf %294, %331 : vector<16x32xf32>
    %cst_118 = arith.constant 0.000000e+00 : f32
    %333 = vector.broadcast %cst_118 : f32 to vector<1x32xf32>
    %334 = tpu.concatenate %332, %333 in 0 : vector<16x32xf32>, vector<1x32xf32> -> vector<17x32xf32>
    %335 = vector.extract_strided_slice %334 {offsets = [1, 0], sizes = [16, 32], strides = [1, 1]} : vector<17x32xf32> to vector<16x32xf32>
    %336 = arith.maximumf %332, %335 : vector<16x32xf32>
    %c0_119 = arith.constant 0 : index
    %c0_120 = arith.constant 0 : index
    %337 = vector.load %arg12[%c0_119, %c0_120] : memref<8x16xbf16, #tpu.memory_space<vmem>>, vector<8x16xbf16>
    %338 = arith.truncf %336 : vector<16x32xf32> to vector<16x32xbf16>
    %cst_121 = arith.constant dense<0.000000e+00> : vector<8x32xf32>
    %339 = tpu.matmul %337, %338, %cst_121 {dimension_numbers = #tpu.dot_dimension_numbers<[1], [0], [0], [1], [0, 0, 1, 1], [], []>} : vector<8x16xbf16>, vector<16x32xbf16>, vector<8x32xf32> -> vector<8x32xf32>
    %340 = vector.extract_strided_slice %0 {offsets = [11, 0], sizes = [1, 32], strides = [1, 1]} : vector<17x256xf32> to vector<1x32xf32>
    %341 = vector.extract_strided_slice %0 {offsets = [12, 0], sizes = [1, 32], strides = [1, 1]} : vector<17x256xf32> to vector<1x32xf32>
    %cst_122 = arith.constant 0.000000e+00 : f32
    %342 = vector.broadcast %cst_122 : f32 to vector<1x32xf32>
    %343 = tpu.concatenate %342, %339, %342 in 0 : vector<1x32xf32>, vector<8x32xf32>, vector<1x32xf32> -> vector<10x32xf32>
    %344 = vector.extract_strided_slice %343 {offsets = [0, 0], sizes = [8, 32], strides = [1, 1]} : vector<10x32xf32> to vector<8x32xf32>
    %345 = vector.extract_strided_slice %343 {offsets = [1, 0], sizes = [8, 32], strides = [1, 1]} : vector<10x32xf32> to vector<8x32xf32>
    %346 = vector.extract_strided_slice %343 {offsets = [2, 0], sizes = [8, 32], strides = [1, 1]} : vector<10x32xf32> to vector<8x32xf32>
    %347 = tpu.concatenate %344, %345, %346 in 1 : vector<8x32xf32>, vector<8x32xf32>, vector<8x32xf32> -> vector<8x96xf32>
    %348 = arith.truncf %347 : vector<8x96xf32> to vector<8x96xbf16>
    %c0_123 = arith.constant 0 : index
    %c0_124 = arith.constant 0 : index
    %349 = vector.load %arg13[%c0_123, %c0_124] : memref<96x32xbf16, #tpu.memory_space<vmem>>, vector<96x32xbf16>
    %cst_125 = arith.constant dense<0.000000e+00> : vector<8x32xf32>
    %350 = tpu.matmul %348, %349, %cst_125 {dimension_numbers = #tpu.dot_dimension_numbers<[1], [0], [0], [1], [0, 0, 1, 1], [], []>} : vector<8x96xbf16>, vector<96x32xbf16>, vector<8x32xf32> -> vector<8x32xf32>
    %cst_126 = arith.constant dense<0.000000e+00> : vector<8xf32>
    %351 = vector.multi_reduction <add>, %350, %cst_126 [1] : vector<8x32xf32> to vector<8xf32>
    %352 = vector.shape_cast %351 : vector<8xf32> to vector<8x1xf32>
    %cst_127 = arith.constant 3.200000e+01 : f32
    %353 = vector.broadcast %cst_127 : f32 to vector<8x1xf32>
    %354 = arith.divf %352, %353 : vector<8x1xf32>
    %355 = vector.broadcast %354 : vector<8x1xf32> to vector<8x32xf32>
    %356 = arith.subf %350, %355 : vector<8x32xf32>
    %357 = arith.mulf %356, %356 : vector<8x32xf32>
    %cst_128 = arith.constant dense<0.000000e+00> : vector<8xf32>
    %358 = vector.multi_reduction <add>, %357, %cst_128 [1] : vector<8x32xf32> to vector<8xf32>
    %359 = vector.shape_cast %358 : vector<8xf32> to vector<8x1xf32>
    %cst_129 = arith.constant 3.200000e+01 : f32
    %360 = vector.broadcast %cst_129 : f32 to vector<8x1xf32>
    %361 = arith.divf %359, %360 : vector<8x1xf32>
    %362 = vector.broadcast %354 : vector<8x1xf32> to vector<8x32xf32>
    %363 = arith.subf %350, %362 : vector<8x32xf32>
    %cst_130 = arith.constant 9.99999974E-6 : f32
    %364 = vector.broadcast %cst_130 : f32 to vector<8x1xf32>
    %365 = arith.addf %361, %364 : vector<8x1xf32>
    %366 = math.rsqrt %365 : vector<8x1xf32>
    %367 = vector.broadcast %366 : vector<8x1xf32> to vector<8x32xf32>
    %368 = arith.mulf %363, %367 : vector<8x32xf32>
    %369 = vector.broadcast %340 : vector<1x32xf32> to vector<8x32xf32>
    %370 = arith.mulf %368, %369 : vector<8x32xf32>
    %371 = vector.broadcast %341 : vector<1x32xf32> to vector<8x32xf32>
    %372 = arith.addf %370, %371 : vector<8x32xf32>
    %cst_131 = arith.constant 5.000000e-01 : f32
    %373 = vector.broadcast %cst_131 : f32 to vector<8x32xf32>
    %374 = arith.mulf %373, %372 : vector<8x32xf32>
    %cst_132 = arith.constant 0.707106769 : f32
    %375 = vector.broadcast %cst_132 : f32 to vector<8x32xf32>
    %376 = arith.mulf %372, %375 : vector<8x32xf32>
    %cst_133 = arith.constant 0.000000e+00 : f32
    %377 = vector.broadcast %cst_133 : f32 to vector<8x32xf32>
    %378 = arith.cmpf oge, %376, %377 : vector<8x32xf32>
    %cst_134 = arith.constant 1.000000e+00 : f32
    %cst_135 = arith.constant -1.000000e+00 : f32
    %379 = vector.broadcast %cst_134 : f32 to vector<8x32xf32>
    %380 = vector.broadcast %cst_135 : f32 to vector<8x32xf32>
    %381 = arith.select %378, %379, %380 : vector<8x32xi1>, vector<8x32xf32>
    %382 = math.absf %376 : vector<8x32xf32>
    %cst_136 = arith.constant 0.327591091 : f32
    %383 = vector.broadcast %cst_136 : f32 to vector<8x32xf32>
    %384 = arith.mulf %383, %382 : vector<8x32xf32>
    %cst_137 = arith.constant 1.000000e+00 : f32
    %385 = vector.broadcast %cst_137 : f32 to vector<8x32xf32>
    %386 = arith.addf %385, %384 : vector<8x32xf32>
    %387 = tpu.reciprocal %386 : vector<8x32xf32> -> vector<8x32xf32>
    %cst_138 = arith.constant 1.06140542 : f32
    %388 = vector.broadcast %cst_138 : f32 to vector<8x32xf32>
    %389 = arith.mulf %387, %388 : vector<8x32xf32>
    %cst_139 = arith.constant -1.45315206 : f32
    %390 = vector.broadcast %cst_139 : f32 to vector<8x32xf32>
    %391 = arith.addf %390, %389 : vector<8x32xf32>
    %392 = arith.mulf %387, %391 : vector<8x32xf32>
    %cst_140 = arith.constant 1.42141378 : f32
    %393 = vector.broadcast %cst_140 : f32 to vector<8x32xf32>
    %394 = arith.addf %393, %392 : vector<8x32xf32>
    %395 = arith.mulf %387, %394 : vector<8x32xf32>
    %cst_141 = arith.constant -0.284496725 : f32
    %396 = vector.broadcast %cst_141 : f32 to vector<8x32xf32>
    %397 = arith.addf %396, %395 : vector<8x32xf32>
    %398 = arith.mulf %387, %397 : vector<8x32xf32>
    %cst_142 = arith.constant 0.254829586 : f32
    %399 = vector.broadcast %cst_142 : f32 to vector<8x32xf32>
    %400 = arith.addf %399, %398 : vector<8x32xf32>
    %401 = arith.mulf %387, %400 : vector<8x32xf32>
    %cst_143 = arith.constant 0.000000e+00 : f32
    %402 = vector.broadcast %cst_143 : f32 to vector<8x32xf32>
    %403 = arith.subf %402, %382 : vector<8x32xf32>
    %404 = arith.mulf %403, %382 : vector<8x32xf32>
    %405 = math.exp %404 : vector<8x32xf32>
    %406 = arith.mulf %401, %405 : vector<8x32xf32>
    %cst_144 = arith.constant 1.000000e+00 : f32
    %407 = vector.broadcast %cst_144 : f32 to vector<8x32xf32>
    %408 = arith.subf %407, %406 : vector<8x32xf32>
    %409 = arith.mulf %381, %408 : vector<8x32xf32>
    %cst_145 = arith.constant 1.000000e+00 : f32
    %410 = vector.broadcast %cst_145 : f32 to vector<8x32xf32>
    %411 = arith.addf %410, %409 : vector<8x32xf32>
    %412 = arith.mulf %374, %411 : vector<8x32xf32>
    %c0_146 = arith.constant 0 : index
    %c0_147 = arith.constant 0 : index
    %413 = vector.load %arg14[%c0_146, %c0_147] : memref<16x8xbf16, #tpu.memory_space<vmem>>, vector<16x8xbf16>
    %414 = arith.truncf %412 : vector<8x32xf32> to vector<8x32xbf16>
    %cst_148 = arith.constant dense<0.000000e+00> : vector<16x32xf32>
    %415 = tpu.matmul %413, %414, %cst_148 {dimension_numbers = #tpu.dot_dimension_numbers<[1], [0], [0], [1], [0, 0, 1, 1], [], []>} : vector<16x8xbf16>, vector<8x32xbf16>, vector<16x32xf32> -> vector<16x32xf32>
    %416 = vector.extract_strided_slice %0 {offsets = [13, 0], sizes = [1, 16], strides = [1, 1]} : vector<17x256xf32> to vector<1x16xf32>
    %417 = vector.extract_strided_slice %0 {offsets = [14, 0], sizes = [1, 16], strides = [1, 1]} : vector<17x256xf32> to vector<1x16xf32>
    %cst_149 = arith.constant 0.000000e+00 : f32
    %418 = vector.broadcast %cst_149 : f32 to vector<1x32xf32>
    %419 = tpu.concatenate %418, %415, %418 in 0 : vector<1x32xf32>, vector<16x32xf32>, vector<1x32xf32> -> vector<18x32xf32>
    %420 = vector.extract_strided_slice %419 {offsets = [0, 0], sizes = [16, 32], strides = [1, 1]} : vector<18x32xf32> to vector<16x32xf32>
    %421 = vector.extract_strided_slice %419 {offsets = [1, 0], sizes = [16, 32], strides = [1, 1]} : vector<18x32xf32> to vector<16x32xf32>
    %422 = vector.extract_strided_slice %419 {offsets = [2, 0], sizes = [16, 32], strides = [1, 1]} : vector<18x32xf32> to vector<16x32xf32>
    %423 = tpu.concatenate %420, %421, %422 in 1 : vector<16x32xf32>, vector<16x32xf32>, vector<16x32xf32> -> vector<16x96xf32>
    %424 = arith.truncf %423 : vector<16x96xf32> to vector<16x96xbf16>
    %c0_150 = arith.constant 0 : index
    %c0_151 = arith.constant 0 : index
    %425 = vector.load %arg15[%c0_150, %c0_151] : memref<96x16xbf16, #tpu.memory_space<vmem>>, vector<96x16xbf16>
    %cst_152 = arith.constant dense<0.000000e+00> : vector<16x16xf32>
    %426 = tpu.matmul %424, %425, %cst_152 {dimension_numbers = #tpu.dot_dimension_numbers<[1], [0], [0], [1], [0, 0, 1, 1], [], []>} : vector<16x96xbf16>, vector<96x16xbf16>, vector<16x16xf32> -> vector<16x16xf32>
    %cst_153 = arith.constant dense<0.000000e+00> : vector<16xf32>
    %427 = vector.multi_reduction <add>, %426, %cst_153 [1] : vector<16x16xf32> to vector<16xf32>
    %428 = vector.shape_cast %427 : vector<16xf32> to vector<16x1xf32>
    %cst_154 = arith.constant 1.600000e+01 : f32
    %429 = vector.broadcast %cst_154 : f32 to vector<16x1xf32>
    %430 = arith.divf %428, %429 : vector<16x1xf32>
    %431 = vector.broadcast %430 : vector<16x1xf32> to vector<16x16xf32>
    %432 = arith.subf %426, %431 : vector<16x16xf32>
    %433 = arith.mulf %432, %432 : vector<16x16xf32>
    %cst_155 = arith.constant dense<0.000000e+00> : vector<16xf32>
    %434 = vector.multi_reduction <add>, %433, %cst_155 [1] : vector<16x16xf32> to vector<16xf32>
    %435 = vector.shape_cast %434 : vector<16xf32> to vector<16x1xf32>
    %cst_156 = arith.constant 1.600000e+01 : f32
    %436 = vector.broadcast %cst_156 : f32 to vector<16x1xf32>
    %437 = arith.divf %435, %436 : vector<16x1xf32>
    %438 = vector.broadcast %430 : vector<16x1xf32> to vector<16x16xf32>
    %439 = arith.subf %426, %438 : vector<16x16xf32>
    %cst_157 = arith.constant 9.99999974E-6 : f32
    %440 = vector.broadcast %cst_157 : f32 to vector<16x1xf32>
    %441 = arith.addf %437, %440 : vector<16x1xf32>
    %442 = math.rsqrt %441 : vector<16x1xf32>
    %443 = vector.broadcast %442 : vector<16x1xf32> to vector<16x16xf32>
    %444 = arith.mulf %439, %443 : vector<16x16xf32>
    %445 = vector.broadcast %416 : vector<1x16xf32> to vector<16x16xf32>
    %446 = arith.mulf %444, %445 : vector<16x16xf32>
    %447 = vector.broadcast %417 : vector<1x16xf32> to vector<16x16xf32>
    %448 = arith.addf %446, %447 : vector<16x16xf32>
    %cst_158 = arith.constant 5.000000e-01 : f32
    %449 = vector.broadcast %cst_158 : f32 to vector<16x16xf32>
    %450 = arith.mulf %449, %448 : vector<16x16xf32>
    %cst_159 = arith.constant 0.707106769 : f32
    %451 = vector.broadcast %cst_159 : f32 to vector<16x16xf32>
    %452 = arith.mulf %448, %451 : vector<16x16xf32>
    %cst_160 = arith.constant 0.000000e+00 : f32
    %453 = vector.broadcast %cst_160 : f32 to vector<16x16xf32>
    %454 = arith.cmpf oge, %452, %453 : vector<16x16xf32>
    %cst_161 = arith.constant 1.000000e+00 : f32
    %cst_162 = arith.constant -1.000000e+00 : f32
    %455 = vector.broadcast %cst_161 : f32 to vector<16x16xf32>
    %456 = vector.broadcast %cst_162 : f32 to vector<16x16xf32>
    %457 = arith.select %454, %455, %456 : vector<16x16xi1>, vector<16x16xf32>
    %458 = math.absf %452 : vector<16x16xf32>
    %cst_163 = arith.constant 0.327591091 : f32
    %459 = vector.broadcast %cst_163 : f32 to vector<16x16xf32>
    %460 = arith.mulf %459, %458 : vector<16x16xf32>
    %cst_164 = arith.constant 1.000000e+00 : f32
    %461 = vector.broadcast %cst_164 : f32 to vector<16x16xf32>
    %462 = arith.addf %461, %460 : vector<16x16xf32>
    %463 = tpu.reciprocal %462 : vector<16x16xf32> -> vector<16x16xf32>
    %cst_165 = arith.constant 1.06140542 : f32
    %464 = vector.broadcast %cst_165 : f32 to vector<16x16xf32>
    %465 = arith.mulf %463, %464 : vector<16x16xf32>
    %cst_166 = arith.constant -1.45315206 : f32
    %466 = vector.broadcast %cst_166 : f32 to vector<16x16xf32>
    %467 = arith.addf %466, %465 : vector<16x16xf32>
    %468 = arith.mulf %463, %467 : vector<16x16xf32>
    %cst_167 = arith.constant 1.42141378 : f32
    %469 = vector.broadcast %cst_167 : f32 to vector<16x16xf32>
    %470 = arith.addf %469, %468 : vector<16x16xf32>
    %471 = arith.mulf %463, %470 : vector<16x16xf32>
    %cst_168 = arith.constant -0.284496725 : f32
    %472 = vector.broadcast %cst_168 : f32 to vector<16x16xf32>
    %473 = arith.addf %472, %471 : vector<16x16xf32>
    %474 = arith.mulf %463, %473 : vector<16x16xf32>
    %cst_169 = arith.constant 0.254829586 : f32
    %475 = vector.broadcast %cst_169 : f32 to vector<16x16xf32>
    %476 = arith.addf %475, %474 : vector<16x16xf32>
    %477 = arith.mulf %463, %476 : vector<16x16xf32>
    %cst_170 = arith.constant 0.000000e+00 : f32
    %478 = vector.broadcast %cst_170 : f32 to vector<16x16xf32>
    %479 = arith.subf %478, %458 : vector<16x16xf32>
    %480 = arith.mulf %479, %458 : vector<16x16xf32>
    %481 = math.exp %480 : vector<16x16xf32>
    %482 = arith.mulf %477, %481 : vector<16x16xf32>
    %cst_171 = arith.constant 1.000000e+00 : f32
    %483 = vector.broadcast %cst_171 : f32 to vector<16x16xf32>
    %484 = arith.subf %483, %482 : vector<16x16xf32>
    %485 = arith.mulf %457, %484 : vector<16x16xf32>
    %cst_172 = arith.constant 1.000000e+00 : f32
    %486 = vector.broadcast %cst_172 : f32 to vector<16x16xf32>
    %487 = arith.addf %486, %485 : vector<16x16xf32>
    %488 = arith.mulf %450, %487 : vector<16x16xf32>
    %c0_173 = arith.constant 0 : index
    %c0_174 = arith.constant 0 : index
    %489 = vector.load %arg16[%c0_173, %c0_174] : memref<32x16xbf16, #tpu.memory_space<vmem>>, vector<32x16xbf16>
    %490 = arith.truncf %488 : vector<16x16xf32> to vector<16x16xbf16>
    %cst_175 = arith.constant dense<0.000000e+00> : vector<32x16xf32>
    %491 = tpu.matmul %489, %490, %cst_175 {dimension_numbers = #tpu.dot_dimension_numbers<[1], [0], [0], [1], [0, 0, 1, 1], [], []>} : vector<32x16xbf16>, vector<16x16xbf16>, vector<32x16xf32> -> vector<32x16xf32>
    %492 = vector.extract_strided_slice %0 {offsets = [15, 0], sizes = [1, 8], strides = [1, 1]} : vector<17x256xf32> to vector<1x8xf32>
    %493 = vector.extract_strided_slice %0 {offsets = [16, 0], sizes = [1, 8], strides = [1, 1]} : vector<17x256xf32> to vector<1x8xf32>
    %cst_176 = arith.constant 0.000000e+00 : f32
    %494 = vector.broadcast %cst_176 : f32 to vector<1x16xf32>
    %495 = tpu.concatenate %494, %491, %494 in 0 : vector<1x16xf32>, vector<32x16xf32>, vector<1x16xf32> -> vector<34x16xf32>
    %496 = vector.extract_strided_slice %495 {offsets = [0, 0], sizes = [32, 16], strides = [1, 1]} : vector<34x16xf32> to vector<32x16xf32>
    %497 = vector.extract_strided_slice %495 {offsets = [1, 0], sizes = [32, 16], strides = [1, 1]} : vector<34x16xf32> to vector<32x16xf32>
    %498 = vector.extract_strided_slice %495 {offsets = [2, 0], sizes = [32, 16], strides = [1, 1]} : vector<34x16xf32> to vector<32x16xf32>
    %499 = tpu.concatenate %496, %497, %498 in 1 : vector<32x16xf32>, vector<32x16xf32>, vector<32x16xf32> -> vector<32x48xf32>
    %500 = arith.truncf %499 : vector<32x48xf32> to vector<32x48xbf16>
    %c0_177 = arith.constant 0 : index
    %c0_178 = arith.constant 0 : index
    %501 = vector.load %arg17[%c0_177, %c0_178] : memref<48x8xbf16, #tpu.memory_space<vmem>>, vector<48x8xbf16>
    %cst_179 = arith.constant dense<0.000000e+00> : vector<32x8xf32>
    %502 = tpu.matmul %500, %501, %cst_179 {dimension_numbers = #tpu.dot_dimension_numbers<[1], [0], [0], [1], [0, 0, 1, 1], [], []>} : vector<32x48xbf16>, vector<48x8xbf16>, vector<32x8xf32> -> vector<32x8xf32>
    %cst_180 = arith.constant dense<0.000000e+00> : vector<32xf32>
    %503 = vector.multi_reduction <add>, %502, %cst_180 [1] : vector<32x8xf32> to vector<32xf32>
    %504 = vector.shape_cast %503 : vector<32xf32> to vector<32x1xf32>
    %cst_181 = arith.constant 8.000000e+00 : f32
    %505 = vector.broadcast %cst_181 : f32 to vector<32x1xf32>
    %506 = arith.divf %504, %505 : vector<32x1xf32>
    %507 = vector.broadcast %506 : vector<32x1xf32> to vector<32x8xf32>
    %508 = arith.subf %502, %507 : vector<32x8xf32>
    %509 = arith.mulf %508, %508 : vector<32x8xf32>
    %cst_182 = arith.constant dense<0.000000e+00> : vector<32xf32>
    %510 = vector.multi_reduction <add>, %509, %cst_182 [1] : vector<32x8xf32> to vector<32xf32>
    %511 = vector.shape_cast %510 : vector<32xf32> to vector<32x1xf32>
    %cst_183 = arith.constant 8.000000e+00 : f32
    %512 = vector.broadcast %cst_183 : f32 to vector<32x1xf32>
    %513 = arith.divf %511, %512 : vector<32x1xf32>
    %514 = vector.broadcast %506 : vector<32x1xf32> to vector<32x8xf32>
    %515 = arith.subf %502, %514 : vector<32x8xf32>
    %cst_184 = arith.constant 9.99999974E-6 : f32
    %516 = vector.broadcast %cst_184 : f32 to vector<32x1xf32>
    %517 = arith.addf %513, %516 : vector<32x1xf32>
    %518 = math.rsqrt %517 : vector<32x1xf32>
    %519 = vector.broadcast %518 : vector<32x1xf32> to vector<32x8xf32>
    %520 = arith.mulf %515, %519 : vector<32x8xf32>
    %521 = vector.broadcast %492 : vector<1x8xf32> to vector<32x8xf32>
    %522 = arith.mulf %520, %521 : vector<32x8xf32>
    %523 = vector.broadcast %493 : vector<1x8xf32> to vector<32x8xf32>
    %524 = arith.addf %522, %523 : vector<32x8xf32>
    %cst_185 = arith.constant 5.000000e-01 : f32
    %525 = vector.broadcast %cst_185 : f32 to vector<32x8xf32>
    %526 = arith.mulf %525, %524 : vector<32x8xf32>
    %cst_186 = arith.constant 0.707106769 : f32
    %527 = vector.broadcast %cst_186 : f32 to vector<32x8xf32>
    %528 = arith.mulf %524, %527 : vector<32x8xf32>
    %cst_187 = arith.constant 0.000000e+00 : f32
    %529 = vector.broadcast %cst_187 : f32 to vector<32x8xf32>
    %530 = arith.cmpf oge, %528, %529 : vector<32x8xf32>
    %cst_188 = arith.constant 1.000000e+00 : f32
    %cst_189 = arith.constant -1.000000e+00 : f32
    %531 = vector.broadcast %cst_188 : f32 to vector<32x8xf32>
    %532 = vector.broadcast %cst_189 : f32 to vector<32x8xf32>
    %533 = arith.select %530, %531, %532 : vector<32x8xi1>, vector<32x8xf32>
    %534 = math.absf %528 : vector<32x8xf32>
    %cst_190 = arith.constant 0.327591091 : f32
    %535 = vector.broadcast %cst_190 : f32 to vector<32x8xf32>
    %536 = arith.mulf %535, %534 : vector<32x8xf32>
    %cst_191 = arith.constant 1.000000e+00 : f32
    %537 = vector.broadcast %cst_191 : f32 to vector<32x8xf32>
    %538 = arith.addf %537, %536 : vector<32x8xf32>
    %539 = tpu.reciprocal %538 : vector<32x8xf32> -> vector<32x8xf32>
    %cst_192 = arith.constant 1.06140542 : f32
    %540 = vector.broadcast %cst_192 : f32 to vector<32x8xf32>
    %541 = arith.mulf %539, %540 : vector<32x8xf32>
    %cst_193 = arith.constant -1.45315206 : f32
    %542 = vector.broadcast %cst_193 : f32 to vector<32x8xf32>
    %543 = arith.addf %542, %541 : vector<32x8xf32>
    %544 = arith.mulf %539, %543 : vector<32x8xf32>
    %cst_194 = arith.constant 1.42141378 : f32
    %545 = vector.broadcast %cst_194 : f32 to vector<32x8xf32>
    %546 = arith.addf %545, %544 : vector<32x8xf32>
    %547 = arith.mulf %539, %546 : vector<32x8xf32>
    %cst_195 = arith.constant -0.284496725 : f32
    %548 = vector.broadcast %cst_195 : f32 to vector<32x8xf32>
    %549 = arith.addf %548, %547 : vector<32x8xf32>
    %550 = arith.mulf %539, %549 : vector<32x8xf32>
    %cst_196 = arith.constant 0.254829586 : f32
    %551 = vector.broadcast %cst_196 : f32 to vector<32x8xf32>
    %552 = arith.addf %551, %550 : vector<32x8xf32>
    %553 = arith.mulf %539, %552 : vector<32x8xf32>
    %cst_197 = arith.constant 0.000000e+00 : f32
    %554 = vector.broadcast %cst_197 : f32 to vector<32x8xf32>
    %555 = arith.subf %554, %534 : vector<32x8xf32>
    %556 = arith.mulf %555, %534 : vector<32x8xf32>
    %557 = math.exp %556 : vector<32x8xf32>
    %558 = arith.mulf %553, %557 : vector<32x8xf32>
    %cst_198 = arith.constant 1.000000e+00 : f32
    %559 = vector.broadcast %cst_198 : f32 to vector<32x8xf32>
    %560 = arith.subf %559, %558 : vector<32x8xf32>
    %561 = arith.mulf %533, %560 : vector<32x8xf32>
    %cst_199 = arith.constant 1.000000e+00 : f32
    %562 = vector.broadcast %cst_199 : f32 to vector<32x8xf32>
    %563 = arith.addf %562, %561 : vector<32x8xf32>
    %564 = arith.mulf %526, %563 : vector<32x8xf32>
    %c0_200 = arith.constant 0 : index
    %c0_201 = arith.constant 0 : index
    %565 = vector.load %arg18[%c0_200, %c0_201] : memref<64x32xbf16, #tpu.memory_space<vmem>>, vector<64x32xbf16>
    %566 = arith.truncf %564 : vector<32x8xf32> to vector<32x8xbf16>
    %cst_202 = arith.constant dense<0.000000e+00> : vector<64x8xf32>
    %567 = tpu.matmul %565, %566, %cst_202 {dimension_numbers = #tpu.dot_dimension_numbers<[1], [0], [0], [1], [0, 0, 1, 1], [], []>} : vector<64x32xbf16>, vector<32x8xbf16>, vector<64x8xf32> -> vector<64x8xf32>
    %c0_203 = arith.constant 0 : index
    %c0_204 = arith.constant 0 : index
    %568 = vector.load %arg19[%c0_203, %c0_204] : memref<3x8xbf16, #tpu.memory_space<vmem>>, vector<3x8xbf16>
    %569 = arith.truncf %567 : vector<64x8xf32> to vector<64x8xbf16>
    %cst_205 = arith.constant dense<0.000000e+00> : vector<3x64xf32>
    %570 = tpu.matmul %568, %569, %cst_205 {dimension_numbers = #tpu.dot_dimension_numbers<[1], [1], [0], [0], [0, 0, 1, 0], [], []>} : vector<3x8xbf16>, vector<64x8xbf16>, vector<3x64xf32> -> vector<3x64xf32>
    %c0_206 = arith.constant 0 : index
    %c0_207 = arith.constant 0 : index
    %571 = vector.load %arg20[%c0_206, %c0_207] : memref<3x1xf32, #tpu.memory_space<vmem>>, vector<3x1xf32>
    %572 = vector.broadcast %571 : vector<3x1xf32> to vector<3x64xf32>
    %573 = arith.addf %570, %572 : vector<3x64xf32>
    %c0_208 = arith.constant 0 : index
    %c0_209 = arith.constant 0 : index
    %c0_210 = arith.constant 0 : index
    %574 = vector.load %arg21[%c0_208, %c0_209, %c0_210] : memref<1x3x64xf32, #tpu.memory_space<vmem>>, vector<1x3x64xf32>
    %575 = vector.shape_cast %574 : vector<1x3x64xf32> to vector<3x64xf32>
    %576 = vector.shape_cast %573 : vector<3x64xf32> to vector<1x3x64xf32>
    tpu.vector_store %arg21[%c0_208, %c0_209, %c0_210], %576 {strides = array<i32>} : memref<1x3x64xf32, #tpu.memory_space<vmem>>, vector<1x3x64xf32>,
    return
  }
  func.func @transform_0(%arg0: i32) -> (i32, i32, i32) {
    %c0_i32 = arith.constant 0 : i32
    %c0_i32_0 = arith.constant 0 : i32
    %c0_i32_1 = arith.constant 0 : i32
    return %arg0, %c0_i32, %c0_i32_0 : i32, i32, i32
  }
  func.func @transform_1(%arg0: i32) -> (i32, i32) {
    %c0_i32 = arith.constant 0 : i32
    %c0_i32_0 = arith.constant 0 : i32
    %c0_i32_1 = arith.constant 0 : i32
    return %c0_i32, %c0_i32_0 : i32, i32
  }
  func.func @transform_2(%arg0: i32) -> (i32, i32) {
    %c0_i32 = arith.constant 0 : i32
    %c0_i32_0 = arith.constant 0 : i32
    %c0_i32_1 = arith.constant 0 : i32
    return %c0_i32, %c0_i32_0 : i32, i32
  }
  func.func @transform_3(%arg0: i32) -> (i32, i32) {
    %c0_i32 = arith.constant 0 : i32
    %c0_i32_0 = arith.constant 0 : i32
    %c0_i32_1 = arith.constant 0 : i32
    return %c0_i32, %c0_i32_0 : i32, i32
  }
  func.func @transform_4(%arg0: i32) -> (i32, i32) {
    %c0_i32 = arith.constant 0 : i32
    %c0_i32_0 = arith.constant 0 : i32
    %c0_i32_1 = arith.constant 0 : i32
    return %c0_i32, %c0_i32_0 : i32, i32
  }
  func.func @transform_5(%arg0: i32) -> (i32, i32) {
    %c0_i32 = arith.constant 0 : i32
    %c0_i32_0 = arith.constant 0 : i32
    %c0_i32_1 = arith.constant 0 : i32
    return %c0_i32, %c0_i32_0 : i32, i32
  }
  func.func @transform_6(%arg0: i32) -> (i32, i32) {
    %c0_i32 = arith.constant 0 : i32
    %c0_i32_0 = arith.constant 0 : i32
    %c0_i32_1 = arith.constant 0 : i32
    return %c0_i32, %c0_i32_0 : i32, i32
  }
  func.func @transform_7(%arg0: i32) -> (i32, i32) {
    %c0_i32 = arith.constant 0 : i32
    %c0_i32_0 = arith.constant 0 : i32
    %c0_i32_1 = arith.constant 0 : i32
    return %c0_i32, %c0_i32_0 : i32, i32
  }
  func.func @transform_8(%arg0: i32) -> (i32, i32) {
    %c0_i32 = arith.constant 0 : i32
    %c0_i32_0 = arith.constant 0 : i32
    %c0_i32_1 = arith.constant 0 : i32
    return %c0_i32, %c0_i32_0 : i32, i32
  }
  func.func @transform_9(%arg0: i32) -> (i32, i32) {
    %c0_i32 = arith.constant 0 : i32
    %c0_i32_0 = arith.constant 0 : i32
    %c0_i32_1 = arith.constant 0 : i32
    return %c0_i32, %c0_i32_0 : i32, i32
  }
  func.func @transform_10(%arg0: i32) -> (i32, i32) {
    %c0_i32 = arith.constant 0 : i32
    %c0_i32_0 = arith.constant 0 : i32
    %c0_i32_1 = arith.constant 0 : i32
    return %c0_i32, %c0_i32_0 : i32, i32
  }
  func.func @transform_11(%arg0: i32) -> (i32, i32) {
    %c0_i32 = arith.constant 0 : i32
    %c0_i32_0 = arith.constant 0 : i32
    %c0_i32_1 = arith.constant 0 : i32
    return %c0_i32, %c0_i32_0 : i32, i32
  }
  func.func @transform_12(%arg0: i32) -> (i32, i32) {
    %c0_i32 = arith.constant 0 : i32
    %c0_i32_0 = arith.constant 0 : i32
    %c0_i32_1 = arith.constant 0 : i32
    return %c0_i32, %c0_i32_0 : i32, i32
  }
  func.func @transform_13(%arg0: i32) -> (i32, i32) {
    %c0_i32 = arith.constant 0 : i32
    %c0_i32_0 = arith.constant 0 : i32
    %c0_i32_1 = arith.constant 0 : i32
    return %c0_i32, %c0_i32_0 : i32, i32
  }
  func.func @transform_14(%arg0: i32) -> (i32, i32) {
    %c0_i32 = arith.constant 0 : i32
    %c0_i32_0 = arith.constant 0 : i32
    %c0_i32_1 = arith.constant 0 : i32
    return %c0_i32, %c0_i32_0 : i32, i32
  }
  func.func @transform_15(%arg0: i32) -> (i32, i32) {
    %c0_i32 = arith.constant 0 : i32
    %c0_i32_0 = arith.constant 0 : i32
    %c0_i32_1 = arith.constant 0 : i32
    return %c0_i32, %c0_i32_0 : i32, i32
  }
  func.func @transform_16(%arg0: i32) -> (i32, i32) {
    %c0_i32 = arith.constant 0 : i32
    %c0_i32_0 = arith.constant 0 : i32
    %c0_i32_1 = arith.constant 0 : i32
    return %c0_i32, %c0_i32_0 : i32, i32
  }
  func.func @transform_17(%arg0: i32) -> (i32, i32) {
    %c0_i32 = arith.constant 0 : i32
    %c0_i32_0 = arith.constant 0 : i32
    %c0_i32_1 = arith.constant 0 : i32
    return %c0_i32, %c0_i32_0 : i32, i32
  }
  func.func @transform_18(%arg0: i32) -> (i32, i32) {
    %c0_i32 = arith.constant 0 : i32
    %c0_i32_0 = arith.constant 0 : i32
    %c0_i32_1 = arith.constant 0 : i32
    return %c0_i32, %c0_i32_0 : i32, i32
  }
  func.func @transform_19(%arg0: i32) -> (i32, i32) {
    %c0_i32 = arith.constant 0 : i32
    %c0_i32_0 = arith.constant 0 : i32
    %c0_i32_1 = arith.constant 0 : i32
    return %c0_i32, %c0_i32_0 : i32, i32
  }
  func.func @transform_20(%arg0: i32) -> (i32, i32, i32) {
    %c0_i32 = arith.constant 0 : i32
    %c0_i32_0 = arith.constant 0 : i32
    %c0_i32_1 = arith.constant 0 : i32
    return %arg0, %c0_i32, %c0_i32_0 : i32, i32, i32
  }
}

</mosaic_0001>

<bundles_post_ra>
// kernel: _lambda_.1
= control target key start
LH: loop header
LB: loop body
LE: loop exit
PB: predicated region body
PF: predicated region fallthrough
CT: control target
= control target key end

     0   :  { %s13546_s0 = inlined_call_operand.vmem [shape: f32[2,4,64], index: 0, kind: input, shape index: {}]   ;;  %s13547_s1 = inlined_call_operand.vmem [shape: f32[17,256], index: 1, kind: input, shape index: {}]   ;;  %s13548_s2 = inlined_call_operand.vmem [shape: f32[4,256], index: 2, kind: input, shape index: {}]   ;;  %s13549_s3 = inlined_call_operand.vmem [shape: bf16[256,256], index: 3, kind: input, shape index: {}]   ;;  %s13550_s4 = inlined_call_operand.vmem [shape: bf16[256,5], index: 4, kind: input, shape index: {}]   ;;  %s13551_s5 = inlined_call_operand.vmem [shape: bf16[15,8], index: 5, kind: input, shape index: {}]   ;;  %s13552_s6 = inlined_call_operand.vmem [shape: bf16[24,16], index: 6, kind: input, shape index: {}]   ;;  %s13553_s7 = inlined_call_operand.vmem [shape: bf16[32,64], index: 7, kind: input, shape index: {}]   ;;  %s13554_s8 = inlined_call_operand.vmem [shape: bf16[48,32], index: 8, kind: input, shape index: {}]   ;;  %s13555_s9 = inlined_call_operand.vmem [shape: bf16[16,32], index: 9, kind: input, shape index: {}]   ;;  %s13556_s10 = inlined_call_operand.vmem [shape: bf16[96,32], index: 10, kind: input, shape index: {}]   ;;  %s13557_s11 = inlined_call_operand.vmem [shape: bf16[8,16], index: 11, kind: input, shape index: {}]   ;;  %s13558_s12 = inlined_call_operand.vmem [shape: bf16[96,32], index: 12, kind: input, shape index: {}]   ;;  %s13559_s13 = inlined_call_operand.vmem [shape: bf16[16,8], index: 13, kind: input, shape index: {}]   ;;  %s13560_s14 = inlined_call_operand.vmem [shape: bf16[96,16], index: 14, kind: input, shape index: {}]   ;;  %s13561_s15 = inlined_call_operand.vmem [shape: bf16[32,16], index: 15, kind: input, shape index: {}]   ;;  %s13562_s16 = inlined_call_operand.vmem [shape: bf16[48,8], index: 16, kind: input, shape index: {}]   ;;  %s13563_s17 = inlined_call_operand.vmem [shape: bf16[64,32], index: 17, kind: input, shape index: {}]   ;;  %s13564_s18 = inlined_call_operand.vmem [shape: bf16[3,8], index: 18, kind: input, shape index: {}]   ;;  %s13565_s19 = inlined_call_operand.vmem [shape: f32[3,1], index: 19, kind: input, shape index: {}]   ;;  %s13566_s20 = inlined_call_operand.vmem [shape: f32[2,3,64], index: 20, kind: output, shape index: {}]  }
   0x1   :  { %13777 = sst [smem:[#allocation51_spill]] %s13546_s0 }
   0x2   :  { %13778 = sst [smem:[#allocation52_spill]] %s13547_s1  ;;  %s9010_s1 = smov 0  }
   0x3   :  { %13779 = sst [smem:[#allocation53_spill]] %s13548_s2 }
   0x4   :  { %13780 = sst [smem:[#allocation54_spill]] %s13549_s3 }
   0x5   :  { %13781 = sst [smem:[#allocation55_spill]] %s13550_s4 }
   0x6 LB: > { %s7655_s22 = sadd.s32 4294967295, %s8886_s1   ;;  %p7659_p0 = scmp.ge.s32.totalorder %s8886_s1, 1  ;;  %s8886_s1 = sphi %s9010_s1, %s30_s1  }
   0x7   : > { %p561_p1 = scmp.lt.s32.totalorder %s8886_s1, 3 }
   0x9   : > { %p562_p2 = pnand %p7659_p0, %p561_p1 }
   0xb   : > { %565 = sbr.rel (%p562_p2) target bundleno = 8194 (0x2002), region = 100 }
  0x12   : > { %p617_p3 = scmp.lt.s32.totalorder %s7655_s22, 1  ;;  %s13782_s2 = sld [smem:[#allocation53_spill]]  ;;  %vm13638_vm0 = vcmask 1043456   ;;  %v13570_v2 = vmov 0.0   ;;  %vm674_vm1 = vcmask 31744   ;;  %v664_v12 = vlaneseq }
  0x13   : > { %768 = vmatprep.mubr.f32.mxu0 %v13570_v2  ;;  %s13783_s27 = sld [smem:[#allocation51_spill]]  ;;  %s13786_s30 = sld [smem:[#allocation52_spill]]  ;;  %v13580_v54 = vmov 683565275   ;;  %v13578_v56 = vmov 2475754826  }
  0x14   : > { %s14145_s22 = smov (!%p617_p3, %s7655_s22), 1  ;;  %v9047_v13 = vshrl.u32 %v664_v12, 7  ;;  %v13583_v60 = vmov 2131351028   ;;  %v13575_v63 = vmov 2102212464  }
  0x15   : > { %s13774_s25 = sshll.u32 %s14145_s22, 2  ;;  %s14039_s23 = sld [smem:[#allocation55_spill]] }
  0x16   : > { %13784 = vst [vmem:[#allocation2_spill] sm:$0xff] %v9047_v13  ;;  %v9050_v14 = vsub.s32 0, %v9047_v13  ;;  %s8896_s0 = smov 10   ;;  %s8897_s21 = smov 5  }
  0x17   : > { %s13775_s24 = smov 16   ;;  %s8900_s3 = smov 8  }
  0x18   : > { %v663_v0 = vld [vmem:[%s13782_s2] sm:$0xff]  ;;  %13785 = vst [vmem:[#allocation3_spill] sm:$0xff] %v9050_v14  ;;  %s13819_s2 = sld [smem:[#allocation54_spill]]  ;;  %s8901_s26 = smov 32  }
  0x19   : > { %v673_v1 = vcombine.high %v663_v0, %v663_v0  ;;  %s620_s28 = scalar_lea.vmem %s13783_s27, %s13774_s25  ;;  %v626_v15 = vld [vmem:[%s13786_s30] sm:$0xff]  ;;  %v627_v16 = vld [vmem:[%s13786_s30 + $0x8] sm:$0xff]  ;;  %s8903_s25 = smov 64  }
  0x1a   : > { %v630_v3 = vld [vmem:[%s620_s28] sm:$0xf]  ;;  %v9059_v17 = vrot.slane %v626_v15, %v9050_v14  ;;  %v9062_v18 = vrot.slane %v627_v16, %v9050_v14  ;;  %s14143_s29 = sshll.u32 %s14145_s22, 2 }
  0x1b   : > { %7662 = vmatprep.subr.msk.mxu0 %vm13638_vm0, %v673_v1  ;;  %631 = vxpose.xlu0.b32.start.end [1/1] (short) (narrow) %v630_v3, 64  ;;  %v13609_v3 = vmov 920167782  }
  0x1c   : > { %7663 = vmatpush1.msk.msra.mxu0 %vm13638_vm0, %v663_v0 }
  0x9b   : > { %v647_v4 = vpop.trf.xlu0 }
  0x9c   : > { %7664 = vmatmul.mubr.msk.f32.vlgmr.msra.gmra.mrb[0].mxu0 %vm674_vm1, %v647_v4 }
  0x9d   : > { %774 = vmatprep.mubr.f32.mxu0 %v13570_v2 }
  0x9f   : > { %v648_v5 = vpop.trf.xlu0 }
  0xa0   : > { %7665 = vmatmul.mubr.msk.f32.gmra.mrb[2].mxu0 %vm674_vm1, %v648_v5 }
  0xa1   : > { %780 = vmatprep.mubr.f32.mxu0 %v13570_v2 }
  0xa3   : > { %v649_v6 = vpop.trf.xlu0 }
  0xa4   : > { %7666 = vmatmul.mubr.msk.f32.gmra.mrb[4].mxu0 %vm674_vm1, %v649_v6  ;;  %v13607_v6 = vmov 1326507024  }
  0xa5   : > { %786 = vmatprep.mubr.f32.mxu0 %v13570_v2 }
  0xa7   : > { %v650_v7 = vpop.trf.xlu0 }
  0xa8   : > { %7667 = vmatmul.mubr.msk.f32.gmra.mrb[6].mxu0 %vm674_vm1, %v650_v7 }
  0xa9   : > { %792 = vmatprep.mubr.f32.mxu0 %v13570_v2 }
  0xab   : > { %v651_v8 = vpop.trf.xlu0 }
  0xac   : > { %7668 = vmatmul.mubr.msk.f32.gmra.mrb[8].mxu0 %vm674_vm1, %v651_v8 }
  0xad   : > { %798 = vmatprep.mubr.f32.mxu0 %v13570_v2 }
  0xaf   : > { %v652_v9 = vpop.trf.xlu0 }
  0xb0   : > { %7669 = vmatmul.mubr.msk.f32.gmra.mrb[10].mxu0 %vm674_vm1, %v652_v9 }
  0xb1   : > { %804 = vmatprep.mubr.f32.mxu0 %v13570_v2 }
  0xb3   : > { %v653_v10 = vpop.trf.xlu0 }
  0xb4   : > { %7670 = vmatmul.mubr.msk.f32.gmra.mrb[12].mxu0 %vm674_vm1, %v653_v10 }
  0xb5   : > { %810 = vmatprep.mubr.f32.mxu0 %v13570_v2 }
  0xb7   : > { %v654_v11 = vpop.trf.xlu0 }
  0xb8   : > { %7671 = vmatmul.mubr.msk.f32.gmra.mrb[14].mxu0 %vm674_vm1, %v654_v11 }
 0x16f   : > { %v770_v19 = vpop.f32.mrb[0].mxu0 }
 0x170   : > { %v771_v20 = vadd.f32 %v770_v19, %v9059_v17  ;;  %v772_v21 = vpop.f32.mrb[1].mxu0 }
 0x171   : > { %v773_v22 = vadd.f32 %v772_v21, %v9062_v18 }
 0x172   : > { %v9066_v23 = vmul.f32 10.0, %v771_v20 }
 0x173   : > { %v776_v24 = vpop.f32.mrb[2].mxu0  ;;  %v9069_v26 = vmul.f32 10.0, %v773_v22 }
 0x174   : > { %13787 = vst [vmem:[#allocation4_spill] sm:$0xff] %v9066_v23  ;;  %v836_v25 = vand.u32 2139095040, %v9066_v23  ;;  %v777_v27 = vadd.f32 %v776_v24, %v9059_v17  ;;  %v778_v28 = vpop.f32.mrb[3].mxu0  ;;  %v13574_v32 = vand.u32 2147483647, %v9066_v23 }
 0x175   : > { %13788 = vst [vmem:[#allocation5_spill] sm:$0xff] %v9069_v26  ;;  %v940_v34 = vand.u32 2139095040, %v9069_v26  ;;  %v779_v38 = vadd.f32 %v778_v28, %v9062_v18 }
 0x176   : > { %v837_v29 = vshrl.u32 %v836_v25, 23  ;;  %v9072_v30 = vmul.f32 10.0, %v777_v27  ;;  %v840_v40 = vand.u32 8388607, %v13574_v32 }
 0x177   : > { %v9074_v31 = vpop.f32.mrb[4].mxu0  ;;  %v941_v41 = vshrl.u32 %v940_v34, 23  ;;  %v9088_v46 = vmul.f32 10.0, %v779_v38 }
 0x178   : > { %v7672_v33 = vadd.s32 4294967169, %v837_v29  ;;  %v9078_v35 = vpop.f32.mrb[5].mxu0  ;;  %v1044_v36 = vand.u32 2139095040, %v9072_v30  ;;  %v841_v48 = vor.u32 8388608, %v840_v40  ;;  %v13573_v51 = vand.u32 2147483647, %v9072_v30 }
 0x179   : > { %13789 = vst [vmem:[#allocation6_spill] sm:$0xff] %v9088_v46  ;;  %v7676_v50 = vadd.s32 4294967169, %v941_v41 }
 0x17a   : > { %v843_v37 = vadd.s32 1, %v7672_v33  ;;  %v1045_v44 = vshrl.u32 %v1044_v36, 23  ;;  %v1048_v11 = vand.u32 8388607, %v13573_v51  ;;  %v881_v29 = vshll.u32 %v841_v48, 8 }
 0x17b   : > { %v9082_v39 = vpop.f32.mrb[6].mxu0 }
 0x17c   : > { %vm844_vm2 = vcmp.gt.s32.totalorder %v843_v37, 0  ;;  %v9086_v42 = vpop.f32.mrb[7].mxu0  ;;  %v7680_v58 = vadd.s32 4294967169, %v1045_v44 }
 0x17d   : > { %v845_v43 = vsel %vm844_vm2, %v843_v37, 0 }
 0x17e   : > { %v847_v45 = vand.u32 31, %v845_v43  ;;  %v846_v53 = vshrl.u32 %v845_v43, 5  ;;  %v1051_v21 = vadd.s32 1, %v7680_v58  ;;  %v1148_v58 = vand.u32 2139095040, %v9088_v46 }
 0x17f   : > { %v9090_v47 = vpop.f32.mrb[8].mxu0 }
 0x180   : > { %v848_v49 = vsub.s32 32, %v847_v45  ;;  %v9093_v52 = vpop.f32.mrb[9].mxu0  ;;  %v850_v55 = vshll.u32 %v13580_v54, %v847_v45  ;;  %v853_v57 = vshll.u32 %v13578_v56, %v847_v45  ;;  %v856_v62 = vshll.u32 %v13583_v60, %v847_v45 }
 0x181   : > { %v859_v1 = vshll.u32 %v13575_v63, %v847_v45  ;;  %v862_v5 = vshll.u32 %v13609_v3, %v847_v45  ;;  %vm865_vm3 = vcmp.lt.s32.totalorder %v846_v53, 1  ;;  %vm868_vm4 = vcmp.lt.s32.totalorder %v846_v53, 4 }
 0x182   : > { %v851_v59 = vshrl.u32 %v13578_v56, %v848_v49  ;;  %v854_v61 = vshrl.u32 %v13583_v60, %v848_v49  ;;  %v857_v0 = vshrl.u32 %v13575_v63, %v848_v49  ;;  %v860_v4 = vshrl.u32 %v13609_v3, %v848_v49 }
 0x183   : > { %v863_v7 = vshrl.u32 %v13607_v6, %v848_v49  ;;  %v849_v22 = vshrl.u32 %v13580_v54, %v848_v49  ;;  %vm867_vm5 = vcmp.lt.s32.totalorder %v846_v53, 3  ;;  %vm866_vm6 = vcmp.lt.s32.totalorder %v846_v53, 2  ;;  %v9108_v33 = vpop.f32.mrb[10].mxu0 }
 0x184   : > { %v852_v8 = vor.u32 %v851_v59, %v850_v55  ;;  %v855_v9 = vor.u32 %v854_v61, %v853_v57  ;;  %v858_v10 = vor.u32 %v857_v0, %v856_v62  ;;  %v861_v12 = vor.u32 %v860_v4, %v859_v1 }
 0x185   : > { %v864_v15 = vor.u32 %v863_v7, %v862_v5  ;;  %v947_v45 = vadd.s32 1, %v7676_v50  ;;  %v1049_v49 = vor.u32 8388608, %v1048_v11  ;;  %vm1052_vm7 = vcmp.gt.s32.totalorder %v1051_v21, 0 }
 0x186   : > { %v870_v16 = vsel %vm868_vm4, %v858_v10, 2102212464  ;;  %v873_v19 = vsel %vm865_vm3, %v852_v8, %v855_v9  ;;  %v877_v20 = vsel %vm865_vm3, %v855_v9, %v858_v10  ;;  %v874_v24 = vsel %vm868_vm4, %v861_v12, 920167782 }
 0x187   : > { %v878_v25 = vsel %vm868_vm4, %v864_v15, 1326507024  ;;  %v875_v27 = vsel %vm867_vm5, %v858_v10, %v874_v24  ;;  %v869_v34 = vsel %vm865_vm3, %v849_v22, %v852_v8  ;;  %v871_v36 = vsel %vm867_vm5, %v855_v9, %v870_v16 }
 0x188   : > { %v879_v28 = vsel %vm867_vm5, %v861_v12, %v878_v25  ;;  %v876_v37 = vsel %vm866_vm6, %v873_v19, %v875_v27  ;;  %v872_v53 = vsel %vm866_vm6, %v869_v34, %v871_v36  ;;  %v1053_v55 = vsel %vm1052_vm7, %v1051_v21, 0 }
 0x189   : > { %v880_v38 = vsel %vm866_vm6, %v877_v20, %v879_v28  ;;  %v9113_v43 = vmul.u32.u64.low %v881_v29, %v876_v37  ;;  %v9114_v44 = vmul.u32.u64.high %v881_v29, %v876_v37, %v9113_v43  ;;  %v1055_v57 = vand.u32 31, %v1053_v55 }
 0x18a   : > { %v9110_v40 = vmul.u32.u64.low %v881_v29, %v880_v38  ;;  %v9111_v41 = vmul.u32.u64.high %v881_v29, %v880_v38, %v9110_v40  ;;  %v783_v59 = vadd.f32 %v9074_v31, %v9059_v17  ;;  %v888_v61 = vmul.u32 %v881_v29, %v872_v53 }
 0x18b   : > { %v891_v48 = vadd.s32 1, %v9114_v44  ;;  %vm948_vm9 = vcmp.gt.s32.totalorder %v947_v45, 0  ;;  %v1054_v62 = vshrl.u32 %v1053_v55, 5  ;;  %v1056_v0 = vsub.s32 32, %v1055_v57 }
 0x18c   : > { %vm890_vm8 = vc.u32 %v9111_v41, %v9113_v43  ;;  %v1089_v50 = vshll.u32 %v1049_v49, 8  ;;  %v1058_v4 = vshll.u32 %v13580_v54, %v1055_v57  ;;  %v1061_v5 = vshll.u32 %v13578_v56, %v1055_v57 }
 0x18d   : > { %v892_v1 = vsel %vm890_vm8, %v891_v48, %v9114_v44  ;;  %v1064_v7 = vshll.u32 %v13583_v60, %v1055_v57  ;;  %v1059_v9 = vshrl.u32 %v13578_v56, %v1056_v0  ;;  %v1062_v10 = vshrl.u32 %v13583_v60, %v1056_v0 }
 0x18e   : > { %v893_v8 = vadd.s32 %v892_v1, %v888_v61  ;;  %v1067_v31 = vshll.u32 %v13575_v63, %v1055_v57  ;;  %v1065_v11 = vshrl.u32 %v13575_v63, %v1056_v0  ;;  %v1068_v12 = vshrl.u32 %v13609_v3, %v1056_v0 }
 0x18f   : > { %v1070_v15 = vshll.u32 %v13609_v3, %v1055_v57  ;;  %v1071_v16 = vshrl.u32 %v13607_v6, %v1056_v0  ;;  %v1060_v20 = vor.u32 %v1059_v9, %v1058_v4  ;;  %v1063_v21 = vor.u32 %v1062_v10, %v1061_v5 }
 0x190   : > { %v894_v19 = vadd.s32 536870912, %v893_v8  ;;  %vm1073_vm10 = vcmp.lt.s32.totalorder %v1054_v62, 1  ;;  %v1057_v22 = vshrl.u32 %v13580_v54, %v1056_v0  ;;  %v1066_v24 = vor.u32 %v1065_v11, %v1064_v7 }
 0x191   : > { %v1069_v25 = vor.u32 %v1068_v12, %v1067_v31  ;;  %v1072_v27 = vor.u32 %v1071_v16, %v1070_v15  ;;  %vm1075_vm11 = vcmp.lt.s32.totalorder %v1054_v62, 3  ;;  %vm1076_vm12 = vcmp.lt.s32.totalorder %v1054_v62, 4 }
 0x192   : > { %v9135_v28 = vshrl.u32 %v894_v19, 30  ;;  %v1081_v29 = vsel %vm1073_vm10, %v1060_v20, %v1063_v21  ;;  %v1078_v34 = vsel %vm1076_vm12, %v1066_v24, 2102212464  ;;  %v1085_v37 = vsel %vm1073_vm10, %v1063_v21, %v1066_v24  ;;  %v9166_v19 = vpop.f32.mrb[11].mxu0 }
 0x193   : > { %v1082_v36 = vsel %vm1076_vm12, %v1069_v25, 920167782  ;;  %v1086_v38 = vsel %vm1076_vm12, %v1072_v27, 1326507024  ;;  %vm1074_vm13 = vcmp.lt.s32.totalorder %v1054_v62, 2  ;;  %v1077_v53 = vsel %vm1073_vm10, %v1057_v22, %v1060_v20 }
 0x194   : > { %13790 = vst [vmem:[#allocation7_spill] sm:$0xff] %v9135_v28  ;;  %v896_v40 = vshll.u32 %v9135_v28, 30  ;;  %v1083_v44 = vsel %vm1075_vm11, %v1066_v24, %v1082_v36  ;;  %v1087_v49 = vsel %vm1075_vm11, %v1069_v25, %v1086_v38  ;;  %v9143_v48 = vmul.f32 10.0, %v783_v59 }
 0x195   : > { %v1084_v55 = vsel %vm1074_vm13, %v1081_v29, %v1083_v44  ;;  %v1088_v57 = vsel %vm1074_vm13, %v1085_v37, %v1087_v49  ;;  %v1079_v0 = vsel %vm1075_vm11, %v1063_v21, %v1078_v34  ;;  %v949_v5 = vsel %vm948_vm9, %v947_v45, 0 }
 0x196   : > { %13791 = vst [vmem:[#allocation8_spill] sm:$0xff] %v9143_v48  ;;  %v9145_v61 = vsub.s32 %v893_v8, %v896_v40  ;;  %v9148_v1 = vmul.u32.u64.low %v1089_v50, %v1088_v57  ;;  %v9149_v4 = vmul.u32.u64.high %v1089_v50, %v1088_v57, %v9148_v1  ;;  %v1080_v31 = vsel %vm1074_vm13, %v1077_v53, %v1079_v0 }
 0x197   : > { %v9152_v7 = vmul.u32.u64.low %v1089_v50, %v1084_v55  ;;  %v9153_v9 = vmul.u32.u64.high %v1089_v50, %v1084_v55, %v9152_v7  ;;  %v1252_v11 = vand.u32 2139095040, %v9143_v48  ;;  %v9158_v59 = vand.u32 31, %v949_v5 }
 0x198   : > { %v899_v10 = vsub.s32 0, %v9145_v61  ;;  %v1149_v62 = vshrl.u32 %v1148_v58, 23  ;;  %v785_v15 = vadd.f32 %v9078_v35, %v9062_v18  ;;  %v1096_v16 = vmul.u32 %v1089_v50, %v1080_v31 }
 0x199   : > { %13792 = vst [vmem:[#allocation9_spill] sm:$0xff] %v9158_v59  ;;  %vm1098_vm14 = vc.u32 %v9149_v4, %v9152_v7  ;;  %v1099_v12 = vadd.s32 1, %v9153_v9  ;;  %v1253_v45 = vshrl.u32 %v1252_v11, 23  ;;  %v9170_v22 = vsub.s32 32, %v9158_v59 }
 0x19a   : > { %v7673_v8 = vmin.u32 %v899_v10, %v9145_v61  ;;  %v7684_v25 = vadd.s32 4294967169, %v1149_v62  ;;  %v13572_v27 = vand.u32 2147483647, %v9143_v48  ;;  %v9173_v34 = vmul.f32 10.0, %v785_v15 }
 0x19b   : > { %v1100_v20 = vsel %vm1098_vm14, %v1099_v12, %v9153_v9  ;;  %v7688_v21 = vadd.s32 4294967169, %v1253_v45  ;;  %13793 = vst [vmem:[#allocation10_spill] sm:$0xff] %v9170_v22  ;;  %v964_v35 = vshrl.u32 %v13609_v3, %v9170_v22  ;;  %v963_v53 = vshll.u32 %v13575_v63, %v9158_v59 }
 0x19c   : > { %v1101_v24 = vadd.s32 %v1100_v20, %v1096_v16  ;;  %v901_v58 = vclz %v7673_v8  ;;  %v1155_v37 = vadd.s32 1, %v7684_v25  ;;  %v1256_v40 = vand.u32 8388607, %v13572_v27 }
 0x19d   : > { %v1259_v29 = vadd.s32 1, %v7688_v21  ;;  %v1356_v49 = vand.u32 2139095040, %v9173_v34  ;;  %v9185_v57 = vshrl.u32 %v949_v5, 5  ;;  %v789_v1 = vadd.f32 %v9082_v39, %v9059_v17 }
 0x19e   : > { %v1102_v36 = vadd.s32 536870912, %v1101_v24  ;;  %v7674_v38 = vadd.s32 4294967294, %v901_v58  ;;  %v9189_v9 = vor.u32 %v964_v35, %v963_v53  ;;  %v966_v10 = vshll.u32 %v13609_v3, %v9158_v59 }
 0x19f   : > { %vm1260_vm15 = vcmp.gt.s32.totalorder %v1259_v29, 0  ;;  %13795 = vst [vmem:[#allocation12_spill] sm:$0xff] %v9185_v57  ;;  %v967_v31 = vshrl.u32 %v13607_v6, %v9170_v22  ;;  %vm1156_vm2 = vcmp.gt.s32.totalorder %v1155_v37, 0  ;;  %v1257_v62 = vor.u32 8388608, %v1256_v40 }
 0x1a0   : > { %v9177_v50 = vshrl.u32 %v1102_v36, 30  ;;  %v1261_v44 = vsel %vm1260_vm15, %v1259_v29, 0  ;;  %13796 = vst [vmem:[#allocation13_spill] sm:$0xff] %v9189_v9  ;;  %vm7675_vm1 = vcmp.lt.s32.totalorder %v7674_v38, 0  ;;  %v1357_v5 = vshrl.u32 %v1356_v49, 23 }
 0x1a1   : > { %v1263_v0 = vand.u32 31, %v1261_v44  ;;  %v1262_v12 = vshrl.u32 %v1261_v44, 5  ;;  %vm972_vm3 = vcmp.lt.s32.totalorder %v9185_v57, 4  ;;  %v9205_v25 = vsel %vm7675_vm1, 0, %v7674_v38 }
 0x1a2   : > { %13794 = vst [vmem:[#allocation11_spill] sm:$0xff] %v9177_v50  ;;  %v1104_v55 = vshll.u32 %v9177_v50, 30  ;;  %v13577_v2 = vand.u32 2147483647, %v9173_v34  ;;  %v9212_v27 = vmul.f32 10.0, %v789_v1  ;;  %v7692_v32 = vadd.s32 4294967169, %v1357_v5 }
 0x1a3   : > { %v1264_v8 = vsub.s32 32, %v1263_v0  ;;  %v1266_v45 = vshll.u32 %v13580_v54, %v1263_v0  ;;  %v1269_v39 = vshll.u32 %v13578_v56, %v1263_v0  ;;  %v1272_v15 = vshll.u32 %v13583_v60, %v1263_v0 }
 0x1a4   : > { %v9195_v11 = vsub.s32 %v1101_v24, %v1104_v55  ;;  %v1275_v58 = vshll.u32 %v13575_v63, %v1263_v0  ;;  %v1278_v36 = vshll.u32 %v13609_v3, %v1263_v0  ;;  %v1297_v55 = vshll.u32 %v1257_v62, 8  ;;  %13797 = vst [vmem:[#allocation14_spill] sm:$0xff] %v9212_v27 }
 0x1a5   : > { %v1267_v20 = vshrl.u32 %v13578_v56, %v1264_v8  ;;  %v1270_v21 = vshrl.u32 %v13583_v60, %v1264_v8  ;;  %v1273_v24 = vshrl.u32 %v13575_v63, %v1264_v8  ;;  %v1276_v29 = vshrl.u32 %v13609_v3, %v1264_v8 }
 0x1a6   : > { %v1107_v16 = vsub.s32 0, %v9195_v11  ;;  %v1279_v49 = vshrl.u32 %v13607_v6, %v1264_v8  ;;  %vm1281_vm4 = vcmp.lt.s32.totalorder %v1262_v12, 1  ;;  %v909_v63 = vsub.s32 4294967266, %v9205_v25 }
 0x1a7   : > { %v1268_v35 = vor.u32 %v1267_v20, %v1266_v45  ;;  %v1271_v40 = vor.u32 %v1270_v21, %v1269_v39  ;;  %v1274_v44 = vor.u32 %v1273_v24, %v1272_v15  ;;  %v1277_v53 = vor.u32 %v1276_v29, %v1275_v58  ;;  %v9217_v45 = vpop.f32.mrb[12].mxu0 }
 0x1a8   : > { %v7681_v38 = vmin.u32 %v1107_v16, %v9195_v11  ;;  %v1280_v51 = vor.u32 %v1279_v49, %v1278_v36  ;;  %vm1283_vm5 = vcmp.lt.s32.totalorder %v1262_v12, 3  ;;  %vm1284_vm6 = vcmp.lt.s32.totalorder %v1262_v12, 4 }
 0x1a9   : > { %v1289_v0 = vsel %vm1281_vm4, %v1268_v35, %v1271_v40  ;;  %v968_v39 = vor.u32 %v967_v31, %v966_v10  ;;  %v1286_v15 = vsel %vm1284_vm6, %v1274_v44, 2102212464  ;;  %v1290_v62 = vsel %vm1284_vm6, %v1277_v53, 920167782 }
 0x1aa   : > { %v1294_v20 = vsel %vm1284_vm6, %v1280_v51, 1326507024  ;;  %v1265_v1 = vshrl.u32 %v13580_v54, %v1264_v8  ;;  %vm1282_vm7 = vcmp.lt.s32.totalorder %v1262_v12, 2  ;;  %v1291_v16 = vsel %vm1283_vm5, %v1274_v44, %v1290_v62 }
 0x1ab   : > { %v1293_v21 = vsel %vm1281_vm4, %v1271_v40, %v1274_v44  ;;  %v1109_v5 = vclz %v7681_v38  ;;  %v1292_v24 = vsel %vm1282_vm7, %v1289_v0, %v1291_v16  ;;  %v1295_v58 = vsel %vm1283_vm5, %v1277_v53, %v1294_v20 }
 0x1ac   : > { %v1363_v29 = vadd.s32 1, %v7692_v32  ;;  %v9227_v10 = vsel %vm972_vm3, %v9189_v9, 920167782  ;;  %v9230_v51 = vsel %vm1156_vm2, %v1155_v37, 0  ;;  %v1285_v31 = vsel %vm1281_vm4, %v1265_v1, %v1268_v35 }
 0x1ad   : > { %13798 = vst [vmem:[#allocation15_spill] sm:$0xff] %v9227_v10  ;;  %v1287_v8 = vsel %vm1283_vm5, %v1271_v40, %v1286_v15  ;;  %v9236_v36 = vsel %vm972_vm3, %v968_v39, 1326507024  ;;  %v1296_v44 = vsel %vm1282_vm7, %v1293_v21, %v1295_v58  ;;  %v1360_v37 = vand.u32 8388607, %v13577_v2 }
 0x1ae   : > { %13799 = vst [vmem:[#allocation16_spill] sm:$0xff] %v9236_v36  ;;  %v9239_v49 = vmul.u32.u64.low %v1297_v55, %v1292_v24  ;;  %v9240_v32 = vmul.u32.u64.high %v1297_v55, %v1292_v24, %v9239_v49  ;;  %v9243_v53 = vmul.u32.u64.low %v1297_v55, %v1296_v44  ;;  %v9244_v38 = vmul.u32.u64.high %v1297_v55, %v1296_v44, %v9243_v53 }
 0x1af   : > { %v1460_v35 = vand.u32 2139095040, %v9212_v27  ;;  %v910_v0 = vadd.s32 127, %v909_v63  ;;  %v7682_v40 = vadd.s32 4294967294, %v1109_v5  ;;  %v1288_v15 = vsel %vm1282_vm7, %v1285_v31, %v1287_v8 }
 0x1b0   : > { %vm1364_vm8 = vcmp.gt.s32.totalorder %v1363_v29, 0  ;;  %v889_v39 = vadd.s32 %v9113_v43, %v9111_v41  ;;  %v9253_v62 = vand.u32 31, %v9230_v51  ;;  %v9257_v1 = vadd.f32 %v9086_v42, %v9062_v18 }
 0x1b1   : > { %v1365_v20 = vsel %vm1364_vm8, %v1363_v29, 0  ;;  %v905_v16 = vsub.s32 32, %v9205_v25  ;;  %v906_v63 = vshll.u32 %v9145_v61, %v9205_v25  ;;  %v1307_v12 = vadd.s32 1, %v9240_v32 }
 0x1b2   : > { %13800 = vst [vmem:[#allocation17_spill] sm:$0xff] %v9253_v62  ;;  %v1367_v21 = vand.u32 31, %v1365_v20  ;;  %v1304_v5 = vmul.u32 %v1297_v55, %v1288_v15  ;;  %vm1306_vm9 = vc.u32 %v9244_v38, %v9239_v49  ;;  %v1361_v41 = vor.u32 8388608, %v1360_v37 }
 0x1b3   : > { %v1461_v43 = vshrl.u32 %v1460_v35, 23  ;;  %v911_v24 = vshll.u32 %v910_v0, 23  ;;  %vm7683_vm10 = vcmp.lt.s32.totalorder %v7682_v40, 0  ;;  %v1308_v58 = vsel %vm1306_vm9, %v1307_v12, %v9240_v32 }
 0x1b4   : > { %v1368_v42 = vsub.s32 32, %v1367_v21  ;;  %v1309_v29 = vadd.s32 %v1308_v58, %v1304_v5  ;;  %v1366_v31 = vshrl.u32 %v1365_v20, 5  ;;  %v1370_v8 = vshll.u32 %v13580_v54, %v1367_v21 }
 0x1b5   : > { %v1373_v61 = vshll.u32 %v13578_v56, %v1367_v21  ;;  %v1376_v44 = vshll.u32 %v13583_v60, %v1367_v21  ;;  %v13801_v53 = vmov 2102212464   ;;  %v1382_v15 = vshll.u32 %v13609_v3, %v1367_v21 }
 0x1b6   : > { %v1371_v25 = vshrl.u32 %v13578_v56, %v1368_v42  ;;  %v1374_v55 = vshrl.u32 %v13583_v60, %v1368_v42  ;;  %v1377_v37 = vshrl.u32 %v13801_v53, %v1368_v42  ;;  %v1310_v35 = vadd.s32 536870912, %v1309_v29 }
 0x1b7   : > { %v1379_v0 = vshll.u32 %v13801_v53, %v1367_v21  ;;  %v1380_v32 = vshrl.u32 %v13609_v3, %v1368_v42  ;;  %v1383_v58 = vshrl.u32 %v13607_v6, %v1368_v42  ;;  %v907_v2 = vshrl.u32 %v889_v39, %v905_v16 }
 0x1b8   : > { %v1372_v20 = vor.u32 %v1371_v25, %v1370_v8  ;;  %v1375_v12 = vor.u32 %v1374_v55, %v1373_v61  ;;  %v1378_v5 = vor.u32 %v1377_v37, %v1376_v44  ;;  %v9276_v56 = vshrl.u32 %v1310_v35, 30 }
 0x1b9   : > { %v1381_v54 = vor.u32 %v1380_v32, %v1379_v0  ;;  %v1401_v14 = vshll.u32 %v1361_v41, 8  ;;  %v912_v60 = vor.u32 4788187, %v911_v24  ;;  %v9279_v13 = vsel %vm7683_vm10, 0, %v7682_v40  ;;  %v9291_v0 = vpop.f32.mrb[13].mxu0 }
 0x1ba   : > { %13802 = vst [vmem:[#allocation18_spill] sm:$0xff] %v9276_v56  ;;  %v1384_v50 = vor.u32 %v1383_v58, %v1382_v15  ;;  %v7696_v28 = vadd.s32 4294967169, %v1461_v43  ;;  %v1312_v46 = vshll.u32 %v9276_v56, 30  ;;  %v13803_v9 = vmov 683565275  }
 0x1bb   : > { %v1369_v21 = vshrl.u32 %v13803_v9, %v1368_v42  ;;  %vm1385_vm11 = vcmp.lt.s32.totalorder %v1366_v31, 1  ;;  %vm1388_vm12 = vcmp.lt.s32.totalorder %v1366_v31, 4  ;;  %vm1387_vm13 = vcmp.lt.s32.totalorder %v1366_v31, 3 }
 0x1bc   : > { %v1390_v8 = vsel %vm1388_vm12, %v1378_v5, 2102212464  ;;  %v1393_v61 = vsel %vm1385_vm11, %v1372_v20, %v1375_v12  ;;  %v1394_v39 = vsel %vm1388_vm12, %v1381_v54, 920167782  ;;  %v1117_v16 = vsub.s32 4294967266, %v9279_v13 }
 0x1bd   : > { %v9284_v25 = vsub.s32 %v1309_v29, %v1312_v46  ;;  %vm1386_vm14 = vcmp.lt.s32.totalorder %v1366_v31, 2  ;;  %v1395_v41 = vsel %vm1387_vm13, %v1378_v5, %v1394_v39  ;;  %v1389_v40 = vsel %vm1385_vm11, %v1369_v21, %v1372_v20 }
 0x1be   : > { %v1396_v24 = vsel %vm1386_vm14, %v1393_v61, %v1395_v41  ;;  %v1397_v43 = vsel %vm1385_vm11, %v1375_v12, %v1378_v5  ;;  %v1398_v55 = vsel %vm1388_vm12, %v1384_v50, 1326507024  ;;  %v1391_v44 = vsel %vm1387_vm13, %v1375_v12, %v1390_v8 }
 0x1bf   : > { %v1399_v37 = vsel %vm1387_vm13, %v1381_v54, %v1398_v55  ;;  %v9287_v42 = vmul.u32.u64.low %v1401_v14, %v1396_v24  ;;  %v9288_v35 = vmul.u32.u64.high %v1401_v14, %v1396_v24, %v9287_v42  ;;  %v908_v32 = vor.u32 %v907_v2, %v906_v63 }
 0x1c0   : > { %v1400_v15 = vsel %vm1386_vm14, %v1397_v43, %v1399_v37  ;;  %v13594_v46 = vand.u32 2147483647, %v9212_v27  ;;  %v1467_v29 = vadd.s32 1, %v7696_v28  ;;  %v9296_v20 = vshrl.u32 %v9230_v51, 5 }
 0x1c1   : > { %v1315_v5 = vsub.s32 0, %v9284_v25  ;;  %v9299_v50 = vmul.u32.u64.low %v1401_v14, %v1400_v15  ;;  %v9300_v12 = vmul.u32.u64.high %v1401_v14, %v1400_v15, %v9299_v50  ;;  %v913_v54 = vand.u32 2147483647, %v912_v60 }
 0x1c2   : > { %13804 = vst [vmem:[#allocation19_spill] sm:$0xff] %v9296_v20  ;;  %v9303_v58 = vsub.s32 32, %v9253_v62  ;;  %v1392_v21 = vsel %vm1386_vm14, %v1389_v40, %v1391_v44  ;;  %vm1468_vm15 = vcmp.gt.s32.totalorder %v1467_v29, 0  ;;  %v1113_v2 = vsub.s32 32, %v9279_v13 }
 0x1c3   : > { %v1118_v63 = vadd.s32 127, %v1117_v16  ;;  %v1411_v28 = vadd.s32 1, %v9288_v35  ;;  %v1469_v8 = vsel %vm1468_vm15, %v1467_v29, 0  ;;  %v915_v51 = vcvt.s32.f32 %v908_v32 }
 0x1c4   : > { %v1464_v61 = vand.u32 8388607, %v13594_v46  ;;  %v1471_v39 = vand.u32 31, %v1469_v8  ;;  %v9311_v41 = vmul.f32 10.0, %v9257_v1  ;;  %v1097_v60 = vadd.s32 %v9152_v7, %v9149_v4 }
 0x1c5   : > { %v7689_v31 = vmin.u32 %v1315_v5, %v9284_v25  ;;  %v1408_v40 = vmul.u32 %v1401_v14, %v1392_v21  ;;  %vm1410_vm1 = vc.u32 %v9300_v12, %v9287_v42  ;;  %v9318_v16 = vmul.f32 %v915_v51, %v913_v54 }
 0x1c6   : > { %v9322_v24 = vshll.u32 %v13801_v53, %v9253_v62  ;;  %v1412_v43 = vsel %vm1410_vm1, %v1411_v28, %v9288_v35  ;;  %v1472_v55 = vsub.s32 32, %v1471_v39  ;;  %v1114_v1 = vshll.u32 %v9195_v11, %v9279_v13 }
 0x1c7   : > { %v1115_v44 = vshrl.u32 %v1097_v60, %v1113_v2  ;;  %v1119_v4 = vshll.u32 %v1118_v63, 23  ;;  %v1413_v7 = vadd.s32 %v1412_v43, %v1408_v40  ;;  %v1465_v37 = vor.u32 8388608, %v1464_v61 }
 0x1c8   : > { %v13805_v14 = vmov 2475754826   ;;  %v13806_v15 = vmov 2131351028   ;;  %v1564_v5 = vand.u32 2139095040, %v9311_v41  ;;  %v1317_v50 = vclz %v7689_v31 }
 0x1c9   : > { %v1475_v32 = vshrl.u32 %v13805_v14, %v1472_v55  ;;  %v1478_v29 = vshrl.u32 %v13806_v15, %v1472_v55  ;;  %v1414_v54 = vadd.s32 536870912, %v1413_v7  ;;  %v1474_v21 = vshll.u32 %v13803_v9, %v1471_v39 }
 0x1ca   : > { %v1477_v35 = vshll.u32 %v13805_v14, %v1471_v39  ;;  %v1480_v28 = vshll.u32 %v13806_v15, %v1471_v39  ;;  %v1481_v13 = vshrl.u32 %v13801_v53, %v1472_v55  ;;  %v1483_v11 = vshll.u32 %v13801_v53, %v1471_v39 }
 0x1cb   : > { %v1484_v2 = vshrl.u32 %v13609_v3, %v1472_v55  ;;  %v9336_v63 = vshrl.u32 %v1414_v54, 30  ;;  %v1470_v51 = vshrl.u32 %v1469_v8, 5  ;;  %v1476_v61 = vor.u32 %v1475_v32, %v1474_v21 }
 0x1cc   : > { %v1479_v60 = vor.u32 %v1478_v29, %v1477_v35  ;;  %v1482_v40 = vor.u32 %v1481_v13, %v1480_v28  ;;  %v1486_v43 = vshll.u32 %v13609_v3, %v1471_v39  ;;  %v1487_v46 = vshrl.u32 %v13607_v6, %v1472_v55 }
 0x1cd   : > { %13807 = vst [vmem:[#allocation20_spill] sm:$0xff] %v9336_v63  ;;  %v1485_v31 = vor.u32 %v1484_v2, %v1483_v11  ;;  %v1116_v56 = vor.u32 %v1115_v44, %v1114_v1  ;;  %v1120_v36 = vor.u32 4788187, %v1119_v4  ;;  %v1416_v10 = vshll.u32 %v9336_v63, 30 }
 0x1ce   : > { %v1505_v57 = vshll.u32 %v1465_v37, 8  ;;  %v7690_v22 = vadd.s32 4294967294, %v1317_v50  ;;  %v1488_v59 = vor.u32 %v1487_v46, %v1486_v43  ;;  %v13606_v26 = vand.u32 2147483647, %v9311_v41 }
 0x1cf   : > { %v1565_v54 = vshrl.u32 %v1564_v5, 23  ;;  %v9342_v20 = vsub.s32 %v1413_v7, %v1416_v10  ;;  %v1473_v8 = vshrl.u32 %v13803_v9, %v1472_v55  ;;  %vm1489_vm2 = vcmp.lt.s32.totalorder %v1470_v51, 1 }
 0x1d0   : > { %vm1492_vm4 = vcmp.lt.s32.totalorder %v1470_v51, 4  ;;  %vm1491_vm5 = vcmp.lt.s32.totalorder %v1470_v51, 3  ;;  %v1497_v32 = vsel %vm1489_vm2, %v1476_v61, %v1479_v60  ;;  %vm13665_vm6 = vcmp.lt.s32.totalorder %v9066_v23, 0 }
 0x1d1   : > { %v1494_v39 = vsel %vm1492_vm4, %v1482_v40, 2102212464  ;;  %v1498_v1 = vsel %vm1492_vm4, %v1485_v31, 920167782  ;;  %v1419_v44 = vsub.s32 0, %v9342_v20  ;;  %vm1490_vm7 = vcmp.lt.s32.totalorder %v1470_v51, 2 }
 0x1d2   : > { %v1499_v46 = vsel %vm1491_vm5, %v1482_v40, %v1498_v1  ;;  %v1501_v4 = vsel %vm1489_vm2, %v1479_v60, %v1482_v40  ;;  %vm7691_vm8 = vcmp.lt.s32.totalorder %v7690_v22, 0  ;;  %v1502_v55 = vsel %vm1492_vm4, %v1488_v59, 1326507024 }
 0x1d3   : > { %v1500_v10 = vsel %vm1490_vm7, %v1497_v32, %v1499_v46  ;;  %v7700_v7 = vadd.s32 4294967169, %v1565_v54  ;;  %v7693_v37 = vmin.u32 %v1419_v44, %v9342_v20  ;;  %v1493_v29 = vsel %vm1489_vm2, %v1473_v8, %v1476_v61 }
 0x1d4   : > { %v1495_v5 = vsel %vm1491_vm5, %v1479_v60, %v1494_v39  ;;  %v1503_v50 = vsel %vm1491_vm5, %v1485_v31, %v1502_v55  ;;  %v9356_v35 = vmul.u32.u64.low %v1505_v57, %v1500_v10  ;;  %v9357_v28 = vmul.u32.u64.high %v1505_v57, %v1500_v10, %v9356_v35 }
 0x1d5   : > { %v1504_v21 = vsel %vm1490_vm7, %v1501_v4, %v1503_v50  ;;  %v1571_v13 = vadd.s32 1, %v7700_v7  ;;  %v9360_v11 = vsel %vm7691_vm8, 0, %v7690_v22  ;;  %v1421_v2 = vclz %v7693_v37  ;;  %v9371_v22 = vpop.f32.mrb[14].mxu0 }
 0x1d6   : > { %v9362_v59 = vmul.u32.u64.low %v1505_v57, %v1504_v21  ;;  %v9363_v40 = vmul.u32.u64.high %v1505_v57, %v1504_v21, %v9362_v59  ;;  %v917_v43 = vxor.u32 2147483648, %v9318_v16  ;;  %v1121_v61 = vand.u32 2147483647, %v1120_v36 }
 0x1d7   : > { %v1496_v60 = vsel %vm1490_vm7, %v1493_v29, %v1495_v5  ;;  %vm1572_vm9 = vcmp.gt.s32.totalorder %v1571_v13, 0  ;;  %v7694_v31 = vadd.s32 4294967294, %v1421_v2  ;;  %v1568_v54 = vand.u32 8388607, %v13606_v26 }
 0x1d8   : > { %v1573_v8 = vsel %vm1572_vm9, %v1571_v13, 0  ;;  %v795_v39 = vadd.f32 %v9090_v47, %v9059_v17  ;;  %v1321_v32 = vsub.s32 32, %v9360_v11  ;;  %v1325_v1 = vsub.s32 4294967266, %v9360_v11 }
 0x1d9   : > { %v1515_v44 = vadd.s32 1, %v9357_v28  ;;  %v1575_v36 = vand.u32 31, %v1573_v8  ;;  %v1123_v51 = vcvt.s32.f32 %v1116_v56  ;;  %v9378_v46 = vshrl.u32 %v13609_v3, %v9303_v58 }
 0x1da   : > { %v1512_v4 = vmul.u32 %v1505_v57, %v1496_v60  ;;  %vm1514_vm10 = vc.u32 %v9363_v40, %v9356_v35  ;;  %v9385_v47 = vsel %vm13665_vm6, %v917_v43, %v9318_v16  ;;  %v1305_v10 = vadd.s32 %v9239_v49, %v9244_v38 }
 0x1db   : > { %v1516_v55 = vsel %vm1514_vm10, %v1515_v44, %v9357_v28  ;;  %v1576_v7 = vsub.s32 32, %v1575_v36  ;;  %v9390_v56 = vmul.f32 %v1123_v51, %v1121_v61  ;;  %vm7695_vm11 = vcmp.lt.s32.totalorder %v7694_v31, 0 }
 0x1dc   : > { %v1517_v37 = vadd.s32 %v1516_v55, %v1512_v4  ;;  %v9392_v29 = vmul.f32 10.0, %v795_v39  ;;  %v9394_v57 = vshrl.u32 %v1305_v10, %v1321_v32  ;;  %v1326_v5 = vadd.s32 127, %v1325_v1 }
 0x1dd   : > { %v1569_v50 = vor.u32 8388608, %v1568_v54  ;;  %v1579_v21 = vshrl.u32 %v13805_v14, %v1576_v7  ;;  %v1578_v13 = vshll.u32 %v13803_v9, %v1575_v36  ;;  %v1581_v49 = vshll.u32 %v13805_v14, %v1575_v36 }
 0x1de   : > { %13808 = vst [vmem:[#allocation21_spill] sm:$0xff] %v9392_v29  ;;  %v1518_v16 = vadd.s32 536870912, %v1517_v37  ;;  %v1582_v38 = vshrl.u32 %v13806_v15, %v1576_v7  ;;  %v9400_v28 = vsel %vm7695_vm11, 0, %v7694_v31  ;;  %v1574_v2 = vshrl.u32 %v1573_v8, 5 }
 0x1df   : > { %v1584_v59 = vshll.u32 %v13806_v15, %v1575_v36  ;;  %v1585_v43 = vshrl.u32 %v13801_v53, %v1576_v7  ;;  %v1580_v60 = vor.u32 %v1579_v21, %v1578_v13  ;;  %v1587_v39 = vshll.u32 %v13801_v53, %v1575_v36 }
 0x1e0   : > { %v9404_v61 = vshrl.u32 %v1518_v16, 30  ;;  %v1583_v54 = vor.u32 %v1582_v38, %v1581_v49  ;;  %v1588_v1 = vshrl.u32 %v13609_v3, %v1576_v7  ;;  %v1590_v44 = vshll.u32 %v13609_v3, %v1575_v36 }
 0x1e1   : > { %v1586_v32 = vor.u32 %v1585_v43, %v1584_v59  ;;  %v1591_v51 = vshrl.u32 %v13607_v6, %v1576_v7  ;;  %v1327_v31 = vshll.u32 %v1326_v5, 23  ;;  %v1609_v4 = vshll.u32 %v1569_v50, 8 }
 0x1e2   : > { %13809 = vst [vmem:[#allocation22_spill] sm:$0xff] %v9404_v61  ;;  %v1520_v8 = vshll.u32 %v9404_v61, 30  ;;  %v1429_v55 = vsub.s32 4294967266, %v9400_v28  ;;  %v1589_v16 = vor.u32 %v1588_v1, %v1587_v39  ;;  %v1668_v13 = vand.u32 2139095040, %v9392_v29 }
 0x1e3   : > { %v1592_v21 = vor.u32 %v1591_v51, %v1590_v44  ;;  %v1577_v38 = vshrl.u32 %v13803_v9, %v1576_v7  ;;  %vm1593_vm12 = vcmp.lt.s32.totalorder %v1574_v2, 1  ;;  %vm1596_vm13 = vcmp.lt.s32.totalorder %v1574_v2, 4 }
 0x1e4   : > { %v9414_v49 = vsub.s32 %v1517_v37, %v1520_v8  ;;  %vm1595_vm14 = vcmp.lt.s32.totalorder %v1574_v2, 3  ;;  %v1598_v36 = vsel %vm1596_vm13, %v1586_v32, 2102212464  ;;  %v1601_v5 = vsel %vm1593_vm12, %v1580_v60, %v1583_v54 }
 0x1e5   : > { %v1602_v59 = vsel %vm1596_vm13, %v1589_v16, 920167782  ;;  %vm1594_vm15 = vcmp.lt.s32.totalorder %v1574_v2, 2  ;;  %v1605_v26 = vsel %vm1593_vm12, %v1583_v54, %v1586_v32  ;;  %v1425_v39 = vsub.s32 32, %v9400_v28 }
 0x1e6   : > { %v1523_v50 = vsub.s32 0, %v9414_v49  ;;  %v1603_v43 = vsel %vm1595_vm14, %v1586_v32, %v1602_v59  ;;  %v1430_v1 = vadd.s32 127, %v1429_v55  ;;  %v1606_v37 = vsel %vm1596_vm13, %v1592_v21, 1326507024 }
 0x1e7   : > { %v1604_v44 = vsel %vm1594_vm15, %v1601_v5, %v1603_v43  ;;  %v1597_v7 = vsel %vm1593_vm12, %v1577_v38, %v1580_v60  ;;  %v1599_v8 = vsel %vm1595_vm14, %v1583_v54, %v1598_v36  ;;  %v1607_v6 = vsel %vm1595_vm14, %v1589_v16, %v1606_v37 }
 0x1e8   : > { %v7697_v51 = vmin.u32 %v1523_v50, %v9414_v49  ;;  %v13810_v3 = vand.u32 2147483647, %v9066_v23  ;;  %v13811_v10 = vmov 0  ;;  %v1608_v59 = vsel %vm1594_vm15, %v1605_v26, %v1607_v6  ;;  %v9440_v26 = vpop.f32.mrb[15].mxu0 }
 0x1e9   : > { %v9428_v32 = vmul.u32.u64.low %v1609_v4, %v1604_v44  ;;  %v9429_v61 = vmul.u32.u64.high %v1609_v4, %v1604_v44, %v9428_v32  ;;  %v1669_v55 = vshrl.u32 %v1668_v13, 23  ;;  %v1409_v21 = vadd.s32 %v9287_v42, %v9300_v12 }
 0x1ea   : > { %vm9423_vm1 = vcmp.le.f32.partialorder %v13810_v3, 0.7853982  ;;  %v1525_v5 = vclz %v7697_v51  ;;  %v9434_v60 = vmul.u32.u64.low %v1609_v4, %v1608_v59  ;;  %v9435_v54 = vmul.u32.u64.high %v1609_v4, %v1608_v59, %v9434_v60 }
 0x1eb   : > { %v13812_v10 = vsel %vm9423_vm1, 4294967295, %v13811_v10  ;;  %v1322_v3 = vshll.u32 %v9284_v25, %v9360_v11  ;;  %v1328_v16 = vor.u32 4788187, %v1327_v31  ;;  %v1600_v38 = vsel %vm1594_vm15, %v1597_v7, %v1599_v8 }
 0x1ec   : > { %13813 = vst [vmem:[#allocation23_spill] sm:$0xff] %v13812_v10  ;;  %v7704_v36 = vadd.s32 4294967169, %v1669_v55  ;;  %v1427_v6 = vshrl.u32 %v1409_v21, %v1425_v39  ;;  %v1431_v50 = vshll.u32 %v1430_v1, 23  ;;  %v7698_v43 = vadd.s32 4294967294, %v1525_v5 }
 0x1ed   : > { %v13814_v13 = vand.u32 2147483647, %v9392_v29  ;;  %v1324_v42 = vor.u32 %v9394_v57, %v1322_v3  ;;  %v1619_v12 = vadd.s32 1, %v9429_v61  ;;  %v797_v25 = vadd.f32 %v9093_v52, %v9062_v18 }
 0x1ee   : > { %v1675_v37 = vadd.s32 1, %v7704_v36  ;;  %v1426_v11 = vshll.u32 %v9342_v20, %v9400_v28  ;;  %vm7699_vm2 = vcmp.lt.s32.totalorder %v7698_v43, 0  ;;  %v1616_v2 = vmul.u32 %v1609_v4, %v1600_v38 }
 0x1ef   : > { %v1672_v44 = vand.u32 8388607, %v13814_v13  ;;  %vm1618_vm4 = vc.u32 %v9435_v54, %v9428_v32  ;;  %v1329_v31 = vand.u32 2147483647, %v1328_v16  ;;  %v9452_v39 = vsel %vm7699_vm2, 0, %v7698_v43 }
 0x1f0   : > { %v1620_v1 = vsel %vm1618_vm4, %v1619_v12, %v9429_v61  ;;  %vm1676_vm5 = vcmp.gt.s32.totalorder %v1675_v37, 0  ;;  %v9455_v57 = vor.u32 %v1427_v6, %v1426_v11  ;;  %v9457_v51 = vor.u32 4788187, %v1431_v50 }
 0x1f1   : > { %v1621_v7 = vadd.s32 %v1620_v1, %v1616_v2  ;;  %v1673_v52 = vor.u32 8388608, %v1672_v44  ;;  %v1331_v8 = vcvt.s32.f32 %v1324_v42  ;;  %v1533_v20 = vsub.s32 4294967266, %v9452_v39 }
 0x1f2   : > { %v1677_v28 = vsel %vm1676_vm5, %v1675_v37, 0  ;;  %v9460_v4 = vmul.f32 10.0, %v797_v25  ;;  %v9466_v59 = vsel %vm9423_vm1, %v9066_v23, %v9385_v47  ;;  %v13816_v61 = vmov 920167782  }
 0x1f3   : > { %v9470_v55 = vshll.u32 %v13816_v61, %v9253_v62  ;;  %v13817_v21 = vmov 1326507024   ;;  %v1622_v60 = vadd.s32 536870912, %v1621_v7  ;;  %v9477_v16 = vmul.f32 %v1331_v8, %v1329_v31 }
 0x1f4   : > { %13815 = vst [vmem:[#allocation24_spill] sm:$0xff] %v9460_v4  ;;  %v9474_v5 = vshrl.u32 %v13817_v21, %v9303_v58  ;;  %v1513_v38 = vadd.s32 %v9356_v35, %v9363_v40  ;;  %v1679_v36 = vand.u32 31, %v1677_v28  ;;  %v9485_v43 = vshll.u32 %v1673_v52, 8 }
 0x1f5   : > { %v9483_v50 = vshrl.u32 %v1622_v60, 30  ;;  %v1529_v13 = vsub.s32 32, %v9452_v39  ;;  %v1534_v44 = vadd.s32 127, %v1533_v20  ;;  %v1772_v12 = vand.u32 2139095040, %v9460_v4 }
 0x1f6   : > { %v1680_v42 = vsub.s32 32, %v1679_v36  ;;  %v9490_v25 = vshrl.u32 %v1677_v28, 5  ;;  %v1682_v35 = vshll.u32 %v13803_v9, %v1679_v36  ;;  %v1685_v40 = vshll.u32 %v13805_v14, %v1679_v36 }
 0x1f7   : > { %13818 = vst [vmem:[#allocation25_spill] sm:$0xff] %v9483_v50  ;;  %v1624_v37 = vshll.u32 %v9483_v50, 30  ;;  %v1688_v31 = vshll.u32 %v13806_v15, %v1679_v36  ;;  %v1691_v8 = vshll.u32 %v13801_v53, %v1679_v36  ;;  %v1694_v28 = vshll.u32 %v13816_v61, %v1679_v36 }
 0x1f8   : > { %v1683_v11 = vshrl.u32 %v13805_v14, %v1680_v42  ;;  %v1686_v2 = vshrl.u32 %v13806_v15, %v1680_v42  ;;  %v1689_v1 = vshrl.u32 %v13801_v53, %v1680_v42  ;;  %v1692_v20 = vshrl.u32 %v13816_v61, %v1680_v42 }
 0x1f9   : > { %v9498_v52 = vsub.s32 %v1621_v7, %v1624_v37  ;;  %v1695_v3 = vshrl.u32 %v13817_v21, %v1680_v42  ;;  %vm13664_vm7 = vcmp.lt.s32.totalorder %v9072_v30, 0  ;;  %v1530_v50 = vshll.u32 %v9414_v49, %v9452_v39  ;;  %v8472_v49 = vld [vmem:[%s13819_s2 + $0x4] ss:$8 sps:$4 sm:$0xff]  }
 0x1fa   : > { %v1684_v60 = vor.u32 %v1683_v11, %v1682_v35  ;;  %v1687_v6 = vor.u32 %v1686_v2, %v1685_v40  ;;  %v1690_v47 = vor.u32 %v1689_v1, %v1688_v31  ;;  %v1693_v7 = vor.u32 %v1692_v20, %v1691_v8  ;;  %v8474_v2 = vld [vmem:[%s13819_s2] ss:$8 sps:$4 sm:$0xff]   ;;  %2705 = vmatprep.subr.bf16.mxu1 %v8472_v49 }
 0x1fb   : > { %v1627_v63 = vsub.s32 0, %v9498_v52  ;;  %v13622_v37 = vand.u32 2147483647, %v9460_v4  ;;  %v1535_v10 = vshll.u32 %v1534_v44, 23  ;;  %v1696_v23 = vor.u32 %v1695_v3, %v1694_v28  ;;  %2706 = vmatpush1.bf16.msra.mxu1 %v8474_v2 }
 0x1fc   : > { %vm1697_vm8 = vcmp.lt.s32.totalorder %v9490_v25, 1  ;;  %v1773_v36 = vshrl.u32 %v1772_v12, 23  ;;  %vm1699_vm9 = vcmp.lt.s32.totalorder %v9490_v25, 3  ;;  %vm1700_vm10 = vcmp.lt.s32.totalorder %v9490_v25, 4 }
 0x1fd   : > { %v7701_v35 = vmin.u32 %v1627_v63, %v9498_v52  ;;  %v1705_v40 = vsel %vm1697_vm8, %v1684_v60, %v1687_v6  ;;  %v13820_v39 = vand.u32 2147483647, %v9072_v30  ;;  %v1531_v44 = vshrl.u32 %v1513_v38, %v1529_v13 }
 0x1fe   : > { %v1706_v12 = vsel %vm1700_vm10, %v1693_v7, 920167782  ;;  %v1709_v63 = vsel %vm1697_vm8, %v1687_v6, %v1690_v47  ;;  %v1710_v11 = vsel %vm1700_vm10, %v1696_v23, 1326507024  ;;  %vm13650_vm12 = vcmp.lt.s32.totalorder %v9143_v48, 0 }
 0x1ff   : > { %vm9520_vm11 = vcmp.le.f32.partialorder %v13820_v39, 0.7853982  ;;  %v1629_v31 = vclz %v7701_v35  ;;  %vm1698_vm13 = vcmp.lt.s32.totalorder %v9490_v25, 2  ;;  %v1702_v1 = vsel %vm1700_vm10, %v1690_v47, 2102212464 }
 0x200   : > { %v1707_v8 = vsel %vm1699_vm9, %v1690_v47, %v1706_v12  ;;  %v1681_v38 = vshrl.u32 %v13803_v9, %v1680_v42  ;;  %v1711_v23 = vsel %vm1699_vm9, %v1693_v7, %v1710_v11  ;;  %v1776_v20 = vand.u32 8388607, %v13622_v37  ;;  %v8475_v47 = vld [vmem:[%s13819_s2 + $0x14] ss:$8 sps:$4 sm:$0xff]  }
 0x201   : > { %v1708_v13 = vsel %vm1698_vm13, %v1705_v40, %v1707_v8  ;;  %v1536_v28 = vor.u32 4788187, %v1535_v10  ;;  %v7702_v35 = vadd.s32 4294967294, %v1629_v31  ;;  %v1712_v39 = vsel %vm1698_vm13, %v1709_v63, %v1711_v23  ;;  %v8477_v10 = vld [vmem:[%s13819_s2 + $0x10] ss:$8 sps:$4 sm:$0xff]   ;;  %2707 = vmatprep.subr.bf16.mxu1 %v8475_v47 }
 0x202   : > { %v7708_v62 = vadd.s32 4294967169, %v1773_v36  ;;  %v1701_v42 = vsel %vm1697_vm8, %v1681_v38, %v1684_v60  ;;  %v1703_v7 = vsel %vm1699_vm9, %v1687_v6, %v1702_v1  ;;  %v1532_v12 = vor.u32 %v1531_v44, %v1530_v50  ;;  %2708 = vmatpush1.bf16.msra.mxu1 %v8477_v10  ;;  %v8478_v8 = vld [vmem:[%s13819_s2 + $0x24] ss:$8 sps:$4 sm:$0xff]   ;;  %v8480_v38 = vld [vmem:[%s13819_s2 + $0x20] ss:$8 sps:$4 sm:$0xff]  }
 0x203   : > { %v9550_v40 = vmul.u32.u64.low %v9485_v43, %v1712_v39  ;;  %v9551_v49 = vmul.u32.u64.high %v9485_v43, %v1712_v39, %v9550_v40  ;;  %v9557_v36 = vmul.u32.u64.low %v9485_v43, %v1708_v13  ;;  %v9558_v63 = vmul.u32.u64.high %v9485_v43, %v1708_v13, %v9557_v36  ;;  %2709 = vmatprep.subr.bf16.mxu1 %v8478_v8 }
 0x204   : > { %v1779_v11 = vadd.s32 1, %v7708_v62  ;;  %8573 = vcosq.f32 %v9466_v59  ;;  %v13823_v6 = vxor.u32 2147483648, %v9390_v56  ;;  %v1333_v2 = vxor.u32 2147483648, %v9477_v16 }
 0x205   : > { %v13824_v31 = vand.u32 2147483647, %v9457_v51  ;;  %v13825_v50 = vcvt.s32.f32 %v9455_v57  ;;  %v1537_v1 = vand.u32 2147483647, %v1536_v28  ;;  %vm7703_vm14 = vcmp.lt.s32.totalorder %v7702_v35, 0 }
 0x206   : > { %v1126_v60 = vsel %vm13664_vm7, %v13823_v6, %v9390_v56  ;;  %v1704_v62 = vsel %vm1698_vm13, %v1701_v42, %v1703_v7  ;;  %vm1780_vm15 = vcmp.gt.s32.totalorder %v1779_v11, 0  ;;  %vm1722_vm2 = vc.u32 %v9551_v49, %v9557_v36  ;;  %2710 = vmatpush1.bf16.msra.mxu1 %v8480_v38 }
 0x207   : > { %v9572_v44 = vmul.f32 %v13825_v50, %v13824_v31  ;;  %v1777_v56 = vor.u32 8388608, %v1776_v20  ;;  %v1781_v51 = vsel %vm1780_vm15, %v1779_v11, 0  ;;  %v801_v57 = vadd.f32 %v9108_v33, %v9059_v17 }
 0x208   : > { %8575 = vsinq.f32 %v9466_v59  ;;  %v9590_v25 = vsel %vm9520_vm11, %v9072_v30, %v1126_v60  ;;  %v1539_v13 = vcvt.s32.f32 %v1532_v12  ;;  %v1723_v23 = vadd.s32 1, %v9558_v63  ;;  %v8483_v12 = vld [vmem:[%s13819_s2 + $0x30] ss:$8 sps:$4 sm:$0xff]  }
 0x209   : > { %v9596_v20 = vsel %vm13650_vm12, %v1333_v2, %v9477_v16  ;;  %v9599_v33 = vsel %vm7703_vm14, 0, %v7702_v35  ;;  %v1720_v28 = vmul.u32 %v9485_v43, %v1704_v62  ;;  %v1783_v59 = vand.u32 31, %v1781_v51  ;;  %v8481_v35 = vld [vmem:[%s13819_s2 + $0x34] ss:$8 sps:$4 sm:$0xff]  }
 0x20a   : > { %v9603_v47 = vmul.f32 %v1539_v13, %v1537_v1  ;;  %v1724_v42 = vsel %vm1722_vm2, %v1723_v23, %v9558_v63  ;;  %v803_v16 = vadd.f32 %v9166_v19, %v9062_v18  ;;  %v9614_v40 = vshll.u32 %v1777_v56, 8  ;;  %2711 = vmatprep.subr.bf16.mxu1 %v8481_v35 }
 0x20b   : > { %v1725_v7 = vadd.s32 %v1724_v42, %v1720_v28  ;;  %v1784_v43 = vsub.s32 32, %v1783_v59  ;;  %v9616_v10 = vmul.f32 10.0, %v801_v57  ;;  %v1637_v11 = vsub.s32 4294967266, %v9599_v33  ;;  %2712 = vmatpush1.bf16.msra.mxu1 %v8483_v12  ;;  %v8486_v42 = vld [vmem:[%s13819_s2 + $0x40] ss:$8 sps:$4 sm:$0xff]  }
 0x20c   : > { %v9622_v63 = vshrl.u32 %v1781_v51, 5  ;;  %v1786_v19 = vshll.u32 %v13803_v9, %v1783_v59  ;;  %v1789_v6 = vshll.u32 %v13805_v14, %v1783_v59  ;;  %v1792_v50 = vshll.u32 %v13806_v15, %v1783_v59  ;;  %v8484_v51 = vld [vmem:[%s13819_s2 + $0x44] ss:$8 sps:$4 sm:$0xff]  }
 0x20d   : > { %13826 = vst [vmem:[#allocation26_spill] sm:$0xff] %v9616_v10  ;;  %v1726_v60 = vadd.s32 536870912, %v1725_v7  ;;  %v1787_v2 = vshrl.u32 %v13805_v14, %v1784_v43  ;;  %v1790_v31 = vshrl.u32 %v13806_v15, %v1784_v43  ;;  %v1793_v1 = vshrl.u32 %v13801_v53, %v1784_v43  ;;  %2713 = vmatprep.subr.bf16.mxu1 %v8484_v51 }
 0x20e   : > { %v1795_v62 = vshll.u32 %v13801_v53, %v1783_v59  ;;  %v1796_v8 = vshrl.u32 %v13816_v61, %v1784_v43  ;;  %v1798_v56 = vshll.u32 %v13816_v61, %v1783_v59  ;;  %v9636_v57 = vpop.eup %8573  ;;  %v1799_v28 = vshrl.u32 %v13817_v21, %v1784_v43 }
 0x20f   : > { %13827 = vst [vmem:[#allocation27_spill] sm:$0xff] %v9636_v57  ;;  %v9638_v38 = vshrl.u32 %v1726_v60, 30  ;;  %v1788_v13 = vor.u32 %v1787_v2, %v1786_v19  ;;  %v1791_v23 = vor.u32 %v1790_v31, %v1789_v6  ;;  %v13829_v35 = vand.u32 2147483647, %v9143_v48  ;;  %2714 = vmatpush1.bf16.msra.mxu1 %v8486_v42 }
 0x210   : > { %v13830_v59 = vmov 0  ;;  %vm13663_vm5 = vcmp.lt.s32.totalorder %v9173_v34, 0  ;;  %v1638_v12 = vadd.s32 127, %v1637_v11  ;;  %v1794_v37 = vor.u32 %v1793_v1, %v1792_v50  ;;  %v8487_v1 = vld [vmem:[%s13819_s2 + $0x54] ss:$8 sps:$4 sm:$0xff]  }
 0x211   : > { %13828 = vst [vmem:[#allocation28_spill] sm:$0xff] %v9638_v38  ;;  %vm9646_vm4 = vcmp.le.f32.partialorder %v13829_v35, 0.7853982  ;;  %v1797_v60 = vor.u32 %v1796_v8, %v1795_v62  ;;  %v9651_v39 = vmul.f32 10.0, %v803_v16  ;;  %v1728_v19 = vshll.u32 %v9638_v38, 30  ;;  %2715 = vmatprep.subr.bf16.mxu1 %v8487_v1 }
 0x212   : > { %v13831_v59 = vsel %vm9646_vm4, 4294967295, %v13830_v59  ;;  %v1800_v6 = vor.u32 %v1799_v28, %v1798_v56  ;;  %vm1801_vm8 = vcmp.lt.s32.totalorder %v9622_v63, 1  ;;  %vm1804_vm9 = vcmp.lt.s32.totalorder %v9622_v63, 4  ;;  %v9656_v2 = vpop.eup %8575 }
 0x213   : > { %13832 = vst [vmem:[#allocation29_spill] sm:$0xff] %v13831_v59  ;;  %13833 = vst [vmem:[#allocation30_spill] sm:$0xff] %v9656_v2  ;;  %v1785_v31 = vshrl.u32 %v13803_v9, %v1784_v43  ;;  %v1806_v11 = vsel %vm1804_vm9, %v1794_v37, 2102212464  ;;  %v1809_v50 = vsel %vm1801_vm8, %v1788_v13, %v1791_v23  ;;  %v1876_v16 = vand.u32 2139095040, %v9616_v10 }
 0x214   : > { %v9665_v62 = vsub.s32 %v1725_v7, %v1728_v19  ;;  %vm1803_vm10 = vcmp.lt.s32.totalorder %v9622_v63, 3  ;;  %v1810_v8 = vsel %vm1804_vm9, %v1797_v60, 920167782  ;;  %v1813_v56 = vsel %vm1801_vm8, %v1791_v23, %v1794_v37  ;;  %v8489_v43 = vld [vmem:[%s13819_s2 + $0x50] ss:$8 sps:$4 sm:$0xff]  }
 0x215   : > { %vm1802_vm13 = vcmp.lt.s32.totalorder %v9622_v63, 2  ;;  %v1805_v51 = vsel %vm1801_vm8, %v1785_v31, %v1788_v13  ;;  %v1811_v28 = vsel %vm1803_vm10, %v1794_v37, %v1810_v8  ;;  %v1814_v42 = vsel %vm1804_vm9, %v1800_v6, 1326507024  ;;  %2716 = vmatpush1.bf16.msra.mxu1 %v8489_v43  ;;  %v8490_v6 = vld [vmem:[%s13819_s2 + $0x64] ss:$8 sps:$4 sm:$0xff]  }
 0x216   : > { %v1731_v7 = vsub.s32 0, %v9665_v62  ;;  %v1807_v35 = vsel %vm1803_vm10, %v1791_v23, %v1806_v11  ;;  %v1812_v19 = vsel %vm1802_vm13, %v1809_v50, %v1811_v28  ;;  %v1815_v38 = vsel %vm1803_vm10, %v1797_v60, %v1814_v42  ;;  %2717 = vmatprep.subr.bf16.mxu1 %v8490_v6 }
 0x217   : > { %v1633_v57 = vsub.s32 32, %v9599_v33  ;;  %v1816_v2 = vsel %vm1802_vm13, %v1813_v56, %v1815_v38  ;;  %v9683_v13 = vmul.u32.u64.low %v9614_v40, %v1812_v19  ;;  %v9684_v37 = vmul.u32.u64.high %v9614_v40, %v1812_v19, %v9683_v13  ;;  %v8492_v38 = vld [vmem:[%s13819_s2 + $0x60] ss:$8 sps:$4 sm:$0xff]  }
 0x218   : > { %8577 = vcosq.f32 %v9590_v25  ;;  %v7705_v23 = vmin.u32 %v1731_v7, %v9665_v62  ;;  %v9693_v60 = vmul.u32.u64.low %v9614_v40, %v1816_v2  ;;  %v9694_v31 = vmul.u32.u64.high %v9614_v40, %v1816_v2, %v9693_v60 }
 0x219   : > { %v1617_v11 = vadd.s32 %v9428_v32, %v9435_v54  ;;  %v1639_v50 = vshll.u32 %v1638_v12, 23  ;;  %v1808_v1 = vsel %vm1802_vm13, %v1805_v51, %v1807_v35  ;;  %v1877_v8 = vshrl.u32 %v1876_v16, 23  ;;  %2718 = vmatpush1.bf16.msra.mxu1 %v8492_v38  ;;  %v8498_v38 = vld [vmem:[%s13819_s2 + $0x80] ss:$8 sps:$4 sm:$0xff]  }
 0x21a   : > { %v1337_v56 = vsel %vm9646_vm4, %v9143_v48, %v9596_v20  ;;  %v13834_v2 = vxor.u32 2147483648, %v9572_v44  ;;  %v1733_v28 = vclz %v7705_v23  ;;  %v1980_v32 = vand.u32 2139095040, %v9651_v39 }
 0x21b   : > { %v1541_v54 = vxor.u32 2147483648, %v9603_v47  ;;  %v1635_v63 = vshrl.u32 %v1617_v11, %v1633_v57  ;;  %v1827_v12 = vadd.s32 1, %v9684_v37  ;;  %v7712_v16 = vadd.s32 4294967169, %v1877_v8  ;;  %v8495_v57 = vld [vmem:[%s13819_s2 + $0x70] ss:$8 sps:$4 sm:$0xff]  }
 0x21c   : > { %v1438_v43 = vsel %vm13663_vm5, %v13834_v2, %v9572_v44  ;;  %v1634_v51 = vshll.u32 %v9498_v52, %v9599_v33  ;;  %v7706_v20 = vadd.s32 4294967294, %v1733_v28  ;;  %v1824_v42 = vmul.u32 %v9614_v40, %v1808_v1  ;;  %v8493_v44 = vld [vmem:[%s13819_s2 + $0x74] ss:$8 sps:$4 sm:$0xff]  }
 0x21d   : > { %vm1826_vm14 = vc.u32 %v9694_v31, %v9683_v13  ;;  %v1640_v7 = vor.u32 4788187, %v1639_v50  ;;  %v1883_v19 = vadd.s32 1, %v7712_v16  ;;  %v1981_v6 = vshrl.u32 %v1980_v32, 23  ;;  %2719 = vmatprep.subr.bf16.mxu1 %v8493_v44 }
 0x21e   : > { %v1828_v35 = vsel %vm1826_vm14, %v1827_v12, %v9684_v37  ;;  %8579 = vsinq.f32 %v9590_v25  ;;  %v9730_v52 = vor.u32 %v9378_v46, %v9322_v24  ;;  %v13835_v33 = vand.u32 2147483647, %v9173_v34  ;;  %2720 = vmatpush1.bf16.msra.mxu1 %v8495_v57  ;;  %v8496_v25 = vld [vmem:[%s13819_s2 + $0x84] ss:$8 sps:$4 sm:$0xff]  }
 0x21f   : > { %v13836_v40 = vmov 0  ;;  %v1829_v23 = vadd.s32 %v1828_v35, %v1824_v42  ;;  %v1636_v60 = vor.u32 %v1635_v63, %v1634_v51  ;;  %vm7707_vm2 = vcmp.lt.s32.totalorder %v7706_v20, 0  ;;  %2721 = vmatprep.subr.bf16.mxu1 %v8496_v25  ;;  %v8499_v42 = vld [vmem:[%s13819_s2 + $0x94] ss:$8 sps:$4 sm:$0xff]  }
 0x220   : > { %vm9734_vm15 = vcmp.le.f32.partialorder %v13835_v33, 0.7853982  ;;  %v13627_v37 = vand.u32 2147483647, %v9616_v10  ;;  %vm1884_vm8 = vcmp.gt.s32.totalorder %v1883_v19, 0  ;;  %8581 = vcosq.f32 %v1337_v56 }
 0x221   : > { %v13837_v40 = vsel %vm9734_vm15, 4294967295, %v13836_v40  ;;  %v9745_v24 = vsel %vm9734_vm15, %v9173_v34, %v1438_v43  ;;  %vm13649_vm9 = vcmp.lt.s32.totalorder %v9212_v27, 0  ;;  %v1830_v46 = vadd.s32 536870912, %v1829_v23 }
 0x222   : > { %13838 = vst [vmem:[#allocation31_spill] sm:$0xff] %v13837_v40  ;;  %v1542_v11 = vsel %vm13649_vm9, %v1541_v54, %v9603_v47  ;;  %v1641_v50 = vand.u32 2147483647, %v1640_v7  ;;  %v1885_v1 = vsel %vm1884_vm8, %v1883_v19, 0  ;;  %v7716_v8 = vadd.s32 4294967169, %v1981_v6  ;;  %v9754_v2 = vpop.eup %8577  ;;  %2722 = vmatpush1.bf16.msra.mxu1 %v8498_v38 }
 0x223   : > { %13839 = vst [vmem:[#allocation32_spill] sm:$0xff] %v9754_v2  ;;  %8583 = vsinq.f32 %v1337_v56  ;;  %v13840_v43 = vand.u32 2147483647, %v9212_v27  ;;  %v13841_v28 = vmov 0  ;;  %v9763_v32 = vsel %vm7707_vm2, 0, %v7706_v20  ;;  %2723 = vmatprep.subr.bf16.mxu1 %v8499_v42 }
 0x224   : > { %v9765_v63 = vshrl.u32 %v1830_v46, 30  ;;  %8585 = vcosq.f32 %v9745_v24  ;;  %v1643_v47 = vcvt.s32.f32 %v1636_v60  ;;  %v1880_v54 = vand.u32 8388607, %v13627_v37  ;;  %v8501_v19 = vld [vmem:[%s13819_s2 + $0x90] ss:$8 sps:$4 sm:$0xff]  }
 0x225   : > { %vm9758_vm10 = vcmp.le.f32.partialorder %v13840_v43, 0.7853982  ;;  %v1887_v12 = vand.u32 31, %v1885_v1  ;;  %v9777_v16 = vadd.s32 %v9557_v36, %v9551_v49  ;;  %v1741_v57 = vsub.s32 4294967266, %v9763_v32 }
 0x226   : > { %v13842_v28 = vsel %vm9758_vm10, 4294967295, %v13841_v28  ;;  %13844 = vst [vmem:[#allocation34_spill] sm:$0xff] %v9765_v63  ;;  %v9773_v56 = vsel %vm9758_vm10, %v9212_v27, %v1542_v11  ;;  %v1832_v51 = vshll.u32 %v9765_v63, 30  ;;  %v9784_v44 = vmul.f32 %v1643_v47, %v1641_v50  ;;  %2724 = vmatpush1.bf16.msra.mxu1 %v8501_v19  ;;  %v8504_v47 = vld [vmem:[%s13819_s2 + $0xa0] ss:$8 sps:$4 sm:$0xff]  }
 0x227   : > { %13843 = vst [vmem:[#allocation33_spill] sm:$0xff] %v13842_v28  ;;  %v1888_v7 = vsub.s32 32, %v1887_v12  ;;  %v1987_v35 = vadd.s32 1, %v7716_v8  ;;  %v9792_v36 = vshrl.u32 %v1885_v1, 5  ;;  %v1890_v6 = vshll.u32 %v13803_v9, %v1887_v12 }
 0x228   : > { %v9790_v49 = vsub.s32 %v1829_v23, %v1832_v51  ;;  %v1893_v33 = vshll.u32 %v13805_v14, %v1887_v12  ;;  %v1896_v46 = vshll.u32 %v13806_v15, %v1887_v12  ;;  %v8502_v23 = vld [vmem:[%s13819_s2 + $0xa4] ss:$8 sps:$4 sm:$0xff]   ;;  %v9803_v11 = vpop.eup %8579  ;;  %v1899_v1 = vshll.u32 %v13801_v53, %v1887_v12 }
 0x229   : > { %v1891_v60 = vshrl.u32 %v13805_v14, %v1888_v7  ;;  %v1894_v25 = vshrl.u32 %v13806_v15, %v1888_v7  ;;  %v1897_v38 = vshrl.u32 %v13801_v53, %v1888_v7  ;;  %v1900_v8 = vshrl.u32 %v13816_v61, %v1888_v7  ;;  %2725 = vmatprep.subr.bf16.mxu1 %v8502_v23 }
 0x22a   : > { %v1835_v50 = vsub.s32 0, %v9790_v49  ;;  %v1902_v43 = vshll.u32 %v13816_v61, %v1887_v12  ;;  %v1903_v37 = vshrl.u32 %v13817_v21, %v1888_v7  ;;  %v9813_v20 = vpop.eup %8581  ;;  %v1881_v28 = vor.u32 8388608, %v1880_v54  ;;  %2726 = vmatpush1.bf16.msra.mxu1 %v8504_v47 }
 0x22b   : > { %v1892_v51 = vor.u32 %v1891_v60, %v1890_v6  ;;  %v1895_v42 = vor.u32 %v1894_v25, %v1893_v33  ;;  %v1898_v19 = vor.u32 %v1897_v38, %v1896_v46  ;;  %13845 = vst [vmem:[#allocation35_spill] sm:$0xff] %v9813_v20  ;;  %v1901_v27 = vor.u32 %v1900_v8, %v1899_v1  ;;  %v8505_v6 = vld [vmem:[%s13819_s2 + $0xb4] ss:$8 sps:$4 sm:$0xff]  }
 0x22c   : > { %v7709_v63 = vmin.u32 %v1835_v50, %v9790_v49  ;;  %v13846_v59 = vand.u32 2147483647, %v9651_v39  ;;  %v1737_v12 = vsub.s32 32, %v9763_v32  ;;  %v1742_v40 = vadd.s32 127, %v1741_v57  ;;  %2727 = vmatprep.subr.bf16.mxu1 %v8505_v6 }
 0x22d   : > { %v1904_v2 = vor.u32 %v1903_v37, %v1902_v43  ;;  %vm1988_vm13 = vcmp.gt.s32.totalorder %v1987_v35, 0  ;;  %v9822_v33 = vpop.eup %8583  ;;  %vm1905_vm14 = vcmp.lt.s32.totalorder %v9792_v36, 1  ;;  %vm1907_vm2 = vcmp.lt.s32.totalorder %v9792_v36, 3 }
 0x22e   : > { %v1984_v48 = vand.u32 8388607, %v13846_v59  ;;  %13847 = vst [vmem:[#allocation36_spill] sm:$0xff] %v9822_v33  ;;  %v1837_v60 = vclz %v7709_v63  ;;  %vm1908_vm8 = vcmp.lt.s32.totalorder %v9792_v36, 4  ;;  %v8507_v59 = vld [vmem:[%s13819_s2 + $0xb0] ss:$8 sps:$4 sm:$0xff]   ;;  %v9830_v37 = vpop.eup %8585  ;;  %v1913_v54 = vsel %vm1905_vm14, %v1892_v51, %v1895_v42 }
 0x22f   : > { %13848 = vst [vmem:[#allocation37_spill] sm:$0xff] %v9830_v37  ;;  %v1914_v57 = vsel %vm1908_vm8, %v1901_v27, 920167782  ;;  %v1917_v25 = vsel %vm1905_vm14, %v1895_v42, %v1898_v19  ;;  %v1918_v63 = vsel %vm1908_vm8, %v1904_v2, 1326507024  ;;  %v1921_v38 = vshll.u32 %v1881_v28, 8  ;;  %2728 = vmatpush1.bf16.msra.mxu1 %v8507_v59 }
 0x230   : > { %v1915_v46 = vsel %vm1907_vm2, %v1898_v19, %v1914_v57  ;;  %v1985_v23 = vor.u32 8388608, %v1984_v48  ;;  %v807_v50 = vadd.f32 %v9217_v45, %v9059_v17  ;;  %v7710_v1 = vadd.s32 4294967294, %v1837_v60  ;;  %v8508_v2 = vld [vmem:[%s13819_s2 + $0xc4] ss:$8 sps:$4 sm:$0xff]  }
 0x231   : > { %vm1906_vm0 = vcmp.lt.s32.totalorder %v9792_v36, 2  ;;  %v1910_v8 = vsel %vm1908_vm8, %v1898_v19, 2102212464  ;;  %v1919_v43 = vsel %vm1907_vm2, %v1901_v27, %v1918_v63  ;;  %v1889_v47 = vshrl.u32 %v13803_v9, %v1888_v7  ;;  %v8510_v19 = vld [vmem:[%s13819_s2 + $0xc0] ss:$8 sps:$4 sm:$0xff]   ;;  %2729 = vmatprep.subr.bf16.mxu1 %v8508_v2 }
 0x232   : > { %v1916_v48 = vsel %vm1906_vm0, %v1913_v54, %v1915_v46  ;;  %v1920_v45 = vsel %vm1906_vm0, %v1917_v25, %v1919_v43  ;;  %v1989_v28 = vsel %vm1988_vm13, %v1987_v35, 0  ;;  %v1739_v27 = vshrl.u32 %v9777_v16, %v1737_v12 }
 0x233   : > { %v1743_v6 = vshll.u32 %v1742_v40, 23  ;;  %v9856_v60 = vmul.u32.u64.low %v1921_v38, %v1920_v45  ;;  %v9857_v59 = vmul.u32.u64.high %v1921_v38, %v1920_v45, %v9856_v60  ;;  %8587 = vsinq.f32 %v9745_v24  ;;  %2730 = vmatpush1.bf16.msra.mxu1 %v8510_v19  ;;  %v8511_v24 = vld [vmem:[%s13819_s2 + $0xd4] ss:$8 sps:$4 sm:$0xff]  }
 0x234   : > { %v1738_v7 = vshll.u32 %v9665_v62, %v9763_v32  ;;  %v1909_v54 = vsel %vm1905_vm14, %v1889_v47, %v1892_v51  ;;  %v1911_v35 = vsel %vm1907_vm2, %v1895_v42, %v1910_v8  ;;  %vm7711_vm13 = vcmp.lt.s32.totalorder %v7710_v1, 0  ;;  %v8513_v51 = vld [vmem:[%s13819_s2 + $0xd0] ss:$8 sps:$4 sm:$0xff]   ;;  %2731 = vmatprep.subr.bf16.mxu1 %v8511_v24 }
 0x235   : > { %v9866_v57 = vmul.u32.u64.low %v1921_v38, %v1916_v48  ;;  %v9867_v25 = vmul.u32.u64.high %v1921_v38, %v1916_v48, %v9866_v57  ;;  %v1991_v40 = vand.u32 31, %v1989_v28  ;;  %8589 = vcosq.f32 %v9773_v56 }
 0x236   : > { %v9875_v32 = vshll.u32 %v1985_v23, 8  ;;  %v9877_v16 = vmul.f32 10.0, %v807_v50  ;;  %v9882_v42 = vor.u32 %v1739_v27, %v1738_v7  ;;  %v9884_v12 = vor.u32 4788187, %v1743_v6  ;;  %v8516_v27 = vld [vmem:[%s13819_s2 + $0xe0] ss:$8 sps:$4 sm:$0xff]  }
 0x237   : > { %v1912_v63 = vsel %vm1906_vm0, %v1909_v54, %v1911_v35  ;;  %v1992_v46 = vsub.s32 32, %v1991_v40  ;;  %v9889_v8 = vsel %vm7711_vm13, 0, %v7710_v1  ;;  %vm1930_vm14 = vc.u32 %v9857_v59, %v9866_v57  ;;  %2732 = vmatpush1.bf16.msra.mxu1 %v8513_v51  ;;  %v8514_v1 = vld [vmem:[%s13819_s2 + $0xe4] ss:$8 sps:$4 sm:$0xff]  }
 0x238   : > { %v9893_v23 = vshrl.u32 %v1989_v28, 5  ;;  %v1994_v50 = vshll.u32 %v13803_v9, %v1991_v40  ;;  %v1931_v43 = vadd.s32 1, %v9867_v25  ;;  %v1997_v47 = vshll.u32 %v13805_v14, %v1991_v40  ;;  %2733 = vmatprep.subr.bf16.mxu1 %v8514_v1 }
 0x239   : > { %v1995_v2 = vshrl.u32 %v13805_v14, %v1992_v46  ;;  %v1998_v36 = vshrl.u32 %v13806_v15, %v1992_v46  ;;  %v1928_v48 = vmul.u32 %v1921_v38, %v1912_v63  ;;  %v2000_v45 = vshll.u32 %v13806_v15, %v1991_v40 }
 0x23a   : > { %v2001_v28 = vshrl.u32 %v13801_v53, %v1992_v46  ;;  %v2003_v19 = vshll.u32 %v13801_v53, %v1991_v40  ;;  %v1932_v6 = vsel %vm1930_vm14, %v1931_v43, %v9867_v25  ;;  %v2004_v54 = vshrl.u32 %v13816_v61, %v1992_v46  ;;  %v8517_v25 = vld [vmem:[%s13819_s2 + $0xf4] ss:$8 sps:$4 sm:$0xff]  }
 0x23b   : > { %v1996_v60 = vor.u32 %v1995_v2, %v1994_v50  ;;  %v1999_v7 = vor.u32 %v1998_v36, %v1997_v47  ;;  %v1841_v35 = vsub.s32 32, %v9889_v8  ;;  %v1933_v38 = vadd.s32 %v1932_v6, %v1928_v48  ;;  %2734 = vmatpush1.bf16.msra.mxu1 %v8516_v27 }
 0x23c   : > { %v2002_v24 = vor.u32 %v2001_v28, %v2000_v45  ;;  %v2084_v51 = vand.u32 2139095040, %v9877_v16  ;;  %vm13653_vm0 = vcmp.lt.s32.totalorder %v9311_v41, 0  ;;  %v2005_v63 = vor.u32 %v2004_v54, %v2003_v19  ;;  %2735 = vmatprep.subr.bf16.mxu1 %v8517_v25 }
 0x23d   : > { %v2006_v62 = vshll.u32 %v13816_v61, %v1991_v40  ;;  %v2007_v20 = vshrl.u32 %v13817_v21, %v1992_v46  ;;  %vm2009_vm2 = vcmp.lt.s32.totalorder %v9893_v23, 1  ;;  %v9920_v50 = vpop.eup %8587  ;;  %v1934_v43 = vadd.s32 536870912, %v1933_v38  ;;  %v8519_v40 = vld [vmem:[%s13819_s2 + $0xf0] ss:$8 sps:$4 sm:$0xff]  }
 0x23e   : > { %13849 = vst [vmem:[#allocation38_spill] sm:$0xff] %v9920_v50  ;;  %v1993_v2 = vshrl.u32 %v13803_v9, %v1992_v46  ;;  %vm2011_vm8 = vcmp.lt.s32.totalorder %v9893_v23, 3  ;;  %vm2012_vm13 = vcmp.lt.s32.totalorder %v9893_v23, 4  ;;  %v2017_v1 = vsel %vm2009_vm2, %v1996_v60, %v1999_v7 }
 0x23f   : > { %v2008_v47 = vor.u32 %v2007_v20, %v2006_v62  ;;  %v2014_v36 = vsel %vm2012_vm13, %v2002_v24, 2102212464  ;;  %v2018_v48 = vsel %vm2012_vm13, %v2005_v63, 920167782  ;;  %v9930_v45 = vpop.eup %8589  ;;  %v1845_v28 = vsub.s32 4294967266, %v9889_v8  ;;  %2736 = vmatpush1.bf16.msra.mxu1 %v8519_v40 }
 0x240   : > { %13850 = vst [vmem:[#allocation39_spill] sm:$0xff] %v9930_v45  ;;  %v9933_v46 = vshrl.u32 %v1934_v43, 30  ;;  %vm2010_vm14 = vcmp.lt.s32.totalorder %v9893_v23, 2  ;;  %v2019_v19 = vsel %vm2011_vm8, %v2002_v24, %v2018_v48  ;;  %v2013_v20 = vsel %vm2009_vm2, %v1993_v2, %v1996_v60 }
 0x241   : > { %v2020_v62 = vsel %vm2010_vm14, %v2017_v1, %v2019_v19  ;;  %v2021_v27 = vsel %vm2009_vm2, %v1999_v7, %v2002_v24  ;;  %v2022_v6 = vsel %vm2012_vm13, %v2008_v47, 1326507024  ;;  %v2015_v25 = vsel %vm2011_vm8, %v1999_v7, %v2014_v36 }
 0x242   : > { %13851 = vst [vmem:[#allocation40_spill] sm:$0xff] %v9933_v46  ;;  %v1936_v54 = vshll.u32 %v9933_v46, 30  ;;  %v2023_v43 = vsel %vm2011_vm8, %v2005_v63, %v2022_v6  ;;  %v2085_v48 = vshrl.u32 %v2084_v51, 23  ;;  %v1825_v60 = vadd.s32 %v9683_v13, %v9694_v31 }
 0x243   : > { %v2024_v2 = vsel %vm2010_vm14, %v2021_v27, %v2023_v43  ;;  %v9954_v1 = vmul.u32.u64.low %v9875_v32, %v2020_v62  ;;  %v9955_v24 = vmul.u32.u64.high %v9875_v32, %v2020_v62, %v9954_v1  ;;  %v1745_v40 = vand.u32 2147483647, %v9884_v12 }
 0x244   : > { %v9959_v47 = vsub.s32 %v1933_v38, %v1936_v54  ;;  %v9962_v7 = vmul.u32.u64.low %v9875_v32, %v2024_v2  ;;  %v9963_v36 = vmul.u32.u64.high %v9875_v32, %v2024_v2, %v9962_v7  ;;  %v1843_v51 = vshrl.u32 %v1825_v60, %v1841_v35 }
 0x245   : > { %v1846_v63 = vadd.s32 127, %v1845_v28  ;;  %v2016_v13 = vsel %vm2010_vm14, %v2013_v20, %v2015_v25  ;;  %v7720_v31 = vadd.s32 4294967169, %v2085_v48  ;;  %v13852_v19 = vxor.u32 2147483648, %v9784_v44 }
 0x246   : > { %v1747_v12 = vcvt.s32.f32 %v9882_v42  ;;  %v1939_v38 = vsub.s32 0, %v9959_v47  ;;  %v809_v27 = vadd.f32 %v9291_v0, %v9062_v18  ;;  %v1842_v35 = vshll.u32 %v9790_v49, %v9889_v8 }
 0x247   : > { %v1646_v62 = vsel %vm13653_vm0, %v13852_v19, %v9784_v44  ;;  %v2035_v23 = vadd.s32 1, %v9955_v24  ;;  %v13640_v28 = vand.u32 2147483647, %v9877_v16  ;;  %v2091_v20 = vadd.s32 1, %v7720_v31 }
 0x248   : > { %v9980_v6 = vmul.f32 %v1747_v12, %v1745_v40  ;;  %v7713_v54 = vmin.u32 %v1939_v38, %v9959_v47  ;;  %v2032_v44 = vmul.u32 %v9875_v32, %v2016_v13  ;;  %vm2034_vm2 = vc.u32 %v9963_v36, %v9954_v1 }
 0x249   : > { %v9986_v42 = vor.u32 %v1843_v51, %v1842_v35  ;;  %v1847_v0 = vshll.u32 %v1846_v63, 23  ;;  %v2036_v25 = vsel %vm2034_vm2, %v2035_v23, %v9955_v24  ;;  %vm2092_vm8 = vcmp.gt.s32.totalorder %v2091_v20, 0 }
 0x24a   : > { %v1941_v49 = vclz %v7713_v54  ;;  %v2037_v8 = vadd.s32 %v2036_v25, %v2032_v44  ;;  %v2093_v43 = vsel %vm2092_vm8, %v2091_v20, 0  ;;  %v9989_v48 = vmul.f32 10.0, %v809_v27 }
 0x24b   : > { %8591 = vsinq.f32 %v9773_v56  ;;  %v13853_v32 = vand.u32 2147483647, %v9311_v41  ;;  %v13854_v2 = vmov 0  ;;  %v2095_v40 = vand.u32 31, %v2093_v43 }
 0x24c   : > { %v7714_v51 = vadd.s32 4294967294, %v1941_v49  ;;  %v2038_v63 = vadd.s32 536870912, %v2037_v8  ;;  %v10006_v13 = vor.u32 4788187, %v1847_v0  ;;  %v1929_v31 = vadd.s32 %v9866_v57, %v9857_v59 }
 0x24d   : > { %vm9996_vm13 = vcmp.le.f32.partialorder %v13853_v32, 0.7853982  ;;  %v2096_v19 = vsub.s32 32, %v2095_v40  ;;  %v2088_v38 = vand.u32 8388607, %v13640_v28  ;;  %v2094_v27 = vshrl.u32 %v2093_v43, 5 }
 0x24e   : > { %v13855_v2 = vsel %vm9996_vm13, 4294967295, %v13854_v2  ;;  %v10003_v24 = vsel %vm9996_vm13, %v9311_v41, %v1646_v62  ;;  %vm7715_vm14 = vcmp.lt.s32.totalorder %v7714_v51, 0  ;;  %v10011_v12 = vshrl.u32 %v2038_v63, 30 }
 0x24f   : > { %13856 = vst [vmem:[#allocation41_spill] sm:$0xff] %v13855_v2  ;;  %v2188_v62 = vand.u32 2139095040, %v9989_v48  ;;  %v2098_v35 = vshll.u32 %v13803_v9, %v2095_v40  ;;  %v2099_v23 = vshrl.u32 %v13805_v14, %v2096_v19  ;;  %v2102_v20 = vshrl.u32 %v13806_v15, %v2096_v19 }
 0x250   : > { %13857 = vst [vmem:[#allocation42_spill] sm:$0xff] %v10011_v12  ;;  %v2040_v54 = vshll.u32 %v10011_v12, 30  ;;  %v2101_v59 = vshll.u32 %v13805_v14, %v2095_v40  ;;  %v2104_v57 = vshll.u32 %v13806_v15, %v2095_v40  ;;  %v2107_v44 = vshll.u32 %v13801_v53, %v2095_v40 }
 0x251   : > { %v10023_v0 = vsel %vm7715_vm14, 0, %v7714_v51  ;;  %v2105_v25 = vshrl.u32 %v13801_v53, %v2096_v19  ;;  %v2108_v49 = vshrl.u32 %v13816_v61, %v2096_v19  ;;  %v2110_v43 = vshll.u32 %v13816_v61, %v2095_v40 }
 0x252   : > { %v10028_v32 = vsub.s32 %v2037_v8, %v2040_v54  ;;  %v2100_v63 = vor.u32 %v2099_v23, %v2098_v35  ;;  %v2103_v28 = vor.u32 %v2102_v20, %v2101_v59  ;;  %v2111_v60 = vshrl.u32 %v13817_v21, %v2096_v19 }
 0x253   : > { %v1849_v56 = vand.u32 2147483647, %v10006_v13  ;;  %v2089_v7 = vor.u32 8388608, %v2088_v38  ;;  %v2106_v46 = vor.u32 %v2105_v25, %v2104_v57  ;;  %v2109_v45 = vor.u32 %v2108_v49, %v2107_v44  ;;  %v13859_v25 = vld [vmem:[#allocation19_spill] sm:$0xff] }
 0x254   : > { %v1949_v51 = vsub.s32 4294967266, %v10023_v0  ;;  %v2043_v12 = vsub.s32 0, %v10028_v32  ;;  %v2112_v33 = vor.u32 %v2111_v60, %v2110_v43  ;;  %v1945_v8 = vsub.s32 32, %v10023_v0 }
 0x255   : > { %v10035_v50 = vpop.eup %8591  ;;  %v2097_v40 = vshrl.u32 %v13803_v9, %v2096_v19  ;;  %vm2113_vm2 = vcmp.lt.s32.totalorder %v2094_v27, 1  ;;  %v2189_v35 = vshrl.u32 %v2188_v62, 23  ;;  %vm2115_vm8 = vcmp.lt.s32.totalorder %v2094_v27, 3 }
 0x256   : > { %13858 = vst [vmem:[#allocation43_spill] sm:$0xff] %v10035_v50  ;;  %v7717_v13 = vmin.u32 %v2043_v12, %v10028_v32  ;;  %vm2116_vm14 = vcmp.lt.s32.totalorder %v2094_v27, 4  ;;  %v2121_v38 = vsel %vm2113_vm2, %v2100_v63, %v2103_v28  ;;  %v2125_v60 = vsel %vm2113_vm2, %v2103_v28, %v2106_v46 }
 0x257   : > { %v2118_v23 = vsel %vm2116_vm14, %v2106_v46, 2102212464  ;;  %v2122_v20 = vsel %vm2116_vm14, %v2109_v45, 920167782  ;;  %v2126_v54 = vsel %vm2116_vm14, %v2112_v33, 1326507024  ;;  %v2117_v37 = vsel %vm2113_vm2, %v2097_v40, %v2100_v63 }
 0x258   : > { %v1950_v59 = vadd.s32 127, %v1949_v51  ;;  %v2045_v57 = vclz %v7717_v13  ;;  %vm2114_vm9 = vcmp.lt.s32.totalorder %v2094_v27, 2  ;;  %v2123_v44 = vsel %vm2115_vm8, %v2106_v46, %v2122_v20 }
 0x259   : > { %vm1180_vm12 = vcmp.lt.s32.totalorder %v13859_v25, 4  ;;  %v2124_v19 = vsel %vm2114_vm9, %v2121_v38, %v2123_v44  ;;  %v2127_v12 = vsel %vm2115_vm8, %v2109_v45, %v2126_v54  ;;  %v2129_v62 = vshll.u32 %v2089_v7, 8 }
 0x25a   : > { %v7724_v49 = vadd.s32 4294967169, %v2189_v35  ;;  %v7718_v43 = vadd.s32 4294967294, %v2045_v57  ;;  %v2119_v50 = vsel %vm2115_vm8, %v2103_v28, %v2118_v23  ;;  %v2128_v33 = vsel %vm2114_vm9, %v2125_v60, %v2127_v12 }
 0x25b   : > { %v10049_v51 = vmul.u32.u64.low %v2129_v62, %v2128_v33  ;;  %v10050_v13 = vmul.u32.u64.high %v2129_v62, %v2128_v33, %v10049_v51  ;;  %v10052_v2 = vmul.u32.u64.low %v2129_v62, %v2124_v19  ;;  %v10053_v46 = vmul.u32.u64.high %v2129_v62, %v2124_v19, %v10052_v2 }
 0x25c   : > { %v1947_v20 = vshrl.u32 %v1929_v31, %v1945_v8  ;;  %v1951_v38 = vshll.u32 %v1950_v59, 23  ;;  %vm7719_vm14 = vcmp.lt.s32.totalorder %v7718_v43, 0  ;;  %v2195_v45 = vadd.s32 1, %v7724_v49 }
 0x25d   : > { %8593 = vcosq.f32 %v10003_v24  ;;  %vm13657_vm0 = vcmp.lt.s32.totalorder %v9392_v29, 0  ;;  %v2120_v7 = vsel %vm2114_vm9, %v2117_v37, %v2119_v50  ;;  %v813_v28 = vadd.f32 %v9371_v22, %v9059_v17 }
 0x25e   : > { %v13860_v63 = vxor.u32 2147483648, %v9980_v6  ;;  %v13861_v31 = vcvt.s32.f32 %v9986_v42  ;;  %v1946_v35 = vshll.u32 %v9959_v47, %v10023_v0  ;;  %v10072_v23 = vsel %vm7719_vm14, 0, %v7718_v43 }
 0x25f   : > { %vm2138_vm9 = vc.u32 %v10050_v13, %v10052_v2  ;;  %v2139_v17 = vadd.s32 1, %v10053_v46  ;;  %v13862_v22 = vand.u32 2147483647, %v9989_v48  ;;  %v815_v50 = vadd.f32 %v9440_v26, %v9062_v18 }
 0x260   : > { %v1750_v40 = vsel %vm13657_vm0, %v13860_v63, %v9980_v6  ;;  %v10068_v8 = vmul.f32 %v13861_v31, %v1849_v56  ;;  %v10081_v6 = vor.u32 %v1947_v20, %v1946_v35  ;;  %v10083_v42 = vor.u32 4788187, %v1951_v38 }
 0x261   : > { %v2192_v37 = vand.u32 8388607, %v13862_v22  ;;  %v2136_v56 = vmul.u32 %v2129_v62, %v2120_v7  ;;  %vm2196_vm2 = vcmp.gt.s32.totalorder %v2195_v45, 0  ;;  %v2053_v47 = vsub.s32 4294967266, %v10072_v23 }
 0x262   : > { %v2140_v27 = vsel %vm2138_vm9, %v2139_v17, %v10053_v46  ;;  %v2197_v0 = vsel %vm2196_vm2, %v2195_v45, 0  ;;  %v10087_v60 = vmul.f32 10.0, %v813_v28  ;;  %v10092_v54 = vsel %vm1180_vm12, %v9730_v52, 920167782 }
 0x263   : > { %8595 = vsinq.f32 %v10003_v24  ;;  %v13863_v18 = vand.u32 2147483647, %v9392_v29  ;;  %v13864_v26 = vmov 0  ;;  %v2141_v59 = vadd.s32 %v2140_v27, %v2136_v56 }
 0x264   : > { %v10109_v19 = vadd.s32 %v9954_v1, %v9963_v36  ;;  %v2199_v12 = vand.u32 31, %v2197_v0  ;;  %v1953_v24 = vand.u32 2147483647, %v10083_v42  ;;  %v1955_v62 = vcvt.s32.f32 %v10081_v6 }
 0x265   : > { %vm10097_vm8 = vcmp.le.f32.partialorder %v13863_v18, 0.7853982  ;;  %v2142_v49 = vadd.s32 536870912, %v2141_v59  ;;  %v10113_v43 = vmul.f32 10.0, %v815_v50  ;;  %v2054_v33 = vadd.s32 127, %v2053_v47 }
 0x266   : > { %v13865_v26 = vsel %vm10097_vm8, 4294967295, %v13864_v26  ;;  %v10104_v57 = vsel %vm10097_vm8, %v9392_v29, %v1750_v40  ;;  %v2193_v51 = vor.u32 8388608, %v2192_v37  ;;  %v2200_v46 = vsub.s32 32, %v2199_v12 }
 0x267   : > { %13866 = vst [vmem:[#allocation19_spill] sm:$0xff] %v13865_v26  ;;  %v2292_v20 = vand.u32 2139095040, %v10087_v60  ;;  %v10116_v38 = vshrl.u32 %v2142_v49, 30  ;;  %v2198_v45 = vshrl.u32 %v2197_v0, 5  ;;  %v2202_v7 = vshll.u32 %v13803_v9, %v2199_v12  ;;  %v10120_v36 = vpop.eup %8593 }
 0x268   : > { %v2205_v1 = vshll.u32 %v13805_v14, %v2199_v12  ;;  %13868 = vst [vmem:[#allocation45_spill] sm:$0xff] %v10120_v36  ;;  %v2203_v28 = vshrl.u32 %v13805_v14, %v2200_v46  ;;  %v2206_v63 = vshrl.u32 %v13806_v15, %v2200_v46  ;;  %v2208_v40 = vshll.u32 %v13806_v15, %v2199_v12 }
 0x269   : > { %13867 = vst [vmem:[#allocation44_spill] sm:$0xff] %v10116_v38  ;;  %v2209_v31 = vshrl.u32 %v13801_v53, %v2200_v46  ;;  %v2144_v35 = vshll.u32 %v10116_v38, 30  ;;  %v2211_v17 = vshll.u32 %v13801_v53, %v2199_v12  ;;  %v2212_v22 = vshrl.u32 %v13816_v61, %v2200_v46 }
 0x26a   : > { %v2215_v37 = vshrl.u32 %v13817_v21, %v2200_v46  ;;  %v2204_v50 = vor.u32 %v2203_v28, %v2202_v7  ;;  %v2207_v6 = vor.u32 %v2206_v63, %v2205_v1  ;;  %v2214_v56 = vshll.u32 %v13816_v61, %v2199_v12 }
 0x26b   : > { %v2210_v42 = vor.u32 %v2209_v31, %v2208_v40  ;;  %v10131_v47 = vsub.s32 %v2141_v59, %v2144_v35  ;;  %v2213_v27 = vor.u32 %v2212_v22, %v2211_v17  ;;  %vm2217_vm14 = vcmp.lt.s32.totalorder %v2198_v45, 1 }
 0x26c   : > { %v2233_v0 = vshll.u32 %v2193_v51, 8  ;;  %v2216_v18 = vor.u32 %v2215_v37, %v2214_v56  ;;  %vm2220_vm9 = vcmp.lt.s32.totalorder %v2198_v45, 4  ;;  %v2225_v49 = vsel %vm2217_vm14, %v2204_v50, %v2207_v6 }
 0x26d   : > { %v13661_v44 = vand.u32 2147483647, %v10087_v60  ;;  %v10135_v38 = vpop.eup %8595  ;;  %v2147_v26 = vsub.s32 0, %v10131_v47  ;;  %vm2219_vm2 = vcmp.lt.s32.totalorder %v2198_v45, 3  ;;  %v2226_v7 = vsel %vm2220_vm9, %v2213_v27, 920167782 }
 0x26e   : > { %v2293_v1 = vshrl.u32 %v2292_v20, 23  ;;  %v2049_v59 = vsub.s32 32, %v10072_v23  ;;  %v2055_v12 = vshll.u32 %v2054_v33, 23  ;;  %vm2218_vm0 = vcmp.lt.s32.totalorder %v2198_v45, 2 }
 0x26f   : > { %v2227_v51 = vsel %vm2219_vm2, %v2210_v42, %v2226_v7  ;;  %v7721_v28 = vmin.u32 %v2147_v26, %v10131_v47  ;;  %v2222_v63 = vsel %vm2220_vm9, %v2210_v42, 2102212464  ;;  %v2229_v31 = vsel %vm2217_vm14, %v2207_v6, %v2210_v42 }
 0x270   : > { %v2228_v40 = vsel %vm2218_vm0, %v2225_v49, %v2227_v51  ;;  %v2201_v35 = vshrl.u32 %v13803_v9, %v2200_v46  ;;  %v2230_v17 = vsel %vm2220_vm9, %v2216_v18, 1326507024  ;;  %v10151_v33 = vmul.f32 %v1955_v62, %v1953_v24 }
 0x271   : > { %v10147_v22 = vmul.u32.u64.low %v2233_v0, %v2228_v40  ;;  %v10148_v20 = vmul.u32.u64.high %v2233_v0, %v2228_v40, %v10147_v22  ;;  %v2149_v37 = vclz %v7721_v28  ;;  %v2231_v56 = vsel %vm2219_vm2, %v2213_v27, %v2230_v17 }
 0x272   : > { %v7728_v26 = vadd.s32 4294967169, %v2293_v1  ;;  %v2221_v7 = vsel %vm2217_vm14, %v2201_v35, %v2204_v50  ;;  %v2223_v49 = vsel %vm2219_vm2, %v2207_v6, %v2222_v63  ;;  %v2232_v42 = vsel %vm2218_vm0, %v2229_v31, %v2231_v56 }
 0x273   : > { %v2296_v46 = vand.u32 8388607, %v13661_v44  ;;  %v7722_v18 = vadd.s32 4294967294, %v2149_v37  ;;  %v10159_v51 = vmul.u32.u64.low %v2233_v0, %v2232_v42  ;;  %v10160_v40 = vmul.u32.u64.high %v2233_v0, %v2232_v42, %v10159_v51 }
 0x274   : > { %v2299_v29 = vadd.s32 1, %v7728_v26  ;;  %v13869_v24 = vor.u32 %v9474_v5, %v9470_v55  ;;  %8597 = vcosq.f32 %v10104_v57  ;;  %v2051_v50 = vshrl.u32 %v10109_v19, %v2049_v59 }
 0x275   : > { %v10171_v6 = vor.u32 4788187, %v2055_v12  ;;  %vm7723_vm14 = vcmp.lt.s32.totalorder %v7722_v18, 0  ;;  %v2224_v27 = vsel %vm2218_vm0, %v2221_v7, %v2223_v49  ;;  %v2243_v1 = vadd.s32 1, %v10148_v20 }
 0x276   : > { %v10167_v62 = vsel %vm1180_vm12, %v13869_v24, 1326507024  ;;  %vm2300_vm9 = vcmp.gt.s32.totalorder %v2299_v29, 0  ;;  %8599 = vsinq.f32 %v10104_v57  ;;  %vm13662_vm2 = vcmp.lt.s32.totalorder %v9460_v4, 0 }
 0x277   : > { %v2297_v55 = vor.u32 8388608, %v2296_v46  ;;  %v2301_v5 = vsel %vm2300_vm9, %v2299_v29, 0  ;;  %v13870_v28 = vxor.u32 2147483648, %v10068_v8  ;;  %v2050_v45 = vshll.u32 %v10028_v32, %v10072_v23 }
 0x278   : > { %v13660_v12 = vand.u32 2147483647, %v10113_v43  ;;  %v10188_v63 = vsel %vm7723_vm14, 0, %v7722_v18  ;;  %v2240_v57 = vmul.u32 %v2233_v0, %v2224_v27  ;;  %vm2242_vm0 = vc.u32 %v10160_v40, %v10147_v22 }
 0x279   : > { %v10182_v19 = vsel %vm13662_vm2, %v13870_v28, %v10068_v8  ;;  %v2303_v29 = vand.u32 31, %v2301_v5  ;;  %v10192_v31 = vor.u32 %v2051_v50, %v2050_v45  ;;  %v2137_v8 = vadd.s32 %v10052_v2, %v10050_v13 }
 0x27a   : > { %v2244_v17 = vsel %vm2242_vm0, %v2243_v1, %v10148_v20  ;;  %v10198_v23 = vshll.u32 %v2297_v55, 8  ;;  %v2396_v56 = vand.u32 2139095040, %v10113_v43  ;;  %v2157_v0 = vsub.s32 4294967266, %v10188_v63 }
 0x27b   : > { %v2245_v37 = vadd.s32 %v2244_v17, %v2240_v57  ;;  %v2304_v32 = vsub.s32 32, %v2303_v29  ;;  %v2302_v26 = vshrl.u32 %v2301_v5, 5  ;;  %v2306_v7 = vshll.u32 %v13803_v9, %v2303_v29 }
 0x27c   : > { %v10205_v49 = vand.u32 8388607, %v13660_v12  ;;  %v2309_v13 = vshll.u32 %v13805_v14, %v2303_v29  ;;  %v2312_v46 = vshll.u32 %v13806_v15, %v2303_v29  ;;  %v2315_v51 = vshll.u32 %v13801_v53, %v2303_v29 }
 0x27d   : > { %v2246_v42 = vadd.s32 536870912, %v2245_v37  ;;  %v2307_v2 = vshrl.u32 %v13805_v14, %v2304_v32  ;;  %v2310_v20 = vshrl.u32 %v13806_v15, %v2304_v32  ;;  %v2313_v18 = vshrl.u32 %v13801_v53, %v2304_v32 }
 0x27e   : > { %v2316_v24 = vshrl.u32 %v13816_v61, %v2304_v32  ;;  %v10214_v50 = vpop.eup %8597  ;;  %v2397_v5 = vshrl.u32 %v2396_v56, 23  ;;  %v13873_v28 = vand.u32 2147483647, %v9460_v4  ;;  %v13874_v45 = vmov 0 }
 0x27f   : > { %13871 = vst [vmem:[#allocation46_spill] sm:$0xff] %v10214_v50  ;;  %v10216_v27 = vshrl.u32 %v2246_v42, 30  ;;  %v2308_v1 = vor.u32 %v2307_v2, %v2306_v7  ;;  %v2311_v55 = vor.u32 %v2310_v20, %v2309_v13  ;;  %v2314_v57 = vor.u32 %v2313_v18, %v2312_v46 }
 0x280   : > { %vm10220_vm14 = vcmp.le.f32.partialorder %v13873_v28, 0.7853982  ;;  %v2317_v17 = vor.u32 %v2316_v24, %v2315_v51  ;;  %v2318_v12 = vshll.u32 %v13816_v61, %v2303_v29  ;;  %v2319_v44 = vshrl.u32 %v13817_v21, %v2304_v32  ;;  %v10226_v35 = vpop.eup %8599 }
 0x281   : > { %13872 = vst [vmem:[#allocation47_spill] sm:$0xff] %v10216_v27  ;;  %v13875_v45 = vsel %vm10220_vm14, 4294967295, %v13874_v45  ;;  %13877 = vst [vmem:[#allocation49_spill] sm:$0xff] %v10226_v35  ;;  %vm13684_vm9 = vcmp.lt.s32.totalorder %v9616_v10, 0  ;;  %v2153_v7 = vsub.s32 32, %v10188_v63  ;;  %v2158_v42 = vadd.s32 127, %v2157_v0 }
 0x282   : > { %13876 = vst [vmem:[#allocation48_spill] sm:$0xff] %v13875_v45  ;;  %v2248_v56 = vshll.u32 %v10216_v27, 30  ;;  %v2305_v2 = vshrl.u32 %v13803_v9, %v2304_v32  ;;  %v2320_v13 = vor.u32 %v2319_v44, %v2318_v12  ;;  %vm2321_vm0 = vcmp.lt.s32.totalorder %v2302_v26, 1 }
 0x283   : > { %vm2323_vm2 = vcmp.lt.s32.totalorder %v2302_v26, 3  ;;  %vm2324_vm5 = vcmp.lt.s32.totalorder %v2302_v26, 4  ;;  %v2329_v46 = vsel %vm2321_vm0, %v2308_v1, %v2311_v55  ;;  %vm2322_vm7 = vcmp.lt.s32.totalorder %v2302_v26, 2 }
 0x284   : > { %v10232_v20 = vsub.s32 %v2245_v37, %v2248_v56  ;;  %v2326_v29 = vsel %vm2324_vm5, %v2314_v57, 2102212464  ;;  %v2330_v18 = vsel %vm2324_vm5, %v2317_v17, 920167782  ;;  %v2333_v24 = vsel %vm2321_vm0, %v2311_v55, %v2314_v57 }
 0x285   : > { %v2331_v51 = vsel %vm2323_vm2, %v2314_v57, %v2330_v18  ;;  %v7732_v28 = vadd.s32 4294967169, %v2397_v5  ;;  %v13878_v0 = vand.u32 2147483647, %v9616_v10  ;;  %v13879_v59 = vmov 0 }
 0x286   : > { %v2251_v44 = vsub.s32 0, %v10232_v20  ;;  %v2325_v12 = vsel %vm2321_vm0, %v2305_v2, %v2308_v1  ;;  %v2332_v37 = vsel %vm2322_vm7, %v2329_v46, %v2331_v51  ;;  %v2334_v32 = vsel %vm2324_vm5, %v2320_v13, 1326507024 }
 0x287   : > { %vm10237_vm6 = vcmp.le.f32.partialorder %v13878_v0, 0.7853982  ;;  %v2327_v56 = vsel %vm2323_vm2, %v2311_v55, %v2326_v29  ;;  %v2335_v50 = vsel %vm2323_vm2, %v2317_v17, %v2334_v32  ;;  %v2155_v5 = vshrl.u32 %v2137_v8, %v2153_v7 }
 0x288   : > { %v13880_v59 = vsel %vm10237_vm6, 4294967295, %v13879_v59  ;;  %v10246_v18 = vmul.u32.u64.low %v10198_v23, %v2332_v37  ;;  %v10247_v57 = vmul.u32.u64.high %v10198_v23, %v2332_v37, %v10246_v18  ;;  %v2159_v0 = vshll.u32 %v2158_v42, 23 }
 0x289   : > { %13881 = vst [vmem:[#allocation50_spill] sm:$0xff] %v13880_v59  ;;  %v7725_v35 = vmin.u32 %v2251_v44, %v10232_v20  ;;  %v2336_v27 = vsel %vm2322_vm7, %v2333_v24, %v2335_v50  ;;  %v2059_v1 = vcvt.s32.f32 %v10192_v31  ;;  %v2403_v55 = vadd.s32 1, %v7732_v28  ;;  %v13884_v24 = vld [vmem:[#allocation5_spill] sm:$0xff] }
 0x28a   : > { %v10254_v2 = vmul.u32.u64.low %v10198_v23, %v2336_v27  ;;  %v10255_v13 = vmul.u32.u64.high %v10198_v23, %v2336_v27, %v10254_v2  ;;  %v1857_v17 = vsel %vm10220_vm14, %v9460_v4, %v10182_v19  ;;  %v2154_v8 = vshll.u32 %v10131_v47, %v10188_v63 }
 0x28b   : > { %v2253_v7 = vclz %v7725_v35  ;;  %v2328_v42 = vsel %vm2322_vm7, %v2325_v12, %v2327_v56  ;;  %v13882_v50 = vxor.u32 2147483648, %v10151_v33  ;;  %v13883_v27 = vand.u32 2147483647, %v10171_v6 }
 0x28c   : > { %v2347_v46 = vadd.s32 1, %v10247_v57  ;;  %vm2404_vm5 = vcmp.gt.s32.totalorder %v2403_v55, 0  ;;  %v10274_v19 = vor.u32 %v2155_v5, %v2154_v8  ;;  %v10276_v51 = vor.u32 4788187, %v2159_v0 }
 0x28d   : > { %v1958_v31 = vsel %vm13684_vm9, %v13882_v50, %v10151_v33  ;;  %v10271_v29 = vmul.f32 %v2059_v1, %v13883_v27  ;;  %v2401_v47 = vor.u32 8388608, %v10205_v49  ;;  %v2405_v63 = vsel %vm2404_vm5, %v2403_v55, 0 }
 0x28e   : > { %8601 = vcosq.f32 %v1857_v17  ;;  %v2344_v35 = vmul.u32 %v10198_v23, %v2328_v42  ;;  %vm2346_vm7 = vc.u32 %v10255_v13, %v10246_v18  ;;  %v2407_v33 = vand.u32 31, %v2405_v63 }
 0x28f   : > { %8603 = vsinq.f32 %v1857_v17  ;;  %v7726_v6 = vadd.s32 4294967294, %v2253_v7  ;;  %v2348_v26 = vsel %vm2346_vm7, %v2347_v46, %v10247_v57  ;;  %v13670_v28 = vand.u32 2147483647, %v13884_v24 }
 0x290   : > { %v10287_v44 = vsel %vm10237_vm6, %v9616_v10, %v1958_v31  ;;  %v2349_v12 = vadd.s32 %v2348_v26, %v2344_v35  ;;  %v2408_v37 = vsub.s32 32, %v2407_v33  ;;  %v2161_v23 = vand.u32 2147483647, %v10276_v51  ;;  %v13886_v26 = vld [vmem:[#allocation9_spill] sm:$0xff] }
 0x291   : > { %v2163_v32 = vcvt.s32.f32 %v10274_v19  ;;  %v10294_v56 = vadd.s32 %v10147_v22, %v10160_v40  ;;  %v10296_v57 = vshll.u32 %v2401_v47, 8  ;;  %v2410_v0 = vshll.u32 %v13803_v9, %v2407_v33 }
 0x292   : > { %v2350_v5 = vadd.s32 536870912, %v2349_v12  ;;  %v2411_v1 = vshrl.u32 %v13805_v14, %v2408_v37  ;;  %v2414_v2 = vshrl.u32 %v13806_v15, %v2408_v37  ;;  %vm7727_vm2 = vcmp.lt.s32.totalorder %v7726_v6, 0 }
 0x293   : > { %v2413_v55 = vshll.u32 %v13805_v14, %v2407_v33  ;;  %v2416_v17 = vshll.u32 %v13806_v15, %v2407_v33  ;;  %v2417_v8 = vshrl.u32 %v13801_v53, %v2408_v37  ;;  %v2406_v22 = vshrl.u32 %v2405_v63, 5 }
 0x294   : > { %v10304_v7 = vshrl.u32 %v2350_v5, 30  ;;  %v2412_v40 = vor.u32 %v2411_v1, %v2410_v0  ;;  %v10308_v42 = vand.u32 8388607, %v13670_v28  ;;  %v2419_v27 = vshll.u32 %v13801_v53, %v2407_v33  ;;  %v13887_v0 = vld [vmem:[#allocation10_spill] sm:$0xff] }
 0x295   : > { %v2415_v50 = vor.u32 %v2414_v2, %v2413_v55  ;;  %v2418_v31 = vor.u32 %v2417_v8, %v2416_v17  ;;  %v2420_v46 = vshrl.u32 %v13816_v61, %v2408_v37  ;;  %v10312_v19 = vsel %vm7727_vm2, 0, %v7726_v6 }
 0x296   : > { %13885 = vst [vmem:[#allocation5_spill] sm:$0xff] %v10304_v7  ;;  %v2352_v51 = vshll.u32 %v10304_v7, 30  ;;  %v2422_v47 = vshll.u32 %v13816_v61, %v2407_v33  ;;  %v2423_v35 = vshrl.u32 %v13817_v21, %v2408_v37  ;;  %v954_v5 = vshll.u32 %v13803_v9, %v13886_v26 }
 0x297   : > { %v2421_v63 = vor.u32 %v2420_v46, %v2419_v27  ;;  %v955_v1 = vshrl.u32 %v13805_v14, %v13887_v0  ;;  %v958_v2 = vshrl.u32 %v13806_v15, %v13887_v0  ;;  %vm2425_vm0 = vcmp.lt.s32.totalorder %v2406_v22, 1 }
 0x298   : > { %v10323_v55 = vpop.eup %8601  ;;  %v10325_v6 = vsub.s32 %v2349_v12, %v2352_v51  ;;  %v2424_v17 = vor.u32 %v2423_v35, %v2422_v47  ;;  %vm2428_vm5 = vcmp.lt.s32.totalorder %v2406_v22, 4  ;;  %v2261_v8 = vsub.s32 4294967266, %v10312_v19 }
 0x299   : > { %13888 = vst [vmem:[#allocation9_spill] sm:$0xff] %v10323_v55  ;;  %v10327_v33 = vpop.eup %8603  ;;  %v2409_v27 = vshrl.u32 %v13803_v9, %v2408_v37  ;;  %v2430_v46 = vsel %vm2428_vm5, %v2418_v31, 2102212464  ;;  %v2433_v28 = vsel %vm2425_vm0, %v2412_v40, %v2415_v50  ;;  %vm2427_vm7 = vcmp.lt.s32.totalorder %v2406_v22, 3 }
 0x29a   : > { %13889 = vst [vmem:[#allocation10_spill] sm:$0xff] %v10327_v33  ;;  %v2355_v49 = vsub.s32 0, %v10325_v6  ;;  %v2434_v21 = vsel %vm2428_vm5, %v2421_v63, 920167782  ;;  %v2437_v61 = vsel %vm2425_vm0, %v2415_v50, %v2418_v31  ;;  %vm2426_vm2 = vcmp.lt.s32.totalorder %v2406_v22, 2 }
 0x29b   : > { %v2429_v7 = vsel %vm2425_vm0, %v2409_v27, %v2412_v40  ;;  %v2435_v12 = vsel %vm2427_vm7, %v2418_v31, %v2434_v21  ;;  %v2438_v51 = vsel %vm2428_vm5, %v2424_v17, 1326507024  ;;  %v2431_v35 = vsel %vm2427_vm7, %v2415_v50, %v2430_v46  ;;  %v13892_v27 = vld [vmem:[#allocation16_spill] sm:$0xff]  ;;  %v13893_v46 = vld [vmem:[#allocation13_spill] sm:$0xff] }
 0x29c   : > { %v7729_v47 = vmin.u32 %v2355_v49, %v10325_v6  ;;  %v2436_v59 = vsel %vm2426_vm2, %v2433_v28, %v2435_v12  ;;  %v2439_v10 = vsel %vm2427_vm7, %v2421_v63, %v2438_v51  ;;  %v957_v45 = vshll.u32 %v13805_v14, %v13886_v26 }
 0x29d   : > { %v2440_v55 = vsel %vm2426_vm2, %v2437_v61, %v2439_v10  ;;  %v10334_v33 = vmul.u32.u64.low %v10296_v57, %v2436_v59  ;;  %v10335_v37 = vmul.u32.u64.high %v10296_v57, %v2436_v59, %v10334_v33  ;;  %v2262_v4 = vadd.s32 127, %v2261_v8 }
 0x29e   : > { %v2357_v36 = vclz %v7729_v47  ;;  %v10341_v22 = vmul.u32.u64.low %v10296_v57, %v2440_v55  ;;  %v10342_v21 = vmul.u32.u64.high %v10296_v57, %v2440_v55, %v10341_v22  ;;  %v10344_v40 = vmul.f32 %v2163_v32, %v2161_v23 }
 0x29f   : > { %v2432_v49 = vsel %vm2426_vm2, %v2429_v7, %v2431_v35  ;;  %v960_v61 = vshll.u32 %v13806_v15, %v13886_v26  ;;  %v961_v10 = vshrl.u32 %v13801_v53, %v13887_v0  ;;  %v953_v28 = vshrl.u32 %v13803_v9, %v13887_v0 }
 0x2a0   : > { %v7730_v59 = vadd.s32 4294967294, %v2357_v36  ;;  %v956_v50 = vor.u32 %v955_v1, %v954_v5  ;;  %v959_v31 = vor.u32 %v958_v2, %v957_v45  ;;  %v2257_v63 = vsub.s32 32, %v10312_v19  ;;  %v13890_v5 = vld [vmem:[#allocation12_spill] sm:$0xff]  ;;  %v13891_v2 = vld [vmem:[#allocation15_spill] sm:$0xff] }
 0x2a1   : > { %v2451_v55 = vadd.s32 1, %v10335_v37  ;;  %v945_v23 = vor.u32 8388608, %v10308_v42  ;;  %v962_v32 = vor.u32 %v961_v10, %v960_v61  ;;  %vm13686_vm0 = vcmp.lt.s32.totalorder %v9651_v39, 0 }
 0x2a2   : > { %v2263_v7 = vshll.u32 %v2262_v4, 23  ;;  %vm7731_vm5 = vcmp.lt.s32.totalorder %v7730_v59, 0  ;;  %v2448_v26 = vmul.u32 %v10296_v57, %v2432_v49  ;;  %vm2450_vm7 = vc.u32 %v10342_v21, %v10334_v33 }
 0x2a3   : > { %v10359_v36 = vsel %vm7731_vm5, 0, %v7730_v59  ;;  %v2452_v45 = vsel %vm2450_vm7, %v2451_v55, %v10335_v37  ;;  %vm969_vm2 = vcmp.lt.s32.totalorder %v13890_v5, 1  ;;  %vm971_vm9 = vcmp.lt.s32.totalorder %v13890_v5, 3 }
 0x2a4   : > { %v2365_v42 = vsub.s32 4294967266, %v10359_v36  ;;  %v2453_v0 = vadd.s32 %v2452_v45, %v2448_v26  ;;  %v974_v4 = vsel %vm972_vm3, %v962_v32, 2102212464  ;;  %v977_v1 = vsel %vm969_vm2, %v956_v50, %v959_v31  ;;  %v13897_v26 = vld [vmem:[#allocation6_spill] sm:$0xff] }
 0x2a5   : > { %v2258_v57 = vshll.u32 %v10232_v20, %v10312_v19  ;;  %v979_v17 = vsel %vm971_vm9, %v962_v32, %v13891_v2  ;;  %v981_v8 = vsel %vm969_vm2, %v959_v31, %v962_v32  ;;  %v983_v12 = vsel %vm971_vm9, %v13893_v46, %v13892_v27 }
 0x2a6   : > { %v2259_v51 = vshrl.u32 %v10294_v56, %v2257_v63  ;;  %v2454_v47 = vadd.s32 536870912, %v2453_v0  ;;  %vm970_vm5 = vcmp.lt.s32.totalorder %v13890_v5, 2  ;;  %v973_v35 = vsel %vm969_vm2, %v953_v28, %v956_v50  ;;  %v13962_v63 = vld [vmem:[#allocation19_spill] sm:$0xff] }
 0x2a7   : > { %v975_v37 = vsel %vm971_vm9, %v959_v31, %v974_v4  ;;  %v980_v22 = vsel %vm970_vm5, %v977_v1, %v979_v17  ;;  %v984_v49 = vsel %vm970_vm5, %v981_v8, %v983_v12  ;;  %v985_v20 = vshll.u32 %v945_v23, 8 }
 0x2a8   : > { %v2264_v19 = vor.u32 4788187, %v2263_v7  ;;  %v2361_v61 = vsub.s32 32, %v10359_v36  ;;  %v2366_v10 = vadd.s32 127, %v2365_v42  ;;  %v10379_v59 = vshrl.u32 %v2454_v47, 30 }
 0x2a9   : > { %v13894_v56 = vand.u32 2147483647, %v9651_v39  ;;  %vm13685_vm9 = vcmp.lt.s32.totalorder %v9877_v16, 0  ;;  %v10388_v28 = vmul.u32.u64.low %v985_v20, %v984_v49  ;;  %v10389_v50 = vmul.u32.u64.high %v985_v20, %v984_v49, %v10388_v28 }
 0x2aa   : > { %v10391_v31 = vmul.u32.u64.low %v985_v20, %v980_v22  ;;  %v10392_v55 = vmul.u32.u64.high %v985_v20, %v980_v22, %v10391_v31  ;;  %v2345_v23 = vadd.s32 %v10246_v18, %v10255_v13  ;;  %v2456_v32 = vshll.u32 %v10379_v59, 30 }
 0x2ab   : > { %vm10383_vm3 = vcmp.le.f32.partialorder %v13894_v56, 0.7853982  ;;  %v976_v7 = vsel %vm970_vm5, %v973_v35, %v975_v37  ;;  %v1145_v45 = vand.u32 2147483647, %v13897_v26  ;;  %8605 = vcosq.f32 %v10287_v44 }
 0x2ac   : > { %v13898_v42 = vxor.u32 2147483648, %v10271_v29  ;;  %v2165_v1 = vxor.u32 2147483648, %v10344_v40  ;;  %v2260_v2 = vor.u32 %v2259_v51, %v2258_v57  ;;  %v2265_v17 = vand.u32 2147483647, %v2264_v19  ;;  %v13899_v57 = vld [vmem:[#allocation17_spill] sm:$0xff] }
 0x2ad   : > { %v2363_v18 = vshrl.u32 %v2345_v23, %v2361_v61  ;;  %v2367_v13 = vshll.u32 %v2366_v10, 23  ;;  %v10408_v8 = vsub.s32 %v2453_v0, %v2456_v32  ;;  %v992_v5 = vmul.u32 %v985_v20, %v976_v7 }
 0x2ae   : > { %v2062_v4 = vsel %vm13686_vm0, %v13898_v42, %v10271_v29  ;;  %vm994_vm7 = vc.u32 %v10389_v50, %v10391_v31  ;;  %v995_v27 = vadd.s32 1, %v10392_v55  ;;  %v1163_v46 = vshrl.u32 %v13805_v14, %v9303_v58 }
 0x2af   : > { %v2459_v12 = vsub.s32 0, %v10408_v8  ;;  %v1152_v29 = vand.u32 8388607, %v1145_v45  ;;  %v1162_v51 = vshll.u32 %v13803_v9, %v13899_v57  ;;  %v1165_v0 = vshll.u32 %v13805_v14, %v13899_v57 }
 0x2b0   : > { %v996_v47 = vsel %vm994_vm7, %v995_v27, %v10392_v55  ;;  %v1166_v35 = vshrl.u32 %v13806_v15, %v9303_v58  ;;  %v1168_v37 = vshll.u32 %v13806_v15, %v13899_v57  ;;  %v1169_v22 = vshrl.u32 %v13801_v53, %v9303_v58 }
 0x2b1   : > { %v2267_v49 = vcvt.s32.f32 %v2260_v2  ;;  %v2362_v20 = vshll.u32 %v10325_v6, %v10359_v36  ;;  %v7733_v19 = vmin.u32 %v2459_v12, %v10408_v8  ;;  %v997_v61 = vadd.s32 %v996_v47, %v992_v5 }
 0x2b2   : > { %v2368_v10 = vor.u32 4788187, %v2367_v13  ;;  %v1164_v56 = vor.u32 %v1163_v46, %v1162_v51  ;;  %v1167_v28 = vor.u32 %v1166_v35, %v1165_v0  ;;  %v1170_v55 = vor.u32 %v1169_v22, %v1168_v37 }
 0x2b3   : > { %v2065_v23 = vsel %vm10383_vm3, %v9651_v39, %v2062_v4  ;;  %v2166_v32 = vsel %vm13685_vm9, %v2165_v1, %v10344_v40  ;;  %v2461_v7 = vclz %v7733_v19  ;;  %v998_v42 = vadd.s32 536870912, %v997_v61 }
 0x2b4   : > { %v10438_v2 = vmul.f32 %v2267_v49, %v2265_v17  ;;  %v2364_v6 = vor.u32 %v2363_v18, %v2362_v20  ;;  %v1153_v36 = vor.u32 8388608, %v1152_v29  ;;  %v1161_v13 = vshrl.u32 %v13803_v9, %v9303_v58 }
 0x2b5   : > { %v13900_v5 = vand.u32 2147483647, %v9877_v16  ;;  %v13901_v27 = vmov 0  ;;  %v7734_v4 = vadd.s32 4294967294, %v2461_v7  ;;  %v10448_v46 = vshrl.u32 %v998_v42, 30  ;;  %v10452_v40 = vpop.eup %8605 }
 0x2b6   : > { %vm13687_vm5 = vcmp.lt.s32.totalorder %v13859_v25, 1  ;;  %vm1179_vm7 = vcmp.lt.s32.totalorder %v13859_v25, 3  ;;  %v2369_v1 = vand.u32 2147483647, %v2368_v10  ;;  %vm1178_vm0 = vcmp.lt.s32.totalorder %v13859_v25, 2 }
 0x2b7   : > { %vm10444_vm2 = vcmp.le.f32.partialorder %v13900_v5, 0.7853982  ;;  %v1185_v17 = vsel %vm13687_vm5, %v1164_v56, %v1167_v28  ;;  %v1187_v58 = vsel %vm1179_vm7, %v1170_v55, %v10092_v54  ;;  %v1189_v18 = vsel %vm13687_vm5, %v1167_v28, %v1170_v55 }
 0x2b8   : > { %v13902_v27 = vsel %vm10444_vm2, 4294967295, %v13901_v27  ;;  %vm7735_vm9 = vcmp.lt.s32.totalorder %v7734_v4, 0  ;;  %v1000_v12 = vshll.u32 %v10448_v46, 30  ;;  %v1191_v29 = vsel %vm1179_vm7, %v9730_v52, %v10167_v62 }
 0x2b9   : > { %v2464_v57 = vsel %vm7735_vm9, 0, %v7734_v4  ;;  %v1182_v51 = vsel %vm1180_vm12, %v1170_v55, 2102212464  ;;  %v1192_v54 = vsel %vm1178_vm0, %v1189_v18, %v1191_v29  ;;  %v1193_v0 = vshll.u32 %v1153_v36, 8  ;;  %v13910_v29 = vld [vmem:[#allocation7_spill] sm:$0xff] }
 0x2ba   : > { %v2465_v47 = vsub.s32 32, %v2464_v57  ;;  %v2469_v35 = vsub.s32 4294967266, %v2464_v57  ;;  %v10471_v37 = vsub.s32 %v997_v61, %v1000_v12  ;;  %v1188_v22 = vsel %vm1178_vm0, %v1185_v17, %v1187_v58 }
 0x2bb   : > { %v2371_v49 = vcvt.s32.f32 %v2364_v6  ;;  %v2449_v52 = vadd.s32 %v10334_v33, %v10342_v21  ;;  %v10478_v62 = vmul.u32.u64.low %v1193_v0, %v1192_v54  ;;  %v10479_v20 = vmul.u32.u64.high %v1193_v0, %v1192_v54, %v10478_v62  ;;  %v13936_v54 = vld [vmem:[#allocation37_spill] sm:$0xff] }
 0x2bc   : > { %v2470_v19 = vadd.s32 127, %v2469_v35  ;;  %v1003_v10 = vsub.s32 0, %v10471_v37  ;;  %vm13903_vm12 = vcmp.lt.s32.totalorder %v13859_v25, 1  ;;  %v1183_v61 = vsel %vm1179_vm7, %v1167_v28, %v1182_v51 }
 0x2bd   : > { %v1181_v55 = vsel %vm13903_vm12, %v1161_v13, %v1164_v56  ;;  %8607 = vsinq.f32 %v10287_v44  ;;  %v2467_v7 = vshrl.u32 %v2449_v52, %v2465_v47  ;;  %v13904_v33 = vand.u32 2147483647, %v9989_v48 }
 0x2be   : > { %v10488_v42 = vmul.u32.u64.low %v1193_v0, %v1188_v22  ;;  %v10489_v6 = vmul.u32.u64.high %v1193_v0, %v1188_v22, %v10488_v42  ;;  %8609 = vcosq.f32 %v2065_v23  ;;  %v2372_v56 = vmul.f32 %v2371_v49, %v2369_v1 }
 0x2bf   : > { %vm10494_vm5 = vcmp.le.f32.partialorder %v13904_v33, 0.7853982  ;;  %v2471_v36 = vshll.u32 %v2470_v19, 23  ;;  %v7677_v28 = vmin.u32 %v1003_v10, %v10471_v37  ;;  %v2169_v44 = vsel %vm10444_vm2, %v9877_v16, %v2166_v32 }
 0x2c0   : > { %v2269_v13 = vxor.u32 2147483648, %v10438_v2  ;;  %v2466_v5 = vshll.u32 %v10408_v8, %v2464_v57  ;;  %v1184_v4 = vsel %vm1178_vm0, %v1181_v55, %v1183_v61  ;;  %v13907_v17 = vand.u32 2147483647, %v10087_v60  ;;  %v13917_v61 = vld [vmem:[#allocation11_spill] sm:$0xff] }
 0x2c1   : > { %v2472_v1 = vor.u32 4788187, %v2471_v36  ;;  %v1005_v18 = vclz %v7677_v28  ;;  %v1023_v12 = vsub.s32 4, %v10448_v46  ;;  %vm1202_vm12 = vc.u32 %v10479_v20, %v10488_v42 }
 0x2c2   : > { %vm10508_vm7 = vcmp.le.f32.partialorder %v13907_v17, 0.7853982  ;;  %8611 = vsinq.f32 %v2065_v23  ;;  %v2468_v32 = vor.u32 %v2467_v7, %v2466_v5  ;;  %v1203_v8 = vadd.s32 1, %v10489_v6 }
 0x2c3   : > { %v919_v25 = vsub.s32 4, %v13910_v29  ;;  %v2373_v57 = vxor.u32 2147483648, %v2372_v56  ;;  %v13911_v51 = vand.u32 2147483647, %v13884_v24  ;;  %v7678_v47 = vadd.s32 4294967294, %v1005_v18 }
 0x2c4   : > { %v1200_v35 = vmul.u32 %v1193_v0, %v1184_v4  ;;  %8613 = vcosq.f32 %v2169_v44  ;;  %v2473_v22 = vand.u32 2147483647, %v2472_v1  ;;  %vm939_vm9 = vcmp.lt.s32.totalorder %v13884_v24, 0  ;;  %v13915_v0 = vld [vmem:[#allocation4_spill] sm:$0xff] }
 0x2c5   : > { %vm10519_vm0 = vcmp.le.f32.partialorder %v13911_v51, 0.7853982  ;;  %v1204_v23 = vsel %vm1202_vm12, %v1203_v8, %v10489_v6  ;;  %vm13914_vm2 = vcmp.lt.s32.totalorder %v9989_v48, 0  ;;  %vm7679_vm6 = vcmp.lt.s32.totalorder %v7678_v47, 0 }
 0x2c6   : > { %v2270_v49 = vsel %vm13914_vm2, %v2269_v13, %v10438_v2  ;;  %v1024_v52 = vsel %vm939_vm9, %v1023_v12, %v10448_v46  ;;  %v1205_v62 = vadd.s32 %v1204_v23, %v1200_v35  ;;  %v2475_v19 = vcvt.s32.f32 %v2468_v32 }
 0x2c7   : > { %v1008_v10 = vsel %vm7679_vm6, 0, %v7678_v47  ;;  %vm13916_vm8 = vcmp.lt.s32.totalorder %v13915_v0, 0  ;;  %v1127_v7 = vsub.s32 4, %v13917_v61  ;;  %vm13918_vm12 = vcmp.lt.s32.totalorder %v10087_v60, 0  ;;  %v10539_v28 = vpop.eup %8607 }
 0x2c8   : > { %v920_v55 = vsel %vm13916_vm8, %v919_v25, %v13910_v29  ;;  %v2374_v6 = vsel %vm13918_vm12, %v2373_v57, %v2372_v56  ;;  %v993_v2 = vadd.s32 %v10391_v31, %v10389_v50  ;;  %v1009_v33 = vsub.s32 32, %v1008_v10  ;;  %v10546_v17 = vpop.eup %8609 }
 0x2c9   : > { %v1013_v36 = vsub.s32 4294967266, %v1008_v10  ;;  %v2273_v46 = vsel %vm10494_vm5, %v9989_v48, %v2270_v49  ;;  %v2476_v13 = vmul.f32 %v2475_v19, %v2473_v22  ;;  %v1026_v5 = vsel %vm10519_vm0, 0, %v1024_v52  ;;  %v13924_v52 = vld [vmem:[#allocation20_spill] sm:$0xff] }
 0x2ca   : > { %v1206_v4 = vadd.s32 536870912, %v1205_v62  ;;  %v1010_v56 = vshll.u32 %v10471_v37, %v1008_v10  ;;  %v1011_v1 = vshrl.u32 %v993_v2, %v1009_v33  ;;  %v922_v31 = vsel %vm9423_vm1, 0, %v920_v55 }
 0x2cb   : > { %v1014_v18 = vadd.s32 127, %v1013_v36  ;;  %8615 = vsinq.f32 %v2169_v44  ;;  %v2377_v12 = vsel %vm10508_vm7, %v10087_v60, %v2374_v6  ;;  %v13920_v32 = vand.u32 2147483647, %v10113_v43 }
 0x2cc   : > { %v1207_v29 = vshrl.u32 %v1206_v4, 30  ;;  %vm13923_vm8 = vcmp.lt.s32.totalorder %v9072_v30, 0  ;;  %8617 = vcosq.f32 %v2273_v46  ;;  %v1012_v25 = vor.u32 %v1011_v1, %v1010_v56  ;;  %v10563_v44 = vpop.eup %8611  ;;  %v13926_v4 = vld [vmem:[#allocation30_spill] sm:$0xff]  ;;  %v13927_v1 = vld [vmem:[#allocation27_spill] sm:$0xff] }
 0x2cd   : > { %vm10556_vm6 = vcmp.le.f32.partialorder %v13920_v32, 0.7853982  ;;  %v1128_v37 = vsel %vm13923_vm8, %v1127_v7, %v13917_v61  ;;  %v1015_v57 = vshll.u32 %v1014_v18, 23  ;;  %v1030_v51 = vadd.s32 3, %v1026_v5 }
 0x2ce   : > { %8619 = vsinq.f32 %v2273_v46  ;;  %v2477_v47 = vxor.u32 2147483648, %v2476_v13  ;;  %v1208_v35 = vshll.u32 %v1207_v29, 30  ;;  %v926_v22 = vadd.s32 3, %v922_v31  ;;  %v10568_v10 = vpop.eup %8613 }
 0x2cf   : > { %8621 = vcosq.f32 %v2377_v12  ;;  %v1016_v23 = vor.u32 4788187, %v1015_v57  ;;  %v1130_v49 = vsel %vm9520_vm11, 0, %v1128_v37  ;;  %v1439_v19 = vsub.s32 4, %v13924_v52 }
 0x2d0   : > { %8623 = vsinq.f32 %v2377_v12  ;;  %vm13691_vm1 = vcmp.lt.s32.totalorder %v10113_v43, 0  ;;  %vm13695_vm2 = vcmp.lt.s32.totalorder %v13897_v26, 0  ;;  %v10572_v55 = vsub.s32 %v1205_v62, %v1208_v35  ;;  %v13928_v12 = vld [vmem:[#allocation32_spill] sm:$0xff] }
 0x2d1   : > { %v1017_v61 = vand.u32 2147483647, %v1016_v23  ;;  %v1019_v7 = vcvt.s32.f32 %v1012_v25  ;;  %v10574_v6 = vand.u32 3, %v1030_v51  ;;  %vm13925_vm12 = vcmp.lt.s32.totalorder %v9173_v34, 0 }
 0x2d2   : > { %v1440_v3 = vsel %vm13925_vm12, %v1439_v19, %v13924_v52  ;;  %v2478_v2 = vsel %vm13691_vm1, %v2477_v47, %v2476_v13  ;;  %v1211_v33 = vsub.s32 0, %v10572_v55  ;;  %v927_v36 = vand.u32 3, %v926_v22 }
 0x2d3   : > { %v1134_v46 = vadd.s32 3, %v1130_v49  ;;  %v1020_v5 = vmul.f32 %v1019_v7, %v1017_v61  ;;  %v1201_v62 = vadd.s32 %v10488_v42, %v10479_v20  ;;  %v930_v56 = vxor.u32 2147483648, %v13926_v4  ;;  %v13930_v42 = vld [vmem:[#allocation25_spill] sm:$0xff] }
 0x2d4   : > { %v933_v18 = vxor.u32 2147483648, %v13927_v1  ;;  %v7685_v50 = vmin.u32 %v1211_v33, %v10572_v55  ;;  %v1138_v31 = vxor.u32 2147483648, %v9803_v11  ;;  %v1141_v32 = vxor.u32 2147483648, %v13928_v12 }
 0x2d5   : > { %v1442_v13 = vsel %vm9734_vm15, 0, %v1440_v3  ;;  %v10594_v25 = vsel %vm10556_vm6, %v10113_v43, %v2478_v2  ;;  %v1021_v57 = vxor.u32 2147483648, %v1020_v5  ;;  %v1231_v20 = vsub.s32 4, %v1207_v29  ;;  %v10597_v47 = vpop.eup %8615 }
 0x2d6   : > { %v1647_v51 = vsub.s32 4, %v13930_v42  ;;  %vm10601_vm11 = vcmp.le.f32.partialorder %v1145_v45, 0.7853982  ;;  %v1213_v22 = vclz %v7685_v50  ;;  %vm928_vm8 = vcmp.lt.s32.totalorder %v927_v36, 2  ;;  %v10605_v49 = vpop.eup %8617  ;;  %v13935_v50 = vld [vmem:[#allocation38_spill] sm:$0xff] }
 0x2d7   : > { %vm929_vm15 = vcmp.eq.s32.totalorder %v927_v36, 0  ;;  %vm932_vm12 = vcmp.eq.s32.totalorder %v927_v36, 2  ;;  %v1135_v23 = vand.u32 3, %v1134_v46  ;;  %v1022_v52 = vsel %vm939_vm9, %v1021_v57, %v1020_v5 }
 0x2d8   : > { %v931_v19 = vsel %vm929_vm15, %v13927_v1, %v930_v56  ;;  %v1446_v61 = vadd.s32 3, %v1442_v13  ;;  %vm13933_vm1 = vcmp.lt.s32.totalorder %v9311_v41, 0  ;;  %v10613_v7 = vpop.eup %8619  ;;  %8625 = vcosq.f32 %v10594_v25 }
 0x2d9   : > { %v1648_v45 = vsel %vm13933_vm1, %v1647_v51, %v13930_v42  ;;  %v1025_v3 = vsel %vm10519_vm0, %v13884_v24, %v1022_v52  ;;  %v7686_v2 = vadd.s32 4294967294, %v1213_v22  ;;  %v10621_v5 = vpop.eup %8621  ;;  %v1232_v56 = vsel %vm13695_vm2, %v1231_v20, %v1207_v29 }
 0x2da   : > { %v1650_v46 = vsel %vm9996_vm13, 0, %v1648_v45  ;;  %8627 = vcosq.f32 %v1025_v3  ;;  %v934_v1 = vsel %vm932_vm12, %v933_v18, %v13926_v4  ;;  %v1450_v37 = vxor.u32 2147483648, %v13935_v50  ;;  %v10627_v13 = vpop.eup %8623 }
 0x2db   : > { %8629 = vsinq.f32 %v1025_v3  ;;  %vm7687_vm9 = vcmp.lt.s32.totalorder %v7686_v2, 0  ;;  %vm1137_vm1 = vcmp.eq.s32.totalorder %v1135_v23, 0  ;;  %v1453_v57 = vxor.u32 2147483648, %v13936_v54  ;;  %v13937_v3 = vld [vmem:[#allocation18_spill] sm:$0xff] }
 0x2dc   : > { %v1216_v42 = vsel %vm7687_vm9, 0, %v7686_v2  ;;  %vm1140_vm13 = vcmp.eq.s32.totalorder %v1135_v23, 2  ;;  %v1447_v51 = vand.u32 3, %v1446_v61  ;;  %v1654_v22 = vadd.s32 3, %v1650_v46  ;;  %v13938_v61 = vld [vmem:[#allocation45_spill] sm:$0xff] }
 0x2dd   : > { %v1217_v52 = vsub.s32 32, %v1216_v42  ;;  %v1221_v45 = vsub.s32 4294967266, %v1216_v42  ;;  %v1139_v29 = vsel %vm1137_vm1, %v13928_v12, %v1138_v31  ;;  %v1142_v4 = vsel %vm1140_vm13, %v1141_v32, %v9803_v11  ;;  %v13939_v32 = vld [vmem:[#allocation8_spill] sm:$0xff] }
 0x2de   : > { %v1218_v18 = vshll.u32 %v10572_v55, %v1216_v42  ;;  %vm1136_vm15 = vcmp.lt.s32.totalorder %v1135_v23, 2  ;;  %v1655_v20 = vand.u32 3, %v1654_v22  ;;  %v1335_v33 = vsub.s32 4, %v13937_v3  ;;  %v13941_v42 = vld [vmem:[#allocation22_spill] sm:$0xff] }
 0x2df   : > { %v1219_v53 = vshrl.u32 %v1201_v62, %v1217_v52  ;;  %v1222_v15 = vadd.s32 127, %v1221_v45  ;;  %v1658_v2 = vxor.u32 2147483648, %v10135_v38  ;;  %v1661_v46 = vxor.u32 2147483648, %v13938_v61 }
 0x2e0   : > { %v1234_v14 = vsel %vm10601_vm11, 0, %v1232_v56  ;;  %v935_v31 = vsel %vm928_vm8, %v931_v19, %v934_v1  ;;  %v1143_v11 = vsel %vm1136_vm15, %v1139_v29, %v1142_v4  ;;  %vm1449_vm9 = vcmp.eq.s32.totalorder %v1447_v51, 0  ;;  %v13944_v29 = vld [vmem:[#allocation14_spill] sm:$0xff] }
 0x2e1   : > { %v1220_v55 = vor.u32 %v1219_v53, %v1218_v18  ;;  %v1223_v12 = vshll.u32 %v1222_v15, 23  ;;  %vm1452_vm1 = vcmp.eq.s32.totalorder %v1447_v51, 2  ;;  %vm13940_vm13 = vcmp.lt.s32.totalorder %v13939_v32, 0 }
 0x2e2   : > { %v1336_v62 = vsel %vm13940_vm13, %v1335_v33, %v13937_v3  ;;  %vm1033_vm2 = vcmp.eq.s32.totalorder %v10574_v6, 0  ;;  %v1451_v23 = vsel %vm1449_vm9, %v13936_v54, %v1450_v37  ;;  %vm1657_vm12 = vcmp.eq.s32.totalorder %v1655_v20, 0  ;;  %v10647_v56 = vpop.eup %8625  ;;  %v13947_v33 = vld [vmem:[#allocation34_spill] sm:$0xff] }
 0x2e3   : > { %vm1660_vm0 = vcmp.eq.s32.totalorder %v1655_v20, 2  ;;  %v1543_v22 = vsub.s32 4, %v13941_v42  ;;  %v1224_v36 = vor.u32 4788187, %v1223_v12  ;;  %v1454_v19 = vsel %vm1452_vm1, %v1453_v57, %v13935_v50 }
 0x2e4   : > { %v1659_v53 = vsel %vm1657_vm12, %v13938_v61, %v1658_v2  ;;  %v1662_v15 = vsel %vm1660_vm0, %v1661_v46, %v10135_v38  ;;  %v8628_v1 = vpop.eup %8627  ;;  %v1238_v52 = vadd.s32 3, %v1234_v14  ;;  %vm13942_vm8 = vweird.f32 %v9072_v30 }
 0x2e5   : > { %v10654_v45 = vsel %vm13942_vm8, nan, %v1143_v11  ;;  %v1338_v54 = vsel %vm9646_vm4, 0, %v1336_v62  ;;  %vm13945_vm15 = vcmp.lt.s32.totalorder %v13944_v29, 0  ;;  %v8630_v18 = vpop.eup %8629  ;;  %vm1032_vm9 = vcmp.lt.s32.totalorder %v10574_v6, 2  ;;  %v13949_v62 = vld [vmem:[#allocation24_spill] sm:$0xff] }
 0x2e6   : > { %v1544_v4 = vsel %vm13945_vm15, %v1543_v22, %v13941_v42  ;;  %v1225_v50 = vand.u32 2147483647, %v1224_v36  ;;  %v1227_v57 = vcvt.s32.f32 %v1220_v55  ;;  %vm1448_vm12 = vcmp.lt.s32.totalorder %v1447_v51, 2 }
 0x2e7   : > { %vm1656_vm0 = vcmp.lt.s32.totalorder %v1655_v20, 2  ;;  %v1455_v38 = vsel %vm1448_vm12, %v1451_v23, %v1454_v19  ;;  %v1546_v30 = vsel %vm9758_vm10, 0, %v1544_v4  ;;  %v1855_v2 = vsub.s32 4, %v13947_v33 }
 0x2e8   : > { %v1663_v14 = vsel %vm1656_vm0, %v1659_v53, %v1662_v15  ;;  %v1034_v61 = vxor.u32 2147483648, %v8630_v18  ;;  %v1037_v46 = vxor.u32 2147483648, %v8628_v1  ;;  %v1228_v11 = vmul.f32 %v1227_v57, %v1225_v50  ;;  %v13952_v53 = vld [vmem:[#allocation36_spill] sm:$0xff]  ;;  %v13955_v57 = vld [vmem:[#allocation42_spill] sm:$0xff] }
 0x2e9   : > { %v1342_v12 = vadd.s32 3, %v1338_v54  ;;  %8631 = vsinq.f32 %v10594_v25  ;;  %vm1029_vm4 = vweird.f32 %v13884_v24  ;;  %vm1036_vm1 = vcmp.eq.s32.totalorder %v10574_v6, 2  ;;  %v13964_v54 = vld [vmem:[#allocation40_spill] sm:$0xff] }
 0x2ea   : > { %vm13948_vm13 = vweird.f32 %v13915_v0  ;;  %vm1445_vm8 = vweird.f32 %v9173_v34  ;;  %v1229_v20 = vxor.u32 2147483648, %v1228_v11  ;;  %vm1653_vm10 = vweird.f32 %v9311_v41 }
 0x2eb   : > { %v10670_v51 = vsel %vm13948_vm13, nan, %v935_v31  ;;  %v1550_v55 = vadd.s32 3, %v1546_v30  ;;  %vm13950_vm15 = vcmp.lt.s32.totalorder %v13949_v62, 0  ;;  %v10677_v42 = vand.u32 3, %v1238_v52  ;;  %v13953_v52 = vld [vmem:[#allocation35_spill] sm:$0xff] }
 0x2ec   : > { %v1856_v23 = vsel %vm13950_vm15, %v1855_v2, %v13947_v33  ;;  %v2497_v25 = vpack.c.bf16 %v10654_v45, %v10670_v51  ;;  %v10681_v22 = vsel %vm1445_vm8, nan, %v1455_v38  ;;  %v10683_v0 = vsel %vm1653_vm10, nan, %v1663_v14  ;;  %v13956_v14 = vld [vmem:[#allocation43_spill] sm:$0xff] }
 0x2ed   : > { %v1035_v34 = vsel %vm1033_vm2, %v8628_v1, %v1034_v61  ;;  %v1038_v31 = vsel %vm1036_vm1, %v1037_v46, %v8630_v18  ;;  %vm13951_vm12 = vcmp.lt.s32.totalorder %v13897_v26, 0  ;;  %v1343_v36 = vand.u32 3, %v1342_v12  ;;  %v13957_v30 = vld [vmem:[#allocation39_spill] sm:$0xff]  ;;  %v13959_v46 = vld [vmem:[#allocation28_spill] sm:$0xff] }
 0x2ee   : > { %v1230_v41 = vsel %vm13951_vm12, %v1229_v20, %v1228_v11  ;;  %v1346_v15 = vxor.u32 2147483648, %v13952_v53  ;;  %v1349_v37 = vxor.u32 2147483648, %v13953_v52  ;;  %v1858_v4 = vsel %vm10220_vm14, 0, %v1856_v23 }
 0x2ef   : > { %v1233_v19 = vsel %vm10601_vm11, %v13897_v26, %v1230_v41  ;;  %v2500_v1 = vpack.c.bf16 %v10683_v0, %v10681_v22  ;;  %vm1341_vm2 = vweird.f32 %v13939_v32  ;;  %v1551_v18 = vand.u32 3, %v1550_v55 }
 0x2f0   : > { %8633 = vcosq.f32 %v1233_v19  ;;  %v1039_v50 = vsel %vm1032_vm9, %v1035_v34, %v1038_v31  ;;  %v1862_v35 = vadd.s32 3, %v1858_v4  ;;  %v2063_v38 = vsub.s32 4, %v13955_v57  ;;  %v13960_v31 = vld [vmem:[#allocation21_spill] sm:$0xff] }
 0x2f1   : > { %8635 = vsinq.f32 %v1233_v19  ;;  %vm1345_vm11 = vcmp.eq.s32.totalorder %v1343_v36, 0  ;;  %vm1348_vm0 = vcmp.eq.s32.totalorder %v1343_v36, 2  ;;  %v1554_v3 = vxor.u32 2147483648, %v13956_v14 }
 0x2f2   : > { %v1557_v33 = vxor.u32 2147483648, %v13957_v30  ;;  %v1347_v2 = vsel %vm1345_vm11, %v13953_v52, %v1346_v15  ;;  %v1350_v61 = vsel %vm1348_vm0, %v1349_v37, %v13952_v53  ;;  %vm1549_vm14 = vweird.f32 %v13944_v29 }
 0x2f3   : > { %vm13958_vm1 = vcmp.lt.s32.totalorder %v9651_v39, 0  ;;  %v1751_v11 = vsub.s32 4, %v13959_v46  ;;  %v10713_v12 = vsel %vm1029_vm4, nan, %v1039_v50  ;;  %vm1244_vm9 = vcmp.eq.s32.totalorder %v10677_v42, 2  ;;  %v10718_v55 = vpop.eup %8631  ;;  %v13965_v50 = vld [vmem:[#allocation10_spill] sm:$0xff] }
 0x2f4   : > { %v2064_v6 = vsel %vm13958_vm1, %v2063_v38, %v13955_v57  ;;  %vm1344_vm13 = vcmp.lt.s32.totalorder %v1343_v36, 2  ;;  %vm1553_vm8 = vcmp.eq.s32.totalorder %v1551_v18, 0  ;;  %vm1241_vm10 = vcmp.eq.s32.totalorder %v10677_v42, 0  ;;  %v13966_v57 = vld [vmem:[#allocation9_spill] sm:$0xff] }
 0x2f5   : > { %v2066_v20 = vsel %vm10383_vm3, 0, %v2064_v6  ;;  %vm1556_vm15 = vcmp.eq.s32.totalorder %v1551_v18, 2  ;;  %v1863_v23 = vand.u32 3, %v1862_v35  ;;  %vm13961_vm12 = vcmp.lt.s32.totalorder %v13960_v31, 0 }
 0x2f6   : > { %v2070_v34 = vadd.s32 3, %v2066_v20  ;;  %v1752_v24 = vsel %vm13961_vm12, %v1751_v11, %v13959_v46  ;;  %vm1240_vm4 = vcmp.lt.s32.totalorder %v10677_v42, 2  ;;  %v1351_v41 = vsel %vm1344_vm13, %v1347_v2, %v1350_v61 }
 0x2f7   : > { %v1555_v36 = vsel %vm1553_vm8, %v13957_v30, %v1554_v3  ;;  %v1558_v19 = vsel %vm1556_vm15, %v1557_v33, %v13956_v14  ;;  %vm13963_vm3 = vnez %v13962_v63  ;;  %vm1237_vm11 = vweird.f32 %v13897_v26  ;;  %v13967_v3 = vld [vmem:[#allocation47_spill] sm:$0xff] }
 0x2f8   : > { %v1754_v53 = vsel %vm13963_vm3, 0, %v1752_v24  ;;  %v2071_v15 = vand.u32 3, %v2070_v34  ;;  %v2074_v52 = vxor.u32 2147483648, %v10563_v44  ;;  %v2077_v37 = vxor.u32 2147483648, %v10546_v17 }
 0x2f9   : > { %v1959_v4 = vsub.s32 4, %v13964_v54  ;;  %vm1552_vm0 = vcmp.lt.s32.totalorder %v1551_v18, 2  ;;  %v1866_v35 = vxor.u32 2147483648, %v13965_v50  ;;  %v1869_v38 = vxor.u32 2147483648, %v13966_v57  ;;  %v13968_v18 = vld [vmem:[#allocation26_spill] sm:$0xff] }
 0x2fa   : > { %v2271_v30 = vsub.s32 4, %v13967_v3  ;;  %v10738_v14 = vsel %vm1341_vm2, nan, %v1351_v41  ;;  %v1559_v33 = vsel %vm1552_vm0, %v1555_v36, %v1558_v19  ;;  %vm1865_vm1 = vcmp.eq.s32.totalorder %v1863_v23, 0  ;;  %v8634_v61 = vpop.eup %8633 }
 0x2fb   : > { %v1758_v2 = vadd.s32 3, %v1754_v53  ;;  %vm1861_vm13 = vweird.f32 %v13949_v62  ;;  %vm1868_vm8 = vcmp.eq.s32.totalorder %v1863_v23, 2  ;;  %vm2073_vm15 = vcmp.eq.s32.totalorder %v2071_v15, 0  ;;  %v8636_v46 = vpop.eup %8635 }
 0x2fc   : > { %vm2076_vm12 = vcmp.eq.s32.totalorder %v2071_v15, 2  ;;  %vm13969_vm3 = vcmp.lt.s32.totalorder %v13968_v18, 0  ;;  %v1245_v11 = vxor.u32 2147483648, %v8634_v61  ;;  %v2075_v20 = vsel %vm2073_vm15, %v10546_v17, %v2074_v52 }
 0x2fd   : > { %v1960_v6 = vsel %vm13969_vm3, %v1959_v4, %v13964_v54  ;;  %v2078_v32 = vsel %vm2076_vm12, %v2077_v37, %v10563_v44  ;;  %vm13970_vm2 = vcmp.lt.s32.totalorder %v9989_v48, 0  ;;  %v1242_v24 = vxor.u32 2147483648, %v8636_v46  ;;  %v13971_v44 = vld [vmem:[#allocation50_spill] sm:$0xff] }
 0x2fe   : > { %v2272_v34 = vsel %vm13970_vm2, %v2271_v30, %v13967_v3  ;;  %v10751_v41 = vsel %vm1549_vm14, nan, %v1559_v33  ;;  %v1867_v36 = vsel %vm1865_vm1, %v13966_v57, %v1866_v35  ;;  %v1870_v19 = vsel %vm1868_vm8, %v1869_v38, %v13965_v50 }
 0x2ff   : > { %v1246_v63 = vsel %vm1244_vm9, %v1245_v11, %v8636_v46  ;;  %vm2072_vm0 = vcmp.lt.s32.totalorder %v2071_v15, 2  ;;  %v10757_v17 = vand.u32 3, %v1758_v2  ;;  %vm13972_vm15 = vnez %v13971_v44  ;;  %v13973_v15 = vld [vmem:[#allocation49_spill] sm:$0xff]  ;;  %v13974_v2 = vld [vmem:[#allocation46_spill] sm:$0xff] }
 0x300   : > { %v1962_v53 = vsel %vm13972_vm15, 0, %v1960_v6  ;;  %v1243_v52 = vsel %vm1241_vm10, %v8634_v61, %v1242_v24  ;;  %v2079_v37 = vsel %vm2072_vm0, %v2075_v20, %v2078_v32  ;;  %v2274_v54 = vsel %vm10494_vm5, 0, %v2272_v34  ;;  %v13976_v32 = vld [vmem:[#allocation44_spill] sm:$0xff] }
 0x301   : > { %v1966_v29 = vadd.s32 3, %v1962_v53  ;;  %v1247_v4 = vsel %vm1240_vm4, %v1243_v52, %v1246_v63  ;;  %v2499_v50 = vpack.c.bf16 %v10751_v41, %v10738_v14  ;;  %vm1864_vm14 = vcmp.lt.s32.totalorder %v1863_v23, 2 }
 0x302   : > { %v1762_v35 = vxor.u32 2147483648, %v13973_v15  ;;  %v1248_v57 = vsel %vm1237_vm11, nan, %v1247_v4  ;;  %v1871_v38 = vsel %vm1864_vm14, %v1867_v36, %v1870_v19  ;;  %vm2069_vm9 = vweird.f32 %v9651_v39 }
 0x303   : > { %v2278_v3 = vadd.s32 3, %v2274_v54  ;;  %v2498_v30 = vpack.c.bf16 %v1248_v57, %v10713_v12  ;;  %v2080_v21 = vsel %vm2069_vm9, nan, %v2079_v37  ;;  %v1967_v33 = vand.u32 3, %v1966_v29 }
 0x304   : > { %v2479_v42 = vsub.s32 4, %v10379_v59  ;;  %vm1761_vm5 = vcmp.eq.s32.totalorder %v10757_v17, 0  ;;  %v1765_v14 = vxor.u32 2147483648, %v13974_v2  ;;  %v1970_v23 = vxor.u32 2147483648, %v10539_v28 }
 0x305   : > { %v1973_v61 = vxor.u32 2147483648, %v10452_v40  ;;  %2737 = vmatprep.mubr.bf16.mxu1 %v2498_v30  ;;  %v1872_v26 = vsel %vm1861_vm13, nan, %v1871_v38  ;;  %vm1760_vm10 = vcmp.lt.s32.totalorder %v10757_v17, 2  ;;  %v1763_v39 = vsel %vm1761_vm5, %v13974_v2, %v1762_v35 }
 0x306   : > { %vm1764_vm4 = vcmp.eq.s32.totalorder %v10757_v17, 2  ;;  %2738 = vmatmul.mubr.bf16.vlgmr.msra.gmra.mrb[0].mxu1 %v2497_v25  ;;  %v2502_v12 = vpack.c.bf16 %v2080_v21, %v1872_v26  ;;  %vm1965_vm11 = vweird.f32 %v13968_v18  ;;  %v2279_v6 = vand.u32 3, %v2278_v3 }
 0x307   : > { %v2282_v46 = vxor.u32 2147483648, %v10613_v7  ;;  %vm13975_vm1 = vcmp.lt.s32.totalorder %v10113_v43, 0  ;;  %2747 = vmatprep.mubr.bf16.mxu1 %v2500_v1  ;;  %vm1969_vm13 = vcmp.eq.s32.totalorder %v1967_v33, 0  ;;  %vm1972_vm8 = vcmp.eq.s32.totalorder %v1967_v33, 2 }
 0x308   : > { %v2480_v62 = vsel %vm13975_vm1, %v2479_v42, %v10379_v59  ;;  %v2285_v11 = vxor.u32 2147483648, %v10605_v49  ;;  %v1971_v51 = vsel %vm1969_vm13, %v10452_v40, %v1970_v23  ;;  %v1974_v25 = vsel %vm1972_vm8, %v1973_v61, %v10539_v28  ;;  %v13978_v28 = vld [vmem:[#allocation5_spill] sm:$0xff] }
 0x309   : > { %v2482_v45 = vsel %vm10556_vm6, 0, %v2480_v62  ;;  %v2167_v34 = vsub.s32 4, %v13976_v32  ;;  %vm1757_vm12 = vweird.f32 %v13960_v31  ;;  %v1766_v59 = vsel %vm1764_vm4, %v1765_v14, %v13973_v15 }
 0x30a   : > { %v2486_v20 = vadd.s32 3, %v2482_v45  ;;  %vm1968_vm3 = vcmp.lt.s32.totalorder %v1967_v33, 2  ;;  %v2490_v22 = vxor.u32 2147483648, %v10718_v55  ;;  %v2493_v0 = vxor.u32 2147483648, %v10647_v56 }
 0x30b   : > { %vm2281_vm2 = vcmp.eq.s32.totalorder %v2279_v6, 0  ;;  %vm13977_vm6 = vcmp.lt.s32.totalorder %v9877_v16, 0  ;;  %v2375_v1 = vsub.s32 4, %v13978_v28  ;;  %v1975_v24 = vsel %vm1968_vm3, %v1971_v51, %v1974_v25 }
 0x30c   : > { %v2487_v8 = vand.u32 3, %v2486_v20  ;;  %v2168_v40 = vsel %vm13977_vm6, %v2167_v34, %v13976_v32  ;;  %v2283_v41 = vsel %vm2281_vm2, %v10605_v49, %v2282_v46  ;;  %vm2284_vm0 = vcmp.eq.s32.totalorder %v2279_v6, 2 }
 0x30d   : > { %vm13979_vm15 = vnez %v13902_v27  ;;  %v2286_v19 = vsel %vm2284_vm0, %v2285_v11, %v10613_v7  ;;  %vm13980_vm4 = vcmp.lt.s32.totalorder %v10087_v60, 0  ;;  %v1767_v49 = vsel %vm1760_vm10, %v1763_v39, %v1766_v59 }
 0x30e   : > { %v2170_v36 = vsel %vm13979_vm15, 0, %v2168_v40  ;;  %vm2489_vm14 = vcmp.eq.s32.totalorder %v2487_v8, 0  ;;  %vm2492_vm9 = vcmp.eq.s32.totalorder %v2487_v8, 2  ;;  %vm2488_vm5 = vcmp.lt.s32.totalorder %v2487_v8, 2  ;;  %2748 = vmatmul.mubr.bf16.gmra.mrb[4].mxu1 %v2499_v50 }
 0x30f   : > { %v2174_v63 = vadd.s32 3, %v2170_v36  ;;  %v2491_v44 = vsel %vm2489_vm14, %v10647_v56, %v2490_v22  ;;  %v2494_v53 = vsel %vm2492_vm9, %v2493_v0, %v10718_v55  ;;  %v2376_v52 = vsel %vm13980_vm4, %v2375_v1, %v13978_v28  ;;  %2757 = vmatprep.mubr.bf16.mxu1 %v2502_v12 }
 0x310   : > { %vm2280_vm1 = vcmp.lt.s32.totalorder %v2279_v6, 2  ;;  %v2495_v27 = vsel %vm2488_vm5, %v2491_v44, %v2494_v53  ;;  %v2378_v7 = vsel %vm10508_vm7, 0, %v2376_v52  ;;  %v1976_v37 = vsel %vm1965_vm11, nan, %v1975_v24 }
 0x311   : > { %v2287_v56 = vsel %vm2280_vm1, %v2283_v41, %v2286_v19  ;;  %vm2485_vm13 = vweird.f32 %v10113_v43  ;;  %v2382_v55 = vadd.s32 3, %v2378_v7  ;;  %v2175_v54 = vand.u32 3, %v2174_v63 }
 0x312   : > { %v2496_v29 = vsel %vm2485_vm13, nan, %v2495_v27  ;;  %v2386_v4 = vxor.u32 2147483648, %v10627_v13  ;;  %v2389_v17 = vxor.u32 2147483648, %v10621_v5  ;;  %vm2277_vm10 = vweird.f32 %v9989_v48 }
 0x313   : > { %v2178_v50 = vxor.u32 2147483648, %v10597_v47  ;;  %v2181_v58 = vxor.u32 2147483648, %v10568_v10  ;;  %v2383_v15 = vand.u32 3, %v2382_v55  ;;  %v1768_v18 = vsel %vm1757_vm12, nan, %v1767_v49 }
 0x314   : > { %v2288_v35 = vsel %vm2277_vm10, nan, %v2287_v56  ;;  %v2501_v57 = vpack.c.bf16 %v1976_v37, %v1768_v18  ;;  %vm2177_vm8 = vcmp.eq.s32.totalorder %v2175_v54, 0  ;;  %vm2180_vm3 = vcmp.eq.s32.totalorder %v2175_v54, 2 }
 0x315   : > { %v2504_v43 = vpack.c.bf16 %v2496_v29, %v2288_v35  ;;  %vm2385_vm7 = vcmp.eq.s32.totalorder %v2383_v15, 0  ;;  %vm2388_vm11 = vcmp.eq.s32.totalorder %v2383_v15, 2  ;;  %v2179_v48 = vsel %vm2177_vm8, %v10568_v10, %v2178_v50  ;;  %v8875_v10 = vld [vmem:[%s13786_s30] sm:$0xff] }
 0x316   : > { %v2387_v38 = vsel %vm2385_vm7, %v10621_v5, %v2386_v4  ;;  %v2390_v3 = vsel %vm2388_vm11, %v2389_v17, %v10627_v13  ;;  %v2182_v30 = vsel %vm2180_vm3, %v2181_v58, %v10597_v47  ;;  %vm2384_vm2 = vcmp.lt.s32.totalorder %v2383_v15, 2  ;;  %2758 = vmatmul.mubr.bf16.gmra.mrb[8].mxu1 %v2501_v57  ;;  %v13981_v5 = vld [vmem:[#allocation2_spill] sm:$0xff] }
 0x317   : > { %v2391_v21 = vsel %vm2384_vm2, %v2387_v38, %v2390_v3  ;;  %2767 = vmatprep.mubr.bf16.mxu1 %v2504_v43  ;;  %vm2176_vm12 = vcmp.lt.s32.totalorder %v2175_v54, 2  ;;  %vm2381_vm6 = vweird.f32 %v10087_v60  ;;  %vm2173_vm0 = vweird.f32 %v9877_v16  ;;  %v8876_v60 = vld [vmem:[%s13786_s30 + $0x8] sm:$0xff] }
 0x318   : > { %v2183_v31 = vsel %vm2176_vm12, %v2179_v48, %v2182_v30  ;;  %v2392_v33 = vsel %vm2381_vm6, nan, %v2391_v21  ;;  %v10841_v13 = vsub.s32 1, %v13981_v5  ;;  %v13985_v57 = vmov 2475754826  }
 0x319   : > { %v2184_v42 = vsel %vm2173_vm0, nan, %v2183_v31  ;;  %v13986_v38 = vmov 2131351028   ;;  %v13987_v48 = vmov 2102212464  }
 0x31a   : > { %v2503_v2 = vpack.c.bf16 %v2392_v33, %v2184_v42  ;;  %13982 = vst [vmem:[#allocation12_spill] sm:$0xff] %v10841_v13  ;;  %v10847_v47 = vrot.slane %v8875_v10, %v10841_v13  ;;  %v10853_v14 = vrot.slane %v8876_v60, %v10841_v13  ;;  %v13988_v21 = vmov 920167782  }
 0x31e   : > { %2768 = vmatmul.mubr.bf16.gmra.mrb[12].mxu1 %v2503_v2 }
 0x3d9   : > { %v2739_v16 = vpop.f32.mrb[0].mxu1 }
 0x3da   : > { %v2740_v23 = vadd.f32 %v2739_v16, %v10847_v47  ;;  %v2741_v61 = vpop.f32.mrb[1].mxu1  ;;  %v13989_v16 = vmov 1326507024  }
 0x3db   : > { %v2742_v26 = vadd.f32 %v2741_v61, %v10853_v14  ;;  %v2743_v39 = vpop.f32.mrb[2].mxu1 }
 0x3dc   : > { %v10857_v12 = vmul.f32 3.0, %v2740_v23  ;;  %v2744_v6 = vadd.f32 %v2743_v39, %v10847_v47  ;;  %v2745_v46 = vpop.f32.mrb[3].mxu1 }
 0x3dd   : > { %v10860_v62 = vmul.f32 3.0, %v2742_v26  ;;  %v2746_v36 = vadd.f32 %v2745_v46, %v10853_v14 }
 0x3de   : > { %13983 = vst [vmem:[#allocation15_spill] sm:$0xff] %v10857_v12  ;;  %v2794_v11 = vand.u32 2147483647, %v10857_v12  ;;  %v2797_v45 = vand.u32 2139095040, %v10857_v12  ;;  %v10866_v20 = vmul.f32 3.0, %v2744_v6 }
 0x3df   : > { %v2898_v51 = vand.u32 2147483647, %v10860_v62  ;;  %v2901_v25 = vand.u32 2139095040, %v10860_v62  ;;  %v10883_v29 = vmul.f32 3.0, %v2746_v36 }
 0x3e0   : > { %13984 = vst [vmem:[#allocation16_spill] sm:$0xff] %v10866_v20  ;;  %v2798_v32 = vshrl.u32 %v2797_v45, 23  ;;  %v2801_v34 = vand.u32 8388607, %v2794_v11  ;;  %v3005_v8 = vand.u32 2139095040, %v10866_v20 }
 0x3e1   : > { %v2902_v59 = vshrl.u32 %v2901_v25, 23  ;;  %v2905_v22 = vand.u32 8388607, %v2898_v51  ;;  %v10873_v40 = vpop.f32.mrb[4].mxu1  ;;  %v13700_v52 = vand.u32 2147483647, %v10866_v20 }
 0x3e2   : > { %v7768_v0 = vadd.s32 4294967169, %v2798_v32  ;;  %v10875_v1 = vpop.f32.mrb[5].mxu1  ;;  %v3006_v41 = vshrl.u32 %v3005_v8, 23  ;;  %v2802_v63 = vor.u32 8388608, %v2801_v34  ;;  %v14000_v5 = vand.u32 2147483647, %v10866_v20 }
 0x3e3   : > { %v7772_v28 = vadd.s32 4294967169, %v2902_v59  ;;  %v10878_v19 = vpop.f32.mrb[6].mxu1  ;;  %v2906_v44 = vor.u32 8388608, %v2905_v22  ;;  %v10891_v17 = vand.u32 8388607, %v13700_v52 }
 0x3e4   : > { %v2804_v24 = vadd.s32 1, %v7768_v0  ;;  %v7776_v49 = vadd.s32 4294967169, %v3006_v41  ;;  %v10881_v27 = vpop.f32.mrb[7].mxu1  ;;  %v10885_v54 = vshll.u32 %v2802_v63, 8 }
 0x3e5   : > { %v2908_v53 = vadd.s32 1, %v7772_v28  ;;  %v10887_v4 = vshll.u32 %v2906_v44, 8 }
 0x3e6   : > { %vm2805_vm15 = vcmp.gt.s32.totalorder %v2804_v24, 0  ;;  %v10893_v50 = vadd.s32 1, %v7776_v49 }
 0x3e7   : > { %v2806_v7 = vsel %vm2805_vm15, %v2804_v24, 0  ;;  %vm2909_vm14 = vcmp.gt.s32.totalorder %v2908_v53, 0 }
 0x3e8   : > { %v2807_v37 = vshrl.u32 %v2806_v7, 5  ;;  %v2808_v56 = vand.u32 31, %v2806_v7  ;;  %v2910_v55 = vsel %vm2909_vm14, %v2908_v53, 0  ;;  %vm3013_vm3 = vcmp.gt.s32.totalorder %v10893_v50, 0 }
 0x3e9   : > { %v10896_v18 = vshrl.u32 %v2910_v55, 5  ;;  %v2912_v35 = vand.u32 31, %v2910_v55  ;;  %v10908_v61 = vpop.f32.mrb[8].mxu1 }
 0x3ea   : > { %v2809_v58 = vsub.s32 32, %v2808_v56  ;;  %v2811_v15 = vshll.u32 %v13803_v9, %v2808_v56  ;;  %v2814_v43 = vshll.u32 %v13985_v57, %v2808_v56  ;;  %v2817_v3 = vshll.u32 %v13986_v38, %v2808_v56 }
 0x3eb   : > { %v2820_v30 = vshll.u32 %v13987_v48, %v2808_v56  ;;  %v2823_v31 = vshll.u32 %v13988_v21, %v2808_v56  ;;  %vm2826_vm9 = vcmp.lt.s32.totalorder %v2807_v37, 1  ;;  %vm2827_vm5 = vcmp.lt.s32.totalorder %v2807_v37, 2 }
 0x3ec   : > { %v2812_v33 = vshrl.u32 %v13985_v57, %v2809_v58  ;;  %v2815_v42 = vshrl.u32 %v13986_v38, %v2809_v58  ;;  %v2818_v2 = vshrl.u32 %v13987_v48, %v2809_v58  ;;  %v2810_v10 = vshrl.u32 %v13803_v9, %v2809_v58 }
 0x3ed   : > { %v2821_v60 = vshrl.u32 %v13988_v21, %v2809_v58  ;;  %v2824_v23 = vshrl.u32 %v13989_v16, %v2809_v58  ;;  %v2913_v46 = vsub.s32 32, %v2912_v35  ;;  %vm2828_vm4 = vcmp.lt.s32.totalorder %v2807_v37, 3 }
 0x3ee   : > { %v2813_v26 = vor.u32 %v2812_v33, %v2811_v15  ;;  %v2816_v39 = vor.u32 %v2815_v42, %v2814_v43  ;;  %v2819_v6 = vor.u32 %v2818_v2, %v2817_v3  ;;  %vm2829_vm1 = vcmp.lt.s32.totalorder %v2807_v37, 4 }
 0x3ef   : > { %v2822_v45 = vor.u32 %v2821_v60, %v2820_v30  ;;  %v2825_v25 = vor.u32 %v2824_v23, %v2823_v31  ;;  %v2915_v24 = vshll.u32 %v13803_v9, %v2912_v35  ;;  %v2916_v63 = vshrl.u32 %v13985_v57, %v2913_v46 }
 0x3f0   : > { %v2830_v32 = vsel %vm2826_vm9, %v2810_v10, %v2813_v26  ;;  %v2831_v34 = vsel %vm2829_vm1, %v2819_v6, 2102212464  ;;  %v2834_v59 = vsel %vm2826_vm9, %v2813_v26, %v2816_v39  ;;  %v2838_v22 = vsel %vm2826_vm9, %v2816_v39, %v2819_v6 }
 0x3f1   : > { %v2832_v0 = vsel %vm2828_vm4, %v2816_v39, %v2831_v34  ;;  %v2835_v8 = vsel %vm2829_vm1, %v2822_v45, 920167782  ;;  %v2839_v28 = vsel %vm2829_vm1, %v2825_v25, 1326507024  ;;  %v2918_v44 = vshll.u32 %v13985_v57, %v2912_v35 }
 0x3f2   : > { %v2836_v41 = vsel %vm2828_vm4, %v2819_v6, %v2835_v8  ;;  %v2840_v36 = vsel %vm2828_vm4, %v2822_v45, %v2839_v28  ;;  %v2833_v53 = vsel %vm2827_vm5, %v2830_v32, %v2832_v0  ;;  %v2919_v56 = vshrl.u32 %v13986_v38, %v2913_v46 }
 0x3f3   : > { %v2837_v49 = vsel %vm2827_vm5, %v2834_v59, %v2836_v41  ;;  %v2841_v7 = vsel %vm2827_vm5, %v2838_v22, %v2840_v36  ;;  %v2917_v3 = vor.u32 %v2916_v63, %v2915_v24  ;;  %v2921_v31 = vshll.u32 %v13986_v38, %v2912_v35 }
 0x3f4   : > { %v10921_v55 = vmul.u32.u64.low %v10885_v54, %v2841_v7  ;;  %v10922_v58 = vmul.u32.u64.high %v10885_v54, %v2841_v7, %v10921_v55  ;;  %v10925_v15 = vmul.u32.u64.low %v10885_v54, %v2837_v49  ;;  %v10926_v43 = vmul.u32.u64.high %v10885_v54, %v2837_v49, %v10925_v15 }
 0x3f5   : > { %v2920_v30 = vor.u32 %v2919_v56, %v2918_v44  ;;  %v2922_v33 = vshrl.u32 %v13987_v48, %v2913_v46  ;;  %v2914_v37 = vshrl.u32 %v13803_v9, %v2913_v46  ;;  %v2924_v42 = vshll.u32 %v13987_v48, %v2912_v35 }
 0x3f6   : > { %v2925_v2 = vshrl.u32 %v13988_v21, %v2913_v46  ;;  %v2928_v10 = vshrl.u32 %v13989_v16, %v2913_v46  ;;  %v2849_v60 = vmul.u32 %v10885_v54, %v2833_v53  ;;  %v2927_v26 = vshll.u32 %v13988_v21, %v2912_v35 }
 0x3f7   : > { %v2923_v23 = vor.u32 %v2922_v33, %v2921_v31  ;;  %vm2930_vm13 = vcmp.lt.s32.totalorder %v10896_v18, 1  ;;  %vm2851_vm10 = vc.u32 %v10922_v58, %v10925_v15  ;;  %v2852_v39 = vadd.s32 1, %v10926_v43  ;;  %v10966_v31 = vpop.f32.mrb[9].mxu1 }
 0x3f8   : > { %v2926_v6 = vor.u32 %v2925_v2, %v2924_v42  ;;  %vm2931_vm7 = vcmp.lt.s32.totalorder %v10896_v18, 2  ;;  %v2929_v45 = vor.u32 %v2928_v10, %v2927_v26  ;;  %vm2932_vm11 = vcmp.lt.s32.totalorder %v10896_v18, 3 }
 0x3f9   : > { %vm2933_vm8 = vcmp.lt.s32.totalorder %v10896_v18, 4  ;;  %v2938_v46 = vsel %vm2930_vm13, %v2917_v3, %v2920_v30  ;;  %v2853_v54 = vsel %vm2851_vm10, %v2852_v39, %v10926_v43  ;;  %v2942_v32 = vsel %vm2930_vm13, %v2920_v30, %v2923_v23 }
 0x3fa   : > { %v2935_v25 = vsel %vm2933_vm8, %v2923_v23, 2102212464  ;;  %v2939_v35 = vsel %vm2933_vm8, %v2926_v6, 920167782  ;;  %v2854_v34 = vadd.s32 %v2853_v54, %v2849_v60  ;;  %v2934_v59 = vsel %vm2930_vm13, %v2914_v37, %v2917_v3 }
 0x3fb   : > { %v2940_v22 = vsel %vm2932_vm11, %v2923_v23, %v2939_v35  ;;  %v2943_v0 = vsel %vm2933_vm8, %v2929_v45, 1326507024  ;;  %v2936_v8 = vsel %vm2932_vm11, %v2920_v30, %v2935_v25  ;;  %v3010_v7 = vor.u32 8388608, %v10891_v17 }
 0x3fc   : > { %v2941_v28 = vsel %vm2931_vm7, %v2938_v46, %v2940_v22  ;;  %v2944_v24 = vsel %vm2932_vm11, %v2926_v6, %v2943_v0  ;;  %v2855_v41 = vadd.s32 536870912, %v2854_v34  ;;  %v3014_v56 = vsel %vm3013_vm3, %v10893_v50, 0 }
 0x3fd   : > { %v2945_v36 = vsel %vm2931_vm7, %v2942_v32, %v2944_v24  ;;  %v10951_v63 = vmul.u32.u64.low %v10887_v4, %v2941_v28  ;;  %v10952_v44 = vmul.u32.u64.high %v10887_v4, %v2941_v28, %v10951_v63  ;;  %v2937_v43 = vsel %vm2931_vm7, %v2934_v59, %v2936_v8 }
 0x3fe   : > { %v10956_v53 = vmul.u32.u64.low %v10887_v4, %v2945_v36  ;;  %v10957_v49 = vmul.u32.u64.high %v10887_v4, %v2945_v36, %v10956_v53  ;;  %v10961_v55 = vshrl.u32 %v2855_v41, 30  ;;  %v3016_v3 = vand.u32 31, %v3014_v56 }
 0x3ff   : > { %v3109_v30 = vand.u32 2139095040, %v10883_v29  ;;  %v2956_v37 = vadd.s32 1, %v10952_v44  ;;  %v2953_v2 = vmul.u32 %v10887_v4, %v2937_v43  ;;  %v10973_v17 = vshll.u32 %v3010_v7, 8 }
 0x400   : > { %v2857_v33 = vshll.u32 %v10961_v55, 30  ;;  %v3017_v42 = vsub.s32 32, %v3016_v3  ;;  %vm2955_vm2 = vc.u32 %v10957_v49, %v10951_v63  ;;  %v13699_v50 = vand.u32 2147483647, %v10883_v29 }
 0x401   : > { %v2957_v10 = vsel %vm2955_vm2, %v2956_v37, %v10952_v44  ;;  %v3019_v60 = vshll.u32 %v13803_v9, %v3016_v3  ;;  %v3110_v23 = vshrl.u32 %v3109_v30, 23  ;;  %v3022_v6 = vshll.u32 %v13985_v57, %v3016_v3 }
 0x402   : > { %v2858_v18 = vsub.s32 %v2854_v34, %v2857_v33  ;;  %v2958_v26 = vadd.s32 %v2957_v10, %v2953_v2  ;;  %v3020_v39 = vshrl.u32 %v13985_v57, %v3017_v42  ;;  %v3023_v4 = vshrl.u32 %v13986_v38, %v3017_v42 }
 0x403   : > { %v3015_v46 = vshrl.u32 %v3014_v56, 5  ;;  %v3025_v54 = vshll.u32 %v13986_v38, %v3016_v3  ;;  %v3026_v25 = vshrl.u32 %v13987_v48, %v3017_v42  ;;  %v2850_v35 = vadd.s32 %v10925_v15, %v10922_v58 }
 0x404   : > { %v2860_v45 = vsub.s32 0, %v2858_v18  ;;  %v2959_v32 = vadd.s32 536870912, %v2958_v26  ;;  %v3021_v34 = vor.u32 %v3020_v39, %v3019_v60  ;;  %v3024_v59 = vor.u32 %v3023_v4, %v3022_v6 }
 0x405   : > { %v3027_v0 = vor.u32 %v3026_v25, %v3025_v54  ;;  %v3028_v8 = vshll.u32 %v13987_v48, %v3016_v3  ;;  %v3029_v28 = vshrl.u32 %v13988_v21, %v3017_v42  ;;  %v3031_v41 = vshll.u32 %v13988_v21, %v3016_v3 }
 0x406   : > { %v7769_v22 = vmin.u32 %v2860_v45, %v2858_v18  ;;  %v10987_v24 = vshrl.u32 %v2959_v32, 30  ;;  %v3032_v36 = vshrl.u32 %v13989_v16, %v3017_v42  ;;  %v7780_v44 = vadd.s32 4294967169, %v3110_v23 }
 0x407   : > { %v3018_v7 = vshrl.u32 %v13803_v9, %v3017_v42  ;;  %v3030_v58 = vor.u32 %v3029_v28, %v3028_v8  ;;  %vm3034_vm12 = vcmp.lt.s32.totalorder %v3015_v46, 1  ;;  %vm3036_vm6 = vcmp.lt.s32.totalorder %v3015_v46, 3 }
 0x408   : > { %v2862_v53 = vclz %v7769_v22  ;;  %v2961_v15 = vshll.u32 %v10987_v24, 30  ;;  %v3033_v56 = vor.u32 %v3032_v36, %v3031_v41  ;;  %vm3037_vm0 = vcmp.lt.s32.totalorder %v3015_v46, 4 }
 0x409   : > { %v3039_v30 = vsel %vm3037_vm0, %v3027_v0, 2102212464  ;;  %v3042_v33 = vsel %vm3034_vm12, %v3021_v34, %v3024_v59  ;;  %v3043_v37 = vsel %vm3037_vm0, %v3030_v58, 920167782  ;;  %vm3035_vm15 = vcmp.lt.s32.totalorder %v3015_v46, 2 }
 0x40a   : > { %v7770_v43 = vadd.s32 4294967294, %v2862_v53  ;;  %v10993_v2 = vsub.s32 %v2958_v26, %v2961_v15  ;;  %v3044_v3 = vsel %vm3036_vm6, %v3027_v0, %v3043_v37  ;;  %v3046_v10 = vsel %vm3034_vm12, %v3024_v59, %v3027_v0 }
 0x40b   : > { %v3038_v60 = vsel %vm3034_vm12, %v3018_v7, %v3021_v34  ;;  %v3040_v42 = vsel %vm3036_vm6, %v3024_v59, %v3039_v30  ;;  %v3047_v23 = vsel %vm3037_vm0, %v3033_v56, 1326507024  ;;  %v3045_v4 = vsel %vm3035_vm15, %v3042_v33, %v3044_v3 }
 0x40c   : > { %vm7771_vm14 = vcmp.lt.s32.totalorder %v7770_v43, 0  ;;  %v2964_v6 = vsub.s32 0, %v10993_v2  ;;  %v3048_v45 = vsel %vm3036_vm6, %v3030_v58, %v3047_v23  ;;  %v3116_v59 = vadd.s32 1, %v7780_v44 }
 0x40d   : > { %v2865_v39 = vsel %vm7771_vm14, 0, %v7770_v43  ;;  %v3049_v32 = vsel %vm3035_vm15, %v3046_v10, %v3048_v45  ;;  %v11007_v41 = vmul.u32.u64.low %v10973_v17, %v3045_v4  ;;  %v11008_v36 = vmul.u32.u64.high %v10973_v17, %v3045_v4, %v11007_v41  ;;  %v11014_v43 = vpop.f32.mrb[10].mxu1 }
 0x40e   : > { %v2866_v54 = vsub.s32 32, %v2865_v39  ;;  %v2867_v25 = vshll.u32 %v2858_v18, %v2865_v39  ;;  %v2870_v26 = vsub.s32 4294967266, %v2865_v39  ;;  %v7773_v22 = vmin.u32 %v2964_v6, %v10993_v2 }
 0x40f   : > { %v11003_v0 = vmul.u32.u64.low %v10973_v17, %v3049_v32  ;;  %v11004_v34 = vmul.u32.u64.high %v10973_v17, %v3049_v32, %v11003_v0  ;;  %vm3117_vm9 = vcmp.gt.s32.totalorder %v3116_v59, 0  ;;  %v3041_v58 = vsel %vm3035_vm15, %v3038_v60, %v3040_v42 }
 0x410   : > { %v2868_v8 = vshrl.u32 %v2850_v35, %v2866_v54  ;;  %v2871_v28 = vadd.s32 127, %v2870_v26  ;;  %v2966_v53 = vclz %v7773_v22  ;;  %v3118_v15 = vsel %vm3117_vm9, %v3116_v59, 0 }
 0x411   : > { %vm3059_vm5 = vc.u32 %v11004_v34, %v11007_v41  ;;  %v3060_v44 = vadd.s32 1, %v11008_v36  ;;  %v3113_v30 = vand.u32 8388607, %v13699_v50  ;;  %v3120_v33 = vand.u32 31, %v3118_v15 }
 0x412   : > { %v2869_v18 = vor.u32 %v2868_v8, %v2867_v25  ;;  %v2872_v7 = vshll.u32 %v2871_v28, 23  ;;  %v7774_v56 = vadd.s32 4294967294, %v2966_v53  ;;  %v3057_v3 = vmul.u32 %v10973_v17, %v3041_v58 }
 0x413   : > { %v3061_v60 = vsel %vm3059_vm5, %v3060_v44, %v11008_v36  ;;  %v3121_v42 = vsub.s32 32, %v3120_v33  ;;  %vm11023_vm1 = vcmp.le.f32.partialorder %v2794_v11, 0.7853982  ;;  %vm2796_vm13 = vcmp.lt.s32.totalorder %v10857_v12, 0 }
 0x414   : > { %v2873_v35 = vor.u32 4788187, %v2872_v7  ;;  %v2876_v37 = vcvt.s32.f32 %v2869_v18  ;;  %vm7775_vm4 = vcmp.lt.s32.totalorder %v7774_v56, 0  ;;  %v3062_v6 = vadd.s32 %v3061_v60, %v3057_v3 }
 0x415   : > { %v2969_v10 = vsel %vm7775_vm4, 0, %v7774_v56  ;;  %v3114_v45 = vor.u32 8388608, %v3113_v30  ;;  %v2750_v17 = vadd.f32 %v10873_v40, %v10847_v47  ;;  %v11032_v54 = vadd.f32 %v10875_v1, %v10853_v14 }
 0x416   : > { %v2874_v46 = vand.u32 2147483647, %v2873_v35  ;;  %v2974_v39 = vsub.s32 4294967266, %v2969_v10  ;;  %v2880_v25 = vsub.s32 4, %v10961_v55  ;;  %v2954_v11 = vadd.s32 %v10951_v63, %v10957_v49 }
 0x417   : > { %v3063_v26 = vadd.s32 536870912, %v3062_v6  ;;  %v3119_v32 = vshrl.u32 %v3118_v15, 5  ;;  %v2970_v0 = vsub.s32 32, %v2969_v10  ;;  %v3124_v59 = vshrl.u32 %v13985_v57, %v3121_v42 }
 0x418   : > { %v2877_v4 = vmul.f32 %v2876_v37, %v2874_v46  ;;  %v3127_v8 = vshrl.u32 %v13986_v38, %v3121_v42  ;;  %v2975_v28 = vadd.s32 127, %v2974_v39  ;;  %v3123_v40 = vshll.u32 %v13803_v9, %v3120_v33 }
 0x419   : > { %v11039_v36 = vshrl.u32 %v3063_v26, 30  ;;  %v3130_v1 = vshrl.u32 %v13987_v48, %v3121_v42  ;;  %v3126_v63 = vshll.u32 %v13985_v57, %v3120_v33  ;;  %v3129_v49 = vshll.u32 %v13986_v38, %v3120_v33 }
 0x41a   : > { %v2878_v22 = vxor.u32 2147483648, %v2877_v4  ;;  %v3133_v18 = vshrl.u32 %v13988_v21, %v3121_v42  ;;  %v3132_v15 = vshll.u32 %v13987_v48, %v3120_v33  ;;  %v11055_v56 = vshll.u32 %v3114_v45, 8 }
 0x41b   : > { %v3065_v58 = vshll.u32 %v11039_v36, 30  ;;  %v3125_v35 = vor.u32 %v3124_v59, %v3123_v40  ;;  %v3128_v44 = vor.u32 %v3127_v8, %v3126_v63  ;;  %v3131_v30 = vor.u32 %v3130_v1, %v3129_v49 }
 0x41c   : > { %v2879_v53 = vsel %vm2796_vm13, %v2878_v22, %v2877_v4  ;;  %v11057_v37 = vmul.f32 3.0, %v2750_v17  ;;  %v2972_v3 = vshrl.u32 %v2954_v11, %v2970_v0  ;;  %v2976_v46 = vshll.u32 %v2975_v28, 23 }
 0x41d   : > { %v11051_v7 = vsel %vm11023_vm1, %v10857_v12, %v2879_v53  ;;  %v11059_v60 = vsub.s32 %v3062_v6, %v3065_v58  ;;  %v3134_v39 = vor.u32 %v3133_v18, %v3132_v15  ;;  %v3135_v4 = vshll.u32 %v13988_v21, %v3120_v33 }
 0x41e   : > { %13992 = vst [vmem:[#allocation13_spill] sm:$0xff] %v11057_v37  ;;  %v3136_v26 = vshrl.u32 %v13989_v16, %v3121_v42  ;;  %vm3138_vm10 = vcmp.lt.s32.totalorder %v3119_v32, 1  ;;  %vm3139_vm7 = vcmp.lt.s32.totalorder %v3119_v32, 2  ;;  %v2971_v22 = vshll.u32 %v10993_v2, %v2969_v10 }
 0x41f   : > { %v3068_v45 = vsub.s32 0, %v11059_v60  ;;  %vm3140_vm11 = vcmp.lt.s32.totalorder %v3119_v32, 3  ;;  %vm3141_vm8 = vcmp.lt.s32.totalorder %v3119_v32, 4  ;;  %v3122_v17 = vshrl.u32 %v13803_v9, %v3121_v42 }
 0x420   : > { %v3137_v59 = vor.u32 %v3136_v26, %v3135_v4  ;;  %v3143_v11 = vsel %vm3141_vm8, %v3131_v30, 2102212464  ;;  %v3146_v6 = vsel %vm3138_vm10, %v3125_v35, %v3128_v44  ;;  %v2973_v0 = vor.u32 %v2972_v3, %v2971_v22  ;;  %v11087_v4 = vpop.f32.mrb[11].mxu1 }
 0x421   : > { %v2977_v8 = vor.u32 4788187, %v2976_v46  ;;  %v7777_v33 = vmin.u32 %v3068_v45, %v11059_v60  ;;  %v3147_v28 = vsel %vm3141_vm8, %v3134_v39, 920167782  ;;  %v3142_v40 = vsel %vm3138_vm10, %v3122_v17, %v3125_v35 }
 0x422   : > { %v3148_v1 = vsel %vm3140_vm11, %v3131_v30, %v3147_v28  ;;  %v3150_v2 = vsel %vm3138_vm10, %v3128_v44, %v3131_v30  ;;  %v3151_v10 = vsel %vm3141_vm8, %v3137_v59, 1326507024  ;;  %v3144_v63 = vsel %vm3140_vm11, %v3128_v44, %v3143_v11 }
 0x423   : > { %v3070_v53 = vclz %v7777_v33  ;;  %v3149_v42 = vsel %vm3139_vm7, %v3146_v6, %v3148_v1  ;;  %v3152_v49 = vsel %vm3140_vm11, %v3134_v39, %v3151_v10  ;;  %v2881_v18 = vsel %vm2796_vm13, %v2880_v25, %v10961_v55 }
 0x424   : > { %v3153_v58 = vsel %vm3139_vm7, %v3150_v2, %v3152_v49  ;;  %v11079_v15 = vmul.u32.u64.low %v11055_v56, %v3149_v42  ;;  %v11080_v35 = vmul.u32.u64.high %v11055_v56, %v3149_v42, %v11079_v15  ;;  %v2978_v30 = vand.u32 2147483647, %v2977_v8 }
 0x425   : > { %v7778_v3 = vadd.s32 4294967294, %v3070_v53  ;;  %v11084_v46 = vmul.u32.u64.low %v11055_v56, %v3153_v58  ;;  %v11085_v44 = vmul.u32.u64.high %v11055_v56, %v3153_v58, %v11084_v46  ;;  %v3145_v39 = vsel %vm3139_vm7, %v3142_v40, %v3144_v63 }
 0x426   : > { %v13697_v26 = vand.u32 2147483647, %v11057_v37  ;;  %v11092_v55 = vmul.f32 3.0, %v11032_v54  ;;  %v2980_v25 = vcvt.s32.f32 %v2973_v0  ;;  %v3213_v22 = vand.u32 2139095040, %v11057_v37 }
 0x427   : > { %vm7779_vm3 = vcmp.lt.s32.totalorder %v7778_v3, 0  ;;  %v2883_v45 = vsel %vm11023_vm1, 0, %v2881_v18  ;;  %v3058_v17 = vadd.s32 %v11007_v41, %v11004_v34  ;;  %v3164_v11 = vadd.s32 1, %v11080_v35 }
 0x428   : > { %13993 = vst [vmem:[#allocation6_spill] sm:$0xff] %v11092_v55  ;;  %v3073_v59 = vsel %vm7779_vm3, 0, %v7778_v3  ;;  %v2981_v32 = vmul.f32 %v2980_v25, %v2978_v30  ;;  %v3161_v33 = vmul.u32 %v11055_v56, %v3145_v39  ;;  %vm3163_vm2 = vc.u32 %v11085_v44, %v11079_v15 }
 0x429   : > { %v3074_v6 = vsub.s32 32, %v3073_v59  ;;  %v3078_v8 = vsub.s32 4294967266, %v3073_v59  ;;  %v3214_v54 = vshrl.u32 %v3213_v22, 23  ;;  %v3217_v0 = vand.u32 8388607, %v13697_v26 }
 0x42a   : > { %v13696_v23 = vand.u32 2147483647, %v11092_v55  ;;  %v3165_v34 = vsel %vm3163_vm2, %v3164_v11, %v11080_v35  ;;  %v3317_v41 = vand.u32 2139095040, %v11092_v55  ;;  %vm2900_vm12 = vcmp.lt.s32.totalorder %v10860_v62, 0 }
 0x42b   : > { %v3076_v28 = vshrl.u32 %v3058_v17, %v3074_v6  ;;  %v3079_v40 = vadd.s32 127, %v3078_v8  ;;  %v3166_v1 = vadd.s32 %v3165_v34, %v3161_v33  ;;  %v7784_v2 = vadd.s32 4294967169, %v3214_v54 }
 0x42c   : > { %v2754_v56 = vadd.f32 %v10878_v19, %v10847_v47  ;;  %v2887_v10 = vadd.s32 3, %v2883_v45  ;;  %v3075_v53 = vshll.u32 %v11059_v60, %v3073_v59  ;;  %v3318_v42 = vshrl.u32 %v3317_v41, 23 }
 0x42d   : > { %v3080_v63 = vshll.u32 %v3079_v40, 23  ;;  %v2982_v49 = vxor.u32 2147483648, %v2981_v32  ;;  %v3088_v18 = vsub.s32 4, %v11039_v36  ;;  %v3167_v58 = vadd.s32 536870912, %v3166_v1 }
 0x42e   : > { %v3220_v30 = vadd.s32 1, %v7784_v2  ;;  %8637 = vcosq.f32 %v11051_v7  ;;  %v3077_v35 = vor.u32 %v3076_v28, %v3075_v53  ;;  %v3218_v3 = vor.u32 8388608, %v3217_v0 }
 0x42f   : > { %v11116_v46 = vand.u32 8388607, %v13696_v23  ;;  %v3081_v39 = vor.u32 4788187, %v3080_v63  ;;  %v11118_v19 = vshrl.u32 %v3167_v58, 30  ;;  %v7788_v60 = vadd.s32 4294967169, %v3318_v42 }
 0x430   : > { %vm3221_vm6 = vcmp.gt.s32.totalorder %v3220_v30, 0  ;;  %8639 = vsinq.f32 %v11051_v7  ;;  %v11121_v25 = vand.u32 3, %v2887_v10  ;;  %vm3004_vm0 = vcmp.lt.s32.totalorder %v10866_v20, 0 }
 0x431   : > { %v3222_v22 = vsel %vm3221_vm6, %v3220_v30, 0  ;;  %v2983_v45 = vsel %vm2900_vm12, %v2982_v49, %v2981_v32  ;;  %v11129_v17 = vsel %vm3004_vm0, %v3088_v18, %v11039_v36  ;;  %v3169_v59 = vshll.u32 %v11118_v19, 30 }
 0x432   : > { %13994 = vst [vmem:[#allocation17_spill] sm:$0xff] %v11121_v25  ;;  %v3224_v11 = vand.u32 31, %v3222_v22  ;;  %v3084_v6 = vcvt.s32.f32 %v3077_v35  ;;  %v11132_v8 = vshll.u32 %v3218_v3, 8  ;;  %v3322_v7 = vor.u32 8388608, %v11116_v46 }
 0x433   : > { %v11135_v33 = vmul.f32 3.0, %v2754_v56  ;;  %v3082_v54 = vand.u32 2147483647, %v3081_v39  ;;  %v11137_v0 = vsub.s32 %v3166_v1, %v3169_v59  ;;  %v3324_v32 = vadd.s32 1, %v7788_v60 }
 0x434   : > { %v3225_v28 = vsub.s32 32, %v3224_v11  ;;  %v3223_v40 = vshrl.u32 %v3222_v22, 5  ;;  %v3227_v34 = vshll.u32 %v13803_v9, %v3224_v11  ;;  %v3230_v36 = vshll.u32 %v13985_v57, %v3224_v11 }
 0x435   : > { %13995 = vst [vmem:[#allocation7_spill] sm:$0xff] %v11135_v33  ;;  %v3233_v41 = vshll.u32 %v13986_v38, %v3224_v11  ;;  %v3172_v2 = vsub.s32 0, %v11137_v0  ;;  %v3236_v56 = vshll.u32 %v13987_v48, %v3224_v11  ;;  %vm11148_vm15 = vcmp.le.f32.partialorder %v2898_v51, 0.7853982 }
 0x436   : > { %v3228_v10 = vshrl.u32 %v13985_v57, %v3225_v28  ;;  %v3231_v53 = vshrl.u32 %v13986_v38, %v3225_v28  ;;  %v3234_v63 = vshrl.u32 %v13987_v48, %v3225_v28  ;;  %v3237_v42 = vshrl.u32 %v13988_v21, %v3225_v28 }
 0x437   : > { %v3239_v49 = vshll.u32 %v13988_v21, %v3224_v11  ;;  %v3240_v18 = vshrl.u32 %v13989_v16, %v3225_v28  ;;  %v7781_v58 = vmin.u32 %v3172_v2, %v11137_v0  ;;  %v13698_v3 = vand.u32 2147483647, %v11135_v33 }
 0x438   : > { %v3229_v30 = vor.u32 %v3228_v10, %v3227_v34  ;;  %v3232_v35 = vor.u32 %v3231_v53, %v3230_v36  ;;  %v11158_v46 = vpop.eup %8637  ;;  %v11160_v51 = vmul.f32 %v3084_v6, %v3082_v54  ;;  %v3235_v39 = vor.u32 %v3234_v63, %v3233_v41 }
 0x439   : > { %13998 = vst [vmem:[#allocation4_spill] sm:$0xff] %v11158_v46  ;;  %v3238_v60 = vor.u32 %v3237_v42, %v3236_v56  ;;  %v3241_v22 = vor.u32 %v3240_v18, %v3239_v49  ;;  %v3174_v59 = vclz %v7781_v58  ;;  %v3226_v23 = vshrl.u32 %v13803_v9, %v3225_v28 }
 0x43a   : > { %vm3242_vm14 = vcmp.lt.s32.totalorder %v3223_v40, 1  ;;  %vm3325_vm9 = vcmp.gt.s32.totalorder %v3324_v32, 0  ;;  %v11163_v11 = vpop.eup %8639  ;;  %vm3243_vm5 = vcmp.lt.s32.totalorder %v3223_v40, 2  ;;  %vm3244_vm4 = vcmp.lt.s32.totalorder %v3223_v40, 3 }
 0x43b   : > { %13999 = vst [vmem:[#allocation11_spill] sm:$0xff] %v11163_v11  ;;  %vm3245_vm1 = vcmp.lt.s32.totalorder %v3223_v40, 4  ;;  %v3250_v34 = vsel %vm3242_vm14, %v3229_v30, %v3232_v35  ;;  %v7782_v36 = vadd.s32 4294967294, %v3174_v59  ;;  %v3254_v53 = vsel %vm3242_vm14, %v3232_v35, %v3235_v39 }
 0x43c   : > { %v3247_v2 = vsel %vm3245_vm1, %v3235_v39, 2102212464  ;;  %v3251_v10 = vsel %vm3245_vm1, %v3238_v60, 920167782  ;;  %v3246_v6 = vsel %vm3242_vm14, %v3226_v23, %v3229_v30  ;;  %v3255_v56 = vsel %vm3245_vm1, %v3241_v22, 1326507024 }
 0x43d   : > { %v3248_v54 = vsel %vm3244_vm4, %v3232_v35, %v3247_v2  ;;  %v3252_v41 = vsel %vm3244_vm4, %v3235_v39, %v3251_v10  ;;  %vm7783_vm13 = vcmp.lt.s32.totalorder %v7782_v36, 0  ;;  %v3256_v28 = vsel %vm3244_vm4, %v3238_v60, %v3255_v56  ;;  %v11180_v60 = vpop.f32.mrb[12].mxu1 }
 0x43e   : > { %v3253_v63 = vsel %vm3243_vm5, %v3250_v34, %v3252_v41  ;;  %v3326_v42 = vsel %vm3325_vm9, %v3324_v32, 0  ;;  %v3177_v49 = vsel %vm7783_vm13, 0, %v7782_v36  ;;  %v3257_v18 = vsel %vm3243_vm5, %v3254_v53, %v3256_v28 }
 0x43f   : > { %v11169_v58 = vmul.u32.u64.low %v11132_v8, %v3253_v63  ;;  %v11170_v26 = vmul.u32.u64.high %v11132_v8, %v3253_v63, %v11169_v58  ;;  %v11176_v23 = vsel %vm11148_vm15, %v10860_v62, %v2983_v45  ;;  %v3162_v30 = vadd.s32 %v11079_v15, %v11085_v44 }
 0x440   : > { %v3178_v35 = vsub.s32 32, %v3177_v49  ;;  %v3182_v39 = vsub.s32 4294967266, %v3177_v49  ;;  %v3249_v32 = vsel %vm3243_vm5, %v3246_v6, %v3248_v54  ;;  %v3328_v34 = vand.u32 31, %v3326_v42 }
 0x441   : > { %v11184_v22 = vmul.u32.u64.low %v11132_v8, %v3257_v18  ;;  %v11185_v59 = vmul.u32.u64.high %v11132_v8, %v3257_v18, %v11184_v22  ;;  %v11187_v2 = vshll.u32 %v3322_v7, 8  ;;  %v3421_v45 = vand.u32 2139095040, %v11135_v33 }
 0x442   : > { %v3183_v36 = vadd.s32 127, %v3182_v39  ;;  %v2756_v10 = vadd.f32 %v10881_v27, %v10853_v14  ;;  %v3086_v15 = vxor.u32 2147483648, %v11160_v51  ;;  %v3268_v44 = vadd.s32 1, %v11170_v26 }
 0x443   : > { %v3329_v53 = vsub.s32 32, %v3328_v34  ;;  %v11196_v40 = vand.u32 8388607, %v13698_v3  ;;  %v3180_v6 = vshrl.u32 %v3162_v30, %v3178_v35  ;;  %v3265_v54 = vmul.u32 %v11132_v8, %v3249_v32 }
 0x444   : > { %v11199_v41 = vshrl.u32 %v3326_v42, 5  ;;  %v3331_v7 = vshll.u32 %v13803_v9, %v3328_v34  ;;  %v3184_v56 = vshll.u32 %v3183_v36, 23  ;;  %vm3267_vm10 = vc.u32 %v11185_v59, %v11169_v58 }
 0x445   : > { %v3332_v27 = vshrl.u32 %v13985_v57, %v3329_v53  ;;  %v3334_v63 = vshll.u32 %v13985_v57, %v3328_v34  ;;  %v3269_v28 = vsel %vm3267_vm10, %v3268_v44, %v11170_v26  ;;  %v3335_v18 = vshrl.u32 %v13986_v38, %v3329_v53 }
 0x446   : > { %v3337_v30 = vshll.u32 %v13986_v38, %v3328_v34  ;;  %v3340_v8 = vshll.u32 %v13987_v48, %v3328_v34  ;;  %v3270_v42 = vadd.s32 %v3269_v28, %v3265_v54  ;;  %v3338_v39 = vshrl.u32 %v13987_v48, %v3329_v53 }
 0x447   : > { %v3333_v35 = vor.u32 %v3332_v27, %v3331_v7  ;;  %v3341_v32 = vshrl.u32 %v13988_v21, %v3329_v53  ;;  %v3179_v22 = vshll.u32 %v11137_v0, %v3177_v49  ;;  %v3336_v36 = vor.u32 %v3335_v18, %v3334_v63 }
 0x448   : > { %v3343_v3 = vshll.u32 %v13988_v21, %v3328_v34  ;;  %v3344_v50 = vshrl.u32 %v13989_v16, %v3329_v53  ;;  %v3271_v26 = vadd.s32 536870912, %v3270_v42  ;;  %v3339_v44 = vor.u32 %v3338_v39, %v3337_v30 }
 0x449   : > { %v3342_v52 = vor.u32 %v3341_v32, %v3340_v8  ;;  %v3422_v13 = vshrl.u32 %v3421_v45, 23  ;;  %vm11217_vm7 = vcmp.le.f32.partialorder %v14000_v5, 0.7853982  ;;  %v3181_v7 = vor.u32 %v3180_v6, %v3179_v22 }
 0x44a   : > { %v3185_v27 = vor.u32 4788187, %v3184_v56  ;;  %v3345_v28 = vor.u32 %v3344_v50, %v3343_v3  ;;  %vm3346_vm11 = vcmp.lt.s32.totalorder %v11199_v41, 1  ;;  %v11222_v0 = vshrl.u32 %v3271_v26, 30  ;;  %v11235_v56 = vpop.f32.mrb[13].mxu1 }
 0x44b   : > { %v3330_v49 = vshrl.u32 %v13803_v9, %v3329_v53  ;;  %vm3349_vm8 = vcmp.lt.s32.totalorder %v11199_v41, 4  ;;  %v3354_v34 = vsel %vm3346_vm11, %v3333_v35, %v3336_v36  ;;  %vm3347_vm3 = vcmp.lt.s32.totalorder %v11199_v41, 2 }
 0x44c   : > { %14003 = vst [vmem:[#allocation23_spill] sm:$0xff] %v11222_v0  ;;  %vm3348_vm2 = vcmp.lt.s32.totalorder %v11199_v41, 3  ;;  %v3355_v5 = vsel %vm3349_vm8, %v3342_v52, 920167782  ;;  %v3358_v45 = vsel %vm3346_vm11, %v3336_v36, %v3339_v44  ;;  %v3273_v50 = vshll.u32 %v11222_v0, 30 }
 0x44d   : > { %v3351_v3 = vsel %vm3349_vm8, %v3339_v44, 2102212464  ;;  %v3356_v6 = vsel %vm3348_vm2, %v3339_v44, %v3355_v5  ;;  %v3359_v53 = vsel %vm3349_vm8, %v3345_v28, 1326507024  ;;  %v3186_v63 = vand.u32 2147483647, %v3185_v27 }
 0x44e   : > { %v3357_v18 = vsel %vm3347_vm3, %v3354_v34, %v3356_v6  ;;  %v3360_v30 = vsel %vm3348_vm2, %v3342_v52, %v3359_v53  ;;  %v11241_v8 = vmul.f32 3.0, %v2756_v10  ;;  %v3188_v39 = vcvt.s32.f32 %v3181_v7 }
 0x44f   : > { %v11243_v32 = vsub.s32 %v3270_v42, %v3273_v50  ;;  %v3350_v22 = vsel %vm3346_vm11, %v3330_v49, %v3333_v35  ;;  %v3361_v26 = vsel %vm3347_vm3, %v3358_v45, %v3360_v30  ;;  %v3352_v44 = vsel %vm3348_vm2, %v3336_v36, %v3351_v3 }
 0x450   : > { %v11252_v27 = vmul.u32.u64.low %v11187_v2, %v3361_v26  ;;  %v11253_v28 = vmul.u32.u64.high %v11187_v2, %v3361_v26, %v11252_v27  ;;  %v7792_v34 = vadd.s32 4294967169, %v3422_v13  ;;  %v3087_v52 = vsel %vm3004_vm0, %v3086_v15, %v11160_v51 }
 0x451   : > { %v3276_v10 = vsub.s32 0, %v11243_v32  ;;  %v11260_v42 = vmul.u32.u64.low %v11187_v2, %v3357_v18  ;;  %v11261_v35 = vmul.u32.u64.high %v11187_v2, %v3357_v18, %v11260_v42  ;;  %8641 = vcosq.f32 %v11176_v23 }
 0x452   : > { %v11265_v7 = vmul.f32 %v3188_v39, %v3186_v63  ;;  %v3426_v36 = vor.u32 8388608, %v11196_v40  ;;  %v3428_v49 = vadd.s32 1, %v7792_v34  ;;  %8643 = vsinq.f32 %v11176_v23 }
 0x453   : > { %v7785_v51 = vmin.u32 %v3276_v10, %v11243_v32  ;;  %v3353_v15 = vsel %vm3347_vm3, %v3350_v22, %v3352_v44  ;;  %v11278_v5 = vsel %vm11217_vm7, %v10866_v20, %v3087_v52  ;;  %vm3371_vm6 = vc.u32 %v11253_v28, %v11260_v42 }
 0x454   : > { %vm3429_vm0 = vcmp.gt.s32.totalorder %v3428_v49, 0  ;;  %v3525_v23 = vand.u32 2139095040, %v11241_v8  ;;  %v3266_v40 = vadd.s32 %v11169_v58, %v11185_v59  ;;  %v3372_v50 = vadd.s32 1, %v11261_v35 }
 0x455   : > { %v3278_v45 = vclz %v7785_v51  ;;  %v3430_v3 = vsel %vm3429_vm0, %v3428_v49, 0  ;;  %v3369_v6 = vmul.u32 %v11187_v2, %v3353_v15  ;;  %v11288_v63 = vshll.u32 %v3426_v36, 8 }
 0x456   : > { %v3432_v53 = vand.u32 31, %v3430_v3  ;;  %v3373_v30 = vsel %vm3371_vm6, %v3372_v50, %v11261_v35  ;;  %v11294_v22 = vadd.f32 %v10908_v61, %v10847_v47  ;;  %v11296_v59 = vshrl.u32 %v3430_v3, 5 }
 0x457   : > { %v7786_v18 = vadd.s32 4294967294, %v3278_v45  ;;  %v3374_v58 = vadd.s32 %v3373_v30, %v3369_v6  ;;  %v3526_v44 = vshrl.u32 %v3525_v23, 23  ;;  %vm13761_vm9 = vcmp.lt.s32.totalorder %v10883_v29, 0 }
 0x458   : > { %v3433_v26 = vsub.s32 32, %v3432_v53  ;;  %v3435_v2 = vshll.u32 %v13803_v9, %v3432_v53  ;;  %v3438_v27 = vshll.u32 %v13985_v57, %v3432_v53  ;;  %v3441_v34 = vshll.u32 %v13986_v38, %v3432_v53 }
 0x459   : > { %vm7787_vm14 = vcmp.lt.s32.totalorder %v7786_v18, 0  ;;  %v3375_v10 = vadd.s32 536870912, %v3374_v58  ;;  %v3444_v36 = vshll.u32 %v13987_v48, %v3432_v53  ;;  %v3447_v15 = vshll.u32 %v13988_v21, %v3432_v53 }
 0x45a   : > { %v3281_v52 = vsel %vm7787_vm14, 0, %v7786_v18  ;;  %v3436_v35 = vshrl.u32 %v13985_v57, %v3433_v26  ;;  %v3439_v51 = vshrl.u32 %v13986_v38, %v3433_v26  ;;  %v3442_v3 = vshrl.u32 %v13987_v48, %v3433_v26 }
 0x45b   : > { %v3282_v61 = vsub.s32 32, %v3281_v52  ;;  %v3286_v49 = vsub.s32 4294967266, %v3281_v52  ;;  %v11305_v23 = vpop.eup %8641  ;;  %v11307_v45 = vshrl.u32 %v3375_v10, 30  ;;  %v3445_v6 = vshrl.u32 %v13988_v21, %v3433_v26 }
 0x45c   : > { %v3437_v50 = vor.u32 %v3436_v35, %v3435_v2  ;;  %v11311_v18 = vpop.eup %8643  ;;  %v3440_v13 = vor.u32 %v3439_v51, %v3438_v27  ;;  %v3448_v39 = vshrl.u32 %v13989_v16, %v3433_v26  ;;  %v3283_v53 = vshll.u32 %v11243_v32, %v3281_v52 }
 0x45d   : > { %14004 = vst [vmem:[#allocation20_spill] sm:$0xff] %v11307_v45  ;;  %v3284_v30 = vshrl.u32 %v3266_v40, %v3282_v61  ;;  %v3287_v41 = vadd.s32 127, %v3286_v49  ;;  %v3377_v0 = vshll.u32 %v11307_v45, 30  ;;  %v3443_v10 = vor.u32 %v3442_v3, %v3441_v34 }
 0x45e   : > { %v3446_v20 = vor.u32 %v3445_v6, %v3444_v36  ;;  %v3449_v35 = vor.u32 %v3448_v39, %v3447_v15  ;;  %v7796_v46 = vadd.s32 4294967169, %v3526_v44  ;;  %v14005_v11 = vand.u32 2147483647, %v11241_v8 }
 0x45f   : > { %v3288_v2 = vshll.u32 %v3287_v41, 23  ;;  %v3285_v12 = vor.u32 %v3284_v30, %v3283_v53  ;;  %v11319_v40 = vsub.s32 %v3374_v58, %v3377_v0  ;;  %v3434_v27 = vshrl.u32 %v13803_v9, %v3433_v26 }
 0x460   : > { %v3529_v25 = vand.u32 8388607, %v14005_v11  ;;  %vm3450_vm5 = vcmp.lt.s32.totalorder %v11296_v59, 1  ;;  %v14006_v61 = vand.u32 2147483647, %v10883_v29  ;;  %v14007_v32 = vmov 0 }
 0x461   : > { %v3289_v34 = vor.u32 4788187, %v3288_v2  ;;  %vm3452_vm1 = vcmp.lt.s32.totalorder %v11296_v59, 3  ;;  %vm3453_vm13 = vcmp.lt.s32.totalorder %v11296_v59, 4  ;;  %v3458_v41 = vsel %vm3450_vm5, %v3437_v50, %v3440_v13 }
 0x462   : > { %vm11325_vm4 = vcmp.le.f32.partialorder %v14006_v61, 0.7853982  ;;  %v3380_v11 = vsub.s32 0, %v11319_v40  ;;  %v3455_v0 = vsel %vm3453_vm13, %v3443_v10, 2102212464  ;;  %v3462_v58 = vsel %vm3450_vm5, %v3440_v13, %v3443_v10 }
 0x463   : > { %v14008_v32 = vsel %vm11325_vm4, 4294967295, %v14007_v32  ;;  %v3459_v39 = vsel %vm3453_vm13, %v3446_v20, 920167782  ;;  %vm3451_vm10 = vcmp.lt.s32.totalorder %v11296_v59, 2  ;;  %v3454_v26 = vsel %vm3450_vm5, %v3434_v27, %v3437_v50  ;;  %v11347_v27 = vpop.f32.mrb[14].mxu1 }
 0x464   : > { %14009 = vst [vmem:[#allocation30_spill] sm:$0xff] %v14008_v32  ;;  %v3460_v44 = vsel %vm3452_vm1, %v3443_v10, %v3459_v39  ;;  %v3463_v52 = vsel %vm3453_vm13, %v3449_v35, 1326507024  ;;  %v3290_v36 = vand.u32 2147483647, %v3289_v34  ;;  %v7789_v49 = vmin.u32 %v3380_v11, %v11319_v40 }
 0x465   : > { %v3461_v51 = vsel %vm3451_vm10, %v3458_v41, %v3460_v44  ;;  %v3464_v15 = vsel %vm3452_vm1, %v3446_v20, %v3463_v52  ;;  %v3456_v3 = vsel %vm3452_vm1, %v3440_v13, %v3455_v0  ;;  %v3292_v2 = vcvt.s32.f32 %v3285_v12 }
 0x466   : > { %v3465_v6 = vsel %vm3451_vm10, %v3462_v58, %v3464_v15  ;;  %v11339_v30 = vmul.u32.u64.low %v11288_v63, %v3461_v51  ;;  %v11340_v53 = vmul.u32.u64.high %v11288_v63, %v3461_v51, %v11339_v30  ;;  %v3382_v50 = vclz %v7789_v49 }
 0x467   : > { %v11344_v10 = vmul.u32.u64.low %v11288_v63, %v3465_v6  ;;  %v11345_v35 = vmul.u32.u64.high %v11288_v63, %v3465_v6, %v11344_v10  ;;  %8645 = vcosq.f32 %v11278_v5  ;;  %v14010_v20 = vsel %vm11217_vm7, 0, %v11129_v17 }
 0x468   : > { %v11354_v13 = vadd.s32 3, %v14010_v20  ;;  %v14011_v61 = vxor.u32 2147483648, %v11265_v7  ;;  %v3532_v34 = vadd.s32 1, %v7796_v46  ;;  %v11361_v41 = vmul.f32 %v3292_v2, %v3290_v36 }
 0x469   : > { %v7790_v11 = vadd.s32 4294967294, %v3382_v50  ;;  %v3457_v0 = vsel %vm3451_vm10, %v3454_v26, %v3456_v3  ;;  %v2762_v54 = vadd.f32 %v10966_v31, %v10853_v14  ;;  %v3476_v17 = vadd.s32 1, %v11340_v53 }
 0x46a   : > { %v3191_v12 = vsel %vm13761_vm9, %v14011_v61, %v11265_v7  ;;  %v3530_v39 = vor.u32 8388608, %v3529_v25  ;;  %vm3533_vm7 = vcmp.gt.s32.totalorder %v3532_v34, 0  ;;  %v11369_v58 = vmul.f32 3.0, %v11294_v22 }
 0x46b   : > { %v11374_v46 = vsel %vm11325_vm4, %v10883_v29, %v3191_v12  ;;  %v3370_v7 = vadd.s32 %v11260_v42, %v11253_v28  ;;  %vm7791_vm11 = vcmp.lt.s32.totalorder %v7790_v11, 0  ;;  %vm3475_vm8 = vc.u32 %v11345_v35, %v11339_v30 }
 0x46c   : > { %14012 = vst [vmem:[#allocation27_spill] sm:$0xff] %v11369_v58  ;;  %v3385_v31 = vsel %vm7791_vm11, 0, %v7790_v11  ;;  %v3473_v59 = vmul.u32 %v11288_v63, %v3457_v0  ;;  %v3477_v25 = vsel %vm3475_vm8, %v3476_v17, %v11340_v53  ;;  %v3534_v26 = vsel %vm3533_vm7, %v3532_v34, 0 }
 0x46d   : > { %v3294_v22 = vxor.u32 2147483648, %v11361_v41  ;;  %v3386_v44 = vsub.s32 32, %v3385_v31  ;;  %v3390_v52 = vsub.s32 4294967266, %v3385_v31  ;;  %v11383_v36 = vmul.f32 3.0, %v2762_v54 }
 0x46e   : > { %v3478_v49 = vadd.s32 %v3477_v25, %v3473_v59  ;;  %v3536_v51 = vand.u32 31, %v3534_v26  ;;  %v11385_v15 = vshll.u32 %v3530_v39, 8  ;;  %v3387_v42 = vshll.u32 %v11319_v40, %v3385_v31 }
 0x46f   : > { %v3388_v3 = vshrl.u32 %v3370_v7, %v3386_v44  ;;  %v3391_v6 = vadd.s32 127, %v3390_v52  ;;  %v3629_v63 = vand.u32 2139095040, %v11369_v58  ;;  %v3535_v2 = vshrl.u32 %v3534_v26, 5 }
 0x470   : > { %v3479_v53 = vadd.s32 536870912, %v3478_v49  ;;  %v3537_v50 = vsub.s32 32, %v3536_v51  ;;  %v3539_v10 = vshll.u32 %v13803_v9, %v3536_v51  ;;  %v3542_v12 = vshll.u32 %v13985_v57, %v3536_v51 }
 0x471   : > { %v3389_v20 = vor.u32 %v3388_v3, %v3387_v42  ;;  %v3392_v61 = vshll.u32 %v3391_v6, 23  ;;  %v3545_v34 = vshll.u32 %v13986_v38, %v3536_v51  ;;  %v11393_v11 = vpop.eup %8645  ;;  %vm13742_vm3 = vcmp.lt.s32.totalorder %v11057_v37, 0 }
 0x472   : > { %14013 = vst [vmem:[#allocation32_spill] sm:$0xff] %v11393_v11  ;;  %v11396_v40 = vshrl.u32 %v3479_v53, 30  ;;  %v3540_v0 = vshrl.u32 %v13985_v57, %v3537_v50  ;;  %v3543_v54 = vshrl.u32 %v13986_v38, %v3537_v50  ;;  %v3548_v17 = vshll.u32 %v13987_v48, %v3536_v51 }
 0x473   : > { %v3393_v39 = vor.u32 4788187, %v3392_v61  ;;  %v3396_v7 = vcvt.s32.f32 %v3389_v20  ;;  %v3546_v31 = vshrl.u32 %v13987_v48, %v3537_v50  ;;  %v3549_v59 = vshrl.u32 %v13988_v21, %v3537_v50 }
 0x474   : > { %14014 = vst [vmem:[#allocation31_spill] sm:$0xff] %v11396_v40  ;;  %v3481_v25 = vshll.u32 %v11396_v40, 30  ;;  %v3541_v26 = vor.u32 %v3540_v0, %v3539_v10  ;;  %v3544_v44 = vor.u32 %v3543_v54, %v3542_v12  ;;  %v3551_v52 = vshll.u32 %v13988_v21, %v3536_v51 }
 0x475   : > { %v3394_v42 = vand.u32 2147483647, %v3393_v39  ;;  %v3547_v3 = vor.u32 %v3546_v31, %v3545_v34  ;;  %v3550_v6 = vor.u32 %v3549_v59, %v3548_v17  ;;  %v3552_v53 = vshrl.u32 %v13989_v16, %v3537_v50 }
 0x476   : > { %v11406_v28 = vsub.s32 %v3478_v49, %v3481_v25  ;;  %v3538_v61 = vshrl.u32 %v13803_v9, %v3537_v50  ;;  %vm3554_vm2 = vcmp.lt.s32.totalorder %v3535_v2, 1  ;;  %v3630_v20 = vshrl.u32 %v3629_v63, 23 }
 0x477   : > { %vm13760_vm6 = vcmp.lt.s32.totalorder %v11092_v55, 0  ;;  %v3397_v45 = vmul.f32 %v3396_v7, %v3394_v42  ;;  %v3553_v11 = vor.u32 %v3552_v53, %v3551_v52  ;;  %vm3556_vm0 = vcmp.lt.s32.totalorder %v3535_v2, 3  ;;  %v11424_v53 = vpop.f32.mrb[15].mxu1 }
 0x478   : > { %vm3557_vm14 = vcmp.lt.s32.totalorder %v3535_v2, 4  ;;  %v3484_v10 = vsub.s32 0, %v11406_v28  ;;  %v3562_v12 = vsel %vm3554_vm2, %v3541_v26, %v3544_v44  ;;  %vm3555_vm5 = vcmp.lt.s32.totalorder %v3535_v2, 2 }
 0x479   : > { %v3559_v51 = vsel %vm3557_vm14, %v3547_v3, 2102212464  ;;  %v3563_v34 = vsel %vm3557_vm14, %v3550_v6, 920167782  ;;  %v3558_v0 = vsel %vm3554_vm2, %v3538_v61, %v3541_v26  ;;  %v3566_v49 = vsel %vm3554_vm2, %v3544_v44, %v3547_v3 }
 0x47a   : > { %v3564_v54 = vsel %vm3556_vm0, %v3547_v3, %v3563_v34  ;;  %v7793_v17 = vmin.u32 %v3484_v10, %v11406_v28  ;;  %v3560_v50 = vsel %vm3556_vm0, %v3544_v44, %v3559_v51  ;;  %v3567_v39 = vsel %vm3557_vm14, %v3553_v11, 1326507024 }
 0x47b   : > { %v3565_v63 = vsel %vm3555_vm5, %v3562_v12, %v3564_v54  ;;  %v3295_v7 = vsel %vm13742_vm3, %v3294_v22, %v11361_v41  ;;  %v3568_v31 = vsel %vm3556_vm0, %v3550_v6, %v3567_v39  ;;  %v3398_v52 = vxor.u32 2147483648, %v3397_v45 }
 0x47c   : > { %v11417_v59 = vmul.u32.u64.low %v11385_v15, %v3565_v63  ;;  %v11418_v25 = vmul.u32.u64.high %v11385_v15, %v3565_v63, %v11417_v59  ;;  %v3486_v26 = vclz %v7793_v17  ;;  %v3569_v42 = vsel %vm3555_vm5, %v3566_v49, %v3568_v31 }
 0x47d   : > { %v14015_v3 = vand.u32 2147483647, %v11369_v58  ;;  %v3561_v11 = vsel %vm3555_vm5, %v3558_v0, %v3560_v50  ;;  %v11428_v61 = vmul.u32.u64.low %v11385_v15, %v3569_v42  ;;  %v11429_v41 = vmul.u32.u64.high %v11385_v15, %v3569_v42, %v11428_v61 }
 0x47e   : > { %v7800_v22 = vadd.s32 4294967169, %v3630_v20  ;;  %8647 = vsinq.f32 %v11278_v5  ;;  %v14016_v6 = vand.u32 2147483647, %v11057_v37  ;;  %v14017_v10 = vmov 0 }
 0x47f   : > { %v3633_v44 = vand.u32 8388607, %v14015_v3  ;;  %v14020_v51 = vand.u32 2147483647, %v11092_v55  ;;  %v14021_v12 = vmov 0  ;;  %v7794_v2 = vadd.s32 4294967294, %v3486_v26 }
 0x480   : > { %vm11434_vm1 = vcmp.le.f32.partialorder %v14016_v6, 0.7853982  ;;  %8649 = vcosq.f32 %v11374_v46  ;;  %v3580_v34 = vadd.s32 1, %v11418_v25  ;;  %v3636_v20 = vadd.s32 1, %v7800_v22 }
 0x481   : > { %v14018_v10 = vsel %vm11434_vm1, 4294967295, %v14017_v10  ;;  %vm11440_vm13 = vcmp.le.f32.partialorder %v14020_v51, 0.7853982  ;;  %v13714_v5 = vand.u32 2147483647, %v11383_v36  ;;  %v11450_v0 = vsel %vm11434_vm1, %v11057_v37, %v3295_v7 }
 0x482   : > { %14019 = vst [vmem:[#allocation25_spill] sm:$0xff] %v14018_v10  ;;  %v14022_v12 = vsel %vm11440_vm13, 4294967295, %v14021_v12  ;;  %v3399_v54 = vsel %vm13760_vm6, %v3398_v52, %v3397_v45  ;;  %vm7795_vm10 = vcmp.lt.s32.totalorder %v7794_v2, 0  ;;  %v3577_v49 = vmul.u32 %v11385_v15, %v3561_v11 }
 0x483   : > { %14023 = vst [vmem:[#allocation41_spill] sm:$0xff] %v14022_v12  ;;  %v3489_v17 = vsel %vm7795_vm10, 0, %v7794_v2  ;;  %vm3579_vm7 = vc.u32 %v11429_v41, %v11417_v59  ;;  %v3634_v50 = vor.u32 8388608, %v3633_v44  ;;  %vm3637_vm11 = vcmp.gt.s32.totalorder %v3636_v20, 0 }
 0x484   : > { %v3490_v63 = vsub.s32 32, %v3489_v17  ;;  %v3494_v39 = vsub.s32 4294967266, %v3489_v17  ;;  %v3581_v31 = vsel %vm3579_vm7, %v3580_v34, %v11418_v25  ;;  %v3733_v26 = vand.u32 2139095040, %v11383_v36 }
 0x485   : > { %8651 = vsinq.f32 %v11374_v46  ;;  %v3474_v45 = vadd.s32 %v11339_v30, %v11345_v35  ;;  %v3582_v7 = vadd.s32 %v3581_v31, %v3577_v49  ;;  %v3638_v52 = vsel %vm3637_vm11, %v3636_v20, 0 }
 0x486   : > { %8653 = vcosq.f32 %v11450_v0  ;;  %v11466_v15 = vsel %vm11440_vm13, %v11092_v55, %v3399_v54  ;;  %v3495_v42 = vadd.s32 127, %v3494_v39  ;;  %v3640_v3 = vand.u32 31, %v3638_v52 }
 0x487   : > { %v3583_v44 = vadd.s32 536870912, %v3582_v7  ;;  %v11468_v25 = vshll.u32 %v3634_v50, 8  ;;  %v11472_v46 = vand.u32 8388607, %v13714_v5  ;;  %v2764_v30 = vadd.f32 %v11014_v43, %v10847_v47 }
 0x488   : > { %v3492_v35 = vshrl.u32 %v3474_v45, %v3490_v63  ;;  %v3496_v11 = vshll.u32 %v3495_v42, 23  ;;  %v3641_v61 = vsub.s32 32, %v3640_v3  ;;  %v3734_v22 = vshrl.u32 %v3733_v26, 23  ;;  %v11480_v20 = vpop.eup %8647 }
 0x489   : > { %v11476_v6 = vshrl.u32 %v3583_v44, 30  ;;  %v3639_v51 = vshrl.u32 %v3638_v52, 5  ;;  %v3643_v2 = vshll.u32 %v13803_v9, %v3640_v3  ;;  %v3646_v34 = vshll.u32 %v13985_v57, %v3640_v3  ;;  %14025 = vst [vmem:[#allocation37_spill] sm:$0xff] %v11480_v20 }
 0x48a   : > { %v3497_v54 = vor.u32 4788187, %v3496_v11  ;;  %v3644_v49 = vshrl.u32 %v13985_v57, %v3641_v61  ;;  %v3649_v50 = vshll.u32 %v13986_v38, %v3640_v3  ;;  %v3652_v43 = vshll.u32 %v13987_v48, %v3640_v3  ;;  %v11485_v63 = vpop.eup %8649 }
 0x48b   : > { %14024 = vst [vmem:[#allocation38_spill] sm:$0xff] %v11476_v6  ;;  %14026 = vst [vmem:[#allocation18_spill] sm:$0xff] %v11485_v63  ;;  %v3585_v39 = vshll.u32 %v11476_v6, 30  ;;  %v3647_v31 = vshrl.u32 %v13986_v38, %v3641_v61  ;;  %v3650_v26 = vshrl.u32 %v13987_v48, %v3641_v61  ;;  %v3653_v45 = vshrl.u32 %v13988_v21, %v3641_v61 }
 0x48c   : > { %v3491_v52 = vshll.u32 %v11406_v28, %v3489_v17  ;;  %v3645_v42 = vor.u32 %v3644_v49, %v3643_v2  ;;  %v3655_v44 = vshll.u32 %v13988_v21, %v3640_v3  ;;  %v3656_v11 = vshrl.u32 %v13989_v16, %v3641_v61 }
 0x48d   : > { %v11494_v5 = vsub.s32 %v3582_v7, %v3585_v39  ;;  %v3648_v40 = vor.u32 %v3647_v31, %v3646_v34  ;;  %v3651_v10 = vor.u32 %v3650_v26, %v3649_v50  ;;  %v3654_v37 = vor.u32 %v3653_v45, %v3652_v43 }
 0x48e   : > { %v3493_v12 = vor.u32 %v3492_v35, %v3491_v52  ;;  %v3642_v6 = vshrl.u32 %v13803_v9, %v3641_v61  ;;  %v3657_v55 = vor.u32 %v3656_v11, %v3655_v44  ;;  %v7804_v20 = vadd.s32 4294967169, %v3734_v22 }
 0x48f   : > { %v11497_v63 = vpop.eup %8651  ;;  %v3498_v32 = vand.u32 2147483647, %v3497_v54  ;;  %v3588_v28 = vsub.s32 0, %v11494_v5  ;;  %vm3658_vm8 = vcmp.lt.s32.totalorder %v3639_v51, 1  ;;  %vm3661_vm2 = vcmp.lt.s32.totalorder %v3639_v51, 4 }
 0x490   : > { %v11500_v17 = vpop.eup %8653  ;;  %vm3660_vm0 = vcmp.lt.s32.totalorder %v3639_v51, 3  ;;  %v3663_v7 = vsel %vm3661_vm2, %v3651_v10, 2102212464  ;;  %v3666_v3 = vsel %vm3658_vm8, %v3645_v42, %v3648_v40  ;;  %v3667_v2 = vsel %vm3661_vm2, %v3654_v37, 920167782 }
 0x491   : > { %14027 = vst [vmem:[#allocation45_spill] sm:$0xff] %v11500_v17  ;;  %v7797_v35 = vmin.u32 %v3588_v28, %v11494_v5  ;;  %vm3659_vm14 = vcmp.lt.s32.totalorder %v3639_v51, 2  ;;  %v3668_v61 = vsel %vm3660_vm0, %v3651_v10, %v3667_v2  ;;  %v3670_v22 = vsel %vm3658_vm8, %v3648_v40, %v3651_v10 }
 0x492   : > { %v3500_v34 = vcvt.s32.f32 %v3493_v12  ;;  %v3669_v54 = vsel %vm3659_vm14, %v3666_v3, %v3668_v61  ;;  %v3671_v49 = vsel %vm3661_vm2, %v3657_v55, 1326507024  ;;  %v11507_v50 = vmul.f32 3.0, %v2764_v30 }
 0x493   : > { %vm13741_vm5 = vcmp.lt.s32.totalorder %v11135_v33, 0  ;;  %v3590_v43 = vclz %v7797_v35  ;;  %v3662_v39 = vsel %vm3658_vm8, %v3642_v6, %v3645_v42  ;;  %v3664_v31 = vsel %vm3660_vm0, %v3648_v40, %v3663_v7 }
 0x494   : > { %14028 = vst [vmem:[#allocation8_spill] sm:$0xff] %v11507_v50  ;;  %v3672_v26 = vsel %vm3660_vm0, %v3654_v37, %v3671_v49  ;;  %v3501_v45 = vmul.f32 %v3500_v34, %v3498_v32  ;;  %v11515_v10 = vmul.u32.u64.low %v11468_v25, %v3669_v54  ;;  %v11516_v12 = vmul.u32.u64.high %v11468_v25, %v3669_v54, %v11515_v10 }
 0x495   : > { %v3673_v52 = vsel %vm3659_vm14, %v3670_v22, %v3672_v26  ;;  %8655 = vsinq.f32 %v11450_v0  ;;  %v7798_v55 = vadd.s32 4294967294, %v3590_v43  ;;  %v3665_v40 = vsel %vm3659_vm14, %v3662_v39, %v3664_v31 }
 0x496   : > { %v11521_v30 = vmul.u32.u64.low %v11468_v25, %v3673_v52  ;;  %v11522_v44 = vmul.u32.u64.high %v11468_v25, %v3673_v52, %v11521_v30  ;;  %8657 = vcosq.f32 %v11466_v15  ;;  %v3740_v37 = vadd.s32 1, %v7804_v20 }
 0x497   : > { %v3837_v32 = vand.u32 2139095040, %v11507_v50  ;;  %v3578_v6 = vadd.s32 %v11417_v59, %v11429_v41  ;;  %vm7799_vm10 = vcmp.lt.s32.totalorder %v7798_v55, 0  ;;  %v3738_v42 = vor.u32 8388608, %v11472_v46 }
 0x498   : > { %v11532_v0 = vadd.f32 %v11087_v4, %v10853_v14  ;;  %v3502_v11 = vxor.u32 2147483648, %v3501_v45  ;;  %v3593_v28 = vsel %vm7799_vm10, 0, %v7798_v55  ;;  %v3684_v7 = vadd.s32 1, %v11516_v12 }
 0x499   : > { %vm3741_vm7 = vcmp.gt.s32.totalorder %v3740_v37, 0  ;;  %v3594_v51 = vsub.s32 32, %v3593_v28  ;;  %v3598_v3 = vsub.s32 4294967266, %v3593_v28  ;;  %v3681_v20 = vmul.u32 %v11468_v25, %v3665_v40 }
 0x49a   : > { %v13728_v2 = vand.u32 2147483647, %v11507_v50  ;;  %v3595_v59 = vshll.u32 %v11494_v5, %v3593_v28  ;;  %vm3683_vm11 = vc.u32 %v11522_v44, %v11515_v10  ;;  %v3742_v41 = vsel %vm3741_vm7, %v3740_v37, 0 }
 0x49b   : > { %v3838_v46 = vshrl.u32 %v3837_v32, 23  ;;  %v3596_v4 = vshrl.u32 %v3578_v6, %v3594_v51  ;;  %v3599_v35 = vadd.s32 127, %v3598_v3  ;;  %v3685_v61 = vsel %vm3683_vm11, %v3684_v7, %v11516_v12 }
 0x49c   : > { %v11541_v22 = vshrl.u32 %v3742_v41, 5  ;;  %v3503_v34 = vsel %vm13741_vm5, %v3502_v11, %v3501_v45  ;;  %v3686_v54 = vadd.s32 %v3685_v61, %v3681_v20  ;;  %v3744_v25 = vand.u32 31, %v3742_v41 }
 0x49d   : > { %v11545_v49 = vshll.u32 %v3738_v42, 8  ;;  %v3597_v43 = vor.u32 %v3596_v4, %v3595_v59  ;;  %v3600_v5 = vshll.u32 %v3599_v35, 23  ;;  %v7808_v39 = vadd.s32 4294967169, %v3838_v46 }
 0x49e   : > { %v11549_v31 = vand.u32 8388607, %v13728_v2  ;;  %v3687_v26 = vadd.s32 536870912, %v3686_v54  ;;  %v3745_v52 = vsub.s32 32, %v3744_v25  ;;  %v3747_v12 = vshll.u32 %v13803_v9, %v3744_v25 }
 0x49f   : > { %vm3762_vm8 = vcmp.lt.s32.totalorder %v11541_v22, 1  ;;  %v11553_v55 = vpop.eup %8655  ;;  %v14030_v45 = vand.u32 2147483647, %v11135_v33  ;;  %v14031_v30 = vmov 0  ;;  %v3601_v40 = vor.u32 4788187, %v3600_v5 }
 0x4a0   : > { %14029 = vst [vmem:[#allocation22_spill] sm:$0xff] %v11553_v55  ;;  %v3604_v37 = vcvt.s32.f32 %v3597_v43  ;;  %v3750_v32 = vshll.u32 %v13985_v57, %v3744_v25  ;;  %v3753_v6 = vshll.u32 %v13986_v38, %v3744_v25  ;;  %v11563_v42 = vpop.eup %8657  ;;  %vm13748_vm0 = vcmp.lt.s32.totalorder %v11241_v8, 0 }
 0x4a1   : > { %vm11557_vm2 = vcmp.le.f32.partialorder %v14030_v45, 0.7853982  ;;  %v11566_v11 = vshrl.u32 %v3687_v26, 30  ;;  %v3748_v28 = vshrl.u32 %v13985_v57, %v3745_v52  ;;  %v3751_v7 = vshrl.u32 %v13986_v38, %v3745_v52 }
 0x4a2   : > { %v14032_v30 = vsel %vm11557_vm2, 4294967295, %v14031_v30  ;;  %v3756_v51 = vshll.u32 %v13987_v48, %v3744_v25  ;;  %v3602_v3 = vand.u32 2147483647, %v3601_v40  ;;  %v3754_v20 = vshrl.u32 %v13987_v48, %v3745_v52 }
 0x4a3   : > { %14033 = vst [vmem:[#allocation29_spill] sm:$0xff] %v14032_v30  ;;  %14034 = vst [vmem:[#allocation14_spill] sm:$0xff] %v11566_v11  ;;  %v3757_v59 = vshrl.u32 %v13988_v21, %v3745_v52  ;;  %v3759_v41 = vshll.u32 %v13988_v21, %v3744_v25  ;;  %v3689_v46 = vshll.u32 %v11566_v11, 30  ;;  %v3749_v4 = vor.u32 %v3748_v28, %v3747_v12 }
 0x4a4   : > { %v3752_v35 = vor.u32 %v3751_v7, %v3750_v32  ;;  %v3760_v61 = vshrl.u32 %v13989_v16, %v3745_v52  ;;  %v3605_v43 = vmul.f32 %v3604_v37, %v3602_v3  ;;  %v3746_v5 = vshrl.u32 %v13803_v9, %v3745_v52 }
 0x4a5   : > { %v3755_v26 = vor.u32 %v3754_v20, %v3753_v6  ;;  %v3758_v45 = vor.u32 %v3757_v59, %v3756_v51  ;;  %v11577_v2 = vsub.s32 %v3686_v54, %v3689_v46  ;;  %vm3764_vm14 = vcmp.lt.s32.totalorder %v11541_v22, 3 }
 0x4a6   : > { %v3761_v40 = vor.u32 %v3760_v61, %v3759_v41  ;;  %vm3765_vm10 = vcmp.lt.s32.totalorder %v11541_v22, 4  ;;  %v3606_v17 = vxor.u32 2147483648, %v3605_v43  ;;  %v3770_v12 = vsel %vm3762_vm8, %v3749_v4, %v3752_v35 }
 0x4a7   : > { %v3767_v25 = vsel %vm3765_vm10, %v3755_v26, 2102212464  ;;  %v3771_v32 = vsel %vm3765_vm10, %v3758_v45, 920167782  ;;  %v3692_v28 = vsub.s32 0, %v11577_v2  ;;  %vm3763_vm7 = vcmp.lt.s32.totalorder %v11541_v22, 2 }
 0x4a8   : > { %v3772_v52 = vsel %vm3764_vm14, %v3755_v26, %v3771_v32  ;;  %v3774_v54 = vsel %vm3762_vm8, %v3752_v35, %v3755_v26  ;;  %v3766_v37 = vsel %vm3762_vm8, %v3746_v5, %v3749_v4  ;;  %v3768_v6 = vsel %vm3764_vm14, %v3752_v35, %v3767_v25 }
 0x4a9   : > { %v3773_v7 = vsel %vm3763_vm7, %v3770_v12, %v3772_v52  ;;  %v3775_v51 = vsel %vm3765_vm10, %v3761_v40, 1326507024  ;;  %v11596_v3 = vsel %vm11557_vm2, %v11135_v33, %v3503_v34  ;;  %v7801_v20 = vmin.u32 %v3692_v28, %v11577_v2 }
 0x4aa   : > { %v3776_v59 = vsel %vm3764_vm14, %v3758_v45, %v3775_v51  ;;  %v3842_v41 = vor.u32 8388608, %v11549_v31  ;;  %v3607_v46 = vsel %vm13748_vm0, %v3606_v17, %v3605_v43  ;;  %v3769_v26 = vsel %vm3763_vm7, %v3766_v37, %v3768_v6 }
 0x4ab   : > { %v3777_v4 = vsel %vm3763_vm7, %v3774_v54, %v3776_v59  ;;  %v11605_v35 = vmul.u32.u64.low %v11545_v49, %v3773_v7  ;;  %v11606_v61 = vmul.u32.u64.high %v11545_v49, %v3773_v7, %v11605_v35  ;;  %v3694_v5 = vclz %v7801_v20  ;;  %v8520_v7 = vld [vmem:[%s14039_s23 + $0x40] sm:$0xff]  }
 0x4ac   : > { %v11610_v34 = vmul.u32.u64.low %v11545_v49, %v3777_v4  ;;  %v11611_v40 = vmul.u32.u64.high %v11545_v49, %v3777_v4, %v11610_v34  ;;  %8659 = vsinq.f32 %v11466_v15  ;;  %v14035_v22 = vand.u32 2147483647, %v11241_v8  ;;  %7915 = vmatprep.subr.bf16.mxu0 %v8520_v7 }
 0x4ad   : > { %v3844_v17 = vadd.s32 1, %v7808_v39  ;;  %v11621_v43 = vmul.f32 3.0, %v11532_v0  ;;  %8661 = vcosq.f32 %v11596_v3  ;;  %v3682_v45 = vadd.s32 %v11515_v10, %v11522_v44 }
 0x4ae   : > { %vm11616_vm11 = vcmp.le.f32.partialorder %v14035_v22, 0.7853982  ;;  %v7802_v25 = vadd.s32 4294967294, %v3694_v5  ;;  %v11628_v12 = vadd.f32 %v11180_v60, %v10847_v47  ;;  %v3785_v39 = vmul.u32 %v11545_v49, %v3769_v26 }
 0x4af   : > { %14038 = vst [vmem:[#allocation33_spill] sm:$0xff] %v11621_v43  ;;  %v11633_v15 = vsel %vm11616_vm11, %v11241_v8, %v3607_v46  ;;  %v3788_v0 = vadd.s32 1, %v11606_v61  ;;  %vm3845_vm8 = vcmp.gt.s32.totalorder %v3844_v17, 0  ;;  %vm3787_vm10 = vc.u32 %v11611_v40, %v11605_v35  ;;  %v8521_v46 = vld [vmem:[%s14039_s23] sm:$0xff]  }
 0x4b0   : > { %vm7803_vm14 = vcmp.lt.s32.totalorder %v7802_v25, 0  ;;  %v3846_v10 = vsel %vm3845_vm8, %v3844_v17, 0  ;;  %v11639_v44 = vshll.u32 %v3842_v41, 8  ;;  %7916 = vmatpush3.bf16.msra.mxu0 %v8521_v46  ;;  %v3941_v7 = vand.u32 2139095040, %v11621_v43 }
 0x4b1   : > { %v3697_v32 = vsel %vm7803_vm14, 0, %v7802_v25  ;;  %v3789_v60 = vsel %vm3787_vm10, %v3788_v0, %v11606_v61  ;;  %v3848_v28 = vand.u32 31, %v3846_v10  ;;  %v11643_v49 = vshrl.u32 %v3846_v10, 5  ;;  %v8522_v10 = vld [vmem:[%s14039_s23 + $0x48] sm:$0xff]  }
 0x4b2   : > { %v3698_v54 = vsub.s32 32, %v3697_v32  ;;  %v3702_v37 = vsub.s32 4294967266, %v3697_v32  ;;  %v3790_v6 = vadd.s32 %v3789_v60, %v3785_v39  ;;  %v3699_v51 = vshll.u32 %v11577_v2, %v3697_v32  ;;  %7917 = vmatprep.subr.bf16.mxu0 %v8522_v10 }
 0x4b3   : > { %v3849_v20 = vsub.s32 32, %v3848_v28  ;;  %v3851_v59 = vshll.u32 %v13803_v9, %v3848_v28  ;;  %v3854_v41 = vshll.u32 %v13985_v57, %v3848_v28  ;;  %v3857_v26 = vshll.u32 %v13986_v38, %v3848_v28 }
 0x4b4   : > { %v3700_v4 = vshrl.u32 %v3682_v45, %v3698_v54  ;;  %v3703_v61 = vadd.s32 127, %v3702_v37  ;;  %v3791_v5 = vadd.s32 536870912, %v3790_v6  ;;  %v3860_v17 = vshll.u32 %v13987_v48, %v3848_v28 }
 0x4b5   : > { %v3852_v34 = vshrl.u32 %v13985_v57, %v3849_v20  ;;  %v3855_v22 = vshrl.u32 %v13986_v38, %v3849_v20  ;;  %v3858_v2 = vshrl.u32 %v13987_v48, %v3849_v20  ;;  %v3861_v45 = vshrl.u32 %v13988_v21, %v3849_v20 }
 0x4b6   : > { %v3701_v25 = vor.u32 %v3700_v4, %v3699_v51  ;;  %v3704_v39 = vshll.u32 %v3703_v61, 23  ;;  %v11659_v0 = vshrl.u32 %v3791_v5, 30  ;;  %v11665_v32 = vpop.eup %8659  ;;  %v8523_v51 = vld [vmem:[%s14039_s23 + $0x8] sm:$0xff]   ;;  %v3850_v5 = vshrl.u32 %v13803_v9, %v3849_v20 }
 0x4b7   : > { %v3853_v60 = vor.u32 %v3852_v34, %v3851_v59  ;;  %v3856_v54 = vor.u32 %v3855_v22, %v3854_v41  ;;  %v3859_v37 = vor.u32 %v3858_v2, %v3857_v26  ;;  %v11671_v46 = vpop.eup %8661  ;;  %v3862_v52 = vor.u32 %v3861_v45, %v3860_v17  ;;  %7918 = vmatpush3.bf16.msra.mxu0 %v8523_v51  ;;  %v8524_v22 = vld [vmem:[%s14039_s23 + $0x50] sm:$0xff]  }
 0x4b8   : > { %14040 = vst [vmem:[#allocation34_spill] sm:$0xff] %v11659_v0  ;;  %14041 = vst [vmem:[#allocation24_spill] sm:$0xff] %v11671_v46  ;;  %v3705_v4 = vor.u32 4788187, %v3704_v39  ;;  %v3793_v61 = vshll.u32 %v11659_v0, 30  ;;  %v3708_v11 = vcvt.s32.f32 %v3701_v25  ;;  %v3863_v59 = vshll.u32 %v13988_v21, %v3848_v28  ;;  %v8525_v25 = vld [vmem:[%s14039_s23 + $0x10] sm:$0xff]   ;;  %7919 = vmatprep.subr.bf16.mxu0 %v8524_v22 }
 0x4b9   : > { %v3864_v41 = vshrl.u32 %v13989_v16, %v3849_v20  ;;  %vm3866_vm7 = vcmp.lt.s32.totalorder %v11643_v49, 1  ;;  %vm3868_vm8 = vcmp.lt.s32.totalorder %v11643_v49, 3  ;;  %vm3869_vm14 = vcmp.lt.s32.totalorder %v11643_v49, 4 }
 0x4ba   : > { %v3706_v26 = vand.u32 2147483647, %v3705_v4  ;;  %v11678_v34 = vsub.s32 %v3790_v6, %v3793_v61  ;;  %v3871_v17 = vsel %vm3869_vm14, %v3859_v37, 2102212464  ;;  %v3874_v28 = vsel %vm3866_vm7, %v3853_v60, %v3856_v54 }
 0x4bb   : > { %v3865_v2 = vor.u32 %v3864_v41, %v3863_v59  ;;  %v3875_v20 = vsel %vm3869_vm14, %v3862_v52, 920167782  ;;  %vm3867_vm10 = vcmp.lt.s32.totalorder %v11643_v49, 2  ;;  %v3878_v51 = vsel %vm3866_vm7, %v3856_v54, %v3859_v37  ;;  %7920 = vmatpush3.bf16.msra.mxu0 %v8525_v25 }
 0x4bc   : > { %v3709_v6 = vmul.f32 %v3708_v11, %v3706_v26  ;;  %v3796_v39 = vsub.s32 0, %v11678_v34  ;;  %v3876_v45 = vsel %vm3868_vm8, %v3859_v37, %v3875_v20  ;;  %v11699_v61 = vmul.f32 3.0, %v11628_v12  ;;  %v8526_v37 = vld [vmem:[%s14039_s23 + $0x58] sm:$0xff]  }
 0x4bd   : > { %v3877_v10 = vsel %vm3867_vm10, %v3874_v28, %v3876_v45  ;;  %v3879_v4 = vsel %vm3869_vm14, %v3865_v2, 1326507024  ;;  %v3870_v59 = vsel %vm3866_vm7, %v3850_v5, %v3853_v60  ;;  %v3872_v41 = vsel %vm3868_vm8, %v3856_v54, %v3871_v17  ;;  %v8527_v60 = vld [vmem:[%s14039_s23 + $0x18] sm:$0xff]   ;;  %7921 = vmatprep.subr.bf16.mxu0 %v8526_v37 }
 0x4be   : > { %v7805_v11 = vmin.u32 %v3796_v39, %v11678_v34  ;;  %v3880_v26 = vsel %vm3868_vm8, %v3862_v52, %v3879_v4  ;;  %v11714_v22 = vmul.u32.u64.low %v11639_v44, %v3877_v10  ;;  %v11715_v2 = vmul.u32.u64.high %v11639_v44, %v3877_v10, %v11714_v22  ;;  %v8528_v10 = vld [vmem:[%s14039_s23 + $0x60] sm:$0xff]  }
 0x4bf   : > { %v3881_v12 = vsel %vm3867_vm10, %v3878_v51, %v3880_v26  ;;  %v3942_v28 = vshrl.u32 %v3941_v7, 23  ;;  %v3710_v54 = vxor.u32 2147483648, %v3709_v6  ;;  %8663 = vsinq.f32 %v11596_v3  ;;  %7922 = vmatpush3.bf16.msra.mxu0 %v8527_v60 }
 0x4c0   : > { %v3798_v5 = vclz %v7805_v11  ;;  %v11722_v52 = vmul.u32.u64.low %v11639_v44, %v3881_v12  ;;  %v11723_v17 = vmul.u32.u64.high %v11639_v44, %v3881_v12, %v11722_v52  ;;  %vm13732_vm7 = vcmp.lt.s32.totalorder %v11369_v58, 0  ;;  %7923 = vmatprep.subr.bf16.mxu0 %v8528_v10 }
 0x4c1   : > { %v3873_v20 = vsel %vm3867_vm10, %v3870_v59, %v3872_v41  ;;  %v7812_v25 = vadd.s32 4294967169, %v3942_v28  ;;  %8665 = vcosq.f32 %v11633_v15  ;;  %v4045_v39 = vand.u32 2139095040, %v11699_v61  ;;  %v8529_v59 = vld [vmem:[%s14039_s23 + $0x20] sm:$0xff]  }
 0x4c2   : > { %v7806_v7 = vadd.s32 4294967294, %v3798_v5  ;;  %v2772_v45 = vadd.f32 %v11235_v56, %v10853_v14  ;;  %v3786_v3 = vadd.s32 %v11605_v35, %v11611_v40  ;;  %v3892_v49 = vadd.s32 1, %v11715_v2 }
 0x4c3   : > { %v14042_v51 = vand.u32 2147483647, %v11621_v43  ;;  %v3948_v11 = vadd.s32 1, %v7812_v25  ;;  %v3711_v56 = vsel %vm13732_vm7, %v3710_v54, %v3709_v6  ;;  %v3889_v41 = vmul.u32 %v11639_v44, %v3873_v20  ;;  %7924 = vmatpush3.bf16.msra.mxu0 %v8529_v59  ;;  %v8530_v6 = vld [vmem:[%s14039_s23 + $0x68] sm:$0xff]   ;;  %v8532_v59 = vld [vmem:[%s14039_s23 + $0x70] sm:$0xff]  }
 0x4c4   : > { %vm7807_vm8 = vcmp.lt.s32.totalorder %v7806_v7, 0  ;;  %vm3891_vm14 = vc.u32 %v11723_v17, %v11714_v22  ;;  %v4046_v26 = vshrl.u32 %v4045_v39, 23  ;;  %v13733_v60 = vand.u32 2147483647, %v11699_v61  ;;  %7925 = vmatprep.subr.bf16.mxu0 %v8530_v6  ;;  %v8531_v39 = vld [vmem:[%s14039_s23 + $0x28] sm:$0xff]  }
 0x4c5   : > { %v11741_v4 = vand.u32 8388607, %v14042_v51  ;;  %v3801_v35 = vsel %vm7807_vm8, 0, %v7806_v7  ;;  %v3893_v40 = vsel %vm3891_vm14, %v3892_v49, %v11715_v2  ;;  %vm3949_vm10 = vcmp.gt.s32.totalorder %v3948_v11, 0 }
 0x4c6   : > { %v3802_v37 = vsub.s32 32, %v3801_v35  ;;  %v3806_v12 = vsub.s32 4294967266, %v3801_v35  ;;  %v3894_v28 = vadd.s32 %v3893_v40, %v3889_v41  ;;  %8667 = vsinq.f32 %v11633_v15 }
 0x4c7   : > { %v14043_v44 = vand.u32 2147483647, %v11369_v58  ;;  %v14044_v54 = vmov 0  ;;  %v3950_v2 = vsel %vm3949_vm10, %v3948_v11, 0  ;;  %v11763_v5 = vmul.f32 3.0, %v2772_v45  ;;  %7926 = vmatpush3.bf16.msra.mxu0 %v8531_v39 }
 0x4c8   : > { %v3803_v52 = vshll.u32 %v11678_v34, %v3801_v35  ;;  %v3804_v20 = vshrl.u32 %v3786_v3, %v3802_v37  ;;  %v3807_v25 = vadd.s32 127, %v3806_v12  ;;  %v3895_v7 = vadd.s32 536870912, %v3894_v28  ;;  %v8533_v37 = vld [vmem:[%s14039_s23 + $0x30] sm:$0xff]   ;;  %7927 = vmatprep.subr.bf16.mxu0 %v8532_v59 }
 0x4c9   : > { %vm11759_vm7 = vcmp.le.f32.partialorder %v14043_v44, 0.7853982  ;;  %v3952_v49 = vand.u32 31, %v3950_v2  ;;  %v7816_v45 = vadd.s32 4294967169, %v4046_v26  ;;  %v11779_v3 = vand.u32 8388607, %v13733_v60  ;;  %v11784_v41 = vpop.eup %8663 }
 0x4ca   : > { %v14045_v54 = vsel %vm11759_vm7, 4294967295, %v14044_v54  ;;  %v11772_v15 = vsel %vm11759_vm7, %v11369_v58, %v3711_v56  ;;  %v3805_v51 = vor.u32 %v3804_v20, %v3803_v52  ;;  %v3808_v11 = vshll.u32 %v3807_v25, 23  ;;  %14048 = vst [vmem:[#allocation48_spill] sm:$0xff] %v11784_v41 }
 0x4cb   : > { %14046 = vst [vmem:[#allocation36_spill] sm:$0xff] %v14045_v54  ;;  %v11775_v34 = vshrl.u32 %v3895_v7, 30  ;;  %v3951_v56 = vshrl.u32 %v3950_v2, 5  ;;  %v3953_v35 = vsub.s32 32, %v3952_v49  ;;  %v3955_v40 = vshll.u32 %v13803_v9, %v3952_v49  ;;  %v11791_v12 = vpop.eup %8665  ;;  %7928 = vmatpush3.bf16.msra.mxu0 %v8533_v37 }
 0x4cc   : > { %v3958_v26 = vshll.u32 %v13985_v57, %v3952_v49  ;;  %v3809_v6 = vor.u32 4788187, %v3808_v11  ;;  %v3812_v44 = vcvt.s32.f32 %v3805_v51  ;;  %v3961_v20 = vshll.u32 %v13986_v38, %v3952_v49  ;;  %v8534_v11 = vld [vmem:[%s14039_s23 + $0x78] sm:$0xff]  }
 0x4cd   : > { %14047 = vst [vmem:[#allocation35_spill] sm:$0xff] %v11775_v34  ;;  %v3897_v52 = vshll.u32 %v11775_v34, 30  ;;  %v3956_v2 = vshrl.u32 %v13985_v57, %v3953_v35  ;;  %v3959_v25 = vshrl.u32 %v13986_v38, %v3953_v35  ;;  %v3962_v7 = vshrl.u32 %v13987_v48, %v3953_v35  ;;  %7929 = vmatprep.subr.bf16.mxu0 %v8534_v11 }
 0x4ce   : > { %v3964_v39 = vshll.u32 %v13987_v48, %v3952_v49  ;;  %v3810_v60 = vand.u32 2147483647, %v3809_v6  ;;  %v3965_v54 = vshrl.u32 %v13988_v21, %v3953_v35  ;;  %v3967_v51 = vshll.u32 %v13988_v21, %v3952_v49  ;;  %v8535_v6 = vld [vmem:[%s14039_s23 + $0x38] sm:$0xff]  }
 0x4cf   : > { %v11799_v10 = vsub.s32 %v3894_v28, %v3897_v52  ;;  %v3957_v59 = vor.u32 %v3956_v2, %v3955_v40  ;;  %v3960_v58 = vor.u32 %v3959_v25, %v3958_v26  ;;  %v3963_v34 = vor.u32 %v3962_v7, %v3961_v20  ;;  %7930 = vmatpush3.bf16.msra.mxu0 %v8535_v6 }
 0x4d0   : > { %v3968_v46 = vshrl.u32 %v13989_v16, %v3953_v35  ;;  %v3966_v52 = vor.u32 %v3965_v54, %v3964_v39  ;;  %vm3970_vm8 = vcmp.lt.s32.totalorder %v3951_v56, 1  ;;  %v4052_v41 = vadd.s32 1, %v7816_v45  ;;  %v11811_v49 = vpop.eup %8667 }
 0x4d1   : > { %v3900_v28 = vsub.s32 0, %v11799_v10  ;;  %vm13759_vm14 = vcmp.lt.s32.totalorder %v11383_v36, 0  ;;  %v3813_v37 = vmul.f32 %v3812_v44, %v3810_v60  ;;  %v3954_v40 = vshrl.u32 %v13803_v9, %v3953_v35 }
 0x4d2   : > { %v3969_v26 = vor.u32 %v3968_v46, %v3967_v51  ;;  %vm3973_vm10 = vcmp.lt.s32.totalorder %v3951_v56, 4  ;;  %vm3971_vm5 = vcmp.lt.s32.totalorder %v3951_v56, 2  ;;  %v3978_v25 = vsel %vm3970_vm8, %v3957_v59, %v3960_v58 }
 0x4d3   : > { %v7809_v20 = vmin.u32 %v3900_v28, %v11799_v10  ;;  %v3975_v2 = vsel %vm3973_vm10, %v3963_v34, 2102212464  ;;  %vm3972_vm3 = vcmp.lt.s32.totalorder %v3951_v56, 3  ;;  %v3979_v54 = vsel %vm3973_vm10, %v3966_v52, 920167782 }
 0x4d4   : > { %v3982_v45 = vsel %vm3970_vm8, %v3960_v58, %v3963_v34  ;;  %v3983_v7 = vsel %vm3973_vm10, %v3969_v26, 1326507024  ;;  %v3974_v11 = vsel %vm3970_vm8, %v3954_v40, %v3957_v59  ;;  %v3976_v60 = vsel %vm3972_vm3, %v3960_v58, %v3975_v2 }
 0x4d5   : > { %v3902_v39 = vclz %v7809_v20  ;;  %v3980_v44 = vsel %vm3972_vm3, %v3963_v34, %v3979_v54  ;;  %v3984_v35 = vsel %vm3972_vm3, %v3966_v52, %v3983_v7  ;;  %v14049_v51 = vor.u32 8388608, %v11741_v4 }
 0x4d6   : > { %v3981_v46 = vsel %vm3971_vm5, %v3978_v25, %v3980_v44  ;;  %v4050_v30 = vor.u32 8388608, %v11779_v3  ;;  %v3814_v0 = vxor.u32 2147483648, %v3813_v37  ;;  %v3985_v33 = vsel %vm3971_vm5, %v3982_v45, %v3984_v35 }
 0x4d7   : > { %v3986_v28 = vshll.u32 %v14049_v51, 8  ;;  %v7810_v6 = vadd.s32 4294967294, %v3902_v39  ;;  %vm4053_vm0 = vcmp.gt.s32.totalorder %v4052_v41, 0  ;;  %v3977_v26 = vsel %vm3971_vm5, %v3974_v11, %v3976_v60 }
 0x4d8   : > { %v4054_v58 = vsel %vm4053_vm0, %v4052_v41, 0  ;;  %8669 = vcosq.f32 %v11772_v15  ;;  %v3890_v4 = vadd.s32 %v11714_v22, %v11723_v17  ;;  %v13751_v40 = vand.u32 2147483647, %v11763_v5 }
 0x4d9   : > { %v11825_v20 = vmul.u32.u64.low %v3986_v28, %v3985_v33  ;;  %v11826_v55 = vmul.u32.u64.high %v3986_v28, %v3985_v33, %v11825_v20  ;;  %vm7811_vm8 = vcmp.lt.s32.totalorder %v7810_v6, 0  ;;  %v4056_v52 = vand.u32 31, %v4054_v58 }
 0x4da   : > { %v11829_v34 = vmul.u32.u64.low %v3986_v28, %v3981_v46  ;;  %v11830_v59 = vmul.u32.u64.high %v3986_v28, %v3981_v46, %v11829_v34  ;;  %v3905_v3 = vsel %vm7811_vm8, 0, %v7810_v6  ;;  %v3815_v56 = vsel %vm13759_vm14, %v3814_v0, %v3813_v37 }
 0x4db   : > { %v3906_v33 = vsub.s32 32, %v3905_v3  ;;  %v3910_v2 = vsub.s32 4294967266, %v3905_v3  ;;  %v3993_v41 = vmul.u32 %v3986_v28, %v3977_v26  ;;  %v11840_v25 = vshrl.u32 %v4054_v58, 5 }
 0x4dc   : > { %vm3995_vm3 = vc.u32 %v11826_v55, %v11829_v34  ;;  %v4057_v54 = vsub.s32 32, %v4056_v52  ;;  %v11842_v45 = vshll.u32 %v4050_v30, 8  ;;  %v3907_v22 = vshll.u32 %v11799_v10, %v3905_v3 }
 0x4dd   : > { %v3908_v17 = vshrl.u32 %v3890_v4, %v3906_v33  ;;  %v3911_v7 = vadd.s32 127, %v3910_v2  ;;  %v3996_v39 = vadd.s32 1, %v11830_v59  ;;  %v4059_v11 = vshll.u32 %v13803_v9, %v4056_v52 }
 0x4de   : > { %v4060_v0 = vshrl.u32 %v13985_v57, %v4057_v54  ;;  %v4062_v37 = vshll.u32 %v13985_v57, %v4056_v52  ;;  %v4063_v60 = vshrl.u32 %v13986_v38, %v4057_v54  ;;  %v4065_v30 = vshll.u32 %v13986_v38, %v4056_v52 }
 0x4df   : > { %v3912_v44 = vshll.u32 %v3911_v7, 23  ;;  %v3997_v46 = vsel %vm3995_vm3, %v3996_v39, %v11830_v59  ;;  %v4066_v35 = vshrl.u32 %v13987_v48, %v4057_v54  ;;  %v14050_v10 = vand.u32 2147483647, %v11383_v36 }
 0x4e0   : > { %v3909_v28 = vor.u32 %v3908_v17, %v3907_v22  ;;  %v3998_v6 = vadd.s32 %v3997_v46, %v3993_v41  ;;  %v4061_v26 = vor.u32 %v4060_v0, %v4059_v11  ;;  %v4064_v20 = vor.u32 %v4063_v60, %v4062_v37 }
 0x4e1   : > { %vm11855_vm5 = vcmp.le.f32.partialorder %v14050_v10, 0.7853982  ;;  %v3913_v58 = vor.u32 4788187, %v3912_v44  ;;  %v4067_v4 = vor.u32 %v4066_v35, %v4065_v30  ;;  %v4068_v3 = vshll.u32 %v13987_v48, %v4056_v52 }
 0x4e2   : > { %v4069_v59 = vshrl.u32 %v13988_v21, %v4057_v54  ;;  %v3999_v33 = vadd.s32 536870912, %v3998_v6  ;;  %v4071_v2 = vshll.u32 %v13988_v21, %v4056_v52  ;;  %v4072_v7 = vshrl.u32 %v13989_v16, %v4057_v54  ;;  %v11864_v39 = vpop.eup %8669 }
 0x4e3   : > { %vm4074_vm0 = vcmp.lt.s32.totalorder %v11840_v25, 1  ;;  %14053 = vst [vmem:[#allocation42_spill] sm:$0xff] %v11864_v39  ;;  %v3914_v10 = vand.u32 2147483647, %v3913_v58  ;;  %v4058_v41 = vshrl.u32 %v13803_v9, %v4057_v54  ;;  %vm4077_vm10 = vcmp.lt.s32.totalorder %v11840_v25, 4 }
 0x4e4   : > { %v4070_v22 = vor.u32 %v4069_v59, %v4068_v3  ;;  %v3916_v17 = vcvt.s32.f32 %v3909_v28  ;;  %v11868_v11 = vshrl.u32 %v3999_v33, 30  ;;  %v4073_v0 = vor.u32 %v4072_v7, %v4071_v2 }
 0x4e5   : > { %v4079_v37 = vsel %vm4077_vm10, %v4067_v4, 2102212464  ;;  %vm4075_vm8 = vcmp.lt.s32.totalorder %v11840_v25, 2  ;;  %vm4076_vm3 = vcmp.lt.s32.totalorder %v11840_v25, 3  ;;  %v4082_v52 = vsel %vm4074_vm0, %v4061_v26, %v4064_v20 }
 0x4e6   : > { %v4083_v54 = vsel %vm4077_vm10, %v4070_v22, 920167782  ;;  %v3917_v60 = vmul.f32 %v3916_v17, %v3914_v10  ;;  %v4001_v44 = vshll.u32 %v11868_v11, 30  ;;  %v4086_v30 = vsel %vm4074_vm0, %v4064_v20, %v4067_v4 }
 0x4e7   : > { %v4084_v46 = vsel %vm4076_vm3, %v4067_v4, %v4083_v54  ;;  %v4078_v35 = vsel %vm4074_vm0, %v4058_v41, %v4061_v26  ;;  %v4080_v28 = vsel %vm4076_vm3, %v4064_v20, %v4079_v37  ;;  %v4087_v3 = vsel %vm4077_vm10, %v4073_v0, 1326507024 }
 0x4e8   : > { %v4085_v58 = vsel %vm4075_vm8, %v4082_v52, %v4084_v46  ;;  %v11887_v59 = vsub.s32 %v3998_v6, %v4001_v44  ;;  %v4088_v33 = vsel %vm4076_vm3, %v4070_v22, %v4087_v3  ;;  %v3818_v4 = vsel %vm11855_vm5, %v11383_v36, %v3815_v56 }
 0x4e9   : > { %v11890_v2 = vmul.u32.u64.low %v11842_v45, %v4085_v58  ;;  %v11891_v7 = vmul.u32.u64.high %v11842_v45, %v4085_v58, %v11890_v2  ;;  %v4089_v26 = vsel %vm4075_vm8, %v4086_v30, %v4088_v33  ;;  %v4149_v20 = vand.u32 2139095040, %v11763_v5 }
 0x4ea   : > { %v4153_v10 = vand.u32 8388607, %v13751_v40  ;;  %v3918_v6 = vxor.u32 2147483648, %v3917_v60  ;;  %v4004_v41 = vsub.s32 0, %v11887_v59  ;;  %8671 = vsinq.f32 %v11772_v15 }
 0x4eb   : > { %v11904_v22 = vmul.u32.u64.low %v11842_v45, %v4089_v26  ;;  %v11905_v17 = vmul.u32.u64.high %v11842_v45, %v4089_v26, %v11904_v22  ;;  %v4081_v56 = vsel %vm4075_vm8, %v4078_v35, %v4080_v28  ;;  %v4150_v0 = vshrl.u32 %v4149_v20, 23 }
 0x4ec   : > { %v2774_v37 = vadd.f32 %v11347_v27, %v10847_v47  ;;  %8673 = vcosq.f32 %v3818_v4  ;;  %vm13750_vm0 = vcmp.lt.s32.totalorder %v11507_v50, 0  ;;  %v7813_v52 = vmin.u32 %v4004_v41, %v11887_v59 }
 0x4ed   : > { %v4100_v54 = vadd.s32 1, %v11891_v7  ;;  %v7820_v44 = vadd.s32 4294967169, %v4150_v0  ;;  %v4154_v46 = vor.u32 8388608, %v4153_v10  ;;  %v2776_v15 = vadd.f32 %v11424_v53, %v10853_v14 }
 0x4ee   : > { %v11915_v30 = vmul.f32 3.0, %v2774_v37  ;;  %v3919_v25 = vsel %vm13750_vm0, %v3918_v6, %v3917_v60  ;;  %v4006_v35 = vclz %v7813_v52  ;;  %v4097_v47 = vmul.u32 %v11842_v45, %v4081_v56 }
 0x4ef   : > { %vm4099_vm10 = vc.u32 %v11905_v17, %v11890_v2  ;;  %8675 = vsinq.f32 %v3818_v4  ;;  %v14054_v27 = vand.u32 2147483647, %v11507_v50  ;;  %v14055_v28 = vmov 0 }
 0x4f0   : > { %v4101_v58 = vsel %vm4099_vm10, %v4100_v54, %v11891_v7  ;;  %v4156_v3 = vadd.s32 1, %v7820_v44  ;;  %v3994_v14 = vadd.s32 %v11829_v34, %v11826_v55  ;;  %v7814_v53 = vadd.s32 4294967294, %v4006_v35 }
 0x4f1   : > { %vm11926_vm8 = vcmp.le.f32.partialorder %v14054_v27, 0.7853982  ;;  %v4102_v60 = vadd.s32 %v4101_v58, %v4097_v47  ;;  %v4253_v45 = vand.u32 2139095040, %v11915_v30  ;;  %v11939_v4 = vshll.u32 %v4154_v46, 8 }
 0x4f2   : > { %v14056_v28 = vsel %vm11926_vm8, 4294967295, %v14055_v28  ;;  %v11937_v33 = vsel %vm11926_vm8, %v11507_v50, %v3919_v25  ;;  %vm4157_vm3 = vcmp.gt.s32.totalorder %v4156_v3, 0  ;;  %v11941_v26 = vmul.f32 3.0, %v2776_v15 }
 0x4f3   : > { %14057 = vst [vmem:[#allocation43_spill] sm:$0xff] %v14056_v28  ;;  %vm7815_vm0 = vcmp.lt.s32.totalorder %v7814_v53, 0  ;;  %v4103_v7 = vadd.s32 536870912, %v4102_v60  ;;  %v4158_v20 = vsel %vm4157_vm3, %v4156_v3, 0  ;;  %v4254_v41 = vshrl.u32 %v4253_v45, 23 }
 0x4f4   : > { %v4009_v55 = vsel %vm7815_vm0, 0, %v7814_v53  ;;  %v4159_v34 = vshrl.u32 %v4158_v20, 5  ;;  %v4160_v6 = vand.u32 31, %v4158_v20  ;;  %v11947_v52 = vpop.eup %8671  ;;  %vm13769_vm0 = vcmp.lt.s32.totalorder %v11621_v43, 0 }
 0x4f5   : > { %v4010_v22 = vsub.s32 32, %v4009_v55  ;;  %v4011_v56 = vshll.u32 %v11887_v59, %v4009_v55  ;;  %v4014_v0 = vsub.s32 4294967266, %v4009_v55  ;;  %v11945_v37 = vshrl.u32 %v4103_v7, 30  ;;  %14059 = vst [vmem:[#allocation28_spill] sm:$0xff] %v11947_v52 }
 0x4f6   : > { %v4161_v54 = vsub.s32 32, %v4160_v6  ;;  %v4163_v44 = vshll.u32 %v13803_v9, %v4160_v6  ;;  %v4166_v46 = vshll.u32 %v13985_v57, %v4160_v6  ;;  %v4169_v15 = vshll.u32 %v13986_v38, %v4160_v6  ;;  %v11952_v25 = vpop.eup %8673 }
 0x4f7   : > { %14058 = vst [vmem:[#allocation39_spill] sm:$0xff] %v11945_v37  ;;  %v4012_v35 = vshrl.u32 %v3994_v14, %v4010_v22  ;;  %v4015_v47 = vadd.s32 127, %v4014_v0  ;;  %v4105_v27 = vshll.u32 %v11945_v37, 30  ;;  %v4172_v59 = vshll.u32 %v13987_v48, %v4160_v6 }
 0x4f8   : > { %v4162_v58 = vshrl.u32 %v13803_v9, %v4161_v54  ;;  %v4164_v3 = vshrl.u32 %v13985_v57, %v4161_v54  ;;  %v4167_v53 = vshrl.u32 %v13986_v38, %v4161_v54  ;;  %v4170_v45 = vshrl.u32 %v13987_v48, %v4161_v54 }
 0x4f9   : > { %v4013_v7 = vor.u32 %v4012_v35, %v4011_v56  ;;  %v4016_v20 = vshll.u32 %v4015_v47, 23  ;;  %v11960_v55 = vsub.s32 %v4102_v60, %v4105_v27  ;;  %v4173_v40 = vshrl.u32 %v13988_v21, %v4161_v54  ;;  %v11963_v14 = vpop.eup %8675 }
 0x4fa   : > { %v4165_v22 = vor.u32 %v4164_v3, %v4163_v44  ;;  %v4168_v0 = vor.u32 %v4167_v53, %v4166_v46  ;;  %v4171_v10 = vor.u32 %v4170_v45, %v4169_v15  ;;  %v4175_v37 = vshll.u32 %v13988_v21, %v4160_v6 }
 0x4fb   : > { %v4017_v28 = vor.u32 4788187, %v4016_v20  ;;  %v4020_v50 = vcvt.s32.f32 %v4013_v7  ;;  %v4108_v39 = vsub.s32 0, %v11960_v55  ;;  %v4174_v52 = vor.u32 %v4173_v40, %v4172_v59 }
 0x4fc   : > { %v4176_v56 = vshrl.u32 %v13989_v16, %v4161_v54  ;;  %vm4178_vm10 = vcmp.lt.s32.totalorder %v4159_v34, 1  ;;  %vm4179_vm3 = vcmp.lt.s32.totalorder %v4159_v34, 2  ;;  %vm4180_vm14 = vcmp.lt.s32.totalorder %v4159_v34, 3 }
 0x4fd   : > { %v14060_v60 = vand.u32 2147483647, %v11621_v43  ;;  %v14061_v35 = vmov 0  ;;  %v4018_v44 = vand.u32 2147483647, %v4017_v28  ;;  %v7817_v46 = vmin.u32 %v4108_v39, %v11960_v55 }
 0x4fe   : > { %vm4181_vm9 = vcmp.lt.s32.totalorder %v4159_v34, 4  ;;  %v4182_v6 = vsel %vm4178_vm10, %v4162_v58, %v4165_v22  ;;  %v4177_v15 = vor.u32 %v4176_v56, %v4175_v37  ;;  %v4186_v40 = vsel %vm4178_vm10, %v4165_v22, %v4168_v0 }
 0x4ff   : > { %vm11971_vm6 = vcmp.le.f32.partialorder %v14060_v60, 0.7853982  ;;  %v4183_v47 = vsel %vm4181_vm9, %v4171_v10, 2102212464  ;;  %v4187_v54 = vsel %vm4181_vm9, %v4174_v52, 920167782  ;;  %v4021_v27 = vmul.f32 %v4020_v50, %v4018_v44 }
 0x500   : > { %v14062_v35 = vsel %vm11971_vm6, 4294967295, %v14061_v35  ;;  %v4110_v59 = vclz %v7817_v46  ;;  %v4184_v3 = vsel %vm4180_vm14, %v4168_v0, %v4183_v47  ;;  %v4188_v53 = vsel %vm4180_vm14, %v4171_v10, %v4187_v54 }
 0x501   : > { %14063 = vst [vmem:[#allocation21_spill] sm:$0xff] %v14062_v35  ;;  %v4189_v45 = vsel %vm4179_vm3, %v4186_v40, %v4188_v53  ;;  %v4190_v28 = vsel %vm4178_vm10, %v4168_v0, %v4171_v10  ;;  %v4191_v7 = vsel %vm4181_vm9, %v4177_v15, 1326507024  ;;  %v14064_v39 = vand.u32 2147483647, %v11915_v30 }
 0x502   : > { %v4022_v58 = vxor.u32 2147483648, %v4021_v27  ;;  %v7818_v37 = vadd.s32 4294967294, %v4110_v59  ;;  %v4185_v56 = vsel %vm4179_vm3, %v4182_v6, %v4184_v3  ;;  %v4192_v22 = vsel %vm4180_vm14, %v4174_v52, %v4191_v7 }
 0x503   : > { %v4257_v20 = vand.u32 8388607, %v14064_v39  ;;  %v4193_v50 = vsel %vm4179_vm3, %v4190_v28, %v4192_v22  ;;  %v11988_v60 = vmul.u32.u64.low %v11939_v4, %v4189_v45  ;;  %v11989_v44 = vmul.u32.u64.high %v11939_v4, %v4189_v45, %v11988_v60 }
 0x504   : > { %v7824_v46 = vadd.s32 4294967169, %v4254_v41  ;;  %v4023_v10 = vsel %vm13769_vm0, %v4022_v58, %v4021_v27  ;;  %vm7819_vm9 = vcmp.lt.s32.totalorder %v7818_v37, 0  ;;  %8677 = vcosq.f32 %v11937_v33 }
 0x505   : > { %v11995_v0 = vmul.u32.u64.low %v11939_v4, %v4193_v50  ;;  %v11996_v15 = vmul.u32.u64.high %v11939_v4, %v4193_v50, %v11995_v0  ;;  %v4098_v34 = vadd.s32 %v11890_v2, %v11905_v17  ;;  %v4113_v52 = vsel %vm7819_vm9, 0, %v7818_v37 }
 0x506   : > { %v4260_v6 = vadd.s32 1, %v7824_v46  ;;  %v4114_v47 = vsub.s32 32, %v4113_v52  ;;  %v4118_v40 = vsub.s32 4294967266, %v4113_v52  ;;  %v4258_v54 = vor.u32 8388608, %v4257_v20 }
 0x507   : > { %v13762_v41 = vand.u32 2147483647, %v11941_v26  ;;  %v12005_v27 = vsel %vm11971_vm6, %v11621_v43, %v4023_v10  ;;  %v4201_v59 = vmul.u32 %v11939_v4, %v4185_v56  ;;  %v4204_v3 = vadd.s32 1, %v11989_v44 }
 0x508   : > { %vm4261_vm14 = vcmp.gt.s32.totalorder %v4260_v6, 0  ;;  %v4115_v53 = vshll.u32 %v11960_v55, %v4113_v52  ;;  %v4116_v2 = vshrl.u32 %v4098_v34, %v4114_v47  ;;  %v4119_v17 = vadd.s32 127, %v4118_v40 }
 0x509   : > { %vm4203_vm10 = vc.u32 %v11996_v15, %v11988_v60  ;;  %v4262_v28 = vsel %vm4261_vm14, %v4260_v6, 0  ;;  %v4357_v7 = vand.u32 2139095040, %v11941_v26  ;;  %v2984_v39 = vsub.s32 4, %v10987_v24 }
 0x50a   : > { %v4205_v45 = vsel %vm4203_vm10, %v4204_v3, %v11989_v44  ;;  %8679 = vsinq.f32 %v11937_v33  ;;  %v4117_v4 = vor.u32 %v4116_v2, %v4115_v53  ;;  %v4120_v20 = vshll.u32 %v4119_v17, 23 }
 0x50b   : > { %v4206_v58 = vadd.s32 %v4205_v45, %v4201_v59  ;;  %8681 = vcosq.f32 %v12005_v27  ;;  %v4264_v55 = vand.u32 31, %v4262_v28  ;;  %v12017_v37 = vshll.u32 %v4258_v54, 8 }
 0x50c   : > { %v12021_v56 = vand.u32 8388607, %v13762_v41  ;;  %vm13770_vm3 = vcmp.lt.s32.totalorder %v11699_v61, 0  ;;  %v4121_v22 = vor.u32 4788187, %v4120_v20  ;;  %v4263_v44 = vshrl.u32 %v4262_v28, 5 }
 0x50d   : > { %v4207_v50 = vadd.s32 536870912, %v4206_v58  ;;  %v4358_v46 = vshrl.u32 %v4357_v7, 23  ;;  %v4124_v10 = vcvt.s32.f32 %v4117_v4  ;;  %v4265_v33 = vsub.s32 32, %v4264_v55 }
 0x50e   : > { %v4267_v0 = vshll.u32 %v13803_v9, %v4264_v55  ;;  %v2985_v34 = vsel %vm2900_vm12, %v2984_v39, %v10987_v24  ;;  %v4122_v52 = vand.u32 2147483647, %v4121_v22  ;;  %v4270_v47 = vshll.u32 %v13985_v57, %v4264_v55  ;;  %v12032_v54 = vpop.eup %8677 }
 0x50f   : > { %v12028_v6 = vshrl.u32 %v4207_v50, 30  ;;  %v4273_v40 = vshll.u32 %v13986_v38, %v4264_v55  ;;  %14066 = vst [vmem:[#allocation40_spill] sm:$0xff] %v12032_v54  ;;  %v14067_v59 = vand.u32 2147483647, %v11699_v61  ;;  %v14068_v3 = vmov 0 }
 0x510   : > { %v4268_v53 = vshrl.u32 %v13985_v57, %v4265_v33  ;;  %v4271_v2 = vshrl.u32 %v13986_v38, %v4265_v33  ;;  %v4274_v24 = vshrl.u32 %v13987_v48, %v4265_v33  ;;  %v4276_v17 = vshll.u32 %v13987_v48, %v4264_v55 }
 0x511   : > { %14065 = vst [vmem:[#allocation19_spill] sm:$0xff] %v12028_v6  ;;  %vm12036_vm9 = vcmp.le.f32.partialorder %v14067_v59, 0.7853982  ;;  %v4125_v45 = vmul.f32 %v4124_v10, %v4122_v52  ;;  %v4209_v28 = vshll.u32 %v12028_v6, 30  ;;  %v4277_v7 = vshrl.u32 %v13988_v21, %v4265_v33 }
 0x512   : > { %v14069_v3 = vsel %vm12036_vm9, 4294967295, %v14068_v3  ;;  %v4280_v39 = vshrl.u32 %v13989_v16, %v4265_v33  ;;  %v4269_v4 = vor.u32 %v4268_v53, %v4267_v0  ;;  %v4272_v20 = vor.u32 %v4271_v2, %v4270_v47 }
 0x513   : > { %v4275_v22 = vor.u32 %v4274_v24, %v4273_v40  ;;  %v4279_v50 = vshll.u32 %v13988_v21, %v4264_v55  ;;  %v4126_v59 = vxor.u32 2147483648, %v4125_v45  ;;  %v12048_v41 = vsub.s32 %v4206_v58, %v4209_v28 }
 0x514   : > { %v4278_v54 = vor.u32 %v4277_v7, %v4276_v17  ;;  %vm4282_vm12 = vcmp.lt.s32.totalorder %v4263_v44, 1  ;;  %v4266_v35 = vshrl.u32 %v13803_v9, %v4265_v33  ;;  %vm4285_vm14 = vcmp.lt.s32.totalorder %v4263_v44, 4  ;;  %v12052_v52 = vpop.eup %8679 }
 0x515   : > { %v4281_v43 = vor.u32 %v4280_v39, %v4279_v50  ;;  %v4290_v10 = vsel %vm4282_vm12, %v4269_v4, %v4272_v20  ;;  %v4212_v6 = vsub.s32 0, %v12048_v41  ;;  %vm4284_vm10 = vcmp.lt.s32.totalorder %v4263_v44, 3  ;;  %v12057_v47 = vpop.eup %8681 }
 0x516   : > { %v4287_v0 = vsel %vm4285_vm14, %v4275_v22, 2102212464  ;;  %v4291_v55 = vsel %vm4285_vm14, %v4278_v54, 920167782  ;;  %v4127_v58 = vsel %vm13770_vm3, %v4126_v59, %v4125_v45  ;;  %vm4283_vm0 = vcmp.lt.s32.totalorder %v4263_v44, 2 }
 0x517   : > { %v4286_v33 = vsel %vm4282_vm12, %v4266_v35, %v4269_v4  ;;  %v4292_v40 = vsel %vm4284_vm10, %v4275_v22, %v4291_v55  ;;  %v7821_v53 = vmin.u32 %v4212_v6, %v12048_v41  ;;  %v4288_v2 = vsel %vm4284_vm10, %v4272_v20, %v4287_v0 }
 0x518   : > { %v4293_v24 = vsel %vm4283_vm0, %v4290_v10, %v4292_v40  ;;  %v4294_v17 = vsel %vm4282_vm12, %v4272_v20, %v4275_v22  ;;  %8683 = vsinq.f32 %v12005_v27  ;;  %v4295_v28 = vsel %vm4285_vm14, %v4281_v43, 1326507024 }
 0x519   : > { %v12069_v7 = vmul.u32.u64.low %v12017_v37, %v4293_v24  ;;  %v12070_v39 = vmul.u32.u64.high %v12017_v37, %v4293_v24, %v12069_v7  ;;  %v12076_v35 = vsel %vm12036_vm9, %v11699_v61, %v4127_v58  ;;  %v4214_v6 = vclz %v7821_v53 }
 0x51a   : > { %v4296_v45 = vsel %vm4284_vm10, %v4278_v54, %v4295_v28  ;;  %v7828_v4 = vadd.s32 4294967169, %v4358_v46  ;;  %v4289_v50 = vsel %vm4283_vm0, %v4286_v33, %v4288_v2  ;;  %v4362_v27 = vor.u32 8388608, %v12021_v56 }
 0x51b   : > { %v4297_v20 = vsel %vm4283_vm0, %v4294_v17, %v4296_v45  ;;  %v2987_v43 = vsel %vm11148_vm15, 0, %v2985_v34  ;;  %v7822_v22 = vadd.s32 4294967294, %v4214_v6  ;;  %v12087_v55 = vand.u32 3, %v11354_v13 }
 0x51c   : > { %v12083_v59 = vmul.u32.u64.low %v12017_v37, %v4297_v20  ;;  %v12084_v10 = vmul.u32.u64.high %v12017_v37, %v4297_v20, %v12083_v59  ;;  %v4364_v0 = vadd.s32 1, %v7828_v4  ;;  %8685 = vcosq.f32 %v12076_v35 }
 0x51d   : > { %v4202_v44 = vadd.s32 %v11988_v60, %v11996_v15  ;;  %v2991_v46 = vadd.s32 3, %v2987_v43  ;;  %vm7823_vm0 = vcmp.lt.s32.totalorder %v7822_v22, 0  ;;  %v4305_v56 = vmul.u32 %v12017_v37, %v4289_v50 }
 0x51e   : > { %v4308_v1 = vadd.s32 1, %v12070_v39  ;;  %vm4365_vm15 = vcmp.gt.s32.totalorder %v4364_v0, 0  ;;  %v4217_v34 = vsel %vm7823_vm0, 0, %v7822_v22  ;;  %v12094_v58 = vshll.u32 %v4362_v27, 8 }
 0x51f   : > { %v4366_v54 = vsel %vm4365_vm15, %v4364_v0, 0  ;;  %v2995_v33 = vxor.u32 2147483648, %v11311_v18  ;;  %v4218_v13 = vsub.s32 32, %v4217_v34  ;;  %v4222_v40 = vsub.s32 4294967266, %v4217_v34 }
 0x520   : > { %v2998_v53 = vxor.u32 2147483648, %v11305_v23  ;;  %v3192_v2 = vsub.s32 4, %v11118_v19  ;;  %vm4307_vm12 = vc.u32 %v12084_v10, %v12069_v7  ;;  %v4368_v60 = vand.u32 31, %v4366_v54 }
 0x521   : > { %v12101_v15 = vand.u32 3, %v2991_v46  ;;  %v4219_v24 = vshll.u32 %v12048_v41, %v4217_v34  ;;  %v4220_v17 = vshrl.u32 %v4202_v44, %v4218_v13  ;;  %v4223_v28 = vadd.s32 127, %v4222_v40 }
 0x522   : > { %v4309_v6 = vsel %vm4307_vm12, %v4308_v1, %v12070_v39  ;;  %v12106_v45 = vpop.eup %8683  ;;  %v4367_v50 = vshrl.u32 %v4366_v54, 5  ;;  %v4369_v20 = vsub.s32 32, %v4368_v60  ;;  %v4371_v27 = vshll.u32 %v13803_v9, %v4368_v60 }
 0x523   : > { %v4310_v4 = vadd.s32 %v4309_v6, %v4305_v56  ;;  %v4221_v43 = vor.u32 %v4220_v17, %v4219_v24  ;;  %v4224_v22 = vshll.u32 %v4223_v28, 23  ;;  %v4374_v59 = vshll.u32 %v13985_v57, %v4368_v60 }
 0x524   : > { %v4377_v0 = vshll.u32 %v13986_v38, %v4368_v60  ;;  %v4372_v41 = vshrl.u32 %v13985_v57, %v4369_v20  ;;  %v4375_v44 = vshrl.u32 %v13986_v38, %v4369_v20  ;;  %v4380_v39 = vshll.u32 %v13987_v48, %v4368_v60 }
 0x525   : > { %v4311_v46 = vadd.s32 536870912, %v4310_v4  ;;  %vm13771_vm14 = vcmp.lt.s32.totalorder %v11763_v5, 0  ;;  %v4225_v56 = vor.u32 4788187, %v4224_v22  ;;  %v4228_v1 = vcvt.s32.f32 %v4221_v43 }
 0x526   : > { %v4378_v34 = vshrl.u32 %v13987_v48, %v4369_v20  ;;  %v4381_v54 = vshrl.u32 %v13988_v21, %v4369_v20  ;;  %v12117_v13 = vpop.eup %8685  ;;  %v4373_v24 = vor.u32 %v4372_v41, %v4371_v27  ;;  %v4376_v17 = vor.u32 %v4375_v44, %v4374_v59 }
 0x527   : > { %v12119_v40 = vshrl.u32 %v4311_v46, 30  ;;  %v4383_v57 = vshll.u32 %v13988_v21, %v4368_v60  ;;  %v4226_v28 = vand.u32 2147483647, %v4225_v56  ;;  %v4384_v37 = vshrl.u32 %v13989_v16, %v4369_v20 }
 0x528   : > { %v4379_v38 = vor.u32 %v4378_v34, %v4377_v0  ;;  %v4382_v6 = vor.u32 %v4381_v54, %v4380_v39  ;;  %v14070_v22 = vand.u32 2147483647, %v11763_v5  ;;  %v4370_v46 = vshrl.u32 %v13803_v9, %v4369_v20 }
 0x529   : > { %v4313_v48 = vshll.u32 %v12119_v40, 30  ;;  %vm4386_vm0 = vcmp.lt.s32.totalorder %v4367_v50, 1  ;;  %vm4387_vm15 = vcmp.lt.s32.totalorder %v4367_v50, 2  ;;  %v4229_v27 = vmul.f32 %v4228_v1, %v4226_v28 }
 0x52a   : > { %vm12125_vm10 = vcmp.le.f32.partialorder %v14070_v22, 0.7853982  ;;  %v4385_v59 = vor.u32 %v4384_v37, %v4383_v57  ;;  %vm4388_vm12 = vcmp.lt.s32.totalorder %v4367_v50, 3  ;;  %vm4389_vm3 = vcmp.lt.s32.totalorder %v4367_v50, 4 }
 0x52b   : > { %v12131_v21 = vsub.s32 %v4310_v4, %v4313_v48  ;;  %v4391_v60 = vsel %vm4389_vm3, %v4379_v38, 2102212464  ;;  %v4394_v16 = vsel %vm4386_vm0, %v4373_v24, %v4376_v17  ;;  %v4395_v0 = vsel %vm4389_vm3, %v4382_v6, 920167782 }
 0x52c   : > { %v4230_v41 = vxor.u32 2147483648, %v4229_v27  ;;  %v4390_v44 = vsel %vm4386_vm0, %v4370_v46, %v4373_v24  ;;  %v4396_v39 = vsel %vm4388_vm12, %v4379_v38, %v4395_v0  ;;  %v4398_v56 = vsel %vm4386_vm0, %v4376_v17, %v4379_v38  ;;  %v14076_v0 = vld [vmem:[#allocation18_spill] sm:$0xff] }
 0x52d   : > { %v4316_v34 = vsub.s32 0, %v12131_v21  ;;  %v4392_v54 = vsel %vm4388_vm12, %v4376_v17, %v4391_v60  ;;  %v4397_v9 = vsel %vm4387_vm15, %v4394_v16, %v4396_v39  ;;  %v4399_v20 = vsel %vm4389_vm3, %v4385_v59, 1326507024  ;;  %v14075_v60 = vld [vmem:[#allocation15_spill] sm:$0xff] }
 0x52e   : > { %v4306_v37 = vadd.s32 %v12069_v7, %v12084_v10  ;;  %v4400_v1 = vsel %vm4388_vm12, %v4382_v6, %v4399_v20  ;;  %v12138_v4 = vmul.u32.u64.low %v12094_v58, %v4397_v9  ;;  %v12139_v57 = vmul.u32.u64.high %v12094_v58, %v4397_v9, %v12138_v4  ;;  %v14078_v39 = vld [vmem:[#allocation11_spill] sm:$0xff] }
 0x52f   : > { %v4231_v24 = vsel %vm13771_vm14, %v4230_v41, %v4229_v27  ;;  %v7825_v28 = vmin.u32 %v4316_v34, %v12131_v21  ;;  %v4401_v38 = vsel %vm4387_vm15, %v4398_v56, %v4400_v1  ;;  %vm2993_vm0 = vcmp.lt.s32.totalorder %v12101_v15, 2 }
 0x530   : > { %v4393_v17 = vsel %vm4387_vm15, %v4390_v44, %v4392_v54  ;;  %v12149_v22 = vmul.u32.u64.low %v12094_v58, %v4401_v38  ;;  %v12150_v7 = vmul.u32.u64.high %v12094_v58, %v4401_v38, %v12149_v22  ;;  %vm2994_vm3 = vcmp.eq.s32.totalorder %v12101_v15, 0  ;;  %v14079_v54 = vld [vmem:[#allocation4_spill] sm:$0xff] }
 0x531   : > { %v4318_v10 = vclz %v7825_v28  ;;  %v2996_v6 = vsel %vm2994_vm3, %v11305_v23, %v2995_v33  ;;  %vm2997_vm14 = vcmp.eq.s32.totalorder %v12101_v15, 2  ;;  %vm14073_vm15 = vcmp.lt.s32.totalorder %v10883_v29, 0  ;;  %v14080_v28 = vld [vmem:[#allocation16_spill] sm:$0xff] }
 0x532   : > { %v3193_v50 = vsel %vm14073_vm15, %v3192_v2, %v11118_v19  ;;  %v12166_v48 = vsel %vm12125_vm10, %v11763_v5, %v4231_v24  ;;  %v4412_v46 = vadd.s32 1, %v12139_v57  ;;  %v2999_v27 = vsel %vm2997_vm14, %v2998_v53, %v11311_v18  ;;  %v14077_v18 = vld [vmem:[#allocation17_spill] sm:$0xff] }
 0x533   : > { %v3195_v59 = vsel %vm11325_vm4, 0, %v3193_v50  ;;  %v7826_v16 = vadd.s32 4294967294, %v4318_v10  ;;  %v4409_v19 = vmul.u32 %v12094_v58, %v4393_v17  ;;  %v3206_v41 = vxor.u32 2147483648, %v14076_v0 }
 0x534   : > { %v3199_v2 = vadd.s32 3, %v3195_v59  ;;  %vm4411_vm15 = vc.u32 %v12150_v7, %v12138_v4  ;;  %v3000_v23 = vsel %vm2993_vm0, %v2996_v6, %v2999_v27  ;;  %vm2890_vm4 = vcmp.eq.s32.totalorder %v14077_v18, 0 }
 0x535   : > { %vm7827_vm9 = vcmp.lt.s32.totalorder %v7826_v16, 0  ;;  %v4413_v53 = vsel %vm4411_vm15, %v4412_v46, %v12139_v57  ;;  %v2891_v56 = vxor.u32 2147483648, %v14078_v39  ;;  %vm2893_vm12 = vcmp.eq.s32.totalorder %v14077_v18, 2 }
 0x536   : > { %v3200_v44 = vand.u32 3, %v3199_v2  ;;  %v4321_v58 = vsel %vm7827_vm9, 0, %v7826_v16  ;;  %v4414_v34 = vadd.s32 %v4413_v53, %v4409_v19  ;;  %v2894_v9 = vxor.u32 2147483648, %v14079_v54 }
 0x537   : > { %v4322_v20 = vsub.s32 32, %v4321_v58  ;;  %v4323_v15 = vshll.u32 %v12131_v21, %v4321_v58  ;;  %v4326_v1 = vsub.s32 4294967266, %v4321_v58  ;;  %v2892_v57 = vsel %vm2890_vm4, %v14079_v54, %v2891_v56 }
 0x538   : > { %vm3201_vm0 = vcmp.lt.s32.totalorder %v3200_v44, 2  ;;  %v4415_v24 = vadd.s32 536870912, %v4414_v34  ;;  %vm3202_vm14 = vcmp.eq.s32.totalorder %v3200_v44, 0  ;;  %vm3205_vm3 = vcmp.eq.s32.totalorder %v3200_v44, 2 }
 0x539   : > { %v4324_v38 = vshrl.u32 %v4306_v37, %v4322_v20  ;;  %v4327_v17 = vadd.s32 127, %v4326_v1  ;;  %v14081_v22 = vxor.u32 2147483648, %v11497_v63  ;;  %v3207_v6 = vsel %vm3205_vm3, %v3206_v41, %v11497_v63 }
 0x53a   : > { %v12197_v21 = vshrl.u32 %v4415_v24, 30  ;;  %vm14082_vm9 = vweird.f32 %v10860_v62  ;;  %v2895_v27 = vsel %vm2893_vm12, %v2894_v9, %v14078_v39  ;;  %vm14083_vm4 = vweird.f32 %v10883_v29  ;;  %v14086_v29 = vld [vmem:[#allocation37_spill] sm:$0xff]  ;;  %v14092_v9 = vld [vmem:[#allocation6_spill] sm:$0xff] }
 0x53b   : > { %v3204_v10 = vsel %vm3202_vm14, %v14076_v0, %v14081_v22  ;;  %v3001_v50 = vsel %vm14082_vm9, nan, %v3000_v23  ;;  %v4325_v33 = vor.u32 %v4324_v38, %v4323_v15  ;;  %v4328_v59 = vshll.u32 %v4327_v17, 23  ;;  %v14094_v15 = vld [vmem:[#allocation38_spill] sm:$0xff] }
 0x53c   : > { %v3208_v46 = vsel %vm3201_vm0, %v3204_v10, %v3207_v6  ;;  %vm14084_vm15 = vcmp.lt.s32.totalorder %v14077_v18, 2  ;;  %8687 = vsinq.f32 %v12076_v35  ;;  %v4417_v63 = vshll.u32 %v12197_v21, 30  ;;  %v14087_v35 = vld [vmem:[#allocation32_spill] sm:$0xff] }
 0x53d   : > { %v3209_v37 = vsel %vm14083_vm4, nan, %v3208_v46  ;;  %v2896_v16 = vsel %vm14084_vm15, %v2892_v57, %v2895_v27  ;;  %vm14085_vm3 = vweird.f32 %v14075_v60  ;;  %8689 = vcosq.f32 %v12166_v48  ;;  %v14088_v18 = vld [vmem:[#allocation20_spill] sm:$0xff] }
 0x53e   : > { %v4459_v19 = vpack.c.bf16 %v3209_v37, %v3001_v50  ;;  %v2897_v62 = vsel %vm14085_vm3, nan, %v2896_v16  ;;  %vm13773_vm12 = vcmp.lt.s32.totalorder %v11915_v30, 0  ;;  %v4329_v2 = vor.u32 4788187, %v4328_v59 }
 0x53f   : > { %vm3097_vm14 = vcmp.lt.s32.totalorder %v12087_v55, 2  ;;  %v3099_v0 = vxor.u32 2147483648, %v14086_v29  ;;  %v12216_v41 = vsub.s32 %v4414_v34, %v4417_v63  ;;  %vm3098_vm0 = vcmp.eq.s32.totalorder %v12087_v55, 0  ;;  %v14098_v63 = vld [vmem:[#allocation23_spill] sm:$0xff] }
 0x540   : > { %4630 = vmatprep.mubr.bf16.mxu0 %v4459_v19  ;;  %v3102_v23 = vxor.u32 2147483648, %v14087_v35  ;;  %v3400_v53 = vsub.s32 4, %v14088_v18  ;;  %v4330_v60 = vand.u32 2147483647, %v4329_v2  ;;  %v4332_v44 = vcvt.s32.f32 %v4325_v33 }
 0x541   : > { %v3100_v39 = vsel %vm3098_vm0, %v14087_v35, %v3099_v0  ;;  %vm3101_vm15 = vcmp.eq.s32.totalorder %v12087_v55, 2  ;;  %v14089_v56 = vand.u32 2147483647, %v11915_v30  ;;  %v4420_v34 = vsub.s32 0, %v12216_v41 }
 0x542   : > { %v3103_v54 = vsel %vm3101_vm15, %v3102_v23, %v14086_v29  ;;  %vm14093_vm4 = vcmp.lt.s32.totalorder %v14092_v9, 0  ;;  %v3608_v1 = vsub.s32 4, %v14094_v15  ;;  %8691 = vsinq.f32 %v12166_v48 }
 0x543   : > { %vm12225_vm9 = vcmp.le.f32.partialorder %v14089_v56, 0.7853982  ;;  %v3401_v20 = vsel %vm14093_vm4, %v3400_v53, %v14088_v18  ;;  %v4333_v24 = vmul.f32 %v4332_v44, %v4330_v60  ;;  %v3104_v57 = vsel %vm3097_vm14, %v3100_v39, %v3103_v54  ;;  %v14099_v18 = vld [vmem:[#allocation13_spill] sm:$0xff] }
 0x544   : > { %v3403_v17 = vsel %vm11440_vm13, 0, %v3401_v20  ;;  %v7829_v22 = vmin.u32 %v4420_v34, %v12216_v41  ;;  %vm14096_vm3 = vweird.f32 %v14080_v28  ;;  %vm14097_vm0 = vcmp.lt.s32.totalorder %v11241_v8, 0 }
 0x545   : > { %v3105_v10 = vsel %vm14096_vm3, nan, %v3104_v57  ;;  %v3407_v6 = vadd.s32 3, %v3403_v17  ;;  %v3609_v50 = vsel %vm14097_vm0, %v3608_v1, %v14094_v15  ;;  %v4334_v46 = vxor.u32 2147483648, %v4333_v24 }
 0x546   : > { %v4458_v27 = vpack.c.bf16 %v3105_v10, %v2897_v62  ;;  %v3411_v48 = vxor.u32 2147483648, %v11665_v32  ;;  %v3611_v55 = vsel %vm11616_vm11, 0, %v3609_v50  ;;  %v4422_v33 = vclz %v7829_v22  ;;  %v12255_v62 = vpop.eup %8687  ;;  %v14103_v50 = vld [vmem:[#allocation45_spill] sm:$0xff] }
 0x547   : > { %v3408_v59 = vand.u32 3, %v3407_v6  ;;  %v3414_v37 = vxor.u32 2147483648, %v11563_v42  ;;  %v3615_v16 = vadd.s32 3, %v3611_v55  ;;  %v4410_v28 = vadd.s32 %v12138_v4, %v12150_v7  ;;  %v12260_v0 = vpop.eup %8689 }
 0x548   : > { %4631 = vmatmul.mubr.bf16.vlgmr.msra.gmra.mrb[16].mxu0 %v4458_v27  ;;  %vm3406_vm13 = vweird.f32 %v14092_v9  ;;  %vm3614_vm14 = vweird.f32 %v11241_v8  ;;  %v3296_v19 = vsub.s32 4, %v14098_v63  ;;  %v4335_v31 = vsel %vm13773_vm12, %v4334_v46, %v4333_v24 }
 0x549   : > { %v7830_v2 = vadd.s32 4294967294, %v4422_v33  ;;  %vm3410_vm11 = vcmp.eq.s32.totalorder %v3408_v59, 0  ;;  %v3619_v29 = vxor.u32 2147483648, %v11811_v49  ;;  %vm3413_vm15 = vcmp.eq.s32.totalorder %v3408_v59, 2 }
 0x54a   : > { %v3412_v4 = vsel %vm3410_vm11, %v11563_v42, %v3411_v48  ;;  %v3616_v7 = vand.u32 3, %v3615_v16  ;;  %v3622_v35 = vxor.u32 2147483648, %v11791_v12  ;;  %vm3409_vm3 = vcmp.lt.s32.totalorder %v3408_v59, 2  ;;  %v14101_v42 = vld [vmem:[#allocation22_spill] sm:$0xff]  ;;  %v14105_v59 = vld [vmem:[#allocation7_spill] sm:$0xff] }
 0x54b   : > { %vm7831_vm4 = vcmp.lt.s32.totalorder %v7830_v2, 0  ;;  %v3415_v23 = vsel %vm3413_vm15, %v3414_v37, %v11665_v32  ;;  %vm14100_vm0 = vcmp.lt.s32.totalorder %v14099_v18, 0  ;;  %v12271_v60 = vsel %vm12225_vm9, %v11915_v30, %v4335_v31  ;;  %v14107_v37 = vld [vmem:[#allocation34_spill] sm:$0xff] }
 0x54c   : > { %v3297_v53 = vsel %vm14100_vm0, %v3296_v19, %v14098_v63  ;;  %v4425_v44 = vsel %vm7831_vm4, 0, %v7830_v2  ;;  %v3416_v39 = vsel %vm3409_vm3, %v3412_v4, %v3415_v23  ;;  %v3307_v56 = vxor.u32 2147483648, %v14101_v42  ;;  %v12274_v20 = vpop.eup %8691 }
 0x54d   : > { %v4426_v34 = vsub.s32 32, %v4425_v44  ;;  %v4430_v54 = vsub.s32 4294967266, %v4425_v44  ;;  %vm3617_vm11 = vcmp.lt.s32.totalorder %v3616_v7, 2  ;;  %vm3618_vm12 = vcmp.eq.s32.totalorder %v3616_v7, 0 }
 0x54e   : > { %v4427_v32 = vshll.u32 %v12216_v41, %v4425_v44  ;;  %v3620_v15 = vsel %vm3618_vm12, %v11791_v12, %v3619_v29  ;;  %vm3621_vm15 = vcmp.eq.s32.totalorder %v3616_v7, 2  ;;  %v3299_v24 = vsel %vm11434_vm1, 0, %v3297_v53  ;;  %v14104_v41 = vld [vmem:[#allocation31_spill] sm:$0xff] }
 0x54f   : > { %v4428_v57 = vshrl.u32 %v4410_v28, %v4426_v34  ;;  %v4431_v38 = vadd.s32 127, %v4430_v54  ;;  %v3623_v17 = vsel %vm3621_vm15, %v3622_v35, %v11811_v49  ;;  %vm3302_vm4 = vweird.f32 %v14099_v18  ;;  %v14114_v54 = vld [vmem:[#allocation24_spill] sm:$0xff] }
 0x550   : > { %v3303_v22 = vadd.s32 3, %v3299_v24  ;;  %v3417_v10 = vsel %vm3406_vm13, nan, %v3416_v39  ;;  %v3624_v6 = vsel %vm3617_vm11, %v3620_v15, %v3623_v17  ;;  %v3310_v46 = vxor.u32 2147483648, %v14103_v50  ;;  %v14113_v39 = vld [vmem:[#allocation48_spill] sm:$0xff] }
 0x551   : > { %v3504_v27 = vsub.s32 4, %v14104_v41  ;;  %v4429_v12 = vor.u32 %v4428_v57, %v4427_v32  ;;  %v4432_v48 = vshll.u32 %v4431_v38, 23  ;;  %v3625_v55 = vsel %vm3614_vm14, nan, %v3624_v6 }
 0x552   : > { %v3304_v33 = vand.u32 3, %v3303_v22  ;;  %8693 = vcosq.f32 %v12271_v60  ;;  %vm4356_vm1 = vcmp.lt.s32.totalorder %v11941_v26, 0  ;;  %v4461_v49 = vpack.c.bf16 %v3625_v55, %v3417_v10 }
 0x553   : > { %vm14106_vm12 = vcmp.lt.s32.totalorder %v14105_v59, 0  ;;  %v3816_v16 = vsub.s32 4, %v14107_v37  ;;  %v14108_v28 = vand.u32 2147483647, %v11941_v26  ;;  %v4433_v8 = vor.u32 4788187, %v4432_v48 }
 0x554   : > { %v3505_v9 = vsel %vm14106_vm12, %v3504_v27, %v14104_v41  ;;  %v4436_v19 = vcvt.s32.f32 %v4429_v12  ;;  %vm3305_vm14 = vcmp.lt.s32.totalorder %v3304_v33, 2  ;;  %vm3306_vm3 = vcmp.eq.s32.totalorder %v3304_v33, 0  ;;  %4638 = vmatprep.mubr.bf16.mxu0 %v4461_v49  ;;  %v14115_v48 = vld [vmem:[#allocation33_spill] sm:$0xff] }
 0x555   : > { %vm12296_vm13 = vcmp.le.f32.partialorder %v14108_v28, 0.7853982  ;;  %v3308_v31 = vsel %vm3306_vm3, %v14103_v50, %v3307_v56  ;;  %vm3309_vm0 = vcmp.eq.s32.totalorder %v3304_v33, 2  ;;  %v3507_v29 = vsel %vm11557_vm2, 0, %v3505_v9 }
 0x556   : > { %vm14112_vm11 = vcmp.lt.s32.totalorder %v11383_v36, 0  ;;  %v4434_v7 = vand.u32 2147483647, %v4433_v8  ;;  %v3311_v35 = vsel %vm3309_vm0, %v3310_v46, %v14101_v42  ;;  %v3511_v23 = vadd.s32 3, %v3507_v29  ;;  %v14119_v8 = vld [vmem:[#allocation28_spill] sm:$0xff]  ;;  %v14121_v29 = vld [vmem:[#allocation27_spill] sm:$0xff] }
 0x557   : > { %v3817_v4 = vsel %vm14112_vm11, %v3816_v16, %v14107_v37  ;;  %v3312_v44 = vsel %vm3305_vm14, %v3308_v31, %v3311_v35  ;;  %v3515_v34 = vxor.u32 2147483648, %v14113_v39  ;;  %v3518_v56 = vxor.u32 2147483648, %v14114_v54  ;;  %v14120_v31 = vld [vmem:[#allocation35_spill] sm:$0xff] }
 0x558   : > { %v3819_v53 = vsel %vm11855_vm5, 0, %v3817_v4  ;;  %v4437_v15 = vmul.f32 %v4436_v19, %v4434_v7  ;;  %vm3510_vm2 = vweird.f32 %v14105_v59  ;;  %v3512_v1 = vand.u32 3, %v3511_v23  ;;  %v14123_v4 = vld [vmem:[#allocation42_spill] sm:$0xff]  ;;  %v14124_v23 = vld [vmem:[#allocation19_spill] sm:$0xff] }
 0x559   : > { %v3823_v32 = vadd.s32 3, %v3819_v53  ;;  %v3827_v24 = vxor.u32 2147483648, %v11963_v14  ;;  %v3313_v57 = vsel %vm3302_vm4, nan, %v3312_v44  ;;  %v3830_v38 = vxor.u32 2147483648, %v11952_v25 }
 0x55a   : > { %v4024_v51 = vsub.s32 4, %v11868_v11  ;;  %v4438_v17 = vxor.u32 2147483648, %v4437_v15  ;;  %vm3513_vm5 = vcmp.lt.s32.totalorder %v3512_v1, 2  ;;  %vm3514_vm15 = vcmp.eq.s32.totalorder %v3512_v1, 0 }
 0x55b   : > { %v3824_v42 = vand.u32 3, %v3823_v32  ;;  %vm3517_vm12 = vcmp.eq.s32.totalorder %v3512_v1, 2  ;;  %v3516_v22 = vsel %vm3514_vm15, %v14114_v54, %v3515_v34  ;;  %vm14116_vm0 = vcmp.lt.s32.totalorder %v14115_v48, 0  ;;  %v14126_v32 = vld [vmem:[#allocation8_spill] sm:$0xff] }
 0x55c   : > { %v3519_v10 = vsel %vm3517_vm12, %v3518_v56, %v14113_v39  ;;  %v4439_v6 = vsel %vm4356_vm1, %v4438_v17, %v4437_v15  ;;  %v12322_v46 = vpop.eup %8693  ;;  %v4025_v55 = vsel %vm14116_vm0, %v4024_v51, %v11868_v11  ;;  %8695 = vsinq.f32 %v12271_v60  ;;  %v14118_v11 = vld [vmem:[#allocation14_spill] sm:$0xff] }
 0x55d   : > { %vm3825_vm14 = vcmp.lt.s32.totalorder %v3824_v42, 2  ;;  %vm3826_vm3 = vcmp.eq.s32.totalorder %v3824_v42, 0  ;;  %v3520_v18 = vsel %vm3513_vm5, %v3516_v22, %v3519_v10  ;;  %vm3829_vm4 = vcmp.eq.s32.totalorder %v3824_v42, 2  ;;  %v14129_v42 = vld [vmem:[#allocation40_spill] sm:$0xff] }
 0x55e   : > { %v3828_v50 = vsel %vm3826_vm3, %v11952_v25, %v3827_v24  ;;  %v4442_v41 = vsel %vm12296_vm13, %v11941_v26, %v4439_v6  ;;  %v3521_v27 = vsel %vm3510_vm2, nan, %v3520_v18  ;;  %v3831_v12 = vsel %vm3829_vm4, %v3830_v38, %v11963_v14 }
 0x55f   : > { %v4460_v33 = vpack.c.bf16 %v3521_v27, %v3313_v57  ;;  %v3832_v25 = vsel %vm3825_vm14, %v3828_v50, %v3831_v12  ;;  %v4027_v9 = vsel %vm11971_vm6, 0, %v4025_v55  ;;  %8697 = vcosq.f32 %v4442_v41 }
 0x560   : > { %vm3822_vm11 = vweird.f32 %v11383_v36  ;;  %vm4030_vm5 = vweird.f32 %v14115_v48  ;;  %v4031_v59 = vadd.s32 3, %v4027_v9  ;;  %8699 = vsinq.f32 %v4442_v41 }
 0x561   : > { %4639 = vmatmul.mubr.bf16.gmra.mrb[20].mxu0 %v4460_v33  ;;  %v4035_v14 = vxor.u32 2147483648, %v12106_v45  ;;  %v4038_v37 = vxor.u32 2147483648, %v12057_v47  ;;  %v3712_v16 = vsub.s32 4, %v14118_v11  ;;  %v3833_v60 = vsel %vm3822_vm11, nan, %v3832_v25 }
 0x562   : > { %v4032_v28 = vand.u32 3, %v4031_v59  ;;  %v3723_v19 = vxor.u32 2147483648, %v14119_v8  ;;  %v3920_v2 = vsub.s32 4, %v14120_v31  ;;  %vm14122_vm6 = vcmp.lt.s32.totalorder %v14121_v29, 0 }
 0x563   : > { %v3713_v36 = vsel %vm14122_vm6, %v3712_v16, %v14118_v11  ;;  %v3726_v7 = vxor.u32 2147483648, %v14123_v4  ;;  %v3931_v35 = vxor.u32 2147483648, %v12052_v52  ;;  %v4232_v53 = vsub.s32 4, %v14124_v23 }
 0x564   : > { %vm4033_vm2 = vcmp.lt.s32.totalorder %v4032_v28, 2  ;;  %vm4034_vm15 = vcmp.eq.s32.totalorder %v4032_v28, 0  ;;  %vm4037_vm12 = vcmp.eq.s32.totalorder %v4032_v28, 2  ;;  %v3715_v39 = vsel %vm11759_vm7, 0, %v3713_v36 }
 0x565   : > { %v4036_v34 = vsel %vm4034_vm15, %v12057_v47, %v4035_v14  ;;  %v4039_v54 = vsel %vm4037_vm12, %v4038_v37, %v12106_v45  ;;  %v3719_v56 = vadd.s32 3, %v3715_v39  ;;  %vm14127_vm14 = vcmp.lt.s32.totalorder %v14126_v32, 0 }
 0x566   : > { %v3921_v15 = vsel %vm14127_vm14, %v3920_v2, %v14120_v31  ;;  %v4040_v1 = vsel %vm4033_vm2, %v4036_v34, %v4039_v54  ;;  %v3934_v38 = vxor.u32 2147483648, %v14129_v42  ;;  %vm14130_vm3 = vcmp.lt.s32.totalorder %v11763_v5, 0  ;;  %v12368_v41 = vpop.eup %8695  ;;  %v14131_v2 = vld [vmem:[#allocation39_spill] sm:$0xff] }
 0x567   : > { %v3923_v57 = vsel %vm11926_vm8, 0, %v3921_v15  ;;  %v4233_v51 = vsel %vm14130_vm3, %v4232_v53, %v14124_v23  ;;  %v4041_v47 = vsel %vm4030_vm5, nan, %v4040_v1  ;;  %v3720_v17 = vand.u32 3, %v3719_v56 }
 0x568   : > { %v3927_v45 = vadd.s32 3, %v3923_v57  ;;  %v4235_v22 = vsel %vm12125_vm10, 0, %v4233_v51  ;;  %v4463_v10 = vpack.c.bf16 %v4041_v47, %v3833_v60  ;;  %v4243_v18 = vxor.u32 2147483648, %v12274_v20 }
 0x569   : > { %v4239_v6 = vadd.s32 3, %v4235_v22  ;;  %v4440_v50 = vsub.s32 4, %v12197_v21  ;;  %vm3721_vm7 = vcmp.lt.s32.totalorder %v3720_v17, 2  ;;  %vm3722_vm8 = vcmp.eq.s32.totalorder %v3720_v17, 0  ;;  %v8698_v12 = vpop.eup %8697 }
 0x56a   : > { %vm3725_vm4 = vcmp.eq.s32.totalorder %v3720_v17, 2  ;;  %v3928_v27 = vand.u32 3, %v3927_v45  ;;  %4646 = vmatprep.mubr.bf16.mxu0 %v4463_v10  ;;  %v3724_v48 = vsel %vm3722_vm8, %v14123_v4, %v3723_v19  ;;  %v8700_v25 = vpop.eup %8699  ;;  %v4246_v9 = vxor.u32 2147483648, %v12260_v0  ;;  %v12414_v10 = vld [vmem:[%s13786_s30] sm:$0xff] }
 0x56b   : > { %v3727_v55 = vsel %vm3725_vm4, %v3726_v7, %v14119_v8  ;;  %v4240_v43 = vand.u32 3, %v4239_v6  ;;  %v4441_v33 = vsel %vm4356_vm1, %v4440_v50, %v12197_v21  ;;  %vm3718_vm5 = vweird.f32 %v14121_v29 }
 0x56c   : > { %v3728_v49 = vsel %vm3721_vm7, %v3724_v48, %v3727_v55  ;;  %vm3930_vm10 = vcmp.eq.s32.totalorder %v3928_v27, 0  ;;  %vm3933_vm0 = vcmp.eq.s32.totalorder %v3928_v27, 2  ;;  %vm3929_vm11 = vcmp.lt.s32.totalorder %v3928_v27, 2 }
 0x56d   : > { %v3932_v59 = vsel %vm3930_vm10, %v14129_v42, %v3931_v35  ;;  %v3935_v14 = vsel %vm3933_vm0, %v3934_v38, %v12052_v52  ;;  %vm3926_vm6 = vweird.f32 %v14126_v32  ;;  %v4443_v11 = vsel %vm12296_vm13, 0, %v4441_v33 }
 0x56e   : > { %v3936_v37 = vsel %vm3929_vm11, %v3932_v59, %v3935_v14  ;;  %v3729_v21 = vsel %vm3718_vm5, nan, %v3728_v49  ;;  %vm4242_vm1 = vcmp.eq.s32.totalorder %v4240_v43, 0  ;;  %vm4245_vm2 = vcmp.eq.s32.totalorder %v4240_v43, 2  ;;  %v8536_v59 = vld [vmem:[%s13551_s5] sm:$0xff]  }
 0x56f   : > { %v3937_v16 = vsel %vm3926_vm6, nan, %v3936_v37  ;;  %v4244_v28 = vsel %vm4242_vm1, %v12260_v0, %v4243_v18  ;;  %v4247_v8 = vsel %vm4245_vm2, %v4246_v9, %v12274_v20  ;;  %v4447_v19 = vadd.s32 3, %v4443_v11 }
 0x570   : > { %v4462_v60 = vpack.c.bf16 %v3937_v16, %v3729_v21  ;;  %v4451_v31 = vxor.u32 2147483648, %v8700_v25  ;;  %v4454_v52 = vxor.u32 2147483648, %v8698_v12  ;;  %v4128_v29 = vsub.s32 4, %v14131_v2 }
 0x571   : > { %vm4241_vm15 = vcmp.lt.s32.totalorder %v4240_v43, 2  ;;  %v4448_v36 = vand.u32 3, %v4447_v19  ;;  %v4336_v63 = vsub.s32 4, %v12119_v40  ;;  %vm4238_vm13 = vweird.f32 %v11763_v5 }
 0x572   : > { %4647 = vmatmul.mubr.bf16.gmra.mrb[24].mxu0 %v4462_v60  ;;  %v4248_v4 = vsel %vm4241_vm15, %v4244_v28, %v4247_v8  ;;  %vm4446_vm12 = vweird.f32 %v11941_v26  ;;  %vm14132_vm14 = vcmp.lt.s32.totalorder %v11699_v61, 0  ;;  %vm14133_vm4 = vnez %v14069_v3 }
 0x573   : > { %v4129_v0 = vsel %vm14132_vm14, %v4128_v29, %v14131_v2  ;;  %vm4449_vm3 = vcmp.lt.s32.totalorder %v4448_v36, 2  ;;  %vm4450_vm7 = vcmp.eq.s32.totalorder %v4448_v36, 0  ;;  %vm4453_vm8 = vcmp.eq.s32.totalorder %v4448_v36, 2 }
 0x574   : > { %v4131_v20 = vsel %vm14133_vm4, 0, %v4129_v0  ;;  %v4452_v7 = vsel %vm4450_vm7, %v8698_v12, %v4451_v31  ;;  %v4455_v35 = vsel %vm4453_vm8, %v4454_v52, %v8700_v25  ;;  %vm14134_vm10 = vcmp.lt.s32.totalorder %v11915_v30, 0 }
 0x575   : > { %v4135_v23 = vadd.s32 3, %v4131_v20  ;;  %v4337_v53 = vsel %vm14134_vm10, %v4336_v63, %v12119_v40  ;;  %v4456_v44 = vsel %vm4449_vm3, %v4452_v7, %v4455_v35  ;;  %v4139_v26 = vxor.u32 2147483648, %v12255_v62 }
 0x576   : > { %v4142_v39 = vxor.u32 2147483648, %v12117_v13  ;;  %v4339_v34 = vsel %vm12225_vm9, 0, %v4337_v53  ;;  %v4249_v54 = vsel %vm4238_vm13, nan, %v4248_v4  ;;  %v4457_v3 = vsel %vm4446_vm12, nan, %v4456_v44 }
 0x577   : > { %v4136_v56 = vand.u32 3, %v4135_v23  ;;  %v4343_v32 = vadd.s32 3, %v4339_v34  ;;  %v4465_v15 = vpack.c.bf16 %v4457_v3, %v4249_v54  ;;  %v4347_v1 = vxor.u32 2147483648, %v12368_v41 }
 0x578   : > { %v4350_v24 = vxor.u32 2147483648, %v12322_v46  ;;  %vm4134_vm2 = vweird.f32 %v11699_v61  ;;  %vm4342_vm15 = vweird.f32 %v11915_v30  ;;  %vm4671_vm13 = vcmask 1040384  }
 0x579   : > { %vm4138_vm0 = vcmp.eq.s32.totalorder %v4136_v56, 0  ;;  %vm4141_vm11 = vcmp.eq.s32.totalorder %v4136_v56, 2  ;;  %v4344_v40 = vand.u32 3, %v4343_v32  ;;  %4654 = vmatprep.mubr.bf16.mxu0 %v4465_v15  ;;  %vm4137_vm5 = vcmp.lt.s32.totalorder %v4136_v56, 2 }
 0x57a   : > { %v4140_v57 = vsel %vm4138_vm0, %v12117_v13, %v4139_v26  ;;  %v4143_v58 = vsel %vm4141_vm11, %v4142_v39, %v12255_v62  ;;  %v14135_v13 = vld [vmem:[#allocation2_spill] sm:$0xff]  ;;  %vm4700_vm12 = vcmask 1046528   ;;  %vm4826_vm14 = vcmask 1047552  }
 0x57b   : > { %v4144_v42 = vsel %vm4137_vm5, %v4140_v57, %v4143_v58  ;;  %vm4346_vm9 = vcmp.eq.s32.totalorder %v4344_v40, 0  ;;  %vm4349_vm6 = vcmp.eq.s32.totalorder %v4344_v40, 2  ;;  %vm4345_vm1 = vcmp.lt.s32.totalorder %v4344_v40, 2 }
 0x57c   : > { %v4348_v5 = vsel %vm4346_vm9, %v12322_v46, %v4347_v1  ;;  %v4351_v38 = vsel %vm4349_vm6, %v4350_v24, %v12368_v41  ;;  %v4145_v47 = vsel %vm4134_vm2, nan, %v4144_v42  ;;  %v4500_v22 = vsub.s32 2, %v14135_v13 }
 0x57d   : > { %v4352_v51 = vsel %vm4345_vm1, %v4348_v5, %v4351_v38  ;;  %v8895_v11 = vmov 65535   ;;  %vm4742_vm3 = vcmask 1045504   ;;  %vm4784_vm7 = vcmask 39936  }
 0x57e   : > { %v4353_v17 = vsel %vm4342_vm15, nan, %v4352_v51  ;;  %v12419_v46 = vrot.slane %v12414_v10, %v4500_v22  ;;  %v4827_v21 = vsel %vm4700_vm12, 4294967295, %v8895_v11  ;;  %vm4793_vm8 = vcmask 80896  }
 0x57f   : > { %v4464_v45 = vpack.c.bf16 %v4353_v17, %v4145_v47  ;;  %v4828_v16 = vsel %vm4826_vm14, %v4827_v21, 0  ;;  %vm4813_vm4 = vcmask 121856   ;;  %vm4897_vm10 = vcmask 64512  }
 0x580   : > { %v4830_v19 = vand.u32 %v8536_v59, %v4828_v16  ;;  %vm14136_vm14 = vcmask 1043456  }
 0x581   : > { %4655 = vmatmul.mubr.bf16.gmra.mrb[28].mxu0 %v4464_v45 }
 0x582   : > { %8024 = vmatprep.subr.bf16.mxu0 %v4830_v19 }
 0x583   : > { %8025 = vmatpush3.bf16.msra.mxu0 %v4830_v19 }
 0x61b   : > { %v7931_v62 = vpop.f32.mrb[16].mxu0 }
 0x61c   : > { %v7932_v61 = vpop.f32.mrb[17].mxu0 }
 0x61d   : > { %v7933_v30 = vadd.f32 %v7932_v61, %v7931_v62  ;;  %v7934_v6 = vpop.f32.mrb[18].mxu0 }
 0x61e   : > { %v7935_v18 = vpop.f32.mrb[19].mxu0 }
 0x61f   : > { %v4633_v50 = vadd.f32 %v7933_v30, %v12419_v46  ;;  %v7936_v41 = vadd.f32 %v7935_v18, %v7934_v6 }
 0x621   : > { %v4636_v27 = vadd.f32 %v7936_v41, %v12419_v46  ;;  %v4672_v12 = vrot.slane %v4633_v50, 7 }
 0x623   : > { %v4673_v48 = vrot.slane %v4636_v27, 7  ;;  %v12432_v60 = vsel %vm4671_vm13, 0.0, %v4672_v12 }
 0x624   : > { %v4701_v36 = vrot.slane %v12432_v60, 1  ;;  %v4743_v63 = vrot.slane %v12432_v60, 2 }
 0x625   : > { %v12424_v55 = vsel %vm4671_vm13, %v4672_v12, %v4673_v48 }
 0x626   : > { %v4744_v31 = vrot.slane %v12424_v55, 2  ;;  %v4702_v52 = vrot.slane %v12424_v55, 1 }
 0x628   : > { %v4745_v7 = vsel %vm4742_vm3, %v4743_v63, %v4744_v31  ;;  %v4703_v23 = vsel %vm4700_vm12, %v4701_v36, %v4702_v52 }
 0x634   : > { %v7937_v43 = vpop.f32.mrb[20].mxu0 }
 0x635   : > { %v7938_v33 = vpop.f32.mrb[21].mxu0 }
 0x636   : > { %v7939_v25 = vadd.f32 %v7938_v33, %v7937_v43  ;;  %v7940_v49 = vpop.f32.mrb[22].mxu0 }
 0x637   : > { %v7941_v9 = vpop.f32.mrb[23].mxu0 }
 0x638   : > { %v4641_v14 = vadd.f32 %v7939_v25, %v12419_v46  ;;  %v7942_v37 = vadd.f32 %v7941_v9, %v7940_v49 }
 0x63a   : > { %v4675_v28 = vrot.slane %v4641_v14, 7  ;;  %v4644_v8 = vadd.f32 %v7942_v37, %v12419_v46 }
 0x63c   : > { %v12438_v2 = vsel %vm4671_vm13, %v4673_v48, %v4675_v28  ;;  %v4677_v29 = vrot.slane %v4644_v8, 7 }
 0x63d   : > { %v4746_v4 = vrot.slane %v12438_v2, 2  ;;  %v4704_v0 = vrot.slane %v12438_v2, 1 }
 0x63e   : > { %v12445_v20 = vsel %vm4671_vm13, %v4675_v28, %v4677_v29 }
 0x63f   : > { %v4747_v35 = vsel %vm4742_vm3, %v4744_v31, %v4746_v4  ;;  %v4705_v53 = vsel %vm4700_vm12, %v4702_v52, %v4704_v0  ;;  %v4706_v40 = vrot.slane %v12445_v20, 1  ;;  %v4748_v17 = vrot.slane %v12445_v20, 2 }
 0x640   : > { %v8335_v44 = vpack.i.bf16 %v4747_v35, %v4745_v7  ;;  %v8330_v26 = vpack.i.bf16 %v4705_v53, %v4703_v23 }
 0x641   : > { %v4707_v51 = vsel %vm4700_vm12, %v4704_v0, %v4706_v40  ;;  %v4749_v30 = vsel %vm4742_vm3, %v4746_v4, %v4748_v17 }
 0x642   : > { %8336 = vrot.lane.b32.xlu1 %v8335_v44, %s8896_s0  ;;  %8331 = vrot.lane.b32.xlu0 %v8330_v26, %s8897_s21 }
 0x645   : > { %v7943_v39 = vpop.f32.mrb[24].mxu0 }
 0x646   : > { %v7944_v34 = vpop.f32.mrb[25].mxu0 }
 0x647   : > { %v7945_v54 = vadd.f32 %v7944_v34, %v7943_v39  ;;  %v7946_v3 = vpop.f32.mrb[26].mxu0 }
 0x648   : > { %v7947_v56 = vpop.f32.mrb[27].mxu0 }
 0x649   : > { %v4649_v32 = vadd.f32 %v7945_v54, %v12419_v46  ;;  %v7948_v15 = vadd.f32 %v7947_v56, %v7946_v3 }
 0x64b   : > { %v4679_v1 = vrot.slane %v4649_v32, 7  ;;  %v4652_v24 = vadd.f32 %v7948_v15, %v12419_v46 }
 0x64d   : > { %v12457_v57 = vsel %vm4671_vm13, %v4677_v29, %v4679_v1  ;;  %v4681_v58 = vrot.slane %v4652_v24, 7 }
 0x64e   : > { %v4708_v42 = vrot.slane %v12457_v57, 1  ;;  %v4750_v5 = vrot.slane %v12457_v57, 2 }
 0x64f   : > { %v12462_v38 = vsel %vm4671_vm13, %v4679_v1, %v4681_v58 }
 0x650   : > { %v4709_v47 = vsel %vm4700_vm12, %v4706_v40, %v4708_v42  ;;  %v4751_v62 = vsel %vm4742_vm3, %v4748_v17, %v4750_v5  ;;  %v4710_v25 = vrot.slane %v12462_v38, 1 }
 0x651   : > { %v8340_v45 = vpack.i.bf16 %v4709_v47, %v4707_v51  ;;  %v8345_v18 = vpack.i.bf16 %v4751_v62, %v4749_v30 }
 0x652   : > { %v4711_v21 = vsel %vm4700_vm12, %v4708_v42, %v4710_v25 }
 0x653   : > { %8341 = vrot.lane.b32.xlu1 %v8340_v45, %s8897_s21 }
 0x654   : > { %v7949_v61 = vpop.f32.mrb[28].mxu0 }
 0x655   : > { %v7950_v6 = vpop.f32.mrb[29].mxu0 }
 0x656   : > { %v7951_v50 = vadd.f32 %v7950_v6, %v7949_v61  ;;  %v7952_v41 = vpop.f32.mrb[30].mxu0 }
 0x657   : > { %v7953_v27 = vpop.f32.mrb[31].mxu0  ;;  %8346 = vrot.lane.b32.xlu1 %v8345_v18, %s8896_s0 }
 0x658   : > { %v4657_v12 = vadd.f32 %v7951_v50, %v12419_v46  ;;  %v7954_v48 = vadd.f32 %v7953_v27, %v7952_v41 }
 0x65a   : > { %v4683_v43 = vrot.slane %v4657_v12, 7  ;;  %v4660_v33 = vadd.f32 %v7954_v48, %v12419_v46  ;;  %v4752_v46 = vrot.slane %v12462_v38, 2 }
 0x65c   : > { %v12475_v49 = vsel %vm4671_vm13, %v4681_v58, %v4683_v43  ;;  %v4685_v9 = vrot.slane %v4660_v33, 7  ;;  %v4753_v52 = vsel %vm4742_vm3, %v4750_v5, %v4752_v46 }
 0x65d   : > { %v4712_v59 = vrot.slane %v12475_v49, 1  ;;  %v4754_v14 = vrot.slane %v12475_v49, 2 }
 0x65e   : > { %v12480_v37 = vsel %vm4671_vm13, %v4683_v43, %v4685_v9  ;;  %v4697_v11 = vsel %vm4671_vm13, %v4685_v9, 0.0 }
 0x65f   : > { %v4713_v16 = vsel %vm4700_vm12, %v4710_v25, %v4712_v59  ;;  %v4716_v8 = vrot.slane %v4697_v11, 1  ;;  %v4755_v19 = vsel %vm4742_vm3, %v4752_v46, %v4754_v14  ;;  %v4714_v31 = vrot.slane %v12480_v37, 1 }
 0x660   : > { %v8350_v28 = vpack.i.bf16 %v4713_v16, %v4711_v21  ;;  %v8355_v29 = vpack.i.bf16 %v4755_v19, %v4753_v52  ;;  %v4758_v36 = vrot.slane %v4697_v11, 2  ;;  %v4756_v0 = vrot.slane %v12480_v37, 2 }
 0x661   : > { %v4715_v63 = vsel %vm4700_vm12, %v4712_v59, %v4714_v31  ;;  %v4717_v4 = vsel %vm4700_vm12, %v4714_v31, %v4716_v8 }
 0x662   : > { %8351 = vrot.lane.b32.xlu1 %v8350_v28, %s8897_s21  ;;  %v8360_v7 = vpack.i.bf16 %v4717_v4, %v4715_v63  ;;  %v4757_v35 = vsel %vm4742_vm3, %v4754_v14, %v4756_v0  ;;  %v4759_v23 = vsel %vm4742_vm3, %v4756_v0, %v4758_v36 }
 0x663   : > { %v8365_v53 = vpack.i.bf16 %v4759_v23, %v4757_v35 }
 0x666   : > { %8356 = vrot.lane.b32.xlu1 %v8355_v29, %s8896_s0 }
 0x66a   : > { %8361 = vrot.lane.b32.xlu1 %v8360_v7, %s8897_s21  ;;  %s14142_s21 = smov 16  }
 0x66e   : > { %8366 = vrot.lane.b32.xlu1 %v8365_v53, %s8896_s0 }
 0x6b4   : > { %v8337_v44 = vpop.permute.xlu1 %8336  ;;  %v8332_v26 = vpop.permute.xlu0 %8331 }
 0x6b5   : > { %v8339_v39 = vunpack.i.h.bf16 %v8337_v44  ;;  %v8338_v34 = vunpack.i.l.bf16 %v8337_v44  ;;  %v8334_v54 = vunpack.i.h.bf16 %v8332_v26  ;;  %v8333_v3 = vunpack.i.l.bf16 %v8332_v26 }
 0x6b7   : > { %v4786_v56 = vsel %vm4784_vm7, %v12424_v55, %v8334_v54  ;;  %v4785_v32 = vsel %vm4784_vm7, %v12432_v60, %v8333_v3 }
 0x6b8   : > { %v4794_v15 = vsel %vm4793_vm8, %v4785_v32, %v8338_v34  ;;  %v4795_v1 = vsel %vm4793_vm8, %v4786_v56, %v8339_v39 }
 0x6b9   : > { %v4802_v24 = vpack.c.bf16 %v4795_v1, %v4794_v15 }
 0x6bb   : > { %8026 = vmatprep.mubr.msk.bf16.mxu0 %vm4813_vm4, %v4802_v24 }
 0x6c5   : > { %v8342_v40 = vpop.permute.xlu1 %8341 }
 0x6c6   : > { %v8344_v58 = vunpack.i.h.bf16 %v8342_v40  ;;  %v8343_v42 = vunpack.i.l.bf16 %v8342_v40 }
 0x6c8   : > { %v4788_v55 = vsel %vm4784_vm7, %v12445_v20, %v8344_v58  ;;  %v4787_v60 = vsel %vm4784_vm7, %v12438_v2, %v8343_v42 }
 0x6c9   : > { %v8347_v5 = vpop.permute.xlu1 %8346 }
 0x6ca   : > { %v8349_v51 = vunpack.i.h.bf16 %v8347_v5  ;;  %v8348_v47 = vunpack.i.l.bf16 %v8347_v5 }
 0x6cc   : > { %v4796_v17 = vsel %vm4793_vm8, %v4787_v60, %v8348_v47  ;;  %v4797_v45 = vsel %vm4793_vm8, %v4788_v55, %v8349_v51 }
 0x6cd   : > { %v4803_v62 = vpack.c.bf16 %v4797_v45, %v4796_v17 }
 0x6cf   : > { %8027 = vmatmul.mubr.msk.bf16.vlgmr.msra.gmra.mrb[32].mxu0 %vm4813_vm4, %v4803_v62 }
 0x6d4   : > { %v8352_v61 = vpop.permute.xlu1 %8351 }
 0x6d5   : > { %v8354_v30 = vunpack.i.h.bf16 %v8352_v61  ;;  %v8353_v6 = vunpack.i.l.bf16 %v8352_v61 }
 0x6d7   : > { %v4790_v27 = vsel %vm4784_vm7, %v12462_v38, %v8354_v30  ;;  %v4789_v20 = vsel %vm4784_vm7, %v12457_v57, %v8353_v6 }
 0x6d8   : > { %v8357_v18 = vpop.permute.xlu1 %8356 }
 0x6d9   : > { %v8359_v50 = vunpack.i.h.bf16 %v8357_v18  ;;  %v8358_v41 = vunpack.i.l.bf16 %v8357_v18 }
 0x6db   : > { %v4798_v2 = vsel %vm4793_vm8, %v4789_v20, %v8358_v41  ;;  %v4799_v12 = vsel %vm4793_vm8, %v4790_v27, %v8359_v50 }
 0x6dc   : > { %v4804_v48 = vpack.c.bf16 %v4799_v12, %v4798_v2  ;;  %v8362_v43 = vpop.permute.xlu1 %8361 }
 0x6dd   : > { %v8364_v33 = vunpack.i.h.bf16 %v8362_v43  ;;  %v8363_v25 = vunpack.i.l.bf16 %v8362_v43 }
 0x6de   : > { %8030 = vmatprep.mubr.msk.bf16.mxu0 %vm4813_vm4, %v4804_v48 }
 0x6df   : > { %v4792_v11 = vsel %vm4784_vm7, %v12480_v37, %v8364_v33  ;;  %v4791_v38 = vsel %vm4784_vm7, %v12475_v49, %v8363_v25  ;;  %vm14137_vm7 = vmmov %vm14136_vm14 }
 0x6e0   : > { %v8367_v9 = vpop.permute.xlu1 %8366 }
 0x6e1   : > { %v8369_v59 = vunpack.i.h.bf16 %v8367_v9  ;;  %v8368_v14 = vunpack.i.l.bf16 %v8367_v9 }
 0x6e3   : > { %v4800_v57 = vsel %vm4793_vm8, %v4791_v38, %v8368_v14  ;;  %v4801_v21 = vsel %vm4793_vm8, %v4792_v11, %v8369_v59  ;;  %vm5361_vm8 = vcmask 130048  }
 0x6e4   : > { %v4805_v16 = vpack.c.bf16 %v4801_v21, %v4800_v57 }
 0x6e6   : > { %8031 = vmatmul.mubr.msk.bf16.gmra.mrb[36].mxu0 %vm4813_vm4, %v4805_v16  ;;  %vm5386_vm4 = vcmask 195584  }
 0x7a2   : > { %v8028_v46 = vpop.f32.mrb[32].mxu0 }
 0x7a3   : > { %v4866_v28 = vpop.f32.mrb[33].mxu0  ;;  %v4904_v8 = vsel %vm4897_vm10, %v8028_v46, 0.0 }
 0x7a4   : > { %v8029_v19 = vpop.f32.mrb[34].mxu0  ;;  %4905 = vadd.xlane.f32.xlu1 %v4904_v8  ;;  %v4898_v37 = vsel %vm4897_vm10, %v4866_v28, 0.0  ;;  %v5017_v8 = vsub.s32 4, %v14135_v13 }
 0x7a5   : > { %v4869_v31 = vpop.f32.mrb[35].mxu0  ;;  %v4907_v49 = vsel %vm4897_vm10, %v8029_v19, 0.0 }
 0x7a6   : > { %v4901_v52 = vsel %vm4897_vm10, %v4869_v31, 0.0 }
 0x7a8   : > { %4899 = vadd.xlane.f32.xlu1 %v4898_v37 }
 0x7ac   : > { %4908 = vadd.xlane.f32.xlu1 %v4907_v49 }
 0x7b0   : > { %4902 = vadd.xlane.f32.xlu1 %v4901_v52 }
 0x7b9   : > { %v8032_v29 = vpop.f32.mrb[36].mxu0 }
 0x7ba   : > { %v4882_v36 = vpop.f32.mrb[37].mxu0  ;;  %v4916_v63 = vsel %vm4897_vm10, %v8032_v29, 0.0 }
 0x7bb   : > { %4917 = vadd.xlane.f32.xlu1 %v4916_v63  ;;  %v8033_v4 = vpop.f32.mrb[38].mxu0  ;;  %v4910_v0 = vsel %vm4897_vm10, %v4882_v36, 0.0 }
 0x7bc   : > { %4911 = vadd.xlane.f32.xlu0 %v4910_v0  ;;  %v4885_v7 = vpop.f32.mrb[39].mxu0  ;;  %v4919_v23 = vsel %vm4897_vm10, %v8033_v4, 0.0 }
 0x7bd   : > { %v4913_v35 = vsel %vm4897_vm10, %v4885_v7, 0.0 }
 0x7bf   : > { %4914 = vadd.xlane.f32.xlu1 %v4913_v35 }
 0x7c3   : > { %4920 = vadd.xlane.f32.xlu1 %v4919_v23 }
 0x831   : > { %v4906_v53 = vpop.xlane.xlu1 %4905 }
 0x832   : > { %v4925_v44 = vmul.f32 0.125, %v4906_v53 }
 0x834   : > { %v4933_v26 = vsub.f32 %v8028_v46, %v4925_v44 }
 0x835   : > { %v4900_v39 = vpop.xlane.xlu1 %4899 }
 0x836   : > { %v4923_v34 = vmul.f32 0.125, %v4900_v39  ;;  %v4941_v54 = vmul.f32 %v4933_v26, %v4933_v26 }
 0x838   : > { %v12534_v3 = vsub.f32 %v4866_v28, %v4923_v34  ;;  %v4953_v56 = vsel %vm4897_vm10, %v4941_v54, 0.0  ;;  %v5005_v28 = vsub.s32 3, %v14135_v13 }
 0x839   : > { %v4909_v32 = vpop.xlane.xlu1 %4908  ;;  %4954 = vadd.xlane.f32.xlu1 %v4953_v56 }
 0x83a   : > { %v4939_v15 = vmul.f32 %v12534_v3, %v12534_v3  ;;  %v4926_v1 = vmul.f32 0.125, %v4909_v32  ;;  %v12575_v37 = vrot.slane %v12414_v10, %v5005_v28 }
 0x83c   : > { %v4947_v24 = vsel %vm4897_vm10, %v4939_v15, 0.0  ;;  %v12540_v42 = vsub.f32 %v8029_v19, %v4926_v1 }
 0x83d   : > { %v4903_v40 = vpop.xlane.xlu1 %4902  ;;  %4948 = vadd.xlane.f32.xlu1 %v4947_v24 }
 0x83e   : > { %v4924_v58 = vmul.f32 0.125, %v4903_v40  ;;  %v4942_v55 = vmul.f32 %v12540_v42, %v12540_v42 }
 0x840   : > { %v12542_v5 = vsub.f32 %v4869_v31, %v4924_v58  ;;  %v4956_v17 = vsel %vm4897_vm10, %v4942_v55, 0.0 }
 0x842   : > { %v4940_v51 = vmul.f32 %v12542_v5, %v12542_v5 }
 0x844   : > { %v4950_v47 = vsel %vm4897_vm10, %v4940_v51, 0.0 }
 0x845   : > { %4951 = vadd.xlane.f32.xlu1 %v4950_v47 }
 0x848   : > { %v4918_v60 = vpop.xlane.xlu1 %4917 }
 0x849   : > { %v4929_v45 = vmul.f32 0.125, %v4918_v60  ;;  %v4912_v62 = vpop.xlane.xlu0 %4911  ;;  %4957 = vadd.xlane.f32.xlu1 %v4956_v17 }
 0x84a   : > { %v4927_v61 = vmul.f32 0.125, %v4912_v62 }
 0x84b   : > { %v12550_v30 = vsub.f32 %v8032_v29, %v4929_v45  ;;  %v12580_v29 = vrot.slane %v12414_v10, %v5017_v8 }
 0x84c   : > { %v12552_v6 = vsub.f32 %v4882_v36, %v4927_v61  ;;  %v4915_v18 = vpop.xlane.xlu1 %4914 }
 0x84d   : > { %v4928_v50 = vmul.f32 0.125, %v4915_v18  ;;  %v4945_v12 = vmul.f32 %v12550_v30, %v12550_v30 }
 0x84e   : > { %v4943_v41 = vmul.f32 %v12552_v6, %v12552_v6 }
 0x84f   : > { %v12556_v27 = vsub.f32 %v4885_v7, %v4928_v50  ;;  %v4965_v9 = vsel %vm4897_vm10, %v4945_v12, 0.0 }
 0x850   : > { %v4921_v20 = vpop.xlane.xlu1 %4920  ;;  %v4959_v2 = vsel %vm4897_vm10, %v4943_v41, 0.0 }
 0x851   : > { %v4930_v48 = vmul.f32 0.125, %v4921_v20  ;;  %4960 = vadd.xlane.f32.xlu0 %v4959_v2  ;;  %v4944_v43 = vmul.f32 %v12556_v27, %v12556_v27 }
 0x853   : > { %v12563_v33 = vsub.f32 %v8033_v4, %v4930_v48  ;;  %v4962_v25 = vsel %vm4897_vm10, %v4944_v43, 0.0 }
 0x854   : > { %4963 = vadd.xlane.f32.xlu1 %v4962_v25 }
 0x855   : > { %4966 = vadd.xlane.f32.xlu0 %v4965_v9  ;;  %v4946_v59 = vmul.f32 %v12563_v33, %v12563_v33 }
 0x857   : > { %v4968_v14 = vsel %vm4897_vm10, %v4946_v59, 0.0 }
 0x858   : > { %4969 = vadd.xlane.f32.xlu1 %v4968_v14 }
 0x8c6   : > { %v4955_v11 = vpop.xlane.xlu1 %4954 }
 0x8c7   : > { %v4973_v38 = vmul.f32 0.125, %v4955_v11 }
 0x8c9   : > { %v4981_v57 = vadd.f32 1e-05, %v4973_v38 }
 0x8ca   : > { %v4949_v21 = vpop.xlane.xlu1 %4948 }
 0x8cb   : > { %8701 = vrsqrt.f32 %v4981_v57  ;;  %v4971_v16 = vmul.f32 0.125, %v4949_v21 }
 0x8cd   : > { %v4979_v46 = vadd.f32 1e-05, %v4971_v16 }
 0x8cf   : > { %8703 = vrsqrt.f32 %v4979_v46 }
 0x8d2   : > { %v4952_v19 = vpop.xlane.xlu1 %4951 }
 0x8d3   : > { %v4972_v31 = vmul.f32 0.125, %v4952_v19 }
 0x8d5   : > { %v8702_v49 = vpop.eup %8701  ;;  %v4980_v52 = vadd.f32 1e-05, %v4972_v31 }
 0x8d6   : > { %v4997_v36 = vmul.f32 %v8702_v49, %v4933_v26  ;;  %v4958_v63 = vpop.xlane.xlu1 %4957 }
 0x8d7   : > { %8705 = vrsqrt.f32 %v4980_v52  ;;  %v4974_v4 = vmul.f32 0.125, %v4958_v63 }
 0x8d8   : > { %v5009_v0 = vmul.f32 %v12575_v37, %v4997_v36 }
 0x8d9   : > { %v8704_v7 = vpop.eup %8703  ;;  %v4982_v35 = vadd.f32 1e-05, %v4974_v4 }
 0x8da   : > { %v5021_v23 = vadd.f32 %v12580_v29, %v5009_v0  ;;  %v4995_v53 = vmul.f32 %v8704_v7, %v12534_v3 }
 0x8db   : > { %8707 = vrsqrt.f32 %v4982_v35 }
 0x8dc   : > { %v12585_v44 = vmul.f32 0.70710677, %v5021_v23  ;;  %v5007_v39 = vmul.f32 %v12575_v37, %v4995_v53  ;;  %v12628_v35 = vmul.f32 0.5, %v5021_v23 }
 0x8de   : > { %v5061_v10 = vand.u32 2147483647, %v12585_v44  ;;  %v12590_v26 = vadd.f32 %v12580_v29, %v5007_v39  ;;  %v4961_v34 = vpop.xlane.xlu0 %4960  ;;  %vm5045_vm0 = vcmp.ge.f32.partialorder %v12585_v44, 0.0 }
 0x8df   : > { %v4975_v54 = vmul.f32 0.125, %v4961_v34 }
 0x8e0   : > { %v5069_v56 = vmul.f32 0.3275911, %v5061_v10  ;;  %v12593_v32 = vmul.f32 0.70710677, %v12590_v26 }
 0x8e1   : > { %v8706_v15 = vpop.eup %8705  ;;  %v4983_v1 = vadd.f32 1e-05, %v4975_v54  ;;  %v4964_v24 = vpop.xlane.xlu1 %4963 }
 0x8e2   : > { %v5077_v3 = vadd.f32 1.0, %v5069_v56  ;;  %v5059_v40 = vand.u32 2147483647, %v12593_v32  ;;  %v4996_v58 = vmul.f32 %v8706_v15, %v12542_v5  ;;  %v4967_v51 = vpop.xlane.xlu0 %4966  ;;  %v4976_v47 = vmul.f32 0.125, %v4964_v24 }
 0x8e3   : > { %8709 = vrsqrt.f32 %v4983_v1  ;;  %v4977_v55 = vmul.f32 0.125, %v4967_v51  ;;  %vm5043_vm11 = vcmp.ge.f32.partialorder %v12593_v32, 0.0 }
 0x8e4   : > { %8711 = vrcp.f32 %v5077_v3  ;;  %v5067_v60 = vmul.f32 0.3275911, %v5059_v40  ;;  %v5008_v45 = vmul.f32 %v12575_v37, %v4996_v58  ;;  %v4984_v62 = vadd.f32 1e-05, %v4976_v47 }
 0x8e5   : > { %v8708_v17 = vpop.eup %8707  ;;  %v4985_v61 = vadd.f32 1e-05, %v4977_v55  ;;  %v4970_v18 = vpop.xlane.xlu1 %4969  ;;  %v5163_v52 = vsub.f32 0.0, %v5059_v40 }
 0x8e6   : > { %v5075_v50 = vadd.f32 1.0, %v5067_v60  ;;  %v4998_v41 = vmul.f32 %v8708_v17, %v12540_v42  ;;  %v12600_v20 = vadd.f32 %v12580_v29, %v5008_v45  ;;  %8713 = vrsqrt.f32 %v4984_v62 }
 0x8e7   : > { %v4978_v5 = vmul.f32 0.125, %v4970_v18  ;;  %v5165_v42 = vsub.f32 0.0, %v5061_v10  ;;  %v5171_v56 = vmul.f32 %v5163_v52, %v5059_v40  ;;  %v8898_v17 = vmov -1.0  }
 0x8e8   : > { %8715 = vrcp.f32 %v5075_v50  ;;  %v5010_v2 = vmul.f32 %v12575_v37, %v4998_v41  ;;  %v12604_v12 = vmul.f32 0.70710677, %v12600_v20  ;;  %v12653_v45 = vsel %vm5045_vm0, 1.0, %v8898_v17 }
 0x8e9   : > { %8717 = vrsqrt.f32 %v4985_v61  ;;  %v4986_v48 = vadd.f32 1e-05, %v4978_v5  ;;  %v5173_v46 = vmul.f32 %v5165_v42, %v5061_v10  ;;  %vm5864_vm0 = vcmask 523264  }
 0x8ea   : > { %v12607_v43 = vadd.f32 %v12580_v29, %v5010_v2  ;;  %v5060_v25 = vand.u32 2147483647, %v12604_v12  ;;  %vm5044_vm5 = vcmp.ge.f32.partialorder %v12604_v12, 0.0 }
 0x8eb   : > { %8719 = vrsqrt.f32 %v4986_v48  ;;  %v5183_v10 = vmul.f32 1.442695, %v5173_v46 }
 0x8ec   : > { %v12611_v9 = vmul.f32 0.70710677, %v12607_v43  ;;  %v5068_v14 = vmul.f32 0.3275911, %v5060_v25  ;;  %v5164_v1 = vsub.f32 0.0, %v5060_v25 }
 0x8ed   : > { %v8710_v59 = vpop.eup %8709 }
 0x8ee   : > { %v12613_v11 = vpop.eup %8711  ;;  %v12616_v38 = vand.u32 2147483647, %v12611_v9  ;;  %v4999_v57 = vmul.f32 %v8710_v59, %v12552_v6  ;;  %v5076_v21 = vadd.f32 1.0, %v5068_v14  ;;  %vm5046_vm9 = vcmp.ge.f32.partialorder %v12611_v9, 0.0 }
 0x8ef   : > { %v5093_v16 = vmul.f32 1.0614054, %v12613_v11 }
 0x8f0   : > { %v5070_v19 = vmul.f32 0.3275911, %v12616_v38  ;;  %v5011_v31 = vmul.f32 %v12575_v37, %v4999_v57  ;;  %v8714_v49 = vpop.eup %8713  ;;  %8721 = vrcp.f32 %v5076_v21  ;;  %v5166_v32 = vsub.f32 0.0, %v12616_v38 }
 0x8f1   : > { %v5101_v36 = vadd.f32 -1.4531521, %v5093_v16  ;;  %v5000_v6 = vmul.f32 %v8714_v49, %v12556_v27 }
 0x8f2   : > { %v12622_v63 = vpop.eup %8715  ;;  %v5078_v4 = vadd.f32 1.0, %v5070_v19  ;;  %v12625_v0 = vadd.f32 %v12580_v29, %v5011_v31 }
 0x8f3   : > { %v8718_v7 = vpop.eup %8717  ;;  %v5091_v53 = vmul.f32 1.0614054, %v12622_v63  ;;  %v5109_v39 = vmul.f32 %v12613_v11, %v5101_v36  ;;  %v5012_v15 = vmul.f32 %v12575_v37, %v5000_v6  ;;  %v5174_v36 = vmul.f32 %v5166_v32, %v12616_v38 }
 0x8f4   : > { %v12634_v34 = vmul.f32 0.70710677, %v12625_v0  ;;  %v5001_v27 = vmul.f32 %v8718_v7, %v12550_v30  ;;  %8723 = vrcp.f32 %v5078_v4  ;;  %v12648_v30 = vmul.f32 0.5, %v12590_v26 }
 0x8f5   : > { %v8720_v54 = vpop.eup %8719  ;;  %v5099_v23 = vadd.f32 -1.4531521, %v5091_v53  ;;  %v12642_v58 = vadd.f32 %v12580_v29, %v5012_v15  ;;  %v5117_v55 = vadd.f32 1.4214138, %v5109_v39  ;;  %v5172_v26 = vmul.f32 %v5164_v1, %v5060_v25 }
 0x8f6   : > { %v5063_v24 = vand.u32 2147483647, %v12634_v34  ;;  %v5002_v3 = vmul.f32 %v8720_v54, %v12563_v33  ;;  %v5013_v51 = vmul.f32 %v12575_v37, %v5001_v27  ;;  %v5179_v33 = vmul.f32 1.442695, %v5171_v56 }
 0x8f7   : > { %v5107_v47 = vmul.f32 %v12622_v63, %v5099_v23  ;;  %v12656_v62 = vmul.f32 0.70710677, %v12642_v58  ;;  %8725 = vpow2.f32 %v5183_v10  ;;  %v5125_v48 = vmul.f32 %v12613_v11, %v5117_v55 }
 0x8f8   : > { %v5071_v40 = vmul.f32 0.3275911, %v5063_v24  ;;  %v5014_v60 = vmul.f32 %v12575_v37, %v5002_v3  ;;  %v12659_v61 = vadd.f32 %v12580_v29, %v5013_v51  ;;  %v12664_v37 = vsel %vm5043_vm11, 1.0, %v8898_v17 }
 0x8f9   : > { %v5115_v44 = vadd.f32 1.4214138, %v5107_v47  ;;  %v12672_v5 = vand.u32 2147483647, %v12656_v62  ;;  %v5181_v14 = vmul.f32 1.442695, %v5172_v26 }
 0x8fa   : > { %v5079_v18 = vadd.f32 1.0, %v5071_v40  ;;  %v12667_v50 = vadd.f32 %v12580_v29, %v5014_v60  ;;  %v12669_v41 = vpop.eup %8721  ;;  %v12675_v2 = vmul.f32 0.70710677, %v12659_v61  ;;  %v5167_v46 = vsub.f32 0.0, %v5063_v24 }
 0x8fb   : > { %v5092_v29 = vmul.f32 1.0614054, %v12669_v41  ;;  %v5072_v42 = vmul.f32 0.3275911, %v12672_v5  ;;  %v5123_v16 = vmul.f32 %v12622_v63, %v5115_v44  ;;  %v5133_v49 = vadd.f32 -0.28449672, %v5125_v48 }
 0x8fc   : > { %8727 = vrcp.f32 %v5079_v18  ;;  %v12680_v25 = vmul.f32 0.70710677, %v12667_v50  ;;  %v5065_v59 = vand.u32 2147483647, %v12675_v2  ;;  %v12696_v53 = vmul.f32 0.5, %v12600_v20 }
 0x8fd   : > { %8729 = vpow2.f32 %v5179_v33  ;;  %v5100_v21 = vadd.f32 -1.4531521, %v5092_v29  ;;  %v5080_v19 = vadd.f32 1.0, %v5072_v42  ;;  %v5131_v7 = vadd.f32 -0.28449672, %v5123_v16 }
 0x8fe   : > { %v12687_v57 = vand.u32 2147483647, %v12680_v25  ;;  %v5073_v31 = vmul.f32 0.3275911, %v5065_v59  ;;  %v12690_v52 = vpop.eup %8723  ;;  %v12699_v39 = vmul.f32 0.5, %v12607_v43  ;;  %v12704_v56 = vsel %vm5044_vm5, 1.0, %v8898_v17 }
 0x8ff   : > { %v5108_v6 = vmul.f32 %v12669_v41, %v5100_v21  ;;  %8731 = vrcp.f32 %v5080_v19  ;;  %v5139_v15 = vmul.f32 %v12622_v63, %v5131_v7  ;;  %v5175_v27 = vmul.f32 %v5167_v46, %v5063_v24 }
 0x900   : > { %v5074_v4 = vmul.f32 0.3275911, %v12687_v57  ;;  %v5081_v10 = vadd.f32 1.0, %v5073_v31  ;;  %8733 = vpow2.f32 %v5181_v14  ;;  %v5141_v23 = vmul.f32 %v12613_v11, %v5133_v49 }
 0x901   : > { %v5116_v38 = vadd.f32 1.4214138, %v5108_v6  ;;  %v5094_v20 = vmul.f32 1.0614054, %v12690_v52  ;;  %v5185_v1 = vmul.f32 1.442695, %v5174_v36  ;;  %v8726_v51 = vpop.eup %8725 }
 0x902   : > { %v5082_v54 = vadd.f32 1.0, %v5074_v4  ;;  %8735 = vrcp.f32 %v5081_v10  ;;  %v5147_v3 = vadd.f32 0.2548296, %v5139_v15  ;;  %vm5047_vm6 = vcmp.ge.f32.partialorder %v12634_v34, 0.0 }
 0x903   : > { %v5124_v43 = vmul.f32 %v12669_v41, %v5116_v38  ;;  %v5149_v12 = vadd.f32 0.2548296, %v5141_v23  ;;  %v5102_v47 = vadd.f32 -1.4531521, %v5094_v20  ;;  %v5168_v24 = vsub.f32 0.0, %v12672_v5 }
 0x904   : > { %8737 = vrcp.f32 %v5082_v54  ;;  %v5155_v60 = vmul.f32 %v12622_v63, %v5147_v3  ;;  %v5187_v26 = vmul.f32 1.442695, %v5175_v27  ;;  %v5169_v32 = vsub.f32 0.0, %v5065_v59 }
 0x905   : > { %v5132_v40 = vadd.f32 -0.28449672, %v5124_v43  ;;  %v5157_v18 = vmul.f32 %v12613_v11, %v5149_v12  ;;  %v5110_v48 = vmul.f32 %v12690_v52, %v5102_v47  ;;  %v12723_v14 = vsel %vm5046_vm9, 1.0, %v8898_v17 }
 0x906   : > { %v12712_v55 = vpop.eup %8727  ;;  %8739 = vpow2.f32 %v5185_v1  ;;  %v5176_v46 = vmul.f32 %v5168_v24, %v12672_v5  ;;  %v12729_v31 = vsel %vm5047_vm6, 1.0, %v8898_v17  ;;  %v5177_v6 = vmul.f32 %v5169_v32, %v5065_v59 }
 0x907   : > { %v8730_v33 = vpop.eup %8729  ;;  %v5095_v44 = vmul.f32 1.0614054, %v12712_v55  ;;  %v5140_v29 = vmul.f32 %v12669_v41, %v5132_v40  ;;  %v5197_v21 = vmul.f32 %v8726_v51, %v5157_v18  ;;  %v5118_v16 = vadd.f32 1.4214138, %v5110_v48 }
 0x908   : > { %v5195_v42 = vmul.f32 %v8730_v33, %v5155_v60  ;;  %8741 = vpow2.f32 %v5187_v26  ;;  %v5170_v34 = vsub.f32 0.0, %v12687_v57  ;;  %v5189_v20 = vmul.f32 1.442695, %v5176_v46 }
 0x909   : > { %v5103_v63 = vadd.f32 -1.4531521, %v5095_v44  ;;  %v5148_v11 = vadd.f32 0.2548296, %v5140_v29  ;;  %v12731_v49 = vpop.eup %8731  ;;  %v5205_v36 = vsub.f32 1.0, %v5197_v21  ;;  %v5126_v4 = vmul.f32 %v12690_v52, %v5118_v16 }
 0x90a   : > { %v5203_v19 = vsub.f32 1.0, %v5195_v42  ;;  %v5096_v10 = vmul.f32 1.0614054, %v12731_v49  ;;  %v8734_v54 = vpop.eup %8733  ;;  %v5191_v47 = vmul.f32 1.442695, %v5177_v6  ;;  %v5178_v60 = vmul.f32 %v5170_v34, %v12687_v57 }
 0x90b   : > { %v5111_v9 = vmul.f32 %v12712_v55, %v5103_v63  ;;  %v5156_v7 = vmul.f32 %v12669_v41, %v5148_v11  ;;  %v5213_v38 = vmul.f32 %v5205_v36, %v12653_v45  ;;  %v5134_v27 = vadd.f32 -0.28449672, %v5126_v4 }
 0x90c   : > { %v5211_v5 = vmul.f32 %v5203_v19, %v12664_v37  ;;  %v12740_v23 = vpop.eup %8735  ;;  %v5104_v3 = vadd.f32 -1.4531521, %v5096_v10  ;;  %8743 = vpow2.f32 %v5189_v20  ;;  %v5193_v19 = vmul.f32 1.442695, %v5178_v60 }
 0x90d   : > { %v5119_v15 = vadd.f32 1.4214138, %v5111_v9  ;;  %v5196_v1 = vmul.f32 %v8734_v54, %v5156_v7  ;;  %v5221_v59 = vadd.f32 1.0, %v5213_v38  ;;  %v5142_v37 = vmul.f32 %v12690_v52, %v5134_v27 }
 0x90e   : > { %v5219_v43 = vadd.f32 1.0, %v5211_v5  ;;  %v5097_v51 = vmul.f32 1.0614054, %v12740_v23  ;;  %v12745_v12 = vpop.eup %8737  ;;  %v5112_v40 = vmul.f32 %v12731_v49, %v5104_v3  ;;  %vm5048_vm1 = vcmp.ge.f32.partialorder %v12656_v62, 0.0 }
 0x90f   : > { %v5127_v41 = vmul.f32 %v12712_v55, %v5119_v15  ;;  %v5204_v24 = vsub.f32 1.0, %v5196_v1  ;;  %v5150_v26 = vadd.f32 0.2548296, %v5142_v37  ;;  %v5098_v29 = vmul.f32 1.0614054, %v12745_v12 }
 0x910   : > { %v5227_v45 = vmul.f32 %v5219_v43, %v12648_v30  ;;  %v5105_v18 = vadd.f32 -1.4531521, %v5097_v51  ;;  %v5120_v32 = vadd.f32 1.4214138, %v5112_v40  ;;  %v8740_v42 = vpop.eup %8739  ;;  %v12753_v21 = vmul.f32 %v5221_v59, %v12628_v35 }
 0x911   : > { %v5135_v33 = vadd.f32 -0.28449672, %v5127_v41  ;;  %v5212_v44 = vmul.f32 %v5204_v24, %v12704_v56  ;;  %v5158_v30 = vmul.f32 %v12690_v52, %v5150_v26  ;;  %v5106_v11 = vadd.f32 -1.4531521, %v5098_v29 }
 0x912   : > { %v5243_v48 = vrot.slane %v5227_v45, 7  ;;  %v5113_v16 = vmul.f32 %v12740_v23, %v5105_v18  ;;  %v5128_v46 = vmul.f32 %v12731_v49, %v5120_v32  ;;  %v8742_v56 = vpop.eup %8741  ;;  %8745 = vpow2.f32 %v5191_v47 }
 0x913   : > { %v5143_v63 = vmul.f32 %v12712_v55, %v5135_v33  ;;  %v5220_v57 = vadd.f32 1.0, %v5212_v44  ;;  %v5198_v4 = vmul.f32 %v8740_v42, %v5158_v30  ;;  %v5114_v52 = vmul.f32 %v12745_v12, %v5106_v11 }
 0x914   : > { %v12760_v36 = vsel %vm4671_vm13, 0.0, %v5243_v48  ;;  %v5121_v6 = vadd.f32 1.4214138, %v5113_v16  ;;  %v5136_v7 = vadd.f32 -0.28449672, %v5128_v46  ;;  %v5246_v5 = vrot.slane %v12753_v21, 7 }
 0x915   : > { %v5151_v9 = vadd.f32 0.2548296, %v5143_v63  ;;  %v5228_v35 = vmul.f32 %v5220_v57, %v12696_v53  ;;  %v5206_v54 = vsub.f32 1.0, %v5198_v4  ;;  %v5312_v38 = vrot.slane %v12760_v36, 2 }
 0x916   : > { %v5129_v15 = vmul.f32 %v12740_v23, %v5121_v6  ;;  %v5144_v27 = vmul.f32 %v12731_v49, %v5136_v7  ;;  %v5271_v53 = vrot.slane %v12760_v36, 1  ;;  %v5122_v43 = vadd.f32 1.4214138, %v5114_v52 }
 0x917   : > { %v5159_v10 = vmul.f32 %v12712_v55, %v5151_v9  ;;  %v5244_v34 = vrot.slane %v5228_v35, 7  ;;  %v5214_v1 = vmul.f32 %v5206_v54, %v12723_v14  ;;  %8747 = vpow2.f32 %v5193_v19  ;;  %v8537_v19 = vld [vmem:[%s13552_s6] sm:$0xff]  }
 0x918   : > { %v5137_v55 = vadd.f32 -0.28449672, %v5129_v15  ;;  %v5152_v41 = vadd.f32 0.2548296, %v5144_v27  ;;  %v5130_v30 = vmul.f32 %v12745_v12, %v5122_v43  ;;  %v5031_v16 = vmul.f32 0.5, %v12625_v0  ;;  %8034 = vmatprep.subr.bf16.mxu0 %v8537_v19 }
 0x919   : > { %v5199_v20 = vmul.f32 %v8742_v56, %v5159_v10  ;;  %v12773_v3 = vsel %vm4671_vm13, %v5243_v48, %v5244_v34  ;;  %v12776_v59 = vsel %vm4671_vm13, %v5244_v34, %v5246_v5  ;;  %v5222_v40 = vadd.f32 1.0, %v5214_v1  ;;  %v8744_v48 = vpop.eup %8743  ;;  %8035 = vmatpush3.bf16.msra.mxu0 %v8537_v19 }
 0x91a   : > { %v5313_v37 = vrot.slane %v12773_v3, 2  ;;  %v5315_v51 = vrot.slane %v12776_v59, 2  ;;  %v5272_v47 = vrot.slane %v12773_v3, 1  ;;  %v5274_v24 = vrot.slane %v12776_v59, 1 }
 0x91b   : > { %v5207_v45 = vsub.f32 1.0, %v5199_v20  ;;  %v5145_v14 = vmul.f32 %v12740_v23, %v5137_v55  ;;  %v5160_v60 = vmul.f32 %v12731_v49, %v5152_v41  ;;  %v5230_v21 = vmul.f32 %v5222_v40, %v12699_v39  ;;  %v8538_v40 = vld [vmem:[%s13552_s6 + $0x8] ss:$0 sps:$4 sm:$0xff]  }
 0x91c   : > { %v5314_v33 = vsel %vm4742_vm3, %v5312_v38, %v5313_v37  ;;  %v5316_v26 = vsel %vm4742_vm3, %v5313_v37, %v5315_v51  ;;  %v5273_v18 = vsel %vm4700_vm12, %v5271_v53, %v5272_v47  ;;  %v5275_v44 = vsel %vm4700_vm12, %v5272_v47, %v5274_v24  ;;  %v8746_v11 = vpop.eup %8745  ;;  %8176 = vmatprep.subr.msk.bf16.mxu0 %vm14136_vm14, %v8538_v40 }
 0x91d   : > { %v8375_v32 = vpack.i.bf16 %v5316_v26, %v5314_v33  ;;  %v8370_v29 = vpack.i.bf16 %v5275_v44, %v5273_v18  ;;  %v5215_v42 = vmul.f32 %v5207_v45, %v12729_v31  ;;  %v5153_v63 = vadd.f32 0.2548296, %v5145_v14 }
 0x91e   : > { %v5200_v49 = vmul.f32 %v8744_v48, %v5160_v60  ;;  %v5248_v46 = vrot.slane %v5230_v21, 7  ;;  %v5138_v39 = vadd.f32 -0.28449672, %v5130_v30  ;;  %vm5049_vm2 = vcmp.ge.f32.partialorder %v12675_v2, 0.0 }
 0x91f   : > { %8376 = vrot.lane.b32.xlu1 %v8375_v32, %s13775_s24  ;;  %8371 = vrot.lane.b32.xlu0 %v8370_v29, %s8900_s3  ;;  %v5223_v57 = vadd.f32 1.0, %v5215_v42  ;;  %v5161_v31 = vmul.f32 %v12740_v23, %v5153_v63  ;;  %v5056_v4 = vsel %vm5048_vm1, 1.0, %v8898_v17  ;;  %v5032_v10 = vmul.f32 0.5, %v12642_v58 }
 0x920   : > { %v5208_v56 = vsub.f32 1.0, %v5200_v49  ;;  %v12802_v9 = vsel %vm4671_vm13, %v5246_v5, %v5248_v46  ;;  %v5146_v52 = vmul.f32 %v12745_v12, %v5138_v39  ;;  %v5057_v2 = vsel %vm5049_vm2, 1.0, %v8898_v17 }
 0x921   : > { %v5231_v0 = vmul.f32 %v5223_v57, %v5031_v16  ;;  %v5276_v35 = vrot.slane %v12802_v9, 1  ;;  %v5201_v6 = vmul.f32 %v8746_v11, %v5161_v31  ;;  %v5317_v38 = vrot.slane %v12802_v9, 2  ;;  %v8748_v43 = vpop.eup %8747 }
 0x922   : > { %v5216_v23 = vmul.f32 %v5208_v56, %v5056_v4  ;;  %v5154_v15 = vadd.f32 0.2548296, %v5146_v52  ;;  %v5033_v55 = vmul.f32 0.5, %v12659_v61  ;;  %vm5050_vm15 = vcmp.ge.f32.partialorder %v12680_v25, 0.0 }
 0x923   : > { %v5250_v7 = vrot.slane %v5231_v0, 7  ;;  %v5209_v54 = vsub.f32 1.0, %v5201_v6  ;;  %v5277_v62 = vsel %vm4700_vm12, %v5274_v24, %v5276_v35  ;;  %v5318_v14 = vsel %vm4742_vm3, %v5315_v51, %v5317_v38 }
 0x924   : > { %v5224_v5 = vadd.f32 1.0, %v5216_v23  ;;  %v5162_v58 = vmul.f32 %v12745_v12, %v5154_v15  ;;  %v5400_v26 = vsel %vm14137_vm7, %v8538_v40, 0  ;;  %v5058_v44 = vsel %vm5050_vm15, 1.0, %v8898_v17 }
 0x925   : > { %v12812_v34 = vsel %vm4671_vm13, %v5248_v46, %v5250_v7  ;;  %v5217_v20 = vmul.f32 %v5209_v54, %v5057_v2  ;;  %8037 = vmatpush3.bf16.msra.mxu0 %v5400_v26  ;;  %v5034_v42 = vmul.f32 0.5, %v12667_v50  ;;  %vm5986_vm7 = vcmask 261120  }
 0x926   : > { %v5278_v27 = vrot.slane %v12812_v34, 1  ;;  %v5319_v53 = vrot.slane %v12812_v34, 2  ;;  %v5232_v1 = vmul.f32 %v5224_v5, %v5032_v10  ;;  %v5202_v24 = vmul.f32 %v8748_v43, %v5162_v58 }
 0x927   : > { %v5225_v37 = vadd.f32 1.0, %v5217_v20 }
 0x928   : > { %v5279_v41 = vsel %vm4700_vm12, %v5276_v35, %v5278_v27  ;;  %v5252_v47 = vrot.slane %v5232_v1, 7  ;;  %v5320_v12 = vsel %vm4742_vm3, %v5317_v38, %v5319_v53  ;;  %v5210_v25 = vsub.f32 1.0, %v5202_v24 }
 0x929   : > { %v8380_v45 = vpack.i.bf16 %v5279_v41, %v5277_v62  ;;  %v5233_v60 = vmul.f32 %v5225_v37, %v5033_v55  ;;  %v8385_v51 = vpack.i.bf16 %v5320_v12, %v5318_v14 }
 0x92a   : > { %v12830_v61 = vsel %vm4671_vm13, %v5250_v7, %v5252_v47  ;;  %v5218_v48 = vmul.f32 %v5210_v25, %v5058_v44 }
 0x92b   : > { %8381 = vrot.lane.b32.xlu1 %v8380_v45, %s8900_s3  ;;  %v5280_v33 = vrot.slane %v12830_v61, 1  ;;  %v5254_v18 = vrot.slane %v5233_v60, 7  ;;  %v5321_v29 = vrot.slane %v12830_v61, 2 }
 0x92c   : > { %v5226_v30 = vadd.f32 1.0, %v5218_v48 }
 0x92d   : > { %v12838_v32 = vsel %vm4671_vm13, %v5252_v47, %v5254_v18  ;;  %v5281_v21 = vsel %vm4700_vm12, %v5278_v27, %v5280_v33  ;;  %v5322_v11 = vsel %vm4742_vm3, %v5319_v53, %v5321_v29 }
 0x92e   : > { %v5282_v63 = vrot.slane %v12838_v32, 1  ;;  %v5323_v49 = vrot.slane %v12838_v32, 2  ;;  %v5234_v57 = vmul.f32 %v5226_v30, %v5034_v42 }
 0x92f   : > { %8386 = vrot.lane.b32.xlu1 %v8385_v51, %s13775_s24 }
 0x930   : > { %v5283_v16 = vsel %vm4700_vm12, %v5280_v33, %v5282_v63  ;;  %v5324_v31 = vsel %vm4742_vm3, %v5321_v29, %v5323_v49  ;;  %v5256_v56 = vrot.slane %v5234_v57, 7 }
 0x931   : > { %v8390_v46 = vpack.i.bf16 %v5283_v16, %v5281_v21  ;;  %v8400_v50 = vpack.i.bf16 %v5324_v31, %v5322_v11 }
 0x932   : > { %v5257_v39 = vsel %vm4671_vm13, %v5254_v18, %v5256_v56  ;;  %v5268_v19 = vsel %vm4671_vm13, %v5256_v56, 0.0 }
 0x933   : > { %8391 = vrot.lane.b32.xlu0 %v8390_v46, %s8900_s3  ;;  %v5284_v0 = vrot.slane %v5257_v39, 1  ;;  %v5286_v4 = vrot.slane %v5268_v19, 1  ;;  %v5325_v35 = vrot.slane %v5257_v39, 2  ;;  %v5327_v6 = vrot.slane %v5268_v19, 2 }
 0x935   : > { %v5285_v23 = vsel %vm4700_vm12, %v5282_v63, %v5284_v0  ;;  %v5287_v7 = vsel %vm4700_vm12, %v5284_v0, %v5286_v4  ;;  %v5326_v10 = vsel %vm4742_vm3, %v5323_v49, %v5325_v35  ;;  %v5328_v2 = vsel %vm4742_vm3, %v5325_v35, %v5327_v6 }
 0x936   : > { %v8395_v52 = vpack.i.bf16 %v5287_v7, %v5285_v23  ;;  %v8405_v54 = vpack.i.bf16 %v5328_v2, %v5326_v10 }
 0x937   : > { %8401 = vrot.lane.b32.xlu0 %v8400_v50, %s13775_s24 }
 0x938   : > { %8396 = vrot.lane.b32.xlu1 %v8395_v52, %s8900_s3 }
 0x93c   : > { %8406 = vrot.lane.b32.xlu1 %v8405_v54, %s13775_s24 }
 0x991   : > { %v8372_v5 = vpop.permute.xlu0 %8371  ;;  %v8377_v62 = vpop.permute.xlu1 %8376 }
 0x992   : > { %v8374_v38 = vunpack.i.h.bf16 %v8372_v5  ;;  %v8373_v15 = vunpack.i.l.bf16 %v8372_v5  ;;  %v8379_v27 = vunpack.i.h.bf16 %v8377_v62  ;;  %v8378_v53 = vunpack.i.l.bf16 %v8377_v62 }
 0x994   : > { %v5354_v20 = vsel %vm4897_vm10, %v12773_v3, %v8374_v38  ;;  %v5353_v1 = vsel %vm4897_vm10, %v12760_v36, %v8373_v15 }
 0x995   : > { %v5363_v58 = vsel %vm5361_vm8, %v5354_v20, %v8379_v27  ;;  %v5362_v43 = vsel %vm5361_vm8, %v5353_v1, %v8378_v53 }
 0x996   : > { %v5370_v55 = vpack.c.bf16 %v5363_v58, %v5362_v43 }
 0x998   : > { %8038 = vmatprep.mubr.msk.bf16.mxu0 %vm5386_vm4, %v5370_v55 }
 0x99d   : > { %v8382_v41 = vpop.permute.xlu1 %8381 }
 0x99e   : > { %v8384_v37 = vunpack.i.h.bf16 %v8382_v41  ;;  %v8383_v47 = vunpack.i.l.bf16 %v8382_v41 }
 0x9a0   : > { %v5356_v3 = vsel %vm4897_vm10, %v12802_v9, %v8384_v37  ;;  %v5355_v36 = vsel %vm4897_vm10, %v12776_v59, %v8383_v47 }
 0x9a1   : > { %v8387_v45 = vpop.permute.xlu1 %8386 }
 0x9a2   : > { %v8389_v24 = vunpack.i.h.bf16 %v8387_v45  ;;  %v8388_v40 = vunpack.i.l.bf16 %v8387_v45 }
 0x9a4   : > { %v5364_v14 = vsel %vm5361_vm8, %v5355_v36, %v8388_v40  ;;  %v5365_v12 = vsel %vm5361_vm8, %v5356_v3, %v8389_v24 }
 0x9a5   : > { %v5371_v60 = vpack.c.bf16 %v5365_v12, %v5364_v14  ;;  %v8392_v33 = vpop.permute.xlu0 %8391 }
 0x9a6   : > { %v8394_v25 = vunpack.i.h.bf16 %v8392_v33  ;;  %v8393_v26 = vunpack.i.l.bf16 %v8392_v33 }
 0x9a7   : > { %8039 = vmatmul.mubr.msk.bf16.vlgmr.msra.gmra.mrb[40].mxu0 %vm5386_vm4, %v5371_v60 }
 0x9a8   : > { %v5358_v48 = vsel %vm4897_vm10, %v12830_v61, %v8394_v25  ;;  %v5357_v9 = vsel %vm4897_vm10, %v12812_v34, %v8393_v26 }
 0x9a9   : > { %v8402_v18 = vpop.permute.xlu0 %8401 }
 0x9aa   : > { %v8404_v44 = vunpack.i.h.bf16 %v8402_v18  ;;  %v8403_v51 = vunpack.i.l.bf16 %v8402_v18  ;;  %v8397_v42 = vpop.permute.xlu1 %8396 }
 0x9ab   : > { %v8399_v63 = vunpack.i.h.bf16 %v8397_v42  ;;  %v8398_v49 = vunpack.i.l.bf16 %v8397_v42 }
 0x9ac   : > { %v5366_v59 = vsel %vm5361_vm8, %v5357_v9, %v8403_v51  ;;  %v5367_v29 = vsel %vm5361_vm8, %v5358_v48, %v8404_v44 }
 0x9ad   : > { %v5372_v21 = vpack.c.bf16 %v5367_v29, %v5366_v59  ;;  %v5360_v46 = vsel %vm4897_vm10, %v5257_v39, %v8399_v63  ;;  %v5359_v61 = vsel %vm4897_vm10, %v12838_v32, %v8398_v49 }
 0x9ae   : > { %v8407_v30 = vpop.permute.xlu1 %8406 }
 0x9af   : > { %8042 = vmatprep.mubr.msk.bf16.mxu0 %vm5386_vm4, %v5372_v21  ;;  %v8409_v16 = vunpack.i.h.bf16 %v8407_v30  ;;  %v8408_v57 = vunpack.i.l.bf16 %v8407_v30 }
 0x9b1   : > { %v5368_v34 = vsel %vm5361_vm8, %v5359_v61, %v8408_v57  ;;  %v5369_v11 = vsel %vm5361_vm8, %v5360_v46, %v8409_v16 }
 0x9b2   : > { %v5373_v31 = vpack.c.bf16 %v5369_v11, %v5368_v34  ;;  %v8539_v34 = vld [vmem:[%s13553_s7] sm:$0xff]  }
 0x9b3   : > { %8054 = vmatprep.mubr.msk.bf16.mxu1 %vm5864_vm0, %v8539_v34 }
 0x9b4   : > { %8043 = vmatmul.mubr.msk.bf16.gmra.mrb[44].mxu0 %vm5386_vm4, %v5373_v31  ;;  %vm6017_vm4 = vcmask 392192  }
 0xa7a   : > { %v8040_v56 = vpop.f32.mrb[40].mxu0 }
 0xa7b   : > { %v5436_v50 = vpop.f32.mrb[41].mxu0  ;;  %v5473_v39 = vsel %vm5361_vm8, %v8040_v56, 0.0 }
 0xa7c   : > { %v8041_v19 = vpop.f32.mrb[42].mxu0  ;;  %v5467_v0 = vsel %vm5361_vm8, %v5436_v50, 0.0 }
 0xa7d   : > { %5468 = vadd.xlane.f32.xlu0 %v5467_v0  ;;  %v5439_v4 = vpop.f32.mrb[43].mxu0  ;;  %v5476_v32 = vsel %vm5361_vm8, %v8041_v19, 0.0 }
 0xa7e   : > { %v5470_v35 = vsel %vm5361_vm8, %v5439_v4, 0.0 }
 0xa7f   : > { %5471 = vadd.xlane.f32.xlu1 %v5470_v35 }
 0xa81   : > { %5474 = vadd.xlane.f32.xlu0 %v5473_v39 }
 0xa85   : > { %5477 = vadd.xlane.f32.xlu0 %v5476_v32 }
 0xa87   : > { %v8044_v6 = vpop.f32.mrb[44].mxu0 }
 0xa88   : > { %v5452_v23 = vpop.f32.mrb[45].mxu0  ;;  %v5485_v54 = vsel %vm5361_vm8, %v8044_v6, 0.0 }
 0xa89   : > { %v8045_v7 = vpop.f32.mrb[46].mxu0  ;;  %v5479_v52 = vsel %vm5361_vm8, %v5452_v23, 0.0 }
 0xa8a   : > { %v5455_v10 = vpop.f32.mrb[47].mxu0  ;;  %5480 = vadd.xlane.f32.xlu0 %v5479_v52  ;;  %v5488_v5 = vsel %vm5361_vm8, %v8045_v7, 0.0  ;;  %v5586_v52 = vsub.s32 6, %v14135_v13 }
 0xa8b   : > { %v5482_v2 = vsel %vm5361_vm8, %v5455_v10, 0.0 }
 0xa8c   : > { %5483 = vadd.xlane.f32.xlu1 %v5482_v2 }
 0xa8e   : > { %5486 = vadd.xlane.f32.xlu0 %v5485_v54 }
 0xa90   : > { %5489 = vadd.xlane.f32.xlu1 %v5488_v5 }
 0xb0a   : > { %v5469_v62 = vpop.xlane.xlu0 %5468 }
 0xb0b   : > { %v5492_v15 = vmul.f32 0.0625, %v5469_v62 }
 0xb0c   : > { %v5472_v38 = vpop.xlane.xlu1 %5471 }
 0xb0d   : > { %v5493_v27 = vmul.f32 0.0625, %v5472_v38  ;;  %v12896_v58 = vsub.f32 %v5436_v50, %v5492_v15 }
 0xb0e   : > { %v5475_v53 = vpop.xlane.xlu0 %5474 }
 0xb0f   : > { %v12894_v20 = vsub.f32 %v5439_v4, %v5493_v27  ;;  %v5494_v1 = vmul.f32 0.0625, %v5475_v53  ;;  %v5508_v3 = vmul.f32 %v12896_v58, %v12896_v58 }
 0xb11   : > { %v12898_v43 = vsub.f32 %v8040_v56, %v5494_v1  ;;  %v5509_v55 = vmul.f32 %v12894_v20, %v12894_v20  ;;  %v5516_v14 = vsel %vm5361_vm8, %v5508_v3, 0.0 }
 0xb12   : > { %v5478_v41 = vpop.xlane.xlu0 %5477 }
 0xb13   : > { %v5495_v37 = vmul.f32 0.0625, %v5478_v41  ;;  %v5519_v47 = vsel %vm5361_vm8, %v5509_v55, 0.0  ;;  %v5510_v45 = vmul.f32 %v12898_v43, %v12898_v43 }
 0xb14   : > { %5520 = vadd.xlane.f32.xlu1 %v5519_v47 }
 0xb15   : > { %v12905_v24 = vsub.f32 %v8041_v19, %v5495_v37  ;;  %v5522_v40 = vsel %vm5361_vm8, %v5510_v45, 0.0 }
 0xb16   : > { %5523 = vadd.xlane.f32.xlu0 %v5522_v40 }
 0xb17   : > { %v5511_v36 = vmul.f32 %v12905_v24, %v12905_v24  ;;  %v5481_v60 = vpop.xlane.xlu0 %5480 }
 0xb18   : > { %v5496_v33 = vmul.f32 0.0625, %v5481_v60 }
 0xb19   : > { %v5525_v12 = vsel %vm5361_vm8, %v5511_v36, 0.0  ;;  %v5484_v25 = vpop.xlane.xlu1 %5483 }
 0xb1a   : > { %5517 = vadd.xlane.f32.xlu0 %v5516_v14  ;;  %5526 = vadd.xlane.f32.xlu1 %v5525_v12  ;;  %v5497_v26 = vmul.f32 0.0625, %v5484_v25  ;;  %v12914_v18 = vsub.f32 %v5452_v23, %v5496_v33 }
 0xb1b   : > { %v5487_v44 = vpop.xlane.xlu0 %5486 }
 0xb1c   : > { %v12916_v51 = vsub.f32 %v5455_v10, %v5497_v26  ;;  %v5498_v48 = vmul.f32 0.0625, %v5487_v44  ;;  %v5512_v9 = vmul.f32 %v12914_v18, %v12914_v18  ;;  %v12943_v10 = vld [vmem:[%s13786_s30] sm:$0xff] }
 0xb1d   : > { %v5490_v59 = vpop.xlane.xlu1 %5489  ;;  %v12954_v15 = vrot.slane %v12943_v10, %v5586_v52 }
 0xb1e   : > { %v5499_v29 = vmul.f32 0.0625, %v5490_v59  ;;  %v12920_v42 = vsub.f32 %v8044_v6, %v5498_v48  ;;  %v5528_v21 = vsel %vm5361_vm8, %v5512_v9, 0.0  ;;  %v5513_v63 = vmul.f32 %v12916_v51, %v12916_v51 }
 0xb1f   : > { %5529 = vadd.xlane.f32.xlu0 %v5528_v21 }
 0xb20   : > { %v12925_v49 = vsub.f32 %v8045_v7, %v5499_v29  ;;  %v5531_v30 = vsel %vm5361_vm8, %v5513_v63, 0.0  ;;  %v5514_v16 = vmul.f32 %v12920_v42, %v12920_v42  ;;  %v5574_v7 = vsub.s32 5, %v14135_v13 }
 0xb21   : > { %5532 = vadd.xlane.f32.xlu1 %v5531_v30 }
 0xb22   : > { %v5534_v57 = vsel %vm5361_vm8, %v5514_v16, 0.0  ;;  %v5515_v46 = vmul.f32 %v12925_v49, %v12925_v49  ;;  %v12948_v2 = vrot.slane %v12943_v10, %v5574_v7 }
 0xb23   : > { %5535 = vadd.xlane.f32.xlu0 %v5534_v57 }
 0xb24   : > { %v5537_v61 = vsel %vm5361_vm8, %v5515_v46, 0.0 }
 0xb25   : > { %5538 = vadd.xlane.f32.xlu1 %v5537_v61 }
 0xba1   : > { %v5521_v11 = vpop.xlane.xlu1 %5520 }
 0xba2   : > { %v5541_v31 = vmul.f32 0.0625, %v5521_v11 }
 0xba3   : > { %v5524_v56 = vpop.xlane.xlu0 %5523 }
 0xba4   : > { %v5549_v50 = vadd.f32 1e-05, %v5541_v31  ;;  %v5542_v19 = vmul.f32 0.0625, %v5524_v56 }
 0xba6   : > { %8749 = vrsqrt.f32 %v5549_v50  ;;  %v5550_v0 = vadd.f32 1e-05, %v5542_v19 }
 0xba7   : > { %v5518_v4 = vpop.xlane.xlu0 %5517  ;;  %v5527_v35 = vpop.xlane.xlu1 %5526 }
 0xba8   : > { %8751 = vrsqrt.f32 %v5550_v0  ;;  %v5540_v39 = vmul.f32 0.0625, %v5518_v4  ;;  %v5543_v32 = vmul.f32 0.0625, %v5527_v35 }
 0xbaa   : > { %v5548_v6 = vadd.f32 1e-05, %v5540_v39  ;;  %v5551_v23 = vadd.f32 1e-05, %v5543_v32 }
 0xbac   : > { %8753 = vrsqrt.f32 %v5548_v6  ;;  %v5530_v54 = vpop.xlane.xlu0 %5529 }
 0xbad   : > { %8755 = vrsqrt.f32 %v5551_v23  ;;  %v5544_v62 = vmul.f32 0.0625, %v5530_v54 }
 0xbae   : > { %v5533_v27 = vpop.xlane.xlu1 %5532 }
 0xbaf   : > { %v5552_v1 = vadd.f32 1e-05, %v5544_v62  ;;  %v5545_v55 = vmul.f32 0.0625, %v5533_v27 }
 0xbb0   : > { %v8750_v5 = vpop.eup %8749  ;;  %v5536_v37 = vpop.xlane.xlu0 %5535 }
 0xbb1   : > { %v5565_v38 = vmul.f32 %v8750_v5, %v12894_v20  ;;  %8757 = vrsqrt.f32 %v5552_v1  ;;  %v5553_v45 = vadd.f32 1e-05, %v5545_v55  ;;  %v5546_v40 = vmul.f32 0.0625, %v5536_v37 }
 0xbb2   : > { %v8752_v53 = vpop.eup %8751  ;;  %v5539_v20 = vpop.xlane.xlu1 %5538 }
 0xbb3   : > { %v5566_v41 = vmul.f32 %v8752_v53, %v12898_v43  ;;  %v5577_v47 = vmul.f32 %v12948_v2, %v5565_v38  ;;  %8759 = vrsqrt.f32 %v5553_v45  ;;  %v5554_v12 = vadd.f32 1e-05, %v5546_v40 }
 0xbb4   : > { %v5547_v43 = vmul.f32 0.0625, %v5539_v20 }
 0xbb5   : > { %v5578_v3 = vmul.f32 %v12948_v2, %v5566_v41  ;;  %v5589_v36 = vadd.f32 %v12954_v15, %v5577_v47  ;;  %8761 = vrsqrt.f32 %v5554_v12 }
 0xbb6   : > { %v8754_v14 = vpop.eup %8753  ;;  %v5555_v63 = vadd.f32 1e-05, %v5547_v43 }
 0xbb7   : > { %v8756_v60 = vpop.eup %8755  ;;  %v5590_v33 = vadd.f32 %v12954_v15, %v5578_v3  ;;  %v5564_v25 = vmul.f32 %v8754_v14, %v12896_v58  ;;  %v5605_v26 = vmul.f32 0.70710677, %v5589_v36 }
 0xbb8   : > { %v5567_v44 = vmul.f32 %v8756_v60, %v12905_v24  ;;  %8763 = vrsqrt.f32 %v5555_v63 }
 0xbb9   : > { %v5606_v48 = vmul.f32 0.70710677, %v5590_v33  ;;  %v5576_v9 = vmul.f32 %v12948_v2, %v5564_v25  ;;  %v5629_v59 = vand.u32 2147483647, %v5605_v26  ;;  %vm5613_vm11 = vcmp.ge.f32.partialorder %v5605_v26, 0.0 }
 0xbba   : > { %v5579_v29 = vmul.f32 %v12948_v2, %v5567_v44  ;;  %v12991_v37 = vmul.f32 0.5, %v5590_v33  ;;  %v12997_v14 = vsel %vm5613_vm11, 1.0, %v8898_v17  ;;  %vm8902_vm11 = vmmov 0  }
 0xbbb   : > { %v5630_v21 = vand.u32 2147483647, %v5606_v48  ;;  %v5588_v30 = vadd.f32 %v12954_v15, %v5576_v9  ;;  %v5637_v16 = vmul.f32 0.3275911, %v5629_v59  ;;  %v8758_v61 = vpop.eup %8757  ;;  %v5733_v50 = vsub.f32 0.0, %v5629_v59 }
 0xbbc   : > { %v5591_v57 = vadd.f32 %v12954_v15, %v5579_v29  ;;  %v5568_v24 = vmul.f32 %v8758_v61, %v12914_v18  ;;  %vm5614_vm5 = vcmp.ge.f32.partialorder %v5606_v48, 0.0 }
 0xbbd   : > { %v5638_v46 = vmul.f32 0.3275911, %v5630_v21  ;;  %v5604_v58 = vmul.f32 0.70710677, %v5588_v30  ;;  %v5645_v34 = vadd.f32 1.0, %v5637_v16  ;;  %v8760_v31 = vpop.eup %8759  ;;  %v5734_v32 = vsub.f32 0.0, %v5630_v21 }
 0xbbe   : > { %v12968_v19 = vmul.f32 0.70710677, %v5591_v57  ;;  %v5580_v0 = vmul.f32 %v12948_v2, %v5568_v24  ;;  %v5569_v4 = vmul.f32 %v8760_v31, %v12916_v51  ;;  %v5741_v54 = vmul.f32 %v5733_v50, %v5629_v59 }
 0xbbf   : > { %v5646_v11 = vadd.f32 1.0, %v5638_v46  ;;  %v5628_v56 = vand.u32 2147483647, %v5604_v58  ;;  %8765 = vrcp.f32 %v5645_v34  ;;  %v8762_v35 = vpop.eup %8761  ;;  %v5742_v41 = vmul.f32 %v5734_v32, %v5630_v21 }
 0xbc0   : > { %v12973_v6 = vadd.f32 %v12954_v15, %v5580_v0  ;;  %v5570_v18 = vmul.f32 %v8762_v35, %v12920_v42  ;;  %v5631_v5 = vand.u32 2147483647, %v12968_v19  ;;  %v5581_v62 = vmul.f32 %v12948_v2, %v5569_v4 }
 0xbc1   : > { %8767 = vrcp.f32 %v5646_v11  ;;  %v5636_v39 = vmul.f32 0.3275911, %v5628_v56  ;;  %v12986_v42 = vmul.f32 0.5, %v5589_v36  ;;  %v5750_v47 = vmul.f32 1.442695, %v5741_v54 }
 0xbc2   : > { %v12979_v38 = vmul.f32 0.70710677, %v12973_v6  ;;  %v5582_v27 = vmul.f32 %v12948_v2, %v5570_v18  ;;  %v5639_v51 = vmul.f32 0.3275911, %v5631_v5  ;;  %v12989_v55 = vadd.f32 %v12954_v15, %v5581_v62  ;;  %v8764_v40 = vpop.eup %8763 }
 0xbc3   : > { %v5644_v23 = vadd.f32 1.0, %v5636_v39  ;;  %v13000_v12 = vsel %vm5614_vm5, 1.0, %v8898_v17  ;;  %v13004_v60 = vmul.f32 0.5, %v5588_v30  ;;  %vm5612_vm9 = vcmp.ge.f32.partialorder %v5604_v58, 0.0 }
 0xbc4   : > { %v5632_v53 = vand.u32 2147483647, %v12979_v38  ;;  %v12984_v1 = vadd.f32 %v12954_v15, %v5582_v27  ;;  %v5647_v45 = vadd.f32 1.0, %v5639_v51  ;;  %v13007_v33 = vmul.f32 0.70710677, %v12989_v55 }
 0xbc5   : > { %8769 = vrcp.f32 %v5644_v23  ;;  %v5732_v48 = vsub.f32 0.0, %v5628_v56  ;;  %v5752_v9 = vmul.f32 1.442695, %v5742_v41  ;;  %v5571_v59 = vmul.f32 %v8764_v40, %v12925_v49 }
 0xbc6   : > { %v5640_v3 = vmul.f32 0.3275911, %v5632_v53  ;;  %v12994_v20 = vmul.f32 0.70710677, %v12984_v1  ;;  %8771 = vrcp.f32 %v5647_v45  ;;  %v13016_v63 = vsel %vm5612_vm9, 1.0, %v8898_v17 }
 0xbc7   : > { %8773 = vpow2.f32 %v5750_v47  ;;  %v13018_v30 = vmul.f32 0.5, %v5591_v57  ;;  %vm5615_vm6 = vcmp.ge.f32.partialorder %v12968_v19, 0.0  ;;  %v5735_v58 = vsub.f32 0.0, %v5631_v5 }
 0xbc8   : > { %v5648_v43 = vadd.f32 1.0, %v5640_v3  ;;  %v5634_v26 = vand.u32 2147483647, %v12994_v20  ;;  %v5736_v61 = vsub.f32 0.0, %v5632_v53  ;;  %v5740_v11 = vmul.f32 %v5732_v48, %v5628_v56 }
 0xbc9   : > { %v13002_v36 = vpop.eup %8765  ;;  %v13022_v49 = vand.u32 2147483647, %v13007_v33  ;;  %v5583_v57 = vmul.f32 %v12948_v2, %v5571_v59  ;;  %v13031_v19 = vsel %vm5615_vm6, 1.0, %v8898_v17  ;;  %v5743_v39 = vmul.f32 %v5735_v58, %v5631_v5 }
 0xbca   : > { %v5661_v44 = vmul.f32 1.0614054, %v13002_v36  ;;  %8775 = vrcp.f32 %v5648_v43  ;;  %v5642_v21 = vmul.f32 0.3275911, %v5634_v26  ;;  %v5744_v18 = vmul.f32 %v5736_v61, %v5632_v53 }
 0xbcb   : > { %v13009_v25 = vpop.eup %8767  ;;  %8777 = vpow2.f32 %v5752_v9  ;;  %v5641_v56 = vmul.f32 0.3275911, %v13022_v49  ;;  %v13035_v32 = vadd.f32 %v12954_v15, %v5583_v57  ;;  %v5748_v54 = vmul.f32 1.442695, %v5740_v11 }
 0xbcc   : > { %v5662_v29 = vmul.f32 1.0614054, %v13009_v25  ;;  %v5669_v16 = vadd.f32 -1.4531521, %v5661_v44  ;;  %v5650_v34 = vadd.f32 1.0, %v5642_v21  ;;  %v5738_v2 = vsub.f32 0.0, %v5634_v26 }
 0xbcd   : > { %v5649_v62 = vadd.f32 1.0, %v5641_v56  ;;  %v13042_v47 = vmul.f32 0.5, %v12973_v6  ;;  %v13047_v15 = vmul.f32 0.70710677, %v13035_v32  ;;  %v5754_v43 = vmul.f32 1.442695, %v5743_v39 }
 0xbce   : > { %v5670_v46 = vadd.f32 -1.4531521, %v5662_v29  ;;  %v5677_v31 = vmul.f32 %v13002_v36, %v5669_v16  ;;  %8779 = vrcp.f32 %v5650_v34  ;;  %v5756_v48 = vmul.f32 1.442695, %v5744_v18 }
 0xbcf   : > { %v13024_v24 = vpop.eup %8769  ;;  %8781 = vrcp.f32 %v5649_v62  ;;  %v5746_v6 = vmul.f32 %v5738_v2, %v5634_v26  ;;  %v5737_v61 = vsub.f32 0.0, %v13022_v49  ;;  %v13058_v34 = vand.u32 2147483647, %v13047_v15 }
 0xbd0   : > { %v5678_v50 = vmul.f32 %v13009_v25, %v5670_v46  ;;  %v5660_v0 = vmul.f32 1.0614054, %v13024_v24  ;;  %v5685_v4 = vadd.f32 1.4214138, %v5677_v31  ;;  %v13037_v27 = vpop.eup %8771  ;;  %8783 = vpow2.f32 %v5748_v54 }
 0xbd1   : > { %v5663_v5 = vmul.f32 1.0614054, %v13037_v27  ;;  %v8774_v53 = vpop.eup %8773  ;;  %8785 = vpow2.f32 %v5754_v43  ;;  %v5760_v54 = vmul.f32 1.442695, %v5746_v6  ;;  %vm5616_vm1 = vcmp.ge.f32.partialorder %v12979_v38, 0.0 }
 0xbd2   : > { %v5686_v35 = vadd.f32 1.4214138, %v5678_v50  ;;  %v5668_v23 = vadd.f32 -1.4531521, %v5660_v0  ;;  %v5693_v51 = vmul.f32 %v13002_v36, %v5685_v4  ;;  %8787 = vpow2.f32 %v5756_v48 }
 0xbd3   : > { %v5671_v59 = vadd.f32 -1.4531521, %v5663_v5  ;;  %v5643_v4 = vmul.f32 0.3275911, %v13058_v34  ;;  %v5745_v43 = vmul.f32 %v5737_v61, %v13022_v49  ;;  %vm5617_vm2 = vcmp.ge.f32.partialorder %v13007_v33, 0.0 }
 0xbd4   : > { %v5694_v41 = vmul.f32 %v13009_v25, %v5686_v35  ;;  %v5676_v45 = vmul.f32 %v13024_v24, %v5668_v23  ;;  %v5701_v40 = vadd.f32 -0.28449672, %v5693_v51  ;;  %v13049_v44 = vpop.eup %8775  ;;  %vm5618_vm15 = vcmp.ge.f32.partialorder %v12994_v20, 0.0 }
 0xbd5   : > { %v5664_v16 = vmul.f32 1.0614054, %v13049_v44  ;;  %v5679_v58 = vmul.f32 %v13037_v27, %v5671_v59  ;;  %v8778_v11 = vpop.eup %8777  ;;  %v5651_v51 = vadd.f32 1.0, %v5643_v4  ;;  %vm5619_vm14 = vcmp.ge.f32.partialorder %v13047_v15, 0.0 }
 0xbd6   : > { %v5702_v3 = vadd.f32 -0.28449672, %v5694_v41  ;;  %v5684_v9 = vadd.f32 1.4214138, %v5676_v45  ;;  %v5709_v29 = vmul.f32 %v13002_v36, %v5701_v40 }
 0xbd7   : > { %v5672_v57 = vadd.f32 -1.4531521, %v5664_v16  ;;  %v5687_v56 = vadd.f32 1.4214138, %v5679_v58  ;;  %8789 = vrcp.f32 %v5651_v51 }
 0xbd8   : > { %v5710_v21 = vmul.f32 %v13009_v25, %v5702_v3  ;;  %v5692_v46 = vmul.f32 %v13024_v24, %v5684_v9  ;;  %v5717_v31 = vadd.f32 0.2548296, %v5709_v29  ;;  %v13060_v26 = vpop.eup %8779  ;;  %8791 = vpow2.f32 %v5760_v54 }
 0xbd9   : > { %v5680_v18 = vmul.f32 %v13049_v44, %v5672_v57  ;;  %v5666_v23 = vmul.f32 1.0614054, %v13060_v26  ;;  %v5695_v2 = vmul.f32 %v13037_v27, %v5687_v56  ;;  %v13070_v3 = vpop.eup %8781  ;;  %v5758_v57 = vmul.f32 1.442695, %v5745_v43 }
 0xbda   : > { %v5718_v50 = vadd.f32 0.2548296, %v5710_v21  ;;  %v5700_v0 = vadd.f32 -0.28449672, %v5692_v46  ;;  %v5725_v35 = vmul.f32 %v13002_v36, %v5717_v31  ;;  %v5665_v6 = vmul.f32 1.0614054, %v13070_v3  ;;  %v8784_v29 = vpop.eup %8783 }
 0xbdb   : > { %v5688_v5 = vadd.f32 1.4214138, %v5680_v18  ;;  %v5674_v40 = vadd.f32 -1.4531521, %v5666_v23  ;;  %8793 = vpow2.f32 %v5758_v57 }
 0xbdc   : > { %v5726_v39 = vmul.f32 %v13009_v25, %v5718_v50  ;;  %v5708_v62 = vmul.f32 %v13024_v24, %v5700_v0  ;;  %v5765_v41 = vmul.f32 %v8774_v53, %v5725_v35  ;;  %v5703_v25 = vadd.f32 -0.28449672, %v5695_v2  ;;  %v8786_v0 = vpop.eup %8785 }
 0xbdd   : > { %v5696_v59 = vmul.f32 %v13049_v44, %v5688_v5  ;;  %v5682_v16 = vmul.f32 %v13060_v26, %v5674_v40  ;;  %v5673_v61 = vadd.f32 -1.4531521, %v5665_v6 }
 0xbde   : > { %v5766_v45 = vmul.f32 %v8778_v11, %v5726_v39  ;;  %v5716_v36 = vadd.f32 0.2548296, %v5708_v62  ;;  %v5773_v48 = vsub.f32 1.0, %v5765_v41  ;;  %v5711_v21 = vmul.f32 %v13037_v27, %v5703_v25  ;;  %v8788_v39 = vpop.eup %8787 }
 0xbdf   : > { %v5704_v49 = vadd.f32 -0.28449672, %v5696_v59  ;;  %v5690_v50 = vadd.f32 1.4214138, %v5682_v16 }
 0xbe0   : > { %v5774_v9 = vsub.f32 1.0, %v5766_v45  ;;  %v5724_v53 = vmul.f32 %v13024_v24, %v5716_v36  ;;  %v5781_v46 = vmul.f32 %v5773_v48, %v12997_v14  ;;  %v5719_v31 = vadd.f32 0.2548296, %v5711_v21 }
 0xbe1   : > { %v5712_v35 = vmul.f32 %v13049_v44, %v5704_v49  ;;  %v5681_v24 = vmul.f32 %v13070_v3, %v5673_v61  ;;  %v5698_v14 = vmul.f32 %v13060_v26, %v5690_v50  ;;  %v13096_v25 = vpop.eup %8789 }
 0xbe2   : > { %v5782_v58 = vmul.f32 %v5774_v9, %v13000_v12  ;;  %v5764_v11 = vmul.f32 %v8784_v29, %v5724_v53  ;;  %v5789_v56 = vadd.f32 1.0, %v5781_v46  ;;  %v5727_v23 = vmul.f32 %v13037_v27, %v5719_v31  ;;  %v8792_v53 = vpop.eup %8791 }
 0xbe3   : > { %v5739_v12 = vsub.f32 0.0, %v13058_v34  ;;  %v5720_v2 = vadd.f32 0.2548296, %v5712_v35  ;;  %v5689_v51 = vadd.f32 1.4214138, %v5681_v24  ;;  %v5624_v27 = vsel %vm5616_vm1, 1.0, %v8898_v17 }
 0xbe4   : > { %v5790_v4 = vadd.f32 1.0, %v5782_v58  ;;  %v5772_v18 = vsub.f32 1.0, %v5764_v11  ;;  %v5797_v54 = vmul.f32 %v5789_v56, %v12986_v42  ;;  %v5767_v45 = vmul.f32 %v8786_v0, %v5727_v23 }
 0xbe5   : > { %v5706_v5 = vadd.f32 -0.28449672, %v5698_v14  ;;  %v5728_v36 = vmul.f32 %v13049_v44, %v5720_v2  ;;  %v5697_v42 = vmul.f32 %v13070_v3, %v5689_v51  ;;  %v5667_v29 = vmul.f32 1.0614054, %v13096_v25  ;;  %v8794_v23 = vpop.eup %8793 }
 0xbe6   : > { %v13087_v62 = vmul.f32 %v5790_v4, %v12991_v37  ;;  %v5780_v41 = vmul.f32 %v5772_v18, %v13016_v63  ;;  %v5775_v43 = vsub.f32 1.0, %v5767_v45  ;;  %v5747_v63 = vmul.f32 %v5739_v12, %v13058_v34 }
 0xbe7   : > { %v5714_v48 = vmul.f32 %v13060_v26, %v5706_v5  ;;  %v5814_v9 = vrot.slane %v5797_v54, 1  ;;  %v5768_v59 = vmul.f32 %v8788_v39, %v5728_v36  ;;  %v5705_v6 = vadd.f32 -0.28449672, %v5697_v42 }
 0xbe8   : > { %v5816_v40 = vrot.slane %v13087_v62, 1  ;;  %v5788_v37 = vadd.f32 1.0, %v5780_v41  ;;  %v5783_v44 = vmul.f32 %v5775_v43, %v13031_v19  ;;  %v5675_v49 = vadd.f32 -1.4531521, %v5667_v29 }
 0xbe9   : > { %v5722_v21 = vadd.f32 0.2548296, %v5714_v48  ;;  %v5776_v46 = vsub.f32 1.0, %v5768_v59  ;;  %v5713_v58 = vmul.f32 %v13070_v3, %v5705_v6  ;;  %v5762_v31 = vmul.f32 1.442695, %v5747_v63 }
 0xbea   : > { %v5796_v38 = vmul.f32 %v5788_v37, %v13004_v60  ;;  %v5817_v16 = vsel %vm4700_vm12, %v5814_v9, %v5816_v40  ;;  %v5791_v61 = vadd.f32 1.0, %v5783_v44  ;;  %v5683_v19 = vmul.f32 %v13096_v25, %v5675_v49 }
 0xbeb   : > { %v5730_v11 = vmul.f32 %v13060_v26, %v5722_v21  ;;  %v5784_v50 = vmul.f32 %v5776_v46, %v5624_v27  ;;  %v5721_v60 = vadd.f32 0.2548296, %v5713_v58  ;;  %v5839_v0 = vmax.f32 %v5797_v54, %v5817_v16 }
 0xbec   : > { %v5813_v34 = vrot.slane %v5796_v38, 1  ;;  %v5799_v56 = vmul.f32 %v5791_v61, %v13018_v30  ;;  %v5691_v18 = vadd.f32 1.4214138, %v5683_v19  ;;  %v5626_v14 = vsel %vm5618_vm15, 1.0, %v8898_v17 }
 0xbed   : > { %v5770_v4 = vmul.f32 %v8792_v53, %v5730_v11  ;;  %v5792_v24 = vadd.f32 1.0, %v5784_v50  ;;  %v5729_v39 = vmul.f32 %v13070_v3, %v5721_v60  ;;  %8795 = vpow2.f32 %v5762_v31 }
 0xbee   : > { %v5815_v57 = vsel %vm4700_vm12, %v5813_v34, %v5814_v9  ;;  %v5818_v26 = vrot.slane %v5799_v56, 1  ;;  %v5699_v54 = vmul.f32 %v13096_v25, %v5691_v18  ;;  %v5602_v27 = vmul.f32 0.5, %v12984_v1 }
 0xbef   : > { %v5838_v35 = vmax.f32 %v5796_v38, %v5815_v57  ;;  %v5778_v12 = vsub.f32 1.0, %v5770_v4  ;;  %v5800_v2 = vmul.f32 %v5792_v24, %v13042_v47  ;;  %v5769_v51 = vmul.f32 %v8794_v23, %v5729_v39  ;;  %v8541_v23 = vld [vmem:[%s13554_s8] sm:$0xff]  }
 0xbf0   : > { %v5819_v30 = vsel %vm4700_vm12, %v5816_v40, %v5818_v26  ;;  %v5707_v3 = vadd.f32 -0.28449672, %v5699_v54  ;;  %v5625_v36 = vsel %vm5617_vm2, 1.0, %v8898_v17  ;;  %v5601_v9 = vmul.f32 0.5, %v12989_v55  ;;  %8058 = vmatprep.subr.bf16.mxu0 %v8541_v23 }
 0xbf1   : > { %v5850_v20 = vpack.c.bf16 %v5839_v0, %v5838_v35  ;;  %v5786_v41 = vmul.f32 %v5778_v12, %v5626_v14  ;;  %v5820_v45 = vrot.slane %v5800_v2, 1  ;;  %v5777_v5 = vsub.f32 1.0, %v5769_v51  ;;  %8059 = vmatpush3.bf16.msra.mxu0 %v8541_v23 }
 0xbf2   : > { %v5715_v43 = vmul.f32 %v13096_v25, %v5707_v3  ;;  %v5840_v48 = vmax.f32 %v13087_v62, %v5819_v30  ;;  %v5627_v49 = vsel %vm5619_vm14, 1.0, %v8898_v17  ;;  %v14138_v50 = vmov 0.0  }
 0xbf3   : > { %8046 = vmatprep.subr.bf16.mxu1 %v5850_v20  ;;  %v5794_v42 = vadd.f32 1.0, %v5786_v41  ;;  %v5821_v47 = vsel %vm4700_vm12, %v5818_v26, %v5820_v45  ;;  %v5785_v37 = vmul.f32 %v5777_v5, %v5625_v36  ;;  %v13131_v15 = vrot.slane %v14138_v50, 1 }
 0xbf4   : > { %8047 = vmatpush3.bf16.msra.mxu1 %v5850_v20  ;;  %v5841_v63 = vmax.f32 %v5799_v56, %v5821_v47  ;;  %v5723_v6 = vadd.f32 0.2548296, %v5715_v43  ;;  %vm6406_vm2 = vcmask 785408  }
 0xbf5   : > { %v5802_v40 = vmul.f32 %v5794_v42, %v5602_v27  ;;  %v5793_v59 = vadd.f32 1.0, %v5785_v37  ;;  %v8542_v27 = vld [vmem:[%s13554_s8 + $0x8] sm:$0xff]  }
 0xbf6   : > { %v5851_v29 = vpack.c.bf16 %v5841_v63, %v5840_v48  ;;  %v5731_v33 = vmul.f32 %v13096_v25, %v5723_v6  ;;  %v5603_v25 = vmul.f32 0.5, %v13035_v32  ;;  %v8540_v32 = vld [vmem:[%s13553_s7 + $0x8] sm:$0xff]   ;;  %8060 = vmatprep.subr.bf16.mxu0 %v8542_v27 }
 0xbf7   : > { %v5801_v1 = vmul.f32 %v5793_v59, %v5601_v9  ;;  %v5824_v53 = vrot.slane %v5802_v40, 1  ;;  %v8796_v38 = vpop.eup %8795  ;;  %8061 = vmatpush3.bf16.msra.mxu0 %v8542_v27 }
 0xbf8   : > { %8048 = vmatprep.subr.bf16.mxu1 %v5851_v29  ;;  %v5771_v21 = vmul.f32 %v8796_v38, %v5731_v33 }
 0xbf9   : > { %8049 = vmatpush3.bf16.msra.mxu1 %v5851_v29  ;;  %v5822_v44 = vrot.slane %v5801_v1, 1  ;;  %v8543_v29 = vld [vmem:[%s13554_s8 + $0x10] sm:$0xff]  }
 0xbfa   : > { %v5779_v46 = vsub.f32 1.0, %v5771_v21  ;;  %8062 = vmatprep.subr.bf16.mxu0 %v8543_v29 }
 0xbfb   : > { %v5823_v62 = vsel %vm4700_vm12, %v5820_v45, %v5822_v44  ;;  %v5825_v16 = vsel %vm4700_vm12, %v5822_v44, %v5824_v53  ;;  %8063 = vmatpush3.bf16.msra.mxu0 %v8543_v29 }
 0xbfc   : > { %v5842_v55 = vmax.f32 %v5800_v2, %v5823_v62  ;;  %v5843_v58 = vmax.f32 %v5801_v1, %v5825_v16  ;;  %v5787_v34 = vmul.f32 %v5779_v46, %v5627_v49  ;;  %8068 = vmatprep.subr.bf16.mxu0 %v14138_v50 }
 0xbfe   : > { %v5852_v61 = vpack.c.bf16 %v5843_v58, %v5842_v55  ;;  %v5795_v11 = vadd.f32 1.0, %v5787_v34 }
 0xc00   : > { %8050 = vmatprep.subr.bf16.mxu1 %v5852_v61  ;;  %v5803_v31 = vmul.f32 %v5795_v11, %v5603_v25 }
 0xc01   : > { %8051 = vmatpush3.bf16.msra.mxu1 %v5852_v61 }
 0xc02   : > { %v5826_v60 = vrot.slane %v5803_v31, 1 }
 0xc04   : > { %v5827_v19 = vsel %vm4700_vm12, %v5824_v53, %v5826_v60  ;;  %v5829_v57 = vsel %vm4700_vm12, %v5826_v60, %v13131_v15 }
 0xc05   : > { %v5844_v0 = vmax.f32 %v5802_v40, %v5827_v19  ;;  %v5845_v56 = vmax.f32 %v5803_v31, %v5829_v57 }
 0xc07   : > { %v5853_v4 = vpack.c.bf16 %v5845_v56, %v5844_v0 }
 0xc09   : > { %8052 = vmatprep.subr.bf16.mxu1 %v5853_v4 }
 0xc0a   : > { %8053 = vmatpush3.bf16.msra.mxu1 %v5853_v4 }
 0xc0b   : > { %8092 = vmatprep.subr.bf16.mxu1 %v14138_v50 }
 0xc0d   : > { %8055 = vmatmul.mubr.msk.bf16.vlgmr.msra.gmra.mrb[16].mxu1 %vm5864_vm0, %v8540_v32 }
 0xc0e   : > { %8094 = vmatprep.mubr.msk.bf16.mxu1 %vm8902_vm11, %v14138_v50 }
 0xce0   : > { %v8056_v35 = vpop.f32.mrb[16].mxu1 }
 0xce1   : > { %v5905_v24 = vpop.f32.mrb[17].mxu1  ;;  %v5927_v26 = vrot.slane %v8056_v35, 7 }
 0xce2   : > { %v5924_v39 = vrot.slane %v5905_v24, 7  ;;  %v8057_v18 = vpop.f32.mrb[18].mxu1 }
 0xce3   : > { %v5929_v14 = vrot.slane %v8057_v18, 7  ;;  %v5908_v12 = vpop.f32.mrb[19].mxu1 }
 0xce4   : > { %v5936_v20 = vsel %vm4671_vm13, 0.0, %v5924_v39  ;;  %v5925_v2 = vrot.slane %v5908_v12, 7 }
 0xce5   : > { %v5930_v51 = vsel %vm4671_vm13, %v5927_v26, %v5929_v14  ;;  %v5937_v54 = vsel %vm4671_vm13, %v5929_v14, 0.0  ;;  %v5940_v45 = vrot.slane %v5936_v20, 1  ;;  %v5961_v48 = vrot.slane %v5936_v20, 2 }
 0xce6   : > { %v5945_v41 = vrot.slane %v5930_v51, 1  ;;  %v5947_v30 = vrot.slane %v5937_v54, 1  ;;  %v5926_v5 = vsel %vm4671_vm13, %v5924_v39, %v5925_v2  ;;  %v5928_v3 = vsel %vm4671_vm13, %v5925_v2, %v5927_v26 }
 0xce7   : > { %v5941_v36 = vrot.slane %v5926_v5, 1  ;;  %v5943_v42 = vrot.slane %v5928_v3, 1  ;;  %v5962_v47 = vrot.slane %v5926_v5, 2  ;;  %v5964_v37 = vrot.slane %v5928_v3, 2 }
 0xce8   : > { %v5948_v43 = vsel %vm4700_vm12, %v5945_v41, %v5947_v30  ;;  %v5966_v1 = vrot.slane %v5930_v51, 2  ;;  %v5968_v53 = vrot.slane %v5937_v54, 2 }
 0xce9   : > { %v5946_v63 = vsel %vm4700_vm12, %v5943_v42, %v5945_v41  ;;  %v5942_v40 = vsel %vm4700_vm12, %v5940_v45, %v5941_v36  ;;  %v5944_v9 = vsel %vm4700_vm12, %v5941_v36, %v5943_v42  ;;  %v5963_v33 = vsel %vm4742_vm3, %v5961_v48, %v5962_v47 }
 0xcea   : > { %v8415_v59 = vpack.i.bf16 %v5948_v43, %v5946_v63  ;;  %v8410_v6 = vpack.i.bf16 %v5944_v9, %v5942_v40  ;;  %v5965_v38 = vsel %vm4742_vm3, %v5962_v47, %v5964_v37  ;;  %v5967_v21 = vsel %vm4742_vm3, %v5964_v37, %v5966_v1 }
 0xceb   : > { %v8420_v44 = vpack.i.bf16 %v5965_v38, %v5963_v33  ;;  %v5969_v62 = vsel %vm4742_vm3, %v5966_v1, %v5968_v53 }
 0xcec   : > { %8416 = vrot.lane.b32.xlu1 %v8415_v59, %s13775_s24  ;;  %8411 = vrot.lane.b32.xlu0 %v8410_v6, %s13775_s24  ;;  %v8425_v16 = vpack.i.bf16 %v5969_v62, %v5967_v21 }
 0xcf0   : > { %8421 = vrot.lane.b32.xlu1 %v8420_v44, %s8901_s26 }
 0xcf4   : > { %8426 = vrot.lane.b32.xlu1 %v8425_v16, %s8901_s26 }
 0xd5e   : > { %v8417_v46 = vpop.permute.xlu1 %8416  ;;  %v8412_v55 = vpop.permute.xlu0 %8411 }
 0xd5f   : > { %v8414_v58 = vunpack.i.h.bf16 %v8412_v55  ;;  %v8413_v49 = vunpack.i.l.bf16 %v8412_v55  ;;  %v8419_v11 = vunpack.i.h.bf16 %v8417_v46  ;;  %v8418_v31 = vunpack.i.l.bf16 %v8417_v46 }
 0xd61   : > { %v5983_v60 = vsel %vm5361_vm8, %v5926_v5, %v8414_v58  ;;  %v5982_v19 = vsel %vm5361_vm8, %v5936_v20, %v8413_v49  ;;  %v5985_v24 = vsel %vm5361_vm8, %v5930_v51, %v8419_v11  ;;  %v5984_v39 = vsel %vm5361_vm8, %v5928_v3, %v8418_v31 }
 0xd62   : > { %v8422_v34 = vpop.permute.xlu1 %8421  ;;  %v6128_v11 = vsub.s32 7, %v14135_v13 }
 0xd63   : > { %v8424_v61 = vunpack.i.h.bf16 %v8422_v34  ;;  %v8423_v25 = vunpack.i.l.bf16 %v8422_v34 }
 0xd65   : > { %v5987_v57 = vsel %vm5986_vm7, %v5982_v19, %v8423_v25  ;;  %v5988_v0 = vsel %vm5986_vm7, %v5983_v60, %v8424_v61  ;;  %v13194_v60 = vld [vmem:[%s13786_s30 + $0x10] sm:$0xff]  ;;  %v6129_v19 = vrot.slane %v12943_v10, %v6128_v11 }
 0xd66   : > { %v5991_v56 = vpack.c.bf16 %v5988_v0, %v5987_v57  ;;  %v8427_v4 = vpop.permute.xlu1 %8426 }
 0xd67   : > { %v8429_v32 = vunpack.i.h.bf16 %v8427_v4  ;;  %v8428_v35 = vunpack.i.l.bf16 %v8427_v4 }
 0xd68   : > { %8064 = vmatprep.mubr.msk.bf16.mxu0 %vm6017_vm4, %v5991_v56  ;;  %v14139_v56 = vld [vmem:[#allocation3_spill] sm:$0xff] }
 0xd69   : > { %v5990_v18 = vsel %vm5986_vm7, %v5985_v24, %v8429_v32  ;;  %v5989_v23 = vsel %vm5986_vm7, %v5984_v39, %v8428_v35  ;;  %v6137_v4 = vrot.slane %v13194_v60, %v14139_v56 }
 0xd6a   : > { %v5992_v26 = vpack.c.bf16 %v5990_v18, %v5989_v23 }
 0xd6c   : > { %8065 = vmatmul.mubr.msk.bf16.vlgmr.msra.gmra.mrb[48].mxu0 %vm6017_vm4, %v5992_v26 }
 0xd6d   : > { %8072 = vmatprep.mubr.msk.bf16.mxu0 %vm8902_vm11, %v14138_v50 }
 0xe3f   : > { %v8066_v14 = vpop.f32.mrb[48].mxu0 }
 0xe40   : > { %v6058_v12 = vpop.f32.mrb[49].mxu0  ;;  %v6079_v41 = vsel %vm5986_vm7, %v8066_v14, 0.0 }
 0xe41   : > { %v8067_v20 = vpop.f32.mrb[50].mxu0  ;;  %v6073_v2 = vsel %vm5986_vm7, %v6058_v12, 0.0 }
 0xe42   : > { %6074 = vadd.xlane.f32.xlu0 %v6073_v2  ;;  %v6061_v54 = vpop.f32.mrb[51].mxu0  ;;  %v6082_v30 = vsel %vm5986_vm7, %v8067_v20, 0.0 }
 0xe43   : > { %v6076_v51 = vsel %vm5986_vm7, %v6061_v54, 0.0 }
 0xe44   : > { %6077 = vadd.xlane.f32.xlu1 %v6076_v51 }
 0xe46   : > { %6080 = vadd.xlane.f32.xlu0 %v6079_v41 }
 0xe4a   : > { %6083 = vadd.xlane.f32.xlu0 %v6082_v30 }
 0xecf   : > { %v6075_v45 = vpop.xlane.xlu0 %6074 }
 0xed0   : > { %v6086_v5 = vmul.f32 0.03125, %v6075_v45 }
 0xed1   : > { %v6078_v3 = vpop.xlane.xlu1 %6077 }
 0xed2   : > { %v6090_v27 = vsub.f32 %v6058_v12, %v6086_v5  ;;  %v6087_v36 = vmul.f32 0.03125, %v6078_v3 }
 0xed3   : > { %v6081_v42 = vpop.xlane.xlu0 %6080 }
 0xed4   : > { %v6091_v47 = vsub.f32 %v6061_v54, %v6087_v36  ;;  %v6088_v37 = vmul.f32 0.03125, %v6081_v42  ;;  %v6094_v43 = vmul.f32 %v6090_v27, %v6090_v27 }
 0xed6   : > { %v6092_v48 = vsub.f32 %v8066_v14, %v6088_v37  ;;  %v6098_v63 = vsel %vm5986_vm7, %v6094_v43, 0.0  ;;  %v6095_v40 = vmul.f32 %v6091_v47, %v6091_v47 }
 0xed7   : > { %6099 = vadd.xlane.f32.xlu0 %v6098_v63  ;;  %v6084_v9 = vpop.xlane.xlu0 %6083 }
 0xed8   : > { %v6089_v59 = vmul.f32 0.03125, %v6084_v9  ;;  %v6101_v6 = vsel %vm5986_vm7, %v6095_v40, 0.0  ;;  %v6096_v29 = vmul.f32 %v6092_v48, %v6092_v48 }
 0xed9   : > { %6102 = vadd.xlane.f32.xlu1 %v6101_v6 }
 0xeda   : > { %v6093_v1 = vsub.f32 %v8067_v20, %v6089_v59  ;;  %v6104_v53 = vsel %vm5986_vm7, %v6096_v29, 0.0 }
 0xedb   : > { %6105 = vadd.xlane.f32.xlu0 %v6104_v53 }
 0xedc   : > { %v6097_v33 = vmul.f32 %v6093_v1, %v6093_v1 }
 0xede   : > { %v6107_v38 = vsel %vm5986_vm7, %v6097_v33, 0.0 }
 0xedf   : > { %6108 = vadd.xlane.f32.xlu1 %v6107_v38 }
 0xf64   : > { %v6100_v44 = vpop.xlane.xlu0 %6099 }
 0xf65   : > { %v6110_v21 = vmul.f32 0.03125, %v6100_v44 }
 0xf66   : > { %v6103_v62 = vpop.xlane.xlu1 %6102 }
 0xf67   : > { %v6114_v16 = vadd.f32 1e-05, %v6110_v21  ;;  %v6111_v46 = vmul.f32 0.03125, %v6103_v62 }
 0xf68   : > { %v6106_v55 = vpop.xlane.xlu0 %6105 }
 0xf69   : > { %8797 = vrsqrt.f32 %v6114_v16  ;;  %v6115_v58 = vadd.f32 1e-05, %v6111_v46  ;;  %v6112_v49 = vmul.f32 0.03125, %v6106_v55 }
 0xf6b   : > { %8799 = vrsqrt.f32 %v6115_v58  ;;  %v6116_v34 = vadd.f32 1e-05, %v6112_v49 }
 0xf6c   : > { %v6109_v61 = vpop.xlane.xlu1 %6108 }
 0xf6d   : > { %8801 = vrsqrt.f32 %v6116_v34  ;;  %v6113_v25 = vmul.f32 0.03125, %v6109_v61 }
 0xf6f   : > { %v6117_v31 = vadd.f32 1e-05, %v6113_v25 }
 0xf71   : > { %8803 = vrsqrt.f32 %v6117_v31 }
 0xf73   : > { %v8798_v57 = vpop.eup %8797 }
 0xf74   : > { %v6122_v0 = vmul.f32 %v8798_v57, %v6090_v27 }
 0xf75   : > { %v8800_v32 = vpop.eup %8799 }
 0xf76   : > { %v6130_v35 = vmul.f32 %v6129_v19, %v6122_v0  ;;  %v6123_v24 = vmul.f32 %v8800_v32, %v6091_v47 }
 0xf77   : > { %v8802_v39 = vpop.eup %8801 }
 0xf78   : > { %v6131_v18 = vmul.f32 %v6129_v19, %v6123_v24  ;;  %v6124_v23 = vmul.f32 %v8802_v39, %v6092_v48  ;;  %v13201_v26 = vadd.f32 %v6137_v4, %v6130_v35 }
 0xf7a   : > { %v6132_v14 = vmul.f32 %v6129_v19, %v6124_v23  ;;  %v13203_v12 = vadd.f32 %v6137_v4, %v6131_v18  ;;  %v13206_v20 = vmul.f32 0.70710677, %v13201_v26 }
 0xf7b   : > { %v8804_v10 = vpop.eup %8803 }
 0xf7c   : > { %v13208_v2 = vadd.f32 %v6137_v4, %v6132_v14  ;;  %v6125_v54 = vmul.f32 %v8804_v10, %v6093_v1  ;;  %v13211_v51 = vmul.f32 0.70710677, %v13203_v12  ;;  %v6158_v41 = vand.u32 2147483647, %v13206_v20 }
 0xf7d   : > { %vm6150_vm5 = vcmp.ge.f32.partialorder %v13206_v20, 0.0  ;;  %v6142_v20 = vmul.f32 0.5, %v13201_v26 }
 0xf7e   : > { %v13215_v30 = vmul.f32 0.70710677, %v13208_v2  ;;  %v6133_v45 = vmul.f32 %v6129_v19, %v6125_v54  ;;  %v6159_v5 = vand.u32 2147483647, %v13211_v51  ;;  %v6162_v3 = vmul.f32 0.3275911, %v6158_v41 }
 0xf7f   : > { %v6210_v59 = vsub.f32 0.0, %v6158_v41  ;;  %vm6151_vm9 = vcmp.ge.f32.partialorder %v13211_v51, 0.0 }
 0xf80   : > { %v6160_v27 = vand.u32 2147483647, %v13215_v30  ;;  %v13219_v36 = vadd.f32 %v6137_v4, %v6133_v45  ;;  %v6163_v42 = vmul.f32 0.3275911, %v6159_v5  ;;  %v6166_v47 = vadd.f32 1.0, %v6162_v3 }
 0xf81   : > { %v6211_v29 = vsub.f32 0.0, %v6159_v5  ;;  %v6214_v33 = vmul.f32 %v6210_v59, %v6158_v41  ;;  %vm6152_vm6 = vcmp.ge.f32.partialorder %v13215_v30, 0.0 }
 0xf82   : > { %v6164_v37 = vmul.f32 0.3275911, %v6160_v27  ;;  %v6167_v43 = vadd.f32 1.0, %v6163_v42  ;;  %8805 = vrcp.f32 %v6166_v47  ;;  %v13222_v48 = vmul.f32 0.70710677, %v13219_v36 }
 0xf83   : > { %v6212_v1 = vsub.f32 0.0, %v6160_v27  ;;  %v6215_v21 = vmul.f32 %v6211_v29, %v6159_v5  ;;  %v6218_v49 = vmul.f32 1.442695, %v6214_v33 }
 0xf84   : > { %v6168_v63 = vadd.f32 1.0, %v6164_v37  ;;  %8807 = vrcp.f32 %v6167_v43  ;;  %v6161_v40 = vand.u32 2147483647, %v13222_v48  ;;  %vm6153_vm1 = vcmp.ge.f32.partialorder %v13222_v48, 0.0 }
 0xf85   : > { %v6216_v16 = vmul.f32 %v6212_v1, %v6160_v27  ;;  %v6220_v19 = vmul.f32 1.442695, %v6215_v21 }
 0xf86   : > { %8809 = vrcp.f32 %v6168_v63  ;;  %v6165_v9 = vmul.f32 0.3275911, %v6161_v40  ;;  %v6213_v34 = vsub.f32 0.0, %v6161_v40 }
 0xf87   : > { %v6222_v57 = vmul.f32 1.442695, %v6216_v16 }
 0xf88   : > { %v6169_v6 = vadd.f32 1.0, %v6165_v9  ;;  %v6217_v35 = vmul.f32 %v6213_v34, %v6161_v40 }
 0xf8a   : > { %8811 = vrcp.f32 %v6169_v6  ;;  %v6224_v45 = vmul.f32 1.442695, %v6217_v35 }
 0xf8b   : > { %8813 = vpow2.f32 %v6218_v49 }
 0xf8c   : > { %v8806_v53 = vpop.eup %8805  ;;  %8815 = vpow2.f32 %v6220_v19 }
 0xf8d   : > { %v6174_v38 = vmul.f32 1.0614054, %v8806_v53  ;;  %8817 = vpow2.f32 %v6222_v57 }
 0xf8e   : > { %v8808_v44 = vpop.eup %8807  ;;  %8819 = vpow2.f32 %v6224_v45 }
 0xf8f   : > { %v6175_v46 = vmul.f32 1.0614054, %v8808_v44  ;;  %v6178_v55 = vadd.f32 -1.4531521, %v6174_v38 }
 0xf90   : > { %v8810_v62 = vpop.eup %8809 }
 0xf91   : > { %v6176_v58 = vmul.f32 1.0614054, %v8810_v62  ;;  %v6179_v61 = vadd.f32 -1.4531521, %v6175_v46  ;;  %v6182_v25 = vmul.f32 %v8806_v53, %v6178_v55 }
 0xf93   : > { %v6180_v31 = vadd.f32 -1.4531521, %v6176_v58  ;;  %v6183_v0 = vmul.f32 %v8808_v44, %v6179_v61  ;;  %v6186_v56 = vadd.f32 1.4214138, %v6182_v25 }
 0xf94   : > { %v8812_v4 = vpop.eup %8811 }
 0xf95   : > { %v6184_v32 = vmul.f32 %v8810_v62, %v6180_v31  ;;  %v6187_v24 = vadd.f32 1.4214138, %v6183_v0  ;;  %v6190_v39 = vmul.f32 %v8806_v53, %v6186_v56  ;;  %v6177_v18 = vmul.f32 1.0614054, %v8812_v4  ;;  %v8814_v6 = vpop.eup %8813 }
 0xf96   : > { %v8816_v21 = vpop.eup %8815 }
 0xf97   : > { %v6188_v23 = vadd.f32 1.4214138, %v6184_v32  ;;  %v6191_v14 = vmul.f32 %v8808_v44, %v6187_v24  ;;  %v6194_v10 = vadd.f32 -0.28449672, %v6190_v39  ;;  %v6181_v54 = vadd.f32 -1.4531521, %v6177_v18  ;;  %v8818_v46 = vpop.eup %8817 }
 0xf98   : > { %v8820_v56 = vpop.eup %8819  ;;  %v6143_v32 = vmul.f32 0.5, %v13203_v12  ;;  %v6144_v18 = vmul.f32 0.5, %v13208_v2 }
 0xf99   : > { %v6192_v41 = vmul.f32 %v8810_v62, %v6188_v23  ;;  %v6195_v5 = vadd.f32 -0.28449672, %v6191_v14  ;;  %v6198_v3 = vmul.f32 %v8806_v53, %v6194_v10  ;;  %v6185_v27 = vmul.f32 %v8812_v4, %v6181_v54 }
 0xf9a   : > { %v6157_v54 = vsel %vm6153_vm1, 1.0, %v8898_v17 }
 0xf9b   : > { %v6196_v42 = vadd.f32 -0.28449672, %v6192_v41  ;;  %v6199_v47 = vmul.f32 %v8808_v44, %v6195_v5  ;;  %v6202_v37 = vadd.f32 0.2548296, %v6198_v3  ;;  %v6189_v43 = vadd.f32 1.4214138, %v6185_v27 }
 0xf9c   : > { %v6145_v3 = vmul.f32 0.5, %v13219_v36  ;;  %v8544_v36 = vld [vmem:[%s13555_s9] sm:$0xff]  }
 0xf9d   : > { %v6200_v63 = vmul.f32 %v8810_v62, %v6196_v42  ;;  %v6203_v40 = vadd.f32 0.2548296, %v6199_v47  ;;  %v6206_v9 = vmul.f32 %v8806_v53, %v6202_v37  ;;  %v6193_v59 = vmul.f32 %v8812_v4, %v6189_v43 }
 0xf9e   : > { %v6154_v53 = vsel %vm6150_vm5, 1.0, %v8898_v17 }
 0xf9f   : > { %v6204_v29 = vadd.f32 0.2548296, %v6200_v63  ;;  %v6207_v1 = vmul.f32 %v8808_v44, %v6203_v40  ;;  %v6226_v33 = vmul.f32 %v8814_v6, %v6206_v9  ;;  %v6197_v38 = vadd.f32 -0.28449672, %v6193_v59 }
 0xfa0   : > { %v6155_v44 = vsel %vm6151_vm9, 1.0, %v8898_v17  ;;  %vm14141_vm9 = vcmask 1043456  }
 0xfa1   : > { %v6208_v16 = vmul.f32 %v8810_v62, %v6204_v29  ;;  %v6227_v55 = vmul.f32 %v8816_v21, %v6207_v1  ;;  %v6230_v58 = vsub.f32 1.0, %v6226_v33  ;;  %v6201_v49 = vmul.f32 %v8812_v4, %v6197_v38  ;;  %v8545_v29 = vld [vmem:[%s13556_s10] sm:$0xff]   ;;  %v8546_v1 = vld [vmem:[%s13556_s10 + $0x8] sm:$0xff]   ;;  %v8547_v33 = vld [vmem:[%s13556_s10 + $0x10] sm:$0xff]  }
 0xfa2   : > { %v6156_v62 = vsel %vm6152_vm6, 1.0, %v8898_v17  ;;  %v8548_v38 = vld [vmem:[%s13556_s10 + $0x18] sm:$0xff]   ;;  %v8549_v21 = vld [vmem:[%s13556_s10 + $0x20] sm:$0xff]  }
 0xfa3   : > { %v6228_v34 = vmul.f32 %v8818_v46, %v6208_v16  ;;  %v6231_v61 = vsub.f32 1.0, %v6227_v55  ;;  %v6234_v25 = vmul.f32 %v6230_v58, %v6154_v53  ;;  %v6205_v31 = vadd.f32 0.2548296, %v6201_v49  ;;  %v8550_v49 = vld [vmem:[%s13556_s10 + $0x28] sm:$0xff]  }
 0xfa5   : > { %v6232_v19 = vsub.f32 1.0, %v6228_v34  ;;  %v6235_v57 = vmul.f32 %v6231_v61, %v6155_v44  ;;  %v6238_v51 = vadd.f32 1.0, %v6234_v25  ;;  %v6209_v0 = vmul.f32 %v8812_v4, %v6205_v31 }
 0xfa7   : > { %v6236_v30 = vmul.f32 %v6232_v19, %v6156_v62  ;;  %v6239_v35 = vadd.f32 1.0, %v6235_v57  ;;  %v6242_v24 = vmul.f32 %v6238_v51, %v6142_v20  ;;  %v6229_v39 = vmul.f32 %v8820_v56, %v6209_v0 }
 0xfa9   : > { %v6240_v26 = vadd.f32 1.0, %v6236_v30  ;;  %v6243_v23 = vmul.f32 %v6239_v35, %v6143_v32  ;;  %v6233_v14 = vsub.f32 1.0, %v6229_v39  ;;  %v6250_v41 = vrot.slane %v6242_v24, 1 }
 0xfab   : > { %v6244_v10 = vmul.f32 %v6240_v26, %v6144_v18  ;;  %v6251_v45 = vrot.slane %v6243_v23, 1  ;;  %v6237_v4 = vmul.f32 %v6233_v14, %v6157_v54 }
 0xfad   : > { %v6253_v5 = vrot.slane %v6244_v10, 1  ;;  %v6252_v12 = vsel %vm4700_vm12, %v6250_v41, %v6251_v45  ;;  %v6241_v27 = vadd.f32 1.0, %v6237_v4 }
 0xfae   : > { %v6262_v42 = vmax.f32 %v6242_v24, %v6252_v12 }
 0xfaf   : > { %v6254_v48 = vsel %vm4700_vm12, %v6251_v45, %v6253_v5  ;;  %v6245_v2 = vmul.f32 %v6241_v27, %v6145_v3 }
 0xfb0   : > { %v6263_v47 = vmax.f32 %v6243_v23, %v6254_v48 }
 0xfb1   : > { %v6255_v43 = vrot.slane %v6245_v2, 1 }
 0xfb2   : > { %v6268_v37 = vpack.c.bf16 %v6263_v47, %v6262_v42 }
 0xfb3   : > { %v6256_v63 = vsel %vm4700_vm12, %v6253_v5, %v6255_v43  ;;  %v6257_v40 = vsel %vm4700_vm12, %v6255_v43, %v13131_v15 }
 0xfb4   : > { %8069 = vmatpush3.bf16.msra.mxu0 %v6268_v37  ;;  %v6264_v9 = vmax.f32 %v6244_v10, %v6256_v63  ;;  %v6265_v59 = vmax.f32 %v6245_v2, %v6257_v40 }
 0xfb5   : > { %8070 = vmatprep.subr.bf16.mxu0 %v14138_v50 }
 0xfb6   : > { %v6269_v6 = vpack.c.bf16 %v6265_v59, %v6264_v9 }
 0xfb8   : > { %8071 = vmatpush3.bf16.msra.mxu0 %v6269_v6 }
 0xfb9   : > { %8076 = vmatprep.subr.bf16.mxu0 %v14138_v50 }
 0xfbb   : > { %8073 = vmatmul.mubr.msk.bf16.vlgmr.msra.gmra.mrb[52].mxu0 %vm5986_vm7, %v8544_v36 }
 0xfbc   : > { %8088 = vmatprep.mubr.msk.bf16.mxu0 %vm8902_vm11, %v14138_v50  ;;  %8077 = vmatpush3.bf16.msra.mxu0 %v8545_v29 }
 0xfbd   : > { %8078 = vmatprep.subr.bf16.mxu0 %v14138_v50 }
 0xfc0   : > { %8079 = vmatpush3.bf16.msra.mxu0 %v8546_v1 }
 0xfc1   : > { %8080 = vmatprep.subr.bf16.mxu0 %v14138_v50 }
 0xfc4   : > { %8081 = vmatpush3.bf16.msra.mxu0 %v8547_v33 }
 0xfc5   : > { %8082 = vmatprep.subr.bf16.mxu0 %v14138_v50 }
 0xfc8   : > { %8083 = vmatpush3.bf16.msra.mxu0 %v8548_v38 }
 0xfc9   : > { %8084 = vmatprep.subr.bf16.mxu0 %v14138_v50 }
 0xfcc   : > { %8085 = vmatpush3.bf16.msra.mxu0 %v8549_v21 }
 0xfcd   : > { %8086 = vmatprep.subr.bf16.mxu0 %v14138_v50 }
 0xfd0   : > { %8087 = vmatpush3.bf16.msra.mxu0 %v8550_v49 }
 0xfd1   : > { %8114 = vmatprep.subr.bf16.mxu0 %v14138_v50 }
0x108e   : > { %v6312_v16 = vpop.f32.mrb[52].mxu0 }
0x108f   : > { %v6321_v46 = vrot.slane %v6312_v16, 7  ;;  %v8074_v55 = vpop.f32.mrb[53].mxu0 }
0x1090   : > { %v6315_v58 = vpop.f32.mrb[54].mxu0  ;;  %v14140_v55 = vld [vmem:[#allocation12_spill] sm:$0xff] }
0x1091   : > { %v6327_v53 = vsel %vm4671_vm13, 0.0, %v6321_v46  ;;  %v6322_v34 = vrot.slane %v6315_v58, 7  ;;  %v8075_v61 = vpop.f32.mrb[55].mxu0  ;;  %v6480_v58 = vrot.slane %v13194_v60, %v14140_v55 }
0x1092   : > { %v6331_v25 = vrot.slane %v6327_v53, 1  ;;  %v6342_v31 = vrot.slane %v6327_v53, 2 }
0x1093   : > { %v6323_v20 = vsel %vm4671_vm13, %v6321_v46, %v6322_v34  ;;  %v6328_v44 = vsel %vm4671_vm13, %v6322_v34, 0.0  ;;  %v6486_v34 = vrot.slane %v13194_v60, %v4500_v22 }
0x1094   : > { %v6332_v19 = vrot.slane %v6323_v20, 1  ;;  %v6334_v62 = vrot.slane %v6328_v44, 1  ;;  %v6343_v57 = vrot.slane %v6323_v20, 2  ;;  %v6345_v51 = vrot.slane %v6328_v44, 2 }
0x1096   : > { %v6333_v0 = vsel %vm4700_vm12, %v6331_v25, %v6332_v19  ;;  %v6335_v56 = vsel %vm4700_vm12, %v6332_v19, %v6334_v62  ;;  %v6344_v32 = vsel %vm4742_vm3, %v6342_v31, %v6343_v57  ;;  %v6346_v30 = vsel %vm4742_vm3, %v6343_v57, %v6345_v51 }
0x1097   : > { %v8430_v35 = vpack.i.bf16 %v6335_v56, %v6333_v0  ;;  %v8435_v24 = vpack.i.bf16 %v6346_v30, %v6344_v32 }
0x1099   : > { %8431 = vrot.lane.b32.xlu0 %v8430_v35, %s8901_s26  ;;  %8436 = vrot.lane.b32.xlu1 %v8435_v24, %s8903_s25 }
0x110b   : > { %v8432_v39 = vpop.permute.xlu0 %8431  ;;  %v8437_v18 = vpop.permute.xlu1 %8436 }
0x110c   : > { %v8434_v26 = vunpack.i.h.bf16 %v8432_v39  ;;  %v8433_v23 = vunpack.i.l.bf16 %v8432_v39  ;;  %v8439_v14 = vunpack.i.h.bf16 %v8437_v18  ;;  %v8438_v10 = vunpack.i.l.bf16 %v8437_v18 }
0x110e   : > { %v6354_v54 = vsel %vm5986_vm7, %v6323_v20, %v8434_v26  ;;  %v6353_v41 = vsel %vm5986_vm7, %v6327_v53, %v8433_v23 }
0x110f   : > { %v6355_v45 = vsel %vm5864_vm0, %v6353_v41, %v8438_v10  ;;  %v6356_v4 = vsel %vm5864_vm0, %v6354_v54, %v8439_v14 }
0x1110   : > { %v6357_v5 = vpack.c.bf16 %v6356_v4, %v6355_v45 }
0x1112   : > { %8089 = vmatmul.mubr.msk.bf16.vlgmr.msra.gmra.mrb[56].mxu0 %vm6406_vm2, %v6357_v5 }
0x1113   : > { %8116 = vmatprep.mubr.msk.bf16.mxu0 %vm8902_vm11, %v14138_v50 }
0x11e5   : > { %v6444_v12 = vpop.f32.mrb[56].mxu0 }
0x11e6   : > { %v8090_v3 = vpop.f32.mrb[57].mxu0  ;;  %v6451_v27 = vsel %vm5986_vm7, %v6444_v12, 0.0 }
0x11e7   : > { %6452 = vadd.xlane.f32.xlu1 %v6451_v27  ;;  %v6447_v48 = vpop.f32.mrb[58].mxu0 }
0x11e8   : > { %v8091_v42 = vpop.f32.mrb[59].mxu0  ;;  %v6454_v47 = vsel %vm5986_vm7, %v6447_v48, 0.0 }
0x11e9   : > { %6455 = vadd.xlane.f32.xlu0 %v6454_v47 }
0x1274   : > { %v6453_v2 = vpop.xlane.xlu1 %6452 }
0x1275   : > { %v6457_v37 = vmul.f32 0.03125, %v6453_v2 }
0x1276   : > { %v6456_v43 = vpop.xlane.xlu0 %6455 }
0x1277   : > { %v6459_v63 = vsub.f32 %v6444_v12, %v6457_v37  ;;  %v6458_v40 = vmul.f32 0.03125, %v6456_v43 }
0x1279   : > { %v6460_v9 = vsub.f32 %v6447_v48, %v6458_v40  ;;  %v6461_v59 = vmul.f32 %v6459_v63, %v6459_v63 }
0x127b   : > { %v6463_v6 = vsel %vm5986_vm7, %v6461_v59, 0.0  ;;  %v6462_v36 = vmul.f32 %v6460_v9, %v6460_v9 }
0x127c   : > { %6464 = vadd.xlane.f32.xlu0 %v6463_v6 }
0x127d   : > { %v6466_v29 = vsel %vm5986_vm7, %v6462_v36, 0.0 }
0x127e   : > { %6467 = vadd.xlane.f32.xlu1 %v6466_v29 }
0x1309   : > { %v6465_v1 = vpop.xlane.xlu0 %6464 }
0x130a   : > { %v6469_v33 = vmul.f32 0.03125, %v6465_v1 }
0x130b   : > { %v6468_v38 = vpop.xlane.xlu1 %6467 }
0x130c   : > { %v6471_v21 = vadd.f32 1e-05, %v6469_v33  ;;  %v6470_v16 = vmul.f32 0.03125, %v6468_v38 }
0x130e   : > { %8821 = vrsqrt.f32 %v6471_v21  ;;  %v6472_v46 = vadd.f32 1e-05, %v6470_v16 }
0x1310   : > { %8823 = vrsqrt.f32 %v6472_v46 }
0x1318   : > { %v8822_v49 = vpop.eup %8821 }
0x1319   : > { %v6475_v53 = vmul.f32 %v8822_v49, %v6459_v63 }
0x131a   : > { %v8824_v61 = vpop.eup %8823 }
0x131b   : > { %v6481_v25 = vmul.f32 %v6480_v58, %v6475_v53  ;;  %v6476_v31 = vmul.f32 %v8824_v61, %v6460_v9 }
0x131d   : > { %v6482_v20 = vmul.f32 %v6480_v58, %v6476_v31  ;;  %v6487_v44 = vadd.f32 %v6486_v34, %v6481_v25 }
0x131f   : > { %v6488_v19 = vadd.f32 %v6486_v34, %v6482_v20  ;;  %v6491_v62 = vmul.f32 0.70710677, %v6487_v44  ;;  %v6489_v55 = vmul.f32 0.5, %v6487_v44  ;;  %v6551_v44 = vld [vmem:[%s13557_s11] sm:$0xf] }
0x1321   : > { %v6492_v57 = vmul.f32 0.70710677, %v6488_v19  ;;  %v6497_v51 = vand.u32 2147483647, %v6491_v62  ;;  %vm6493_vm15 = vcmp.ge.f32.partialorder %v6491_v62, 0.0  ;;  %v6490_v53 = vmul.f32 0.5, %v6488_v19 }
0x1322   : > { %v6495_v38 = vsel %vm6493_vm15, 1.0, %v8898_v17  ;;  %v8551_v19 = vld [vmem:[%s13558_s12] sm:$0xff]  }
0x1323   : > { %v6498_v0 = vand.u32 2147483647, %v6492_v57  ;;  %v6499_v56 = vmul.f32 0.3275911, %v6497_v51  ;;  %v6523_v24 = vsub.f32 0.0, %v6497_v51  ;;  %vm6494_vm14 = vcmp.ge.f32.partialorder %v6492_v57, 0.0 }
0x1324   : > { %v6496_v46 = vsel %vm6494_vm14, 1.0, %v8898_v17 }
0x1325   : > { %v6500_v32 = vmul.f32 0.3275911, %v6498_v0  ;;  %v6501_v30 = vadd.f32 1.0, %v6499_v56  ;;  %v6524_v39 = vsub.f32 0.0, %v6498_v0  ;;  %v6525_v22 = vmul.f32 %v6523_v24, %v6497_v51  ;;  %v8556_v24 = vld [vmem:[%s13558_s12 + $0x28] sm:$0xff]  }
0x1327   : > { %v6502_v35 = vadd.f32 1.0, %v6500_v32  ;;  %8825 = vrcp.f32 %v6501_v30  ;;  %v6526_v14 = vmul.f32 %v6524_v39, %v6498_v0  ;;  %v6527_v41 = vmul.f32 1.442695, %v6525_v22  ;;  %v8553_v32 = vld [vmem:[%s13558_s12 + $0x10] sm:$0xff]   ;;  %v8554_v30 = vld [vmem:[%s13558_s12 + $0x18] sm:$0xff]  }
0x1329   : > { %8827 = vrcp.f32 %v6502_v35  ;;  %v6529_v5 = vmul.f32 1.442695, %v6526_v14  ;;  %v8555_v35 = vld [vmem:[%s13558_s12 + $0x20] sm:$0xff]  }
0x132a   : > { %8829 = vpow2.f32 %v6527_v41 }
0x132b   : > { %8831 = vpow2.f32 %v6529_v5 }
0x1331   : > { %v8826_v18 = vpop.eup %8825 }
0x1332   : > { %v6505_v26 = vmul.f32 1.0614054, %v8826_v18 }
0x1333   : > { %v8828_v23 = vpop.eup %8827 }
0x1334   : > { %v6506_v10 = vmul.f32 1.0614054, %v8828_v23  ;;  %v6507_v54 = vadd.f32 -1.4531521, %v6505_v26  ;;  %v8830_v59 = vpop.eup %8829 }
0x1335   : > { %v8832_v29 = vpop.eup %8831 }
0x1336   : > { %v6508_v45 = vadd.f32 -1.4531521, %v6506_v10  ;;  %v6509_v4 = vmul.f32 %v8826_v18, %v6507_v54 }
0x1338   : > { %v6510_v12 = vmul.f32 %v8828_v23, %v6508_v45  ;;  %v6511_v3 = vadd.f32 1.4214138, %v6509_v4 }
0x133a   : > { %v6512_v27 = vadd.f32 1.4214138, %v6510_v12  ;;  %v6513_v48 = vmul.f32 %v8826_v18, %v6511_v3 }
0x133c   : > { %v6514_v42 = vmul.f32 %v8828_v23, %v6512_v27  ;;  %v6515_v47 = vadd.f32 -0.28449672, %v6513_v48 }
0x133e   : > { %v6516_v2 = vadd.f32 -0.28449672, %v6514_v42  ;;  %v6517_v37 = vmul.f32 %v8826_v18, %v6515_v47 }
0x1340   : > { %v6518_v43 = vmul.f32 %v8828_v23, %v6516_v2  ;;  %v6519_v63 = vadd.f32 0.2548296, %v6517_v37 }
0x1342   : > { %v6520_v40 = vadd.f32 0.2548296, %v6518_v43  ;;  %v6521_v9 = vmul.f32 %v8826_v18, %v6519_v63 }
0x1344   : > { %v6522_v6 = vmul.f32 %v8828_v23, %v6520_v40  ;;  %v6531_v36 = vmul.f32 %v8830_v59, %v6521_v9 }
0x1346   : > { %v6532_v1 = vmul.f32 %v8832_v29, %v6522_v6  ;;  %v6533_v33 = vsub.f32 1.0, %v6531_v36 }
0x1348   : > { %v6534_v21 = vsub.f32 1.0, %v6532_v1  ;;  %v6535_v16 = vmul.f32 %v6533_v33, %v6495_v38 }
0x134a   : > { %v6536_v58 = vmul.f32 %v6534_v21, %v6496_v46  ;;  %v6537_v49 = vadd.f32 1.0, %v6535_v16  ;;  %v6725_v21 = vrot.slane %v13194_v60, %v5005_v28 }
0x134c   : > { %v6538_v34 = vadd.f32 1.0, %v6536_v58  ;;  %v6539_v61 = vmul.f32 %v6537_v49, %v6489_v55  ;;  %v6730_v55 = vrot.slane %v13194_v60, %v5017_v8 }
0x134e   : > { %v6540_v25 = vmul.f32 %v6538_v34, %v6490_v53  ;;  %v6543_v31 = vrot.slane %v6539_v61, 1 }
0x1350   : > { %v6544_v20 = vrot.slane %v6540_v25, 1 }
0x1352   : > { %v6545_v62 = vsel %vm4700_vm12, %v6543_v31, %v6544_v20  ;;  %v6546_v57 = vsel %vm4700_vm12, %v6544_v20, %v13131_v15  ;;  %v8552_v15 = vld [vmem:[%s13558_s12 + $0x8] sm:$0xff]  }
0x1353   : > { %v6549_v51 = vmax.f32 %v6539_v61, %v6545_v62  ;;  %v6550_v0 = vmax.f32 %v6540_v25, %v6546_v57 }
0x1355   : > { %v6552_v56 = vpack.c.bf16 %v6550_v0, %v6549_v51 }
0x1357   : > { %8093 = vmatpush3.bf16.msra.mxu1 %v6552_v56 }
0x1358   : > { %8098 = vmatprep.subr.bf16.mxu1 %v14138_v50 }
0x135a   : > { %8095 = vmatmul.mubr.msk.bf16.vlgmr.msra.gmra.mrb[20].mxu1 %vm5361_vm8, %v6551_v44 }
0x135b   : > { %8110 = vmatprep.mubr.msk.bf16.mxu1 %vm8902_vm11, %v14138_v50  ;;  %8099 = vmatpush3.bf16.msra.mxu1 %v8551_v19 }
0x135c   : > { %8100 = vmatprep.subr.bf16.mxu1 %v14138_v50 }
0x135f   : > { %8101 = vmatpush3.bf16.msra.mxu1 %v8552_v15 }
0x1360   : > { %8102 = vmatprep.subr.bf16.mxu1 %v14138_v50 }
0x1363   : > { %8103 = vmatpush3.bf16.msra.mxu1 %v8553_v32 }
0x1364   : > { %8104 = vmatprep.subr.bf16.mxu1 %v14138_v50 }
0x1367   : > { %8105 = vmatpush3.bf16.msra.mxu1 %v8554_v30 }
0x1368   : > { %8106 = vmatprep.subr.bf16.mxu1 %v14138_v50 }
0x136b   : > { %8107 = vmatpush3.bf16.msra.mxu1 %v8555_v35 }
0x136c   : > { %8108 = vmatprep.subr.bf16.mxu1 %v14138_v50 }
0x136f   : > { %8109 = vmatpush3.bf16.msra.mxu1 %v8556_v24 }
0x142d   : > { %v6590_v39 = vpop.f32.mrb[20].mxu1 }
0x142e   : > { %v6597_v18 = vrot.slane %v6590_v39, 7  ;;  %v8096_v22 = vpop.f32.mrb[21].mxu1 }
0x142f   : > { %v6593_v26 = vpop.f32.mrb[22].mxu1 }
0x1430   : > { %v6599_v23 = vsel %vm4671_vm13, 0.0, %v6597_v18  ;;  %v6600_v14 = vsel %vm4671_vm13, %v6597_v18, 0.0  ;;  %v8097_v10 = vpop.f32.mrb[23].mxu1 }
0x1431   : > { %v6603_v54 = vrot.slane %v6599_v23, 1  ;;  %v6604_v41 = vrot.slane %v6600_v14, 1  ;;  %v6609_v45 = vrot.slane %v6599_v23, 2  ;;  %v6610_v4 = vrot.slane %v6600_v14, 2 }
0x1433   : > { %v6605_v5 = vsel %vm4700_vm12, %v6603_v54, %v6604_v41  ;;  %v6611_v12 = vsel %vm4742_vm3, %v6609_v45, %v6610_v4  ;;  %v8557_v54 = vld [vmem:[%s13559_s13] sm:$0xff]   ;;  %v8559_v45 = vld [vmem:[%s13560_s14 + $0x8] sm:$0xff]   ;;  %v8560_v4 = vld [vmem:[%s13560_s14 + $0x10] sm:$0xff]  }
0x1434   : > { %6606 = vrot.lane.b32.xlu0 %v6605_v5, %s8901_s26  ;;  %6612 = vrot.lane.b32.xlu1 %v6611_v12, %s8903_s25  ;;  %v8558_v41 = vld [vmem:[%s13560_s14] sm:$0xff]   ;;  %v8561_v5 = vld [vmem:[%s13560_s14 + $0x18] sm:$0xff]  }
0x1435   : > { %v8562_v12 = vld [vmem:[%s13560_s14 + $0x20] sm:$0xff]  }
0x14a6   : > { %v6607_v3 = vpop.permute.xlu0 %6606  ;;  %v6613_v27 = vpop.permute.xlu1 %6612 }
0x14a7   : > { %v6615_v48 = vsel %vm5986_vm7, %v6599_v23, %v6607_v3 }
0x14a8   : > { %v6616_v42 = vsel %vm5864_vm0, %v6615_v48, %v6613_v27 }
0x14a9   : > { %v6617_v47 = vpack.c.bf16 %v6616_v42, %v6616_v42 }
0x14ab   : > { %8111 = vmatmul.mubr.msk.bf16.vlgmr.msra.gmra.mrb[24].mxu1 %vm6406_vm2, %v6617_v47  ;;  %v8563_v47 = vld [vmem:[%s13560_s14 + $0x28] sm:$0xff]  }
0x157e   : > { %v6703_v2 = vpop.f32.mrb[24].mxu1 }
0x157f   : > { %v8112_v37 = vpop.f32.mrb[25].mxu1  ;;  %v6709_v43 = vsel %vm5986_vm7, %v6703_v2, 0.0 }
0x1580   : > { %6710 = vadd.xlane.f32.xlu1 %v6709_v43  ;;  %v6706_v63 = vpop.f32.mrb[26].mxu1 }
0x1581   : > { %v8113_v40 = vpop.f32.mrb[27].mxu1 }
0x160d   : > { %v6711_v9 = vpop.xlane.xlu1 %6710 }
0x160e   : > { %v6712_v59 = vmul.f32 0.03125, %v6711_v9 }
0x1610   : > { %v6713_v6 = vsub.f32 %v6703_v2, %v6712_v59 }
0x1612   : > { %v6714_v36 = vmul.f32 %v6713_v6, %v6713_v6 }
0x1614   : > { %v6715_v29 = vsel %vm5986_vm7, %v6714_v36, 0.0 }
0x1615   : > { %6716 = vadd.xlane.f32.xlu0 %v6715_v29 }
0x16a2   : > { %v6717_v1 = vpop.xlane.xlu0 %6716 }
0x16a3   : > { %v6718_v33 = vmul.f32 0.03125, %v6717_v1 }
0x16a5   : > { %v6719_v38 = vadd.f32 1e-05, %v6718_v33 }
0x16a7   : > { %8833 = vrsqrt.f32 %v6719_v38 }
0x16b1   : > { %v8834_v16 = vpop.eup %8833 }
0x16b2   : > { %v6721_v46 = vmul.f32 %v8834_v16, %v6713_v6 }
0x16b4   : > { %v6726_v58 = vmul.f32 %v6725_v21, %v6721_v46 }
0x16b6   : > { %v6731_v49 = vadd.f32 %v6730_v55, %v6726_v58 }
0x16b8   : > { %v6733_v53 = vmul.f32 0.70710677, %v6731_v49  ;;  %v6732_v22 = vmul.f32 0.5, %v6731_v49 }
0x16ba   : > { %v6736_v34 = vand.u32 2147483647, %v6733_v53  ;;  %vm6734_vm5 = vcmp.ge.f32.partialorder %v6733_v53, 0.0 }
0x16bb   : > { %v6735_v39 = vsel %vm6734_vm5, 1.0, %v8898_v17 }
0x16bc   : > { %v6737_v61 = vmul.f32 0.3275911, %v6736_v34  ;;  %v6749_v31 = vsub.f32 0.0, %v6736_v34 }
0x16be   : > { %v6738_v25 = vadd.f32 1.0, %v6737_v61  ;;  %v6750_v62 = vmul.f32 %v6749_v31, %v6736_v34 }
0x16c0   : > { %8835 = vrcp.f32 %v6738_v25  ;;  %v6751_v0 = vmul.f32 1.442695, %v6750_v62 }
0x16c2   : > { %8837 = vpow2.f32 %v6751_v0 }
0x16ca   : > { %v8836_v20 = vpop.eup %8835 }
0x16cb   : > { %v6740_v57 = vmul.f32 1.0614054, %v8836_v20 }
0x16cc   : > { %v8838_v30 = vpop.eup %8837 }
0x16cd   : > { %v6741_v51 = vadd.f32 -1.4531521, %v6740_v57 }
0x16cf   : > { %v6742_v28 = vmul.f32 %v8836_v20, %v6741_v51 }
0x16d1   : > { %v6743_v56 = vadd.f32 1.4214138, %v6742_v28 }
0x16d3   : > { %v6744_v44 = vmul.f32 %v8836_v20, %v6743_v56 }
0x16d5   : > { %v6745_v19 = vadd.f32 -0.28449672, %v6744_v44 }
0x16d7   : > { %v6746_v15 = vmul.f32 %v8836_v20, %v6745_v19 }
0x16d9   : > { %v6747_v8 = vadd.f32 0.2548296, %v6746_v15 }
0x16db   : > { %v6748_v32 = vmul.f32 %v8836_v20, %v6747_v8 }
0x16dd   : > { %v6753_v35 = vmul.f32 %v8838_v30, %v6748_v32 }
0x16df   : > { %v6754_v24 = vsub.f32 1.0, %v6753_v35 }
0x16e1   : > { %v6755_v18 = vmul.f32 %v6754_v24, %v6735_v39 }
0x16e3   : > { %v6756_v26 = vadd.f32 1.0, %v6755_v18 }
0x16e5   : > { %v6757_v23 = vmul.f32 %v6756_v26, %v6732_v22 }
0x16e7   : > { %v6760_v14 = vpack.c.bf16 %v6757_v23, %v6757_v23 }
0x16e9   : > { %v6770_v10 = vsel %vm14141_vm9, %v6760_v14, 0  ;;  %v8564_v14 = vld [vmem:[%s13561_s15] sm:$0xff]  }
0x16ea   : > { %8115 = vmatpush3.bf16.msra.mxu0 %v6770_v10  ;;  %8138 = vmatprep.mubr.msk.bf16.mxu1 %vm5361_vm8, %v8564_v14 }
0x16eb   : > { %8120 = vmatprep.subr.bf16.mxu0 %v14138_v50 }
0x16ed   : > { %8117 = vmatmul.mubr.msk.bf16.vlgmr.msra.gmra.mrb[60].mxu0 %vm4897_vm10, %v8557_v54 }
0x16ee   : > { %8132 = vmatprep.mubr.msk.bf16.mxu0 %vm8902_vm11, %v14138_v50  ;;  %8121 = vmatpush3.bf16.msra.mxu0 %v8558_v41 }
0x16ef   : > { %8122 = vmatprep.subr.bf16.mxu0 %v14138_v50 }
0x16f2   : > { %8123 = vmatpush3.bf16.msra.mxu0 %v8559_v45 }
0x16f3   : > { %8124 = vmatprep.subr.bf16.mxu0 %v14138_v50 }
0x16f6   : > { %8125 = vmatpush3.bf16.msra.mxu0 %v8560_v4 }
0x16f7   : > { %8126 = vmatprep.subr.bf16.mxu0 %v14138_v50 }
0x16fa   : > { %8127 = vmatpush3.bf16.msra.mxu0 %v8561_v5 }
0x16fb   : > { %8128 = vmatprep.subr.bf16.mxu0 %v14138_v50 }
0x16fe   : > { %8129 = vmatpush3.bf16.msra.mxu0 %v8562_v12  ;;  %v6973_v12 = vrot.slane %v13194_v60, %v5574_v7 }
0x16ff   : > { %8130 = vmatprep.subr.bf16.mxu0 %v14138_v50 }
0x1702   : > { %8131 = vmatpush3.bf16.msra.mxu0 %v8563_v47 }
0x17c0   : > { %v6806_v3 = vpop.f32.mrb[60].mxu0 }
0x17c1   : > { %v6815_v27 = vrot.slane %v6806_v3, 7  ;;  %v8118_v48 = vpop.f32.mrb[61].mxu0 }
0x17c2   : > { %v6809_v42 = vpop.f32.mrb[62].mxu0  ;;  %v6979_v48 = vrot.slane %v13194_v60, %v5586_v52 }
0x17c3   : > { %v6821_v2 = vsel %vm4671_vm13, 0.0, %v6815_v27  ;;  %v6816_v37 = vrot.slane %v6809_v42, 7  ;;  %v8119_v43 = vpop.f32.mrb[63].mxu0 }
0x17c4   : > { %v6825_v63 = vrot.slane %v6821_v2, 1  ;;  %v6836_v40 = vrot.slane %v6821_v2, 2 }
0x17c5   : > { %v6817_v9 = vsel %vm4671_vm13, %v6815_v27, %v6816_v37  ;;  %v6822_v59 = vsel %vm4671_vm13, %v6816_v37, 0.0 }
0x17c6   : > { %v6826_v6 = vrot.slane %v6817_v9, 1  ;;  %v6828_v36 = vrot.slane %v6822_v59, 1  ;;  %v6837_v29 = vrot.slane %v6817_v9, 2  ;;  %v6839_v1 = vrot.slane %v6822_v59, 2 }
0x17c8   : > { %v6827_v33 = vsel %vm4700_vm12, %v6825_v63, %v6826_v6  ;;  %v6829_v38 = vsel %vm4700_vm12, %v6826_v6, %v6828_v36  ;;  %v6838_v21 = vsel %vm4742_vm3, %v6836_v40, %v6837_v29  ;;  %v6840_v16 = vsel %vm4742_vm3, %v6837_v29, %v6839_v1 }
0x17c9   : > { %v8440_v46 = vpack.i.bf16 %v6829_v38, %v6827_v33  ;;  %v8445_v55 = vpack.i.bf16 %v6840_v16, %v6838_v21 }
0x17cb   : > { %8441 = vrot.lane.b32.xlu0 %v8440_v46, %s8901_s26  ;;  %8446 = vrot.lane.b32.xlu1 %v8445_v55, %s8903_s25 }
0x183d   : > { %v8442_v58 = vpop.permute.xlu0 %8441  ;;  %v8447_v49 = vpop.permute.xlu1 %8446 }
0x183e   : > { %v8444_v53 = vunpack.i.h.bf16 %v8442_v58  ;;  %v8443_v34 = vunpack.i.l.bf16 %v8442_v58  ;;  %v8449_v61 = vunpack.i.h.bf16 %v8447_v49  ;;  %v8448_v25 = vunpack.i.l.bf16 %v8447_v49 }
0x1840   : > { %v6848_v31 = vsel %vm5986_vm7, %v6817_v9, %v8444_v53  ;;  %v6847_v20 = vsel %vm5986_vm7, %v6821_v2, %v8443_v34 }
0x1841   : > { %v6849_v62 = vsel %vm5864_vm0, %v6847_v20, %v8448_v25  ;;  %v6850_v57 = vsel %vm5864_vm0, %v6848_v31, %v8449_v61 }
0x1842   : > { %v6851_v51 = vpack.c.bf16 %v6850_v57, %v6849_v62 }
0x1844   : > { %8133 = vmatmul.mubr.msk.bf16.vlgmr.msra.gmra.mrb[64].mxu0 %vm6406_vm2, %v6851_v51 }
0x1917   : > { %v6937_v0 = vpop.f32.mrb[64].mxu0 }
0x1918   : > { %v8134_v28 = vpop.f32.mrb[65].mxu0  ;;  %v6944_v56 = vsel %vm5361_vm8, %v6937_v0, 0.0 }
0x1919   : > { %6945 = vadd.xlane.f32.xlu1 %v6944_v56  ;;  %v6940_v44 = vpop.f32.mrb[66].mxu0 }
0x191a   : > { %v8135_v19 = vpop.f32.mrb[67].mxu0  ;;  %v6947_v15 = vsel %vm5361_vm8, %v6940_v44, 0.0 }
0x191b   : > { %6948 = vadd.xlane.f32.xlu0 %v6947_v15 }
0x19a6   : > { %v6946_v8 = vpop.xlane.xlu1 %6945 }
0x19a7   : > { %v6950_v32 = vmul.f32 0.0625, %v6946_v8 }
0x19a8   : > { %v6949_v30 = vpop.xlane.xlu0 %6948 }
0x19a9   : > { %v6952_v35 = vsub.f32 %v6937_v0, %v6950_v32  ;;  %v6951_v24 = vmul.f32 0.0625, %v6949_v30 }
0x19ab   : > { %v6953_v39 = vsub.f32 %v6940_v44, %v6951_v24  ;;  %v6954_v18 = vmul.f32 %v6952_v35, %v6952_v35 }
0x19ad   : > { %v6956_v22 = vsel %vm5361_vm8, %v6954_v18, 0.0  ;;  %v6955_v26 = vmul.f32 %v6953_v39, %v6953_v39 }
0x19ae   : > { %6957 = vadd.xlane.f32.xlu0 %v6956_v22 }
0x19af   : > { %v6959_v23 = vsel %vm5361_vm8, %v6955_v26, 0.0 }
0x19b0   : > { %6960 = vadd.xlane.f32.xlu1 %v6959_v23 }
0x1a3b   : > { %v6958_v10 = vpop.xlane.xlu0 %6957 }
0x1a3c   : > { %v6962_v54 = vmul.f32 0.0625, %v6958_v10 }
0x1a3d   : > { %v6961_v41 = vpop.xlane.xlu1 %6960 }
0x1a3e   : > { %v6964_v45 = vadd.f32 1e-05, %v6962_v54  ;;  %v6963_v4 = vmul.f32 0.0625, %v6961_v41 }
0x1a40   : > { %8839 = vrsqrt.f32 %v6964_v45  ;;  %v6965_v5 = vadd.f32 1e-05, %v6963_v4 }
0x1a42   : > { %8841 = vrsqrt.f32 %v6965_v5 }
0x1a4a   : > { %v8840_v3 = vpop.eup %8839 }
0x1a4b   : > { %v6968_v27 = vmul.f32 %v8840_v3, %v6952_v35  ;;  %v8565_v3 = vld [vmem:[%s13561_s15 + $0x8] sm:$0xff]  }
0x1a4c   : > { %v8842_v42 = vpop.eup %8841 }
0x1a4d   : > { %v6969_v47 = vmul.f32 %v8842_v42, %v6953_v39  ;;  %v6974_v2 = vmul.f32 %v6973_v12, %v6968_v27 }
0x1a4f   : > { %v6975_v37 = vmul.f32 %v6973_v12, %v6969_v47  ;;  %v6980_v43 = vadd.f32 %v6979_v48, %v6974_v2  ;;  %v8566_v2 = vld [vmem:[%s13562_s16] sm:$0xff]  }
0x1a51   : > { %v6981_v63 = vadd.f32 %v6979_v48, %v6975_v37  ;;  %v6984_v40 = vmul.f32 0.70710677, %v6980_v43  ;;  %v6982_v54 = vmul.f32 0.5, %v6980_v43 }
0x1a53   : > { %v6985_v9 = vmul.f32 0.70710677, %v6981_v63  ;;  %v6990_v59 = vand.u32 2147483647, %v6984_v40  ;;  %vm6986_vm0 = vcmp.ge.f32.partialorder %v6984_v40, 0.0  ;;  %v6983_v41 = vmul.f32 0.5, %v6981_v63 }
0x1a54   : > { %v6988_v18 = vsel %vm6986_vm0, 1.0, %v8898_v17 }
0x1a55   : > { %v6991_v6 = vand.u32 2147483647, %v6985_v9  ;;  %v6992_v36 = vmul.f32 0.3275911, %v6990_v59  ;;  %v7016_v33 = vsub.f32 0.0, %v6990_v59  ;;  %vm6987_vm6 = vcmp.ge.f32.partialorder %v6985_v9, 0.0 }
0x1a56   : > { %v6989_v23 = vsel %vm6987_vm6, 1.0, %v8898_v17 }
0x1a57   : > { %v6993_v29 = vmul.f32 0.3275911, %v6991_v6  ;;  %v6994_v1 = vadd.f32 1.0, %v6992_v36  ;;  %v7017_v38 = vsub.f32 0.0, %v6991_v6  ;;  %v7018_v52 = vmul.f32 %v7016_v33, %v6990_v59 }
0x1a59   : > { %v6995_v7 = vadd.f32 1.0, %v6993_v29  ;;  %8843 = vrcp.f32 %v6994_v1  ;;  %v7019_v46 = vmul.f32 %v7017_v38, %v6991_v6  ;;  %v7020_v49 = vmul.f32 1.442695, %v7018_v52  ;;  %v8567_v38 = vld [vmem:[%s13562_s16 + $0x8] sm:$0xff]  }
0x1a5b   : > { %8845 = vrcp.f32 %v6995_v7  ;;  %v7022_v61 = vmul.f32 1.442695, %v7019_v46 }
0x1a5c   : > { %8847 = vpow2.f32 %v7020_v49 }
0x1a5d   : > { %8849 = vpow2.f32 %v7022_v61 }
0x1a63   : > { %v8844_v21 = vpop.eup %8843 }
0x1a64   : > { %v6998_v60 = vmul.f32 1.0614054, %v8844_v21 }
0x1a65   : > { %v8846_v16 = vpop.eup %8845 }
0x1a66   : > { %v6999_v55 = vmul.f32 1.0614054, %v8846_v16  ;;  %v7000_v58 = vadd.f32 -1.4531521, %v6998_v60  ;;  %v8848_v8 = vpop.eup %8847 }
0x1a67   : > { %v8850_v35 = vpop.eup %8849 }
0x1a68   : > { %v7001_v53 = vadd.f32 -1.4531521, %v6999_v55  ;;  %v7002_v34 = vmul.f32 %v8844_v21, %v7000_v58 }
0x1a6a   : > { %v7003_v25 = vmul.f32 %v8846_v16, %v7001_v53  ;;  %v7004_v31 = vadd.f32 1.4214138, %v7002_v34 }
0x1a6c   : > { %v7005_v20 = vadd.f32 1.4214138, %v7003_v25  ;;  %v7006_v62 = vmul.f32 %v8844_v21, %v7004_v31  ;;  %v8568_v25 = vld [vmem:[%s13562_s16 + $0x10] sm:$0xff]  }
0x1a6e   : > { %v7007_v57 = vmul.f32 %v8846_v16, %v7005_v20  ;;  %v7008_v51 = vadd.f32 -0.28449672, %v7006_v62 }
0x1a70   : > { %v7009_v0 = vadd.f32 -0.28449672, %v7007_v57  ;;  %v7010_v28 = vmul.f32 %v8844_v21, %v7008_v51 }
0x1a72   : > { %v7011_v56 = vmul.f32 %v8846_v16, %v7009_v0  ;;  %v7012_v44 = vadd.f32 0.2548296, %v7010_v28 }
0x1a74   : > { %v7013_v19 = vadd.f32 0.2548296, %v7011_v56  ;;  %v7014_v15 = vmul.f32 %v8844_v21, %v7012_v44 }
0x1a76   : > { %v7015_v32 = vmul.f32 %v8846_v16, %v7013_v19  ;;  %v7024_v30 = vmul.f32 %v8848_v8, %v7014_v15 }
0x1a78   : > { %v7025_v24 = vmul.f32 %v8850_v35, %v7015_v32  ;;  %v7026_v39 = vsub.f32 1.0, %v7024_v30 }
0x1a7a   : > { %v7027_v22 = vsub.f32 1.0, %v7025_v24  ;;  %v7028_v26 = vmul.f32 %v7026_v39, %v6988_v18 }
0x1a7c   : > { %v7029_v14 = vmul.f32 %v7027_v22, %v6989_v23  ;;  %v7030_v10 = vadd.f32 1.0, %v7028_v26 }
0x1a7e   : > { %v7031_v45 = vadd.f32 1.0, %v7029_v14  ;;  %v7032_v4 = vmul.f32 %v7030_v10, %v6982_v54 }
0x1a80   : > { %v7033_v5 = vmul.f32 %v7031_v45, %v6983_v41 }
0x1a82   : > { %v7038_v12 = vpack.c.bf16 %v7033_v5, %v7032_v4 }
0x1a84   : > { %8136 = vmatprep.subr.bf16.mxu1 %v7038_v12 }
0x1a85   : > { %8137 = vmatpush3.bf16.msra.mxu1 %v7038_v12 }
0x1a86   : > { %8142 = vmatprep.subr.bf16.mxu1 %v8566_v2 }
0x1a88   : > { %8139 = vmatmul.mubr.msk.bf16.vlgmr.msra.gmra.mrb[28].mxu1 %vm5361_vm8, %v8565_v3 }
0x1a89   : > { %8143 = vmatpush3.bf16.msra.mxu1 %v8566_v2 }
0x1a8a   : > { %8144 = vmatprep.subr.bf16.mxu1 %v8567_v38 }
0x1a8d   : > { %8145 = vmatpush3.bf16.msra.mxu1 %v8567_v38 }
0x1a8e   : > { %8146 = vmatprep.subr.bf16.mxu1 %v8568_v25 }
0x1a91   : > { %8147 = vmatpush3.bf16.msra.mxu1 %v8568_v25 }
0x1a92   : > { %8164 = vmatprep.subr.bf16.mxu1 %v14138_v50 }
0x1b5b   : > { %v8140_v27 = vpop.f32.mrb[28].mxu1 }
0x1b5c   : > { %v7089_v48 = vpop.f32.mrb[29].mxu1  ;;  %v7111_v37 = vrot.slane %v8140_v27, 7 }
0x1b5d   : > { %v7108_v42 = vrot.slane %v7089_v48, 7  ;;  %v8141_v47 = vpop.f32.mrb[30].mxu1 }
0x1b5e   : > { %v7113_v43 = vrot.slane %v8141_v47, 7  ;;  %v7092_v63 = vpop.f32.mrb[31].mxu1 }
0x1b5f   : > { %v7120_v40 = vsel %vm4671_vm13, 0.0, %v7108_v42  ;;  %v7109_v9 = vrot.slane %v7092_v63, 7 }
0x1b60   : > { %v7114_v59 = vsel %vm4671_vm13, %v7111_v37, %v7113_v43  ;;  %v7121_v6 = vsel %vm4671_vm13, %v7113_v43, 0.0  ;;  %v7124_v1 = vrot.slane %v7120_v40, 1  ;;  %v7145_v55 = vrot.slane %v7120_v40, 2 }
0x1b61   : > { %v7129_v36 = vrot.slane %v7114_v59, 1  ;;  %v7131_v29 = vrot.slane %v7121_v6, 1  ;;  %v7110_v7 = vsel %vm4671_vm13, %v7108_v42, %v7109_v9  ;;  %v7112_v33 = vsel %vm4671_vm13, %v7109_v9, %v7111_v37 }
0x1b62   : > { %v7125_v21 = vrot.slane %v7110_v7, 1  ;;  %v7127_v52 = vrot.slane %v7112_v33, 1  ;;  %v7146_v60 = vrot.slane %v7110_v7, 2  ;;  %v7148_v16 = vrot.slane %v7112_v33, 2 }
0x1b63   : > { %v7132_v46 = vsel %vm4700_vm12, %v7129_v36, %v7131_v29  ;;  %v7150_v31 = vrot.slane %v7114_v59, 2  ;;  %v7152_v20 = vrot.slane %v7121_v6, 2 }
0x1b64   : > { %v7130_v58 = vsel %vm4700_vm12, %v7127_v52, %v7129_v36  ;;  %v7126_v49 = vsel %vm4700_vm12, %v7124_v1, %v7125_v21  ;;  %v7128_v53 = vsel %vm4700_vm12, %v7125_v21, %v7127_v52  ;;  %v7147_v62 = vsel %vm4742_vm3, %v7145_v55, %v7146_v60 }
0x1b65   : > { %v8455_v34 = vpack.i.bf16 %v7132_v46, %v7130_v58  ;;  %v8450_v61 = vpack.i.bf16 %v7128_v53, %v7126_v49  ;;  %v7149_v57 = vsel %vm4742_vm3, %v7146_v60, %v7148_v16  ;;  %v7151_v0 = vsel %vm4742_vm3, %v7148_v16, %v7150_v31 }
0x1b66   : > { %v8460_v51 = vpack.i.bf16 %v7149_v57, %v7147_v62  ;;  %v7153_v28 = vsel %vm4742_vm3, %v7150_v31, %v7152_v20 }
0x1b67   : > { %8456 = vrot.lane.b32.xlu1 %v8455_v34, %s14142_s21  ;;  %8451 = vrot.lane.b32.xlu0 %v8450_v61, %s14142_s21  ;;  %v8465_v56 = vpack.i.bf16 %v7153_v28, %v7151_v0  ;;  %v8569_v61 = vld [vmem:[%s13563_s17] sm:$0xff]   ;;  %s624_s21 = scalar_lea.vmem %s13566_s20, %s14143_s29 }
0x1b68   : > { %8156 = vmatprep.mubr.msk.bf16.mxu0 %vm5986_vm7, %v8569_v61 }
0x1b6b   : > { %8461 = vrot.lane.b32.xlu1 %v8460_v51, %s8901_s26 }
0x1b6f   : > { %8466 = vrot.lane.b32.xlu1 %v8465_v56, %s8901_s26 }
0x1bd9   : > { %v8457_v44 = vpop.permute.xlu1 %8456  ;;  %v8452_v19 = vpop.permute.xlu0 %8451 }
0x1bda   : > { %v8454_v15 = vunpack.i.h.bf16 %v8452_v19  ;;  %v8453_v8 = vunpack.i.l.bf16 %v8452_v19  ;;  %v8459_v24 = vunpack.i.h.bf16 %v8457_v44  ;;  %v8458_v39 = vunpack.i.l.bf16 %v8457_v44 }
0x1bdc   : > { %v7167_v18 = vsel %vm5361_vm8, %v7110_v7, %v8454_v15  ;;  %v7166_v22 = vsel %vm5361_vm8, %v7120_v40, %v8453_v8  ;;  %v7169_v45 = vsel %vm5361_vm8, %v7114_v59, %v8459_v24  ;;  %v7168_v4 = vsel %vm5361_vm8, %v7112_v33, %v8458_v39  ;;  %v8879_v8 = vld [vmem:[%s13786_s30 + $0x10] sm:$0xff]  ;;  %v7903_v39 = vld [vmem:[%s13786_s30 + $0x20] ss:$0 sm:$0xff] }
0x1bdd   : > { %v8462_v32 = vpop.permute.xlu1 %8461 }
0x1bde   : > { %v8464_v30 = vunpack.i.h.bf16 %v8462_v32  ;;  %v8463_v35 = vunpack.i.l.bf16 %v8462_v32  ;;  %v7310_v32 = vrot.slane %v8879_v8, %v6128_v11 }
0x1be0   : > { %v7170_v26 = vsel %vm5986_vm7, %v7166_v22, %v8463_v35  ;;  %v7171_v23 = vsel %vm5986_vm7, %v7167_v18, %v8464_v30 }
0x1be1   : > { %v7174_v14 = vpack.c.bf16 %v7171_v23, %v7170_v26  ;;  %v8467_v10 = vpop.permute.xlu1 %8466 }
0x1be2   : > { %v8469_v54 = vunpack.i.h.bf16 %v8467_v10  ;;  %v8468_v41 = vunpack.i.l.bf16 %v8467_v10 }
0x1be3   : > { %8148 = vmatprep.mubr.msk.bf16.mxu1 %vm6017_vm4, %v7174_v14 }
0x1be4   : > { %v7173_v5 = vsel %vm5986_vm7, %v7169_v45, %v8469_v54  ;;  %v7172_v12 = vsel %vm5986_vm7, %v7168_v4, %v8468_v41 }
0x1be5   : > { %v7175_v3 = vpack.c.bf16 %v7173_v5, %v7172_v12 }
0x1be7   : > { %8149 = vmatmul.mubr.msk.bf16.vlgmr.msra.gmra.mrb[32].mxu1 %vm6017_vm4, %v7175_v3 }
0x1be8   : > { %8172 = vmatprep.mubr.msk.bf16.mxu1 %vm8902_vm11, %v14138_v50 }
0x1cba   : > { %v8150_v27 = vpop.f32.mrb[32].mxu1 }
0x1cbb   : > { %v7240_v48 = vpop.f32.mrb[33].mxu1  ;;  %v7261_v43 = vsel %vm4897_vm10, %v8150_v27, 0.0 }
0x1cbc   : > { %v8151_v42 = vpop.f32.mrb[34].mxu1  ;;  %v7255_v47 = vsel %vm4897_vm10, %v7240_v48, 0.0 }
0x1cbd   : > { %7256 = vadd.xlane.f32.xlu0 %v7255_v47  ;;  %v7243_v2 = vpop.f32.mrb[35].mxu1  ;;  %v7264_v63 = vsel %vm4897_vm10, %v8151_v42, 0.0 }
0x1cbe   : > { %v7258_v37 = vsel %vm4897_vm10, %v7243_v2, 0.0 }
0x1cbf   : > { %7259 = vadd.xlane.f32.xlu1 %v7258_v37 }
0x1cc1   : > { %7262 = vadd.xlane.f32.xlu0 %v7261_v43 }
0x1cc5   : > { %7265 = vadd.xlane.f32.xlu0 %v7264_v63 }
0x1d4a   : > { %v7257_v40 = vpop.xlane.xlu0 %7256 }
0x1d4b   : > { %v7267_v9 = vmul.f32 0.125, %v7257_v40 }
0x1d4c   : > { %v7260_v59 = vpop.xlane.xlu1 %7259 }
0x1d4d   : > { %v7271_v6 = vsub.f32 %v7240_v48, %v7267_v9  ;;  %v7268_v36 = vmul.f32 0.125, %v7260_v59 }
0x1d4e   : > { %v7263_v29 = vpop.xlane.xlu0 %7262 }
0x1d4f   : > { %v7272_v1 = vsub.f32 %v7243_v2, %v7268_v36  ;;  %v7269_v7 = vmul.f32 0.125, %v7263_v29  ;;  %v7275_v33 = vmul.f32 %v7271_v6, %v7271_v6 }
0x1d51   : > { %v7273_v38 = vsub.f32 %v8150_v27, %v7269_v7  ;;  %v7279_v21 = vsel %vm4897_vm10, %v7275_v33, 0.0  ;;  %v7276_v52 = vmul.f32 %v7272_v1, %v7272_v1 }
0x1d52   : > { %7280 = vadd.xlane.f32.xlu0 %v7279_v21  ;;  %v7266_v60 = vpop.xlane.xlu0 %7265 }
0x1d53   : > { %v7270_v16 = vmul.f32 0.125, %v7266_v60  ;;  %v7282_v46 = vsel %vm4897_vm10, %v7276_v52, 0.0  ;;  %v7277_v55 = vmul.f32 %v7273_v38, %v7273_v38 }
0x1d54   : > { %7283 = vadd.xlane.f32.xlu1 %v7282_v46 }
0x1d55   : > { %v7274_v58 = vsub.f32 %v8151_v42, %v7270_v16  ;;  %v7285_v49 = vsel %vm4897_vm10, %v7277_v55, 0.0 }
0x1d56   : > { %7286 = vadd.xlane.f32.xlu0 %v7285_v49 }
0x1d57   : > { %v7278_v53 = vmul.f32 %v7274_v58, %v7274_v58 }
0x1d59   : > { %v7288_v34 = vsel %vm4897_vm10, %v7278_v53, 0.0 }
0x1d5a   : > { %7289 = vadd.xlane.f32.xlu1 %v7288_v34 }
0x1ddf   : > { %v7281_v25 = vpop.xlane.xlu0 %7280 }
0x1de0   : > { %v7291_v31 = vmul.f32 0.125, %v7281_v25 }
0x1de1   : > { %v7284_v20 = vpop.xlane.xlu1 %7283 }
0x1de2   : > { %v7295_v62 = vadd.f32 1e-05, %v7291_v31  ;;  %v7292_v57 = vmul.f32 0.125, %v7284_v20 }
0x1de3   : > { %v7287_v51 = vpop.xlane.xlu0 %7286 }
0x1de4   : > { %8851 = vrsqrt.f32 %v7295_v62  ;;  %v7296_v0 = vadd.f32 1e-05, %v7292_v57  ;;  %v7293_v28 = vmul.f32 0.125, %v7287_v51 }
0x1de6   : > { %8853 = vrsqrt.f32 %v7296_v0  ;;  %v7297_v56 = vadd.f32 1e-05, %v7293_v28 }
0x1de7   : > { %v7290_v44 = vpop.xlane.xlu1 %7289 }
0x1de8   : > { %8855 = vrsqrt.f32 %v7297_v56  ;;  %v7294_v19 = vmul.f32 0.125, %v7290_v44 }
0x1dea   : > { %v7298_v15 = vadd.f32 1e-05, %v7294_v19 }
0x1dec   : > { %8857 = vrsqrt.f32 %v7298_v15 }
0x1dee   : > { %v8852_v30 = vpop.eup %8851 }
0x1def   : > { %v7303_v35 = vmul.f32 %v8852_v30, %v7271_v6 }
0x1df0   : > { %v8854_v24 = vpop.eup %8853 }
0x1df1   : > { %v7304_v18 = vmul.f32 %v8854_v24, %v7272_v1  ;;  %v7311_v22 = vmul.f32 %v7310_v32, %v7303_v35 }
0x1df2   : > { %v8856_v26 = vpop.eup %8855 }
0x1df3   : > { %v7305_v23 = vmul.f32 %v8856_v26, %v7273_v38  ;;  %v7312_v14 = vmul.f32 %v7310_v32, %v7304_v18  ;;  %v13476_v10 = vadd.f32 %v7903_v39, %v7311_v22 }
0x1df5   : > { %v13478_v54 = vadd.f32 %v7903_v39, %v7312_v14  ;;  %v13481_v41 = vmul.f32 0.70710677, %v13476_v10  ;;  %v7313_v13 = vmul.f32 %v7310_v32, %v7305_v23 }
0x1df6   : > { %v8858_v11 = vpop.eup %8857 }
0x1df7   : > { %v7306_v45 = vmul.f32 %v8858_v11, %v7274_v58  ;;  %v13484_v4 = vmul.f32 0.70710677, %v13478_v54  ;;  %v7339_v5 = vand.u32 2147483647, %v13481_v41  ;;  %v13487_v12 = vadd.f32 %v7903_v39, %v7313_v13 }
0x1df8   : > { %vm7331_vm13 = vcmp.ge.f32.partialorder %v13481_v41, 0.0 }
0x1df9   : > { %v7340_v3 = vand.u32 2147483647, %v13484_v4  ;;  %v7314_v27 = vmul.f32 %v7310_v32, %v7306_v45  ;;  %v7343_v48 = vmul.f32 0.3275911, %v7339_v5  ;;  %v13493_v2 = vmul.f32 0.70710677, %v13487_v12 }
0x1dfa   : > { %v7391_v29 = vsub.f32 0.0, %v7339_v5  ;;  %vm7332_vm12 = vcmp.ge.f32.partialorder %v13484_v4, 0.0 }
0x1dfb   : > { %v7344_v42 = vmul.f32 0.3275911, %v7340_v3  ;;  %v13490_v47 = vadd.f32 %v7903_v39, %v7314_v27  ;;  %v7347_v37 = vadd.f32 1.0, %v7343_v48  ;;  %v7341_v40 = vand.u32 2147483647, %v13493_v2 }
0x1dfc   : > { %v7392_v7 = vsub.f32 0.0, %v7340_v3  ;;  %v7395_v38 = vmul.f32 %v7391_v29, %v7339_v5  ;;  %vm7333_vm3 = vcmp.ge.f32.partialorder %v13493_v2, 0.0 }
0x1dfd   : > { %v7348_v43 = vadd.f32 1.0, %v7344_v42  ;;  %v13496_v63 = vmul.f32 0.70710677, %v13490_v47  ;;  %8859 = vrcp.f32 %v7347_v37  ;;  %v7345_v59 = vmul.f32 0.3275911, %v7341_v40 }
0x1dfe   : > { %v7396_v60 = vmul.f32 %v7392_v7, %v7340_v3  ;;  %v7393_v46 = vsub.f32 0.0, %v7341_v40  ;;  %v7399_v49 = vmul.f32 1.442695, %v7395_v38 }
0x1dff   : > { %8861 = vrcp.f32 %v7348_v43  ;;  %v7342_v9 = vand.u32 2147483647, %v13496_v63  ;;  %v7349_v36 = vadd.f32 1.0, %v7345_v59  ;;  %vm7334_vm8 = vcmp.ge.f32.partialorder %v13496_v63, 0.0 }
0x1e00   : > { %v7401_v61 = vmul.f32 1.442695, %v7396_v60  ;;  %v7397_v20 = vmul.f32 %v7393_v46, %v7341_v40  ;;  %v7338_v2 = vsel %vm7334_vm8, 1.0, %v8898_v17 }
0x1e01   : > { %v7346_v6 = vmul.f32 0.3275911, %v7342_v9  ;;  %8863 = vrcp.f32 %v7349_v36  ;;  %v7394_v53 = vsub.f32 0.0, %v7342_v9 }
0x1e02   : > { %v7403_v8 = vmul.f32 1.442695, %v7397_v20 }
0x1e03   : > { %v7350_v1 = vadd.f32 1.0, %v7346_v6  ;;  %v7398_v28 = vmul.f32 %v7394_v53, %v7342_v9 }
0x1e05   : > { %8865 = vrcp.f32 %v7350_v1  ;;  %v7405_v39 = vmul.f32 1.442695, %v7398_v28  ;;  %v7335_v1 = vsel %vm7331_vm13, 1.0, %v8898_v17 }
0x1e06   : > { %8867 = vpow2.f32 %v7399_v49  ;;  %v7324_v49 = vmul.f32 0.5, %v13478_v54  ;;  %v7326_v54 = vmul.f32 0.5, %v13490_v47  ;;  %v7539_v47 = vld [vmem:[%s13565_s19] sm:$0x7] }
0x1e07   : > { %v8860_v33 = vpop.eup %8859  ;;  %8869 = vpow2.f32 %v7401_v61 }
0x1e08   : > { %v7355_v52 = vmul.f32 1.0614054, %v8860_v33  ;;  %8871 = vpow2.f32 %v7403_v8  ;;  %v8904_v8 = vmov 0  }
0x1e09   : > { %v8862_v21 = vpop.eup %8861  ;;  %8873 = vpow2.f32 %v7405_v39  ;;  %8470 = vset.pattern.permute.xlu0 %v8904_v8 }
0x1e0a   : > { %v7356_v16 = vmul.f32 1.0614054, %v8862_v21  ;;  %v7359_v55 = vadd.f32 -1.4531521, %v7355_v52  ;;  %7542 = vperm.xlu0 %8470, %v7539_v47  }
0x1e0b   : > { %v8864_v25 = vpop.eup %8863 }
0x1e0c   : > { %v7360_v58 = vadd.f32 -1.4531521, %v7356_v16  ;;  %v7363_v34 = vmul.f32 %v8860_v33, %v7359_v55  ;;  %v7357_v57 = vmul.f32 1.0614054, %v8864_v25 }
0x1e0e   : > { %v7364_v31 = vmul.f32 %v8862_v21, %v7360_v58  ;;  %v7367_v62 = vadd.f32 1.4214138, %v7363_v34  ;;  %v7361_v19 = vadd.f32 -1.4531521, %v7357_v57  ;;  %v7323_v58 = vmul.f32 0.5, %v13476_v10 }
0x1e0f   : > { %v8866_v51 = vpop.eup %8865  ;;  %v7325_v10 = vmul.f32 0.5, %v13487_v12  ;;  %v8572_v12 = vld [vmem:[%s13563_s17 + $0x18] sm:$0xff]  }
0x1e10   : > { %v7368_v0 = vadd.f32 1.4214138, %v7364_v31  ;;  %v7371_v56 = vmul.f32 %v8860_v33, %v7367_v62  ;;  %v7358_v44 = vmul.f32 1.0614054, %v8866_v51  ;;  %v7365_v35 = vmul.f32 %v8864_v25, %v7361_v19  ;;  %v8868_v48 = vpop.eup %8867 }
0x1e11   : > { %v8870_v37 = vpop.eup %8869 }
0x1e12   : > { %v7372_v15 = vmul.f32 %v8862_v21, %v7368_v0  ;;  %v7375_v32 = vadd.f32 -0.28449672, %v7371_v56  ;;  %v7362_v30 = vadd.f32 -1.4531521, %v7358_v44  ;;  %v7369_v26 = vadd.f32 1.4214138, %v7365_v35  ;;  %v8872_v60 = vpop.eup %8871 }
0x1e13   : > { %v8874_v4 = vpop.eup %8873 }
0x1e14   : > { %v7376_v24 = vadd.f32 -0.28449672, %v7372_v15  ;;  %v7379_v18 = vmul.f32 %v8860_v33, %v7375_v32  ;;  %v7366_v22 = vmul.f32 %v8866_v51, %v7362_v30  ;;  %v7373_v11 = vmul.f32 %v8864_v25, %v7369_v26  ;;  %v8570_v15 = vld [vmem:[%s13563_s17 + $0x8] sm:$0xff]  }
0x1e16   : > { %v7380_v23 = vmul.f32 %v8862_v21, %v7376_v24  ;;  %v7383_v14 = vadd.f32 0.2548296, %v7379_v18  ;;  %v7370_v13 = vadd.f32 1.4214138, %v7366_v22  ;;  %v7377_v27 = vadd.f32 -0.28449672, %v7373_v11 }
0x1e18   : > { %v7384_v45 = vadd.f32 0.2548296, %v7380_v23  ;;  %v7387_v5 = vmul.f32 %v8860_v33, %v7383_v14  ;;  %v7374_v3 = vmul.f32 %v8866_v51, %v7370_v13  ;;  %v7381_v9 = vmul.f32 %v8864_v25, %v7377_v27 }
0x1e19   : > { %v7336_v33 = vsel %vm7332_vm12, 1.0, %v8898_v17 }
0x1e1a   : > { %v7388_v42 = vmul.f32 %v8862_v21, %v7384_v45  ;;  %v7407_v43 = vmul.f32 %v8868_v48, %v7387_v5  ;;  %v7378_v40 = vadd.f32 -0.28449672, %v7374_v3  ;;  %v7385_v29 = vadd.f32 0.2548296, %v7381_v9  ;;  %v7534_v48 = vld [vmem:[%s13564_s18] sm:$0x3] }
0x1e1c   : > { %v7408_v59 = vmul.f32 %v8870_v37, %v7388_v42  ;;  %v7411_v6 = vsub.f32 1.0, %v7407_v43  ;;  %v7382_v36 = vmul.f32 %v8866_v51, %v7378_v40  ;;  %v7389_v21 = vmul.f32 %v8864_v25, %v7385_v29 }
0x1e1d   : > { %v7337_v25 = vsel %vm7333_vm3, 1.0, %v8898_v17  ;;  %v8571_v17 = vld [vmem:[%s13563_s17 + $0x10] sm:$0xff]  }
0x1e1e   : > { %v7412_v7 = vsub.f32 1.0, %v7408_v59  ;;  %v7415_v38 = vmul.f32 %v7411_v6, %v7335_v1  ;;  %v7386_v52 = vadd.f32 0.2548296, %v7382_v36  ;;  %v7409_v55 = vmul.f32 %v8872_v60, %v7389_v21 }
0x1e20   : > { %v7416_v16 = vmul.f32 %v7412_v7, %v7336_v33  ;;  %v7419_v41 = vadd.f32 1.0, %v7415_v38  ;;  %v7390_v46 = vmul.f32 %v8866_v51, %v7386_v52  ;;  %v7413_v61 = vsub.f32 1.0, %v7409_v55 }
0x1e22   : > { %v7420_v53 = vadd.f32 1.0, %v7416_v16  ;;  %v7410_v34 = vmul.f32 %v8874_v4, %v7390_v46  ;;  %v7423_v31 = vmul.f32 %v7419_v41, %v7323_v58  ;;  %v7417_v57 = vmul.f32 %v7413_v61, %v7337_v25 }
0x1e24   : > { %v7424_v20 = vmul.f32 %v7420_v53, %v7324_v49  ;;  %v7414_v62 = vsub.f32 1.0, %v7410_v34  ;;  %v7421_v28 = vadd.f32 1.0, %v7417_v57 }
0x1e26   : > { %v7435_v0 = vpack.c.bf16 %v7424_v20, %v7423_v31  ;;  %v7418_v51 = vmul.f32 %v7414_v62, %v7338_v2  ;;  %v7425_v56 = vmul.f32 %v7421_v28, %v7325_v10 }
0x1e28   : > { %8152 = vmatprep.subr.bf16.mxu0 %v7435_v0  ;;  %v7422_v63 = vadd.f32 1.0, %v7418_v51 }
0x1e29   : > { %8153 = vmatpush3.bf16.msra.mxu0 %v7435_v0 }
0x1e2a   : > { %v7426_v44 = vmul.f32 %v7422_v63, %v7326_v54 }
0x1e2c   : > { %v7436_v19 = vpack.c.bf16 %v7426_v44, %v7425_v56 }
0x1e2e   : > { %8154 = vmatprep.subr.bf16.mxu0 %v7436_v19 }
0x1e2f   : > { %8155 = vmatpush3.bf16.msra.mxu0 %v7436_v19 }
0x1e32   : > { %8157 = vmatmul.mubr.msk.bf16.vlgmr.msra.gmra.mrb[68].mxu0 %vm5986_vm7, %v8570_v15 }
0x1e33   : > { %8160 = vmatprep.mubr.msk.bf16.mxu0 %vm5986_vm7, %v8571_v17 }
0x1e3a   : > { %8161 = vmatmul.mubr.msk.bf16.gmra.mrb[72].mxu0 %vm5986_vm7, %v8572_v12  ;;  %vm7600_vm7 = vcmask 518144  }
0x1e89   : > { %v7543_v42 = vpop.permute.xlu0 %7542 }
0x1f05   : > { %v8158_v32 = vpop.f32.mrb[68].mxu0 }
0x1f06   : > { %v7503_v30 = vpop.f32.mrb[69].mxu0 }
0x1f07   : > { %v8159_v35 = vpop.f32.mrb[70].mxu0 }
0x1f08   : > { %v7536_v24 = vpack.c.bf16 %v8159_v35, %v8158_v32  ;;  %v7506_v39 = vpop.f32.mrb[71].mxu0 }
0x1f09   : > { %v7535_v18 = vpack.c.bf16 %v7506_v39, %v7503_v30 }
0x1f0a   : > { %v7552_v5 = vsel %vm4897_vm10, %v7536_v24, 0 }
0x1f0b   : > { %v7549_v22 = vsel %vm4897_vm10, %v7535_v18, 0 }
0x1f0c   : > { %8165 = vmatpush3.bf16.xpose.msra.mxu1 %v7549_v22 }
0x1f0d   : > { %8166 = vmatprep.subr.bf16.mxu1 %v14138_v50  ;;  %v8162_v26 = vpop.f32.mrb[72].mxu0 }
0x1f0e   : > { %v7519_v23 = vpop.f32.mrb[73].mxu0 }
0x1f0f   : > { %v8163_v14 = vpop.f32.mrb[74].mxu0 }
0x1f10   : > { %v7538_v13 = vpack.c.bf16 %v8163_v14, %v8162_v26  ;;  %v7522_v11 = vpop.f32.mrb[75].mxu0 }
0x1f11   : > { %v7537_v45 = vpack.c.bf16 %v7522_v11, %v7519_v23 }
0x1f12   : > { %v7558_v27 = vsel %vm4897_vm10, %v7538_v13, 0 }
0x1f13   : > { %v7555_v3 = vsel %vm4897_vm10, %v7537_v45, 0 }
0x1f14   : > { %8167 = vmatpush3.bf16.xpose.msra.mxu1 %v7552_v5 }
0x1f15   : > { %8168 = vmatprep.subr.bf16.mxu1 %v14138_v50 }
0x1f1c   : > { %8169 = vmatpush3.bf16.xpose.msra.mxu1 %v7555_v3 }
0x1f1d   : > { %8170 = vmatprep.subr.bf16.mxu1 %v14138_v50 }
0x1f24   : > { %8171 = vmatpush3.bf16.xpose.msra.mxu1 %v7558_v27 }
0x1f2b   : > { %8173 = vmatmul.mubr.msk.bf16.vlgmr.msra.gmra.mrb[36].mxu1 %vm4897_vm10, %v7534_v48 }
0x1ffe   : > { %v7594_v37 = vpop.f32.mrb[36].mxu1 }
0x1fff   : > { %v8174_v43 = vpop.f32.mrb[37].mxu1  ;;  %v7595_v40 = vadd.f32 %v7594_v37, %v7543_v42 }
0x2000   : > { %v7597_v50 = vpop.f32.mrb[38].mxu1 }
0x2001   : > { %7601 = vst.msk [vmem:[%s624_s21] sm:$0x7] %vm7600_vm7, %v7595_v40  ;;  %v8175_v9 = vpop.f32.mrb[39].mxu1 }
0x2002 PF: > { %s30_s1 = sadd.s32 1, %s8886_s1  }
0x2003   : > { %p27_p4 = scmp.ge.s32.totalorder %s30_s1, 4  }
0x2005   :  { %29 = sbr.rel (!%p27_p4) target bundleno = 6 (0x6), region = 130 }

</bundles_post_ra>
